<compile_context>
chip_gen: v7x
topology: tpu7x:2x2x1
jax: 0.10.0
libtpu: 0.0.40
codegen_flags: <defaults>
</compile_context>

<pallas_src>
import jax
import jax.numpy as jnp
from jax import lax
from jax.experimental import pallas as pl
from jax.experimental.pallas import tpu as pltpu


# FeatureExtractor = VGG19.features[:36] layer structure (scaled-down widths).
# original widths: 64,64,M,128,128,M,256x4,M,512x4,M,512x4  (ends at relu5_4)
VGG_CFG = (8, 8, 'M', 16, 16, 'M', 32, 32, 32, 32, 'M',
           64, 64, 64, 64, 'M', 64, 64, 64, 64)
IN_CHANNELS = 3


# ---------------------------------------------------------------------------
# In-kernel building blocks (operate on values resident in VMEM/vregs).
# ---------------------------------------------------------------------------
def _pad_hw1(x):
    """Zero-pad H and W by 1 on each side: (H, W, C) -> (H+2, W+2, C)."""
    H, W, C = x.shape
    zr = jnp.zeros((1, W, C), x.dtype)
    x = jnp.concatenate([zr, x, zr], axis=0)           # (H+2, W,   C)
    zc = jnp.zeros((H + 2, 1, C), x.dtype)
    return jnp.concatenate([zc, x, zc], axis=1)        # (H+2, W+2, C)


def _conv3x3_bias_relu(x, w, b):
    """3x3 SAME conv + bias + ReLU for one image.

    x: (H, W, Cin)   float32 activation
    w: (9*Cin, Cout) bfloat16 weights, rows ordered tap-major (kh*3+kw), Cin-minor
    b: (1, Cout)     float32 bias
    -> (H, W, Cout)  float32
    """
    H, W, Cin = x.shape
    Cout = w.shape[-1]
    xp = _pad_hw1(x.astype(jnp.bfloat16))              # (H+2, W+2, Cin) bf16
    # im2col: one (H*W, 9*Cin) LHS so the MXU sees a single K=9*Cin matmul
    # instead of nine tiny K=Cin accumulate/drain sequences.
    cols = []
    for kh in range(3):
        for kw in range(3):
            cols.append(xp[kh:kh + H, kw:kw + W, :].reshape(H * W, Cin))
    patches = jnp.concatenate(cols, axis=1)            # (H*W, 9*Cin) bf16
    acc = jnp.dot(patches, w, preferred_element_type=jnp.float32)
    acc = jnp.maximum(acc + b, 0.0)                    # bias + ReLU in f32
    return acc.reshape(H, W, Cout)


def _maxpool2x2(x):
    """2x2 stride-2 max pool: (H, W, C) -> (H//2, W//2, C)."""
    H, W, C = x.shape
    Ho, Wo = H // 2, W // 2
    x = x.reshape(Ho, 2, 2 * Wo, C)
    x = jnp.max(x, axis=1)                             # pool over H
    x = x.reshape(Ho, Wo, 2, C)
    return jnp.max(x, axis=2)                          # pool over W


def _make_fused_kernel(cfg):
    """One kernel that runs the whole conv/pool stack for a single image."""
    n_conv = sum(1 for v in cfg if v != 'M')

    def kernel(*refs):
        # refs = (x_ref, w0, b0, w1, b1, ..., w{n-1}, b{n-1}, o_ref)
        x_ref = refs[0]
        o_ref = refs[1 + 2 * n_conv]
        x = x_ref[...]                                 # (H, W, Cin) f32
        wi = 0
        for v in cfg:
            if v == 'M':
                x = _maxpool2x2(x)
            else:
                w = refs[1 + 2 * wi][...]              # (9*Cin, Cout) bf16
                b = refs[2 + 2 * wi][...]              # (1, Cout)     f32
                x = _conv3x3_bias_relu(x, w, b)
                wi += 1
        o_ref[...] = x.astype(o_ref.dtype)

    return kernel


# ---------------------------------------------------------------------------
# Wrapper: single pallas_call, grid over batch, weights passed untiled.
# ---------------------------------------------------------------------------
def feature_extractor_pallas(x_nchw, params, cfg=VGG_CFG):
    """Forward pass. Input NCHW, output NCHW (like the PyTorch module)."""
    N, Cin, H, W = x_nchw.shape
    x = jnp.transpose(x_nchw, (0, 2, 3, 1)).astype(jnp.float32)   # -> NHWC

    # Round the first Cin up to 8 with zero channels (zero weights added too),
    # so every in-kernel lane width is a multiple of 8.  Mathematically a no-op.
    cin_pad = (-Cin) % 8
    cin0 = Cin + cin_pad
    if cin_pad:
        x = jnp.pad(x, ((0, 0), (0, 0), (0, 0), (0, cin_pad)))

    flat_args = []
    in_specs = [pl.BlockSpec((None, H, W, cin0), lambda n: (n, 0, 0, 0))]
    h, wsp, c = H, W, cin0
    first = True
    for v, p in zip(cfg, params):
        if v == 'M':
            h //= 2
            wsp //= 2
            continue
        wgt, bias = p                                  # (3,3,cin,cout) HWIO f32
        cin, cout = wgt.shape[2], wgt.shape[3]
        if first and cin_pad:
            wgt = jnp.pad(wgt, ((0, 0), (0, 0), (0, cin_pad), (0, 0)))
            cin = cin0
        first = False
        # rows ordered tap-major (kh*3+kw), Cin-minor -> matches im2col concat.
        w2 = wgt.reshape(9 * cin, cout).astype(jnp.bfloat16)
        b2 = bias.reshape(1, cout).astype(jnp.float32)
        flat_args += [w2, b2]
        in_specs += [
            pl.BlockSpec((9 * cin, cout), lambda n: (0, 0)),
            pl.BlockSpec((1, cout), lambda n: (0, 0)),
        ]
        c = cout

    out_shape = jax.ShapeDtypeStruct((N, h, wsp, c), jnp.float32)
    out_spec = pl.BlockSpec((None, h, wsp, c), lambda n: (n, 0, 0, 0))

    y = pl.pallas_call(
        _make_fused_kernel(cfg),
        out_shape=out_shape,
        grid=(N,),
        in_specs=in_specs,
        out_specs=out_spec,
        compiler_params=pltpu.CompilerParams(
            dimension_semantics=("parallel",)),
    )(x, *flat_args)
    return jnp.transpose(y, (0, 3, 1, 2))              # -> NCHW


# ---------------------------------------------------------------------------
# Deterministic parameters + pure-JAX reference (same bf16/f32 matmul math).
# ---------------------------------------------------------------------------
def make_params(key, in_ch, cfg):
    params = []
    c = in_ch
    for i, v in enumerate(cfg):
        if v == 'M':
            params.append(None)
        else:
            k1, k2 = jax.random.split(jax.random.fold_in(key, i))
            std = (2.0 / (9 * c)) ** 0.5               # He init
            w = jax.random.normal(k1, (3, 3, c, v), jnp.float32) * std  # HWIO
            b = jax.random.normal(k2, (v,), jnp.float32) * 0.01
            params.append((w, b))
            c = v
    return params


def feature_extractor_reference(x_nchw, params, cfg=VGG_CFG):
    x = jnp.transpose(x_nchw, (0, 2, 3, 1)).astype(jnp.float32)
    for v, p in zip(cfg, params):
        if v == 'M':
            x = lax.reduce_window(x, -jnp.inf, lax.max,
                                  (1, 2, 2, 1), (1, 2, 2, 1), 'VALID')
        else:
            w, b = p
            y = lax.conv_general_dilated(
                x.astype(jnp.bfloat16), w.astype(jnp.bfloat16), (1, 1), 'SAME',
                dimension_numbers=('NHWC', 'HWIO', 'NHWC'),
                preferred_element_type=jnp.float32)
            x = jnp.maximum(y + b, 0.0)
    return jnp.transpose(x, (0, 3, 1, 2))


if __name__ == "__main__":
    key = jax.random.PRNGKey(0)
    kx, kp = jax.random.split(key)

    # Small deterministic input, NCHW like PyTorch: (batch=2, C=3, H=16, W=16).
    x = jax.random.normal(kx, (2, IN_CHANNELS, 16, 16), jnp.float32)
    params = make_params(kp, IN_CHANNELS, VGG_CFG)

    fwd = jax.jit(feature_extractor_pallas)
    out = jax.block_until_ready(fwd(x, params))

    ref = jax.block_until_ready(feature_extractor_reference(x, params))
    assert out.shape == ref.shape, (out.shape, ref.shape)
    max_err = float(jnp.max(jnp.abs(out - ref)))
    assert jnp.allclose(out, ref, rtol=1e-2, atol=1e-2), max_err

    print("KERNEL_OK")
</pallas_src>

<mosaic_0001>
module attributes {stable_mosaic.version = 11 : i64} {
  func.func @kernel(%arg0: i32, %arg1: memref<1x16x16x8xf32, #tpu.memory_space<vmem>>, %arg2: memref<72x8xbf16, #tpu.memory_space<vmem>>, %arg3: memref<1x8xf32, #tpu.memory_space<vmem>>, %arg4: memref<72x8xbf16, #tpu.memory_space<vmem>>, %arg5: memref<1x8xf32, #tpu.memory_space<vmem>>, %arg6: memref<72x16xbf16, #tpu.memory_space<vmem>>, %arg7: memref<1x16xf32, #tpu.memory_space<vmem>>, %arg8: memref<144x16xbf16, #tpu.memory_space<vmem>>, %arg9: memref<1x16xf32, #tpu.memory_space<vmem>>, %arg10: memref<144x32xbf16, #tpu.memory_space<vmem>>, %arg11: memref<1x32xf32, #tpu.memory_space<vmem>>, %arg12: memref<288x32xbf16, #tpu.memory_space<vmem>>, %arg13: memref<1x32xf32, #tpu.memory_space<vmem>>, %arg14: memref<288x32xbf16, #tpu.memory_space<vmem>>, %arg15: memref<1x32xf32, #tpu.memory_space<vmem>>, %arg16: memref<288x32xbf16, #tpu.memory_space<vmem>>, %arg17: memref<1x32xf32, #tpu.memory_space<vmem>>, %arg18: memref<288x64xbf16, #tpu.memory_space<vmem>>, %arg19: memref<1x64xf32, #tpu.memory_space<vmem>>, %arg20: memref<576x64xbf16, #tpu.memory_space<vmem>>, %arg21: memref<1x64xf32, #tpu.memory_space<vmem>>, %arg22: memref<576x64xbf16, #tpu.memory_space<vmem>>, %arg23: memref<1x64xf32, #tpu.memory_space<vmem>>, %arg24: memref<576x64xbf16, #tpu.memory_space<vmem>>, %arg25: memref<1x64xf32, #tpu.memory_space<vmem>>, %arg26: memref<576x64xbf16, #tpu.memory_space<vmem>>, %arg27: memref<1x64xf32, #tpu.memory_space<vmem>>, %arg28: memref<576x64xbf16, #tpu.memory_space<vmem>>, %arg29: memref<1x64xf32, #tpu.memory_space<vmem>>, %arg30: memref<576x64xbf16, #tpu.memory_space<vmem>>, %arg31: memref<1x64xf32, #tpu.memory_space<vmem>>, %arg32: memref<576x64xbf16, #tpu.memory_space<vmem>>, %arg33: memref<1x64xf32, #tpu.memory_space<vmem>>, %arg34: memref<1x1x1x64xf32, #tpu.memory_space<vmem>>) attributes {dimension_semantics = [#tpu.dimension_semantics<parallel>], iteration_bounds = array<i64: 2>, scalar_prefetch = 0 : i64, scratch_operands = 0 : i64, tpu.core_type = #tpu.core_type<tc>, window_params = [{transform_indices = @transform_0, window_bounds = array<i64: 1, 16, 16, 8>}, {pipeline_mode = #tpu.pipeline_mode<synchronous>, transform_indices = @transform_1, window_bounds = array<i64: 72, 8>}, {pipeline_mode = #tpu.pipeline_mode<synchronous>, transform_indices = @transform_2, window_bounds = array<i64: 1, 8>}, {pipeline_mode = #tpu.pipeline_mode<synchronous>, transform_indices = @transform_3, window_bounds = array<i64: 72, 8>}, {pipeline_mode = #tpu.pipeline_mode<synchronous>, transform_indices = @transform_4, window_bounds = array<i64: 1, 8>}, {pipeline_mode = #tpu.pipeline_mode<synchronous>, transform_indices = @transform_5, window_bounds = array<i64: 72, 16>}, {pipeline_mode = #tpu.pipeline_mode<synchronous>, transform_indices = @transform_6, window_bounds = array<i64: 1, 16>}, {pipeline_mode = #tpu.pipeline_mode<synchronous>, transform_indices = @transform_7, window_bounds = array<i64: 144, 16>}, {pipeline_mode = #tpu.pipeline_mode<synchronous>, transform_indices = @transform_8, window_bounds = array<i64: 1, 16>}, {pipeline_mode = #tpu.pipeline_mode<synchronous>, transform_indices = @transform_9, window_bounds = array<i64: 144, 32>}, {pipeline_mode = #tpu.pipeline_mode<synchronous>, transform_indices = @transform_10, window_bounds = array<i64: 1, 32>}, {pipeline_mode = #tpu.pipeline_mode<synchronous>, transform_indices = @transform_11, window_bounds = array<i64: 288, 32>}, {pipeline_mode = #tpu.pipeline_mode<synchronous>, transform_indices = @transform_12, window_bounds = array<i64: 1, 32>}, {pipeline_mode = #tpu.pipeline_mode<synchronous>, transform_indices = @transform_13, window_bounds = array<i64: 288, 32>}, {pipeline_mode = #tpu.pipeline_mode<synchronous>, transform_indices = @transform_14, window_bounds = array<i64: 1, 32>}, {pipeline_mode = #tpu.pipeline_mode<synchronous>, transform_indices = @transform_15, window_bounds = array<i64: 288, 32>}, {pipeline_mode = #tpu.pipeline_mode<synchronous>, transform_indices = @transform_16, window_bounds = array<i64: 1, 32>}, {pipeline_mode = #tpu.pipeline_mode<synchronous>, transform_indices = @transform_17, window_bounds = array<i64: 288, 64>}, {pipeline_mode = #tpu.pipeline_mode<synchronous>, transform_indices = @transform_18, window_bounds = array<i64: 1, 64>}, {pipeline_mode = #tpu.pipeline_mode<synchronous>, transform_indices = @transform_19, window_bounds = array<i64: 576, 64>}, {pipeline_mode = #tpu.pipeline_mode<synchronous>, transform_indices = @transform_20, window_bounds = array<i64: 1, 64>}, {pipeline_mode = #tpu.pipeline_mode<synchronous>, transform_indices = @transform_21, window_bounds = array<i64: 576, 64>}, {pipeline_mode = #tpu.pipeline_mode<synchronous>, transform_indices = @transform_22, window_bounds = array<i64: 1, 64>}, {pipeline_mode = #tpu.pipeline_mode<synchronous>, transform_indices = @transform_23, window_bounds = array<i64: 576, 64>}, {pipeline_mode = #tpu.pipeline_mode<synchronous>, transform_indices = @transform_24, window_bounds = array<i64: 1, 64>}, {pipeline_mode = #tpu.pipeline_mode<synchronous>, transform_indices = @transform_25, window_bounds = array<i64: 576, 64>}, {pipeline_mode = #tpu.pipeline_mode<synchronous>, transform_indices = @transform_26, window_bounds = array<i64: 1, 64>}, {pipeline_mode = #tpu.pipeline_mode<synchronous>, transform_indices = @transform_27, window_bounds = array<i64: 576, 64>}, {pipeline_mode = #tpu.pipeline_mode<synchronous>, transform_indices = @transform_28, window_bounds = array<i64: 1, 64>}, {pipeline_mode = #tpu.pipeline_mode<synchronous>, transform_indices = @transform_29, window_bounds = array<i64: 576, 64>}, {pipeline_mode = #tpu.pipeline_mode<synchronous>, transform_indices = @transform_30, window_bounds = array<i64: 1, 64>}, {pipeline_mode = #tpu.pipeline_mode<synchronous>, transform_indices = @transform_31, window_bounds = array<i64: 576, 64>}, {pipeline_mode = #tpu.pipeline_mode<synchronous>, transform_indices = @transform_32, window_bounds = array<i64: 1, 64>}, {transform_indices = @transform_33, window_bounds = array<i64: 1, 1, 1, 64>}]} {
    %c0 = arith.constant 0 : index
    %c0_0 = arith.constant 0 : index
    %c0_1 = arith.constant 0 : index
    %c0_2 = arith.constant 0 : index
    %0 = vector.load %arg1[%c0, %c0_0, %c0_1, %c0_2] : memref<1x16x16x8xf32, #tpu.memory_space<vmem>>, vector<1x16x16x8xf32>
    %1 = vector.shape_cast %0 : vector<1x16x16x8xf32> to vector<16x16x8xf32>
    %c0_3 = arith.constant 0 : index
    %c0_4 = arith.constant 0 : index
    %2 = vector.load %arg2[%c0_3, %c0_4] : memref<72x8xbf16, #tpu.memory_space<vmem>>, vector<72x8xbf16>
    %c0_5 = arith.constant 0 : index
    %c0_6 = arith.constant 0 : index
    %3 = vector.load %arg3[%c0_5, %c0_6] : memref<1x8xf32, #tpu.memory_space<vmem>>, vector<1x8xf32>
    %4 = arith.truncf %1 : vector<16x16x8xf32> to vector<16x16x8xbf16>
    %cst = arith.constant 0.000000e+00 : bf16
    %5 = vector.broadcast %cst : bf16 to vector<1x16x8xbf16>
    %6 = tpu.concatenate %5, %4, %5 in 0 : vector<1x16x8xbf16>, vector<16x16x8xbf16>, vector<1x16x8xbf16> -> vector<18x16x8xbf16>
    %cst_7 = arith.constant 0.000000e+00 : bf16
    %7 = vector.broadcast %cst_7 : bf16 to vector<18x1x8xbf16>
    %8 = tpu.concatenate %7, %6, %7 in 1 : vector<18x1x8xbf16>, vector<18x16x8xbf16>, vector<18x1x8xbf16> -> vector<18x18x8xbf16>
    %9 = vector.extract_strided_slice %8 {offsets = [0, 0, 0], sizes = [16, 16, 8], strides = [1, 1, 1]} : vector<18x18x8xbf16> to vector<16x16x8xbf16>
    %10 = vector.shape_cast %9 : vector<16x16x8xbf16> to vector<256x8xbf16>
    %11 = vector.extract_strided_slice %8 {offsets = [0, 1, 0], sizes = [16, 16, 8], strides = [1, 1, 1]} : vector<18x18x8xbf16> to vector<16x16x8xbf16>
    %12 = vector.shape_cast %11 : vector<16x16x8xbf16> to vector<256x8xbf16>
    %13 = vector.extract_strided_slice %8 {offsets = [0, 2, 0], sizes = [16, 16, 8], strides = [1, 1, 1]} : vector<18x18x8xbf16> to vector<16x16x8xbf16>
    %14 = vector.shape_cast %13 : vector<16x16x8xbf16> to vector<256x8xbf16>
    %15 = vector.extract_strided_slice %8 {offsets = [1, 0, 0], sizes = [16, 16, 8], strides = [1, 1, 1]} : vector<18x18x8xbf16> to vector<16x16x8xbf16>
    %16 = vector.shape_cast %15 : vector<16x16x8xbf16> to vector<256x8xbf16>
    %17 = vector.extract_strided_slice %8 {offsets = [1, 1, 0], sizes = [16, 16, 8], strides = [1, 1, 1]} : vector<18x18x8xbf16> to vector<16x16x8xbf16>
    %18 = vector.shape_cast %17 : vector<16x16x8xbf16> to vector<256x8xbf16>
    %19 = vector.extract_strided_slice %8 {offsets = [1, 2, 0], sizes = [16, 16, 8], strides = [1, 1, 1]} : vector<18x18x8xbf16> to vector<16x16x8xbf16>
    %20 = vector.shape_cast %19 : vector<16x16x8xbf16> to vector<256x8xbf16>
    %21 = vector.extract_strided_slice %8 {offsets = [2, 0, 0], sizes = [16, 16, 8], strides = [1, 1, 1]} : vector<18x18x8xbf16> to vector<16x16x8xbf16>
    %22 = vector.shape_cast %21 : vector<16x16x8xbf16> to vector<256x8xbf16>
    %23 = vector.extract_strided_slice %8 {offsets = [2, 1, 0], sizes = [16, 16, 8], strides = [1, 1, 1]} : vector<18x18x8xbf16> to vector<16x16x8xbf16>
    %24 = vector.shape_cast %23 : vector<16x16x8xbf16> to vector<256x8xbf16>
    %25 = vector.extract_strided_slice %8 {offsets = [2, 2, 0], sizes = [16, 16, 8], strides = [1, 1, 1]} : vector<18x18x8xbf16> to vector<16x16x8xbf16>
    %26 = vector.shape_cast %25 : vector<16x16x8xbf16> to vector<256x8xbf16>
    %27 = tpu.concatenate %10, %12, %14, %16, %18, %20, %22, %24, %26 in 1 : vector<256x8xbf16>, vector<256x8xbf16>, vector<256x8xbf16>, vector<256x8xbf16>, vector<256x8xbf16>, vector<256x8xbf16>, vector<256x8xbf16>, vector<256x8xbf16>, vector<256x8xbf16> -> vector<256x72xbf16>
    %cst_8 = arith.constant dense<0.000000e+00> : vector<256x8xf32>
    %28 = tpu.matmul %27, %2, %cst_8 {dimension_numbers = #tpu.dot_dimension_numbers<[1], [0], [0], [1], [0, 0, 1, 1], [], []>} : vector<256x72xbf16>, vector<72x8xbf16>, vector<256x8xf32> -> vector<256x8xf32>
    %29 = vector.broadcast %3 : vector<1x8xf32> to vector<256x8xf32>
    %30 = arith.addf %28, %29 : vector<256x8xf32>
    %cst_9 = arith.constant 0.000000e+00 : f32
    %31 = vector.broadcast %cst_9 : f32 to vector<256x8xf32>
    %32 = arith.maximumf %30, %31 : vector<256x8xf32>
    %33 = vector.shape_cast %32 : vector<256x8xf32> to vector<16x16x8xf32>
    %c0_10 = arith.constant 0 : index
    %c0_11 = arith.constant 0 : index
    %34 = vector.load %arg4[%c0_10, %c0_11] : memref<72x8xbf16, #tpu.memory_space<vmem>>, vector<72x8xbf16>
    %c0_12 = arith.constant 0 : index
    %c0_13 = arith.constant 0 : index
    %35 = vector.load %arg5[%c0_12, %c0_13] : memref<1x8xf32, #tpu.memory_space<vmem>>, vector<1x8xf32>
    %36 = arith.truncf %33 : vector<16x16x8xf32> to vector<16x16x8xbf16>
    %cst_14 = arith.constant 0.000000e+00 : bf16
    %37 = vector.broadcast %cst_14 : bf16 to vector<1x16x8xbf16>
    %38 = tpu.concatenate %37, %36, %37 in 0 : vector<1x16x8xbf16>, vector<16x16x8xbf16>, vector<1x16x8xbf16> -> vector<18x16x8xbf16>
    %cst_15 = arith.constant 0.000000e+00 : bf16
    %39 = vector.broadcast %cst_15 : bf16 to vector<18x1x8xbf16>
    %40 = tpu.concatenate %39, %38, %39 in 1 : vector<18x1x8xbf16>, vector<18x16x8xbf16>, vector<18x1x8xbf16> -> vector<18x18x8xbf16>
    %41 = vector.extract_strided_slice %40 {offsets = [0, 0, 0], sizes = [16, 16, 8], strides = [1, 1, 1]} : vector<18x18x8xbf16> to vector<16x16x8xbf16>
    %42 = vector.shape_cast %41 : vector<16x16x8xbf16> to vector<256x8xbf16>
    %43 = vector.extract_strided_slice %40 {offsets = [0, 1, 0], sizes = [16, 16, 8], strides = [1, 1, 1]} : vector<18x18x8xbf16> to vector<16x16x8xbf16>
    %44 = vector.shape_cast %43 : vector<16x16x8xbf16> to vector<256x8xbf16>
    %45 = vector.extract_strided_slice %40 {offsets = [0, 2, 0], sizes = [16, 16, 8], strides = [1, 1, 1]} : vector<18x18x8xbf16> to vector<16x16x8xbf16>
    %46 = vector.shape_cast %45 : vector<16x16x8xbf16> to vector<256x8xbf16>
    %47 = vector.extract_strided_slice %40 {offsets = [1, 0, 0], sizes = [16, 16, 8], strides = [1, 1, 1]} : vector<18x18x8xbf16> to vector<16x16x8xbf16>
    %48 = vector.shape_cast %47 : vector<16x16x8xbf16> to vector<256x8xbf16>
    %49 = vector.extract_strided_slice %40 {offsets = [1, 1, 0], sizes = [16, 16, 8], strides = [1, 1, 1]} : vector<18x18x8xbf16> to vector<16x16x8xbf16>
    %50 = vector.shape_cast %49 : vector<16x16x8xbf16> to vector<256x8xbf16>
    %51 = vector.extract_strided_slice %40 {offsets = [1, 2, 0], sizes = [16, 16, 8], strides = [1, 1, 1]} : vector<18x18x8xbf16> to vector<16x16x8xbf16>
    %52 = vector.shape_cast %51 : vector<16x16x8xbf16> to vector<256x8xbf16>
    %53 = vector.extract_strided_slice %40 {offsets = [2, 0, 0], sizes = [16, 16, 8], strides = [1, 1, 1]} : vector<18x18x8xbf16> to vector<16x16x8xbf16>
    %54 = vector.shape_cast %53 : vector<16x16x8xbf16> to vector<256x8xbf16>
    %55 = vector.extract_strided_slice %40 {offsets = [2, 1, 0], sizes = [16, 16, 8], strides = [1, 1, 1]} : vector<18x18x8xbf16> to vector<16x16x8xbf16>
    %56 = vector.shape_cast %55 : vector<16x16x8xbf16> to vector<256x8xbf16>
    %57 = vector.extract_strided_slice %40 {offsets = [2, 2, 0], sizes = [16, 16, 8], strides = [1, 1, 1]} : vector<18x18x8xbf16> to vector<16x16x8xbf16>
    %58 = vector.shape_cast %57 : vector<16x16x8xbf16> to vector<256x8xbf16>
    %59 = tpu.concatenate %42, %44, %46, %48, %50, %52, %54, %56, %58 in 1 : vector<256x8xbf16>, vector<256x8xbf16>, vector<256x8xbf16>, vector<256x8xbf16>, vector<256x8xbf16>, vector<256x8xbf16>, vector<256x8xbf16>, vector<256x8xbf16>, vector<256x8xbf16> -> vector<256x72xbf16>
    %cst_16 = arith.constant dense<0.000000e+00> : vector<256x8xf32>
    %60 = tpu.matmul %59, %34, %cst_16 {dimension_numbers = #tpu.dot_dimension_numbers<[1], [0], [0], [1], [0, 0, 1, 1], [], []>} : vector<256x72xbf16>, vector<72x8xbf16>, vector<256x8xf32> -> vector<256x8xf32>
    %61 = vector.broadcast %35 : vector<1x8xf32> to vector<256x8xf32>
    %62 = arith.addf %60, %61 : vector<256x8xf32>
    %cst_17 = arith.constant 0.000000e+00 : f32
    %63 = vector.broadcast %cst_17 : f32 to vector<256x8xf32>
    %64 = arith.maximumf %62, %63 : vector<256x8xf32>
    %65 = vector.shape_cast %64 : vector<256x8xf32> to vector<16x16x8xf32>
    %66 = vector.shape_cast %65 : vector<16x16x8xf32> to vector<8x2x16x8xf32>
    %cst_18 = arith.constant dense<0xFF800000> : vector<8x16x8xf32>
    %67 = vector.multi_reduction <maximumf>, %66, %cst_18 [1] : vector<8x2x16x8xf32> to vector<8x16x8xf32>
    %68 = vector.shape_cast %67 : vector<8x16x8xf32> to vector<8x8x2x8xf32>
    %cst_19 = arith.constant dense<0xFF800000> : vector<8x8x8xf32>
    %69 = vector.multi_reduction <maximumf>, %68, %cst_19 [2] : vector<8x8x2x8xf32> to vector<8x8x8xf32>
    %c0_20 = arith.constant 0 : index
    %c0_21 = arith.constant 0 : index
    %70 = vector.load %arg6[%c0_20, %c0_21] : memref<72x16xbf16, #tpu.memory_space<vmem>>, vector<72x16xbf16>
    %c0_22 = arith.constant 0 : index
    %c0_23 = arith.constant 0 : index
    %71 = vector.load %arg7[%c0_22, %c0_23] : memref<1x16xf32, #tpu.memory_space<vmem>>, vector<1x16xf32>
    %72 = arith.truncf %69 : vector<8x8x8xf32> to vector<8x8x8xbf16>
    %cst_24 = arith.constant 0.000000e+00 : bf16
    %73 = vector.broadcast %cst_24 : bf16 to vector<1x8x8xbf16>
    %74 = tpu.concatenate %73, %72, %73 in 0 : vector<1x8x8xbf16>, vector<8x8x8xbf16>, vector<1x8x8xbf16> -> vector<10x8x8xbf16>
    %cst_25 = arith.constant 0.000000e+00 : bf16
    %75 = vector.broadcast %cst_25 : bf16 to vector<10x1x8xbf16>
    %76 = tpu.concatenate %75, %74, %75 in 1 : vector<10x1x8xbf16>, vector<10x8x8xbf16>, vector<10x1x8xbf16> -> vector<10x10x8xbf16>
    %77 = vector.extract_strided_slice %76 {offsets = [0, 0, 0], sizes = [8, 8, 8], strides = [1, 1, 1]} : vector<10x10x8xbf16> to vector<8x8x8xbf16>
    %78 = vector.shape_cast %77 : vector<8x8x8xbf16> to vector<64x8xbf16>
    %79 = vector.extract_strided_slice %76 {offsets = [0, 1, 0], sizes = [8, 8, 8], strides = [1, 1, 1]} : vector<10x10x8xbf16> to vector<8x8x8xbf16>
    %80 = vector.shape_cast %79 : vector<8x8x8xbf16> to vector<64x8xbf16>
    %81 = vector.extract_strided_slice %76 {offsets = [0, 2, 0], sizes = [8, 8, 8], strides = [1, 1, 1]} : vector<10x10x8xbf16> to vector<8x8x8xbf16>
    %82 = vector.shape_cast %81 : vector<8x8x8xbf16> to vector<64x8xbf16>
    %83 = vector.extract_strided_slice %76 {offsets = [1, 0, 0], sizes = [8, 8, 8], strides = [1, 1, 1]} : vector<10x10x8xbf16> to vector<8x8x8xbf16>
    %84 = vector.shape_cast %83 : vector<8x8x8xbf16> to vector<64x8xbf16>
    %85 = vector.extract_strided_slice %76 {offsets = [1, 1, 0], sizes = [8, 8, 8], strides = [1, 1, 1]} : vector<10x10x8xbf16> to vector<8x8x8xbf16>
    %86 = vector.shape_cast %85 : vector<8x8x8xbf16> to vector<64x8xbf16>
    %87 = vector.extract_strided_slice %76 {offsets = [1, 2, 0], sizes = [8, 8, 8], strides = [1, 1, 1]} : vector<10x10x8xbf16> to vector<8x8x8xbf16>
    %88 = vector.shape_cast %87 : vector<8x8x8xbf16> to vector<64x8xbf16>
    %89 = vector.extract_strided_slice %76 {offsets = [2, 0, 0], sizes = [8, 8, 8], strides = [1, 1, 1]} : vector<10x10x8xbf16> to vector<8x8x8xbf16>
    %90 = vector.shape_cast %89 : vector<8x8x8xbf16> to vector<64x8xbf16>
    %91 = vector.extract_strided_slice %76 {offsets = [2, 1, 0], sizes = [8, 8, 8], strides = [1, 1, 1]} : vector<10x10x8xbf16> to vector<8x8x8xbf16>
    %92 = vector.shape_cast %91 : vector<8x8x8xbf16> to vector<64x8xbf16>
    %93 = vector.extract_strided_slice %76 {offsets = [2, 2, 0], sizes = [8, 8, 8], strides = [1, 1, 1]} : vector<10x10x8xbf16> to vector<8x8x8xbf16>
    %94 = vector.shape_cast %93 : vector<8x8x8xbf16> to vector<64x8xbf16>
    %95 = tpu.concatenate %78, %80, %82, %84, %86, %88, %90, %92, %94 in 1 : vector<64x8xbf16>, vector<64x8xbf16>, vector<64x8xbf16>, vector<64x8xbf16>, vector<64x8xbf16>, vector<64x8xbf16>, vector<64x8xbf16>, vector<64x8xbf16>, vector<64x8xbf16> -> vector<64x72xbf16>
    %cst_26 = arith.constant dense<0.000000e+00> : vector<64x16xf32>
    %96 = tpu.matmul %95, %70, %cst_26 {dimension_numbers = #tpu.dot_dimension_numbers<[1], [0], [0], [1], [0, 0, 1, 1], [], []>} : vector<64x72xbf16>, vector<72x16xbf16>, vector<64x16xf32> -> vector<64x16xf32>
    %97 = vector.broadcast %71 : vector<1x16xf32> to vector<64x16xf32>
    %98 = arith.addf %96, %97 : vector<64x16xf32>
    %cst_27 = arith.constant 0.000000e+00 : f32
    %99 = vector.broadcast %cst_27 : f32 to vector<64x16xf32>
    %100 = arith.maximumf %98, %99 : vector<64x16xf32>
    %101 = vector.shape_cast %100 : vector<64x16xf32> to vector<8x8x16xf32>
    %c0_28 = arith.constant 0 : index
    %c0_29 = arith.constant 0 : index
    %102 = vector.load %arg8[%c0_28, %c0_29] : memref<144x16xbf16, #tpu.memory_space<vmem>>, vector<144x16xbf16>
    %c0_30 = arith.constant 0 : index
    %c0_31 = arith.constant 0 : index
    %103 = vector.load %arg9[%c0_30, %c0_31] : memref<1x16xf32, #tpu.memory_space<vmem>>, vector<1x16xf32>
    %104 = arith.truncf %101 : vector<8x8x16xf32> to vector<8x8x16xbf16>
    %cst_32 = arith.constant 0.000000e+00 : bf16
    %105 = vector.broadcast %cst_32 : bf16 to vector<1x8x16xbf16>
    %106 = tpu.concatenate %105, %104, %105 in 0 : vector<1x8x16xbf16>, vector<8x8x16xbf16>, vector<1x8x16xbf16> -> vector<10x8x16xbf16>
    %cst_33 = arith.constant 0.000000e+00 : bf16
    %107 = vector.broadcast %cst_33 : bf16 to vector<10x1x16xbf16>
    %108 = tpu.concatenate %107, %106, %107 in 1 : vector<10x1x16xbf16>, vector<10x8x16xbf16>, vector<10x1x16xbf16> -> vector<10x10x16xbf16>
    %109 = vector.extract_strided_slice %108 {offsets = [0, 0, 0], sizes = [8, 8, 16], strides = [1, 1, 1]} : vector<10x10x16xbf16> to vector<8x8x16xbf16>
    %110 = vector.shape_cast %109 : vector<8x8x16xbf16> to vector<64x16xbf16>
    %111 = vector.extract_strided_slice %108 {offsets = [0, 1, 0], sizes = [8, 8, 16], strides = [1, 1, 1]} : vector<10x10x16xbf16> to vector<8x8x16xbf16>
    %112 = vector.shape_cast %111 : vector<8x8x16xbf16> to vector<64x16xbf16>
    %113 = vector.extract_strided_slice %108 {offsets = [0, 2, 0], sizes = [8, 8, 16], strides = [1, 1, 1]} : vector<10x10x16xbf16> to vector<8x8x16xbf16>
    %114 = vector.shape_cast %113 : vector<8x8x16xbf16> to vector<64x16xbf16>
    %115 = vector.extract_strided_slice %108 {offsets = [1, 0, 0], sizes = [8, 8, 16], strides = [1, 1, 1]} : vector<10x10x16xbf16> to vector<8x8x16xbf16>
    %116 = vector.shape_cast %115 : vector<8x8x16xbf16> to vector<64x16xbf16>
    %117 = vector.extract_strided_slice %108 {offsets = [1, 1, 0], sizes = [8, 8, 16], strides = [1, 1, 1]} : vector<10x10x16xbf16> to vector<8x8x16xbf16>
    %118 = vector.shape_cast %117 : vector<8x8x16xbf16> to vector<64x16xbf16>
    %119 = vector.extract_strided_slice %108 {offsets = [1, 2, 0], sizes = [8, 8, 16], strides = [1, 1, 1]} : vector<10x10x16xbf16> to vector<8x8x16xbf16>
    %120 = vector.shape_cast %119 : vector<8x8x16xbf16> to vector<64x16xbf16>
    %121 = vector.extract_strided_slice %108 {offsets = [2, 0, 0], sizes = [8, 8, 16], strides = [1, 1, 1]} : vector<10x10x16xbf16> to vector<8x8x16xbf16>
    %122 = vector.shape_cast %121 : vector<8x8x16xbf16> to vector<64x16xbf16>
    %123 = vector.extract_strided_slice %108 {offsets = [2, 1, 0], sizes = [8, 8, 16], strides = [1, 1, 1]} : vector<10x10x16xbf16> to vector<8x8x16xbf16>
    %124 = vector.shape_cast %123 : vector<8x8x16xbf16> to vector<64x16xbf16>
    %125 = vector.extract_strided_slice %108 {offsets = [2, 2, 0], sizes = [8, 8, 16], strides = [1, 1, 1]} : vector<10x10x16xbf16> to vector<8x8x16xbf16>
    %126 = vector.shape_cast %125 : vector<8x8x16xbf16> to vector<64x16xbf16>
    %127 = tpu.concatenate %110, %112, %114, %116, %118, %120, %122, %124, %126 in 1 : vector<64x16xbf16>, vector<64x16xbf16>, vector<64x16xbf16>, vector<64x16xbf16>, vector<64x16xbf16>, vector<64x16xbf16>, vector<64x16xbf16>, vector<64x16xbf16>, vector<64x16xbf16> -> vector<64x144xbf16>
    %cst_34 = arith.constant dense<0.000000e+00> : vector<64x16xf32>
    %128 = tpu.matmul %127, %102, %cst_34 {dimension_numbers = #tpu.dot_dimension_numbers<[1], [0], [0], [1], [0, 0, 1, 1], [], []>} : vector<64x144xbf16>, vector<144x16xbf16>, vector<64x16xf32> -> vector<64x16xf32>
    %129 = vector.broadcast %103 : vector<1x16xf32> to vector<64x16xf32>
    %130 = arith.addf %128, %129 : vector<64x16xf32>
    %cst_35 = arith.constant 0.000000e+00 : f32
    %131 = vector.broadcast %cst_35 : f32 to vector<64x16xf32>
    %132 = arith.maximumf %130, %131 : vector<64x16xf32>
    %133 = vector.shape_cast %132 : vector<64x16xf32> to vector<8x8x16xf32>
    %134 = vector.shape_cast %133 : vector<8x8x16xf32> to vector<4x2x8x16xf32>
    %cst_36 = arith.constant dense<0xFF800000> : vector<4x8x16xf32>
    %135 = vector.multi_reduction <maximumf>, %134, %cst_36 [1] : vector<4x2x8x16xf32> to vector<4x8x16xf32>
    %136 = vector.shape_cast %135 : vector<4x8x16xf32> to vector<4x4x2x16xf32>
    %cst_37 = arith.constant dense<0xFF800000> : vector<4x4x16xf32>
    %137 = vector.multi_reduction <maximumf>, %136, %cst_37 [2] : vector<4x4x2x16xf32> to vector<4x4x16xf32>
    %c0_38 = arith.constant 0 : index
    %c0_39 = arith.constant 0 : index
    %138 = vector.load %arg10[%c0_38, %c0_39] : memref<144x32xbf16, #tpu.memory_space<vmem>>, vector<144x32xbf16>
    %c0_40 = arith.constant 0 : index
    %c0_41 = arith.constant 0 : index
    %139 = vector.load %arg11[%c0_40, %c0_41] : memref<1x32xf32, #tpu.memory_space<vmem>>, vector<1x32xf32>
    %140 = arith.truncf %137 : vector<4x4x16xf32> to vector<4x4x16xbf16>
    %cst_42 = arith.constant 0.000000e+00 : bf16
    %141 = vector.broadcast %cst_42 : bf16 to vector<1x4x16xbf16>
    %142 = tpu.concatenate %141, %140, %141 in 0 : vector<1x4x16xbf16>, vector<4x4x16xbf16>, vector<1x4x16xbf16> -> vector<6x4x16xbf16>
    %cst_43 = arith.constant 0.000000e+00 : bf16
    %143 = vector.broadcast %cst_43 : bf16 to vector<6x1x16xbf16>
    %144 = tpu.concatenate %143, %142, %143 in 1 : vector<6x1x16xbf16>, vector<6x4x16xbf16>, vector<6x1x16xbf16> -> vector<6x6x16xbf16>
    %145 = vector.extract_strided_slice %144 {offsets = [0, 0, 0], sizes = [4, 4, 16], strides = [1, 1, 1]} : vector<6x6x16xbf16> to vector<4x4x16xbf16>
    %146 = vector.shape_cast %145 : vector<4x4x16xbf16> to vector<16x16xbf16>
    %147 = vector.extract_strided_slice %144 {offsets = [0, 1, 0], sizes = [4, 4, 16], strides = [1, 1, 1]} : vector<6x6x16xbf16> to vector<4x4x16xbf16>
    %148 = vector.shape_cast %147 : vector<4x4x16xbf16> to vector<16x16xbf16>
    %149 = vector.extract_strided_slice %144 {offsets = [0, 2, 0], sizes = [4, 4, 16], strides = [1, 1, 1]} : vector<6x6x16xbf16> to vector<4x4x16xbf16>
    %150 = vector.shape_cast %149 : vector<4x4x16xbf16> to vector<16x16xbf16>
    %151 = vector.extract_strided_slice %144 {offsets = [1, 0, 0], sizes = [4, 4, 16], strides = [1, 1, 1]} : vector<6x6x16xbf16> to vector<4x4x16xbf16>
    %152 = vector.shape_cast %151 : vector<4x4x16xbf16> to vector<16x16xbf16>
    %153 = vector.extract_strided_slice %144 {offsets = [1, 1, 0], sizes = [4, 4, 16], strides = [1, 1, 1]} : vector<6x6x16xbf16> to vector<4x4x16xbf16>
    %154 = vector.shape_cast %153 : vector<4x4x16xbf16> to vector<16x16xbf16>
    %155 = vector.extract_strided_slice %144 {offsets = [1, 2, 0], sizes = [4, 4, 16], strides = [1, 1, 1]} : vector<6x6x16xbf16> to vector<4x4x16xbf16>
    %156 = vector.shape_cast %155 : vector<4x4x16xbf16> to vector<16x16xbf16>
    %157 = vector.extract_strided_slice %144 {offsets = [2, 0, 0], sizes = [4, 4, 16], strides = [1, 1, 1]} : vector<6x6x16xbf16> to vector<4x4x16xbf16>
    %158 = vector.shape_cast %157 : vector<4x4x16xbf16> to vector<16x16xbf16>
    %159 = vector.extract_strided_slice %144 {offsets = [2, 1, 0], sizes = [4, 4, 16], strides = [1, 1, 1]} : vector<6x6x16xbf16> to vector<4x4x16xbf16>
    %160 = vector.shape_cast %159 : vector<4x4x16xbf16> to vector<16x16xbf16>
    %161 = vector.extract_strided_slice %144 {offsets = [2, 2, 0], sizes = [4, 4, 16], strides = [1, 1, 1]} : vector<6x6x16xbf16> to vector<4x4x16xbf16>
    %162 = vector.shape_cast %161 : vector<4x4x16xbf16> to vector<16x16xbf16>
    %163 = tpu.concatenate %146, %148, %150, %152, %154, %156, %158, %160, %162 in 1 : vector<16x16xbf16>, vector<16x16xbf16>, vector<16x16xbf16>, vector<16x16xbf16>, vector<16x16xbf16>, vector<16x16xbf16>, vector<16x16xbf16>, vector<16x16xbf16>, vector<16x16xbf16> -> vector<16x144xbf16>
    %cst_44 = arith.constant dense<0.000000e+00> : vector<16x32xf32>
    %164 = tpu.matmul %163, %138, %cst_44 {dimension_numbers = #tpu.dot_dimension_numbers<[1], [0], [0], [1], [0, 0, 1, 1], [], []>} : vector<16x144xbf16>, vector<144x32xbf16>, vector<16x32xf32> -> vector<16x32xf32>
    %165 = vector.broadcast %139 : vector<1x32xf32> to vector<16x32xf32>
    %166 = arith.addf %164, %165 : vector<16x32xf32>
    %cst_45 = arith.constant 0.000000e+00 : f32
    %167 = vector.broadcast %cst_45 : f32 to vector<16x32xf32>
    %168 = arith.maximumf %166, %167 : vector<16x32xf32>
    %169 = vector.shape_cast %168 : vector<16x32xf32> to vector<4x4x32xf32>
    %c0_46 = arith.constant 0 : index
    %c0_47 = arith.constant 0 : index
    %170 = vector.load %arg12[%c0_46, %c0_47] : memref<288x32xbf16, #tpu.memory_space<vmem>>, vector<288x32xbf16>
    %c0_48 = arith.constant 0 : index
    %c0_49 = arith.constant 0 : index
    %171 = vector.load %arg13[%c0_48, %c0_49] : memref<1x32xf32, #tpu.memory_space<vmem>>, vector<1x32xf32>
    %172 = arith.truncf %169 : vector<4x4x32xf32> to vector<4x4x32xbf16>
    %cst_50 = arith.constant 0.000000e+00 : bf16
    %173 = vector.broadcast %cst_50 : bf16 to vector<1x4x32xbf16>
    %174 = tpu.concatenate %173, %172, %173 in 0 : vector<1x4x32xbf16>, vector<4x4x32xbf16>, vector<1x4x32xbf16> -> vector<6x4x32xbf16>
    %cst_51 = arith.constant 0.000000e+00 : bf16
    %175 = vector.broadcast %cst_51 : bf16 to vector<6x1x32xbf16>
    %176 = tpu.concatenate %175, %174, %175 in 1 : vector<6x1x32xbf16>, vector<6x4x32xbf16>, vector<6x1x32xbf16> -> vector<6x6x32xbf16>
    %177 = vector.extract_strided_slice %176 {offsets = [0, 0, 0], sizes = [4, 4, 32], strides = [1, 1, 1]} : vector<6x6x32xbf16> to vector<4x4x32xbf16>
    %178 = vector.shape_cast %177 : vector<4x4x32xbf16> to vector<16x32xbf16>
    %179 = vector.extract_strided_slice %176 {offsets = [0, 1, 0], sizes = [4, 4, 32], strides = [1, 1, 1]} : vector<6x6x32xbf16> to vector<4x4x32xbf16>
    %180 = vector.shape_cast %179 : vector<4x4x32xbf16> to vector<16x32xbf16>
    %181 = vector.extract_strided_slice %176 {offsets = [0, 2, 0], sizes = [4, 4, 32], strides = [1, 1, 1]} : vector<6x6x32xbf16> to vector<4x4x32xbf16>
    %182 = vector.shape_cast %181 : vector<4x4x32xbf16> to vector<16x32xbf16>
    %183 = vector.extract_strided_slice %176 {offsets = [1, 0, 0], sizes = [4, 4, 32], strides = [1, 1, 1]} : vector<6x6x32xbf16> to vector<4x4x32xbf16>
    %184 = vector.shape_cast %183 : vector<4x4x32xbf16> to vector<16x32xbf16>
    %185 = vector.extract_strided_slice %176 {offsets = [1, 1, 0], sizes = [4, 4, 32], strides = [1, 1, 1]} : vector<6x6x32xbf16> to vector<4x4x32xbf16>
    %186 = vector.shape_cast %185 : vector<4x4x32xbf16> to vector<16x32xbf16>
    %187 = vector.extract_strided_slice %176 {offsets = [1, 2, 0], sizes = [4, 4, 32], strides = [1, 1, 1]} : vector<6x6x32xbf16> to vector<4x4x32xbf16>
    %188 = vector.shape_cast %187 : vector<4x4x32xbf16> to vector<16x32xbf16>
    %189 = vector.extract_strided_slice %176 {offsets = [2, 0, 0], sizes = [4, 4, 32], strides = [1, 1, 1]} : vector<6x6x32xbf16> to vector<4x4x32xbf16>
    %190 = vector.shape_cast %189 : vector<4x4x32xbf16> to vector<16x32xbf16>
    %191 = vector.extract_strided_slice %176 {offsets = [2, 1, 0], sizes = [4, 4, 32], strides = [1, 1, 1]} : vector<6x6x32xbf16> to vector<4x4x32xbf16>
    %192 = vector.shape_cast %191 : vector<4x4x32xbf16> to vector<16x32xbf16>
    %193 = vector.extract_strided_slice %176 {offsets = [2, 2, 0], sizes = [4, 4, 32], strides = [1, 1, 1]} : vector<6x6x32xbf16> to vector<4x4x32xbf16>
    %194 = vector.shape_cast %193 : vector<4x4x32xbf16> to vector<16x32xbf16>
    %195 = tpu.concatenate %178, %180, %182, %184, %186, %188, %190, %192, %194 in 1 : vector<16x32xbf16>, vector<16x32xbf16>, vector<16x32xbf16>, vector<16x32xbf16>, vector<16x32xbf16>, vector<16x32xbf16>, vector<16x32xbf16>, vector<16x32xbf16>, vector<16x32xbf16> -> vector<16x288xbf16>
    %cst_52 = arith.constant dense<0.000000e+00> : vector<16x32xf32>
    %196 = tpu.matmul %195, %170, %cst_52 {dimension_numbers = #tpu.dot_dimension_numbers<[1], [0], [0], [1], [0, 0, 1, 1], [], []>} : vector<16x288xbf16>, vector<288x32xbf16>, vector<16x32xf32> -> vector<16x32xf32>
    %197 = vector.broadcast %171 : vector<1x32xf32> to vector<16x32xf32>
    %198 = arith.addf %196, %197 : vector<16x32xf32>
    %cst_53 = arith.constant 0.000000e+00 : f32
    %199 = vector.broadcast %cst_53 : f32 to vector<16x32xf32>
    %200 = arith.maximumf %198, %199 : vector<16x32xf32>
    %201 = vector.shape_cast %200 : vector<16x32xf32> to vector<4x4x32xf32>
    %c0_54 = arith.constant 0 : index
    %c0_55 = arith.constant 0 : index
    %202 = vector.load %arg14[%c0_54, %c0_55] : memref<288x32xbf16, #tpu.memory_space<vmem>>, vector<288x32xbf16>
    %c0_56 = arith.constant 0 : index
    %c0_57 = arith.constant 0 : index
    %203 = vector.load %arg15[%c0_56, %c0_57] : memref<1x32xf32, #tpu.memory_space<vmem>>, vector<1x32xf32>
    %204 = arith.truncf %201 : vector<4x4x32xf32> to vector<4x4x32xbf16>
    %cst_58 = arith.constant 0.000000e+00 : bf16
    %205 = vector.broadcast %cst_58 : bf16 to vector<1x4x32xbf16>
    %206 = tpu.concatenate %205, %204, %205 in 0 : vector<1x4x32xbf16>, vector<4x4x32xbf16>, vector<1x4x32xbf16> -> vector<6x4x32xbf16>
    %cst_59 = arith.constant 0.000000e+00 : bf16
    %207 = vector.broadcast %cst_59 : bf16 to vector<6x1x32xbf16>
    %208 = tpu.concatenate %207, %206, %207 in 1 : vector<6x1x32xbf16>, vector<6x4x32xbf16>, vector<6x1x32xbf16> -> vector<6x6x32xbf16>
    %209 = vector.extract_strided_slice %208 {offsets = [0, 0, 0], sizes = [4, 4, 32], strides = [1, 1, 1]} : vector<6x6x32xbf16> to vector<4x4x32xbf16>
    %210 = vector.shape_cast %209 : vector<4x4x32xbf16> to vector<16x32xbf16>
    %211 = vector.extract_strided_slice %208 {offsets = [0, 1, 0], sizes = [4, 4, 32], strides = [1, 1, 1]} : vector<6x6x32xbf16> to vector<4x4x32xbf16>
    %212 = vector.shape_cast %211 : vector<4x4x32xbf16> to vector<16x32xbf16>
    %213 = vector.extract_strided_slice %208 {offsets = [0, 2, 0], sizes = [4, 4, 32], strides = [1, 1, 1]} : vector<6x6x32xbf16> to vector<4x4x32xbf16>
    %214 = vector.shape_cast %213 : vector<4x4x32xbf16> to vector<16x32xbf16>
    %215 = vector.extract_strided_slice %208 {offsets = [1, 0, 0], sizes = [4, 4, 32], strides = [1, 1, 1]} : vector<6x6x32xbf16> to vector<4x4x32xbf16>
    %216 = vector.shape_cast %215 : vector<4x4x32xbf16> to vector<16x32xbf16>
    %217 = vector.extract_strided_slice %208 {offsets = [1, 1, 0], sizes = [4, 4, 32], strides = [1, 1, 1]} : vector<6x6x32xbf16> to vector<4x4x32xbf16>
    %218 = vector.shape_cast %217 : vector<4x4x32xbf16> to vector<16x32xbf16>
    %219 = vector.extract_strided_slice %208 {offsets = [1, 2, 0], sizes = [4, 4, 32], strides = [1, 1, 1]} : vector<6x6x32xbf16> to vector<4x4x32xbf16>
    %220 = vector.shape_cast %219 : vector<4x4x32xbf16> to vector<16x32xbf16>
    %221 = vector.extract_strided_slice %208 {offsets = [2, 0, 0], sizes = [4, 4, 32], strides = [1, 1, 1]} : vector<6x6x32xbf16> to vector<4x4x32xbf16>
    %222 = vector.shape_cast %221 : vector<4x4x32xbf16> to vector<16x32xbf16>
    %223 = vector.extract_strided_slice %208 {offsets = [2, 1, 0], sizes = [4, 4, 32], strides = [1, 1, 1]} : vector<6x6x32xbf16> to vector<4x4x32xbf16>
    %224 = vector.shape_cast %223 : vector<4x4x32xbf16> to vector<16x32xbf16>
    %225 = vector.extract_strided_slice %208 {offsets = [2, 2, 0], sizes = [4, 4, 32], strides = [1, 1, 1]} : vector<6x6x32xbf16> to vector<4x4x32xbf16>
    %226 = vector.shape_cast %225 : vector<4x4x32xbf16> to vector<16x32xbf16>
    %227 = tpu.concatenate %210, %212, %214, %216, %218, %220, %222, %224, %226 in 1 : vector<16x32xbf16>, vector<16x32xbf16>, vector<16x32xbf16>, vector<16x32xbf16>, vector<16x32xbf16>, vector<16x32xbf16>, vector<16x32xbf16>, vector<16x32xbf16>, vector<16x32xbf16> -> vector<16x288xbf16>
    %cst_60 = arith.constant dense<0.000000e+00> : vector<16x32xf32>
    %228 = tpu.matmul %227, %202, %cst_60 {dimension_numbers = #tpu.dot_dimension_numbers<[1], [0], [0], [1], [0, 0, 1, 1], [], []>} : vector<16x288xbf16>, vector<288x32xbf16>, vector<16x32xf32> -> vector<16x32xf32>
    %229 = vector.broadcast %203 : vector<1x32xf32> to vector<16x32xf32>
    %230 = arith.addf %228, %229 : vector<16x32xf32>
    %cst_61 = arith.constant 0.000000e+00 : f32
    %231 = vector.broadcast %cst_61 : f32 to vector<16x32xf32>
    %232 = arith.maximumf %230, %231 : vector<16x32xf32>
    %233 = vector.shape_cast %232 : vector<16x32xf32> to vector<4x4x32xf32>
    %c0_62 = arith.constant 0 : index
    %c0_63 = arith.constant 0 : index
    %234 = vector.load %arg16[%c0_62, %c0_63] : memref<288x32xbf16, #tpu.memory_space<vmem>>, vector<288x32xbf16>
    %c0_64 = arith.constant 0 : index
    %c0_65 = arith.constant 0 : index
    %235 = vector.load %arg17[%c0_64, %c0_65] : memref<1x32xf32, #tpu.memory_space<vmem>>, vector<1x32xf32>
    %236 = arith.truncf %233 : vector<4x4x32xf32> to vector<4x4x32xbf16>
    %cst_66 = arith.constant 0.000000e+00 : bf16
    %237 = vector.broadcast %cst_66 : bf16 to vector<1x4x32xbf16>
    %238 = tpu.concatenate %237, %236, %237 in 0 : vector<1x4x32xbf16>, vector<4x4x32xbf16>, vector<1x4x32xbf16> -> vector<6x4x32xbf16>
    %cst_67 = arith.constant 0.000000e+00 : bf16
    %239 = vector.broadcast %cst_67 : bf16 to vector<6x1x32xbf16>
    %240 = tpu.concatenate %239, %238, %239 in 1 : vector<6x1x32xbf16>, vector<6x4x32xbf16>, vector<6x1x32xbf16> -> vector<6x6x32xbf16>
    %241 = vector.extract_strided_slice %240 {offsets = [0, 0, 0], sizes = [4, 4, 32], strides = [1, 1, 1]} : vector<6x6x32xbf16> to vector<4x4x32xbf16>
    %242 = vector.shape_cast %241 : vector<4x4x32xbf16> to vector<16x32xbf16>
    %243 = vector.extract_strided_slice %240 {offsets = [0, 1, 0], sizes = [4, 4, 32], strides = [1, 1, 1]} : vector<6x6x32xbf16> to vector<4x4x32xbf16>
    %244 = vector.shape_cast %243 : vector<4x4x32xbf16> to vector<16x32xbf16>
    %245 = vector.extract_strided_slice %240 {offsets = [0, 2, 0], sizes = [4, 4, 32], strides = [1, 1, 1]} : vector<6x6x32xbf16> to vector<4x4x32xbf16>
    %246 = vector.shape_cast %245 : vector<4x4x32xbf16> to vector<16x32xbf16>
    %247 = vector.extract_strided_slice %240 {offsets = [1, 0, 0], sizes = [4, 4, 32], strides = [1, 1, 1]} : vector<6x6x32xbf16> to vector<4x4x32xbf16>
    %248 = vector.shape_cast %247 : vector<4x4x32xbf16> to vector<16x32xbf16>
    %249 = vector.extract_strided_slice %240 {offsets = [1, 1, 0], sizes = [4, 4, 32], strides = [1, 1, 1]} : vector<6x6x32xbf16> to vector<4x4x32xbf16>
    %250 = vector.shape_cast %249 : vector<4x4x32xbf16> to vector<16x32xbf16>
    %251 = vector.extract_strided_slice %240 {offsets = [1, 2, 0], sizes = [4, 4, 32], strides = [1, 1, 1]} : vector<6x6x32xbf16> to vector<4x4x32xbf16>
    %252 = vector.shape_cast %251 : vector<4x4x32xbf16> to vector<16x32xbf16>
    %253 = vector.extract_strided_slice %240 {offsets = [2, 0, 0], sizes = [4, 4, 32], strides = [1, 1, 1]} : vector<6x6x32xbf16> to vector<4x4x32xbf16>
    %254 = vector.shape_cast %253 : vector<4x4x32xbf16> to vector<16x32xbf16>
    %255 = vector.extract_strided_slice %240 {offsets = [2, 1, 0], sizes = [4, 4, 32], strides = [1, 1, 1]} : vector<6x6x32xbf16> to vector<4x4x32xbf16>
    %256 = vector.shape_cast %255 : vector<4x4x32xbf16> to vector<16x32xbf16>
    %257 = vector.extract_strided_slice %240 {offsets = [2, 2, 0], sizes = [4, 4, 32], strides = [1, 1, 1]} : vector<6x6x32xbf16> to vector<4x4x32xbf16>
    %258 = vector.shape_cast %257 : vector<4x4x32xbf16> to vector<16x32xbf16>
    %259 = tpu.concatenate %242, %244, %246, %248, %250, %252, %254, %256, %258 in 1 : vector<16x32xbf16>, vector<16x32xbf16>, vector<16x32xbf16>, vector<16x32xbf16>, vector<16x32xbf16>, vector<16x32xbf16>, vector<16x32xbf16>, vector<16x32xbf16>, vector<16x32xbf16> -> vector<16x288xbf16>
    %cst_68 = arith.constant dense<0.000000e+00> : vector<16x32xf32>
    %260 = tpu.matmul %259, %234, %cst_68 {dimension_numbers = #tpu.dot_dimension_numbers<[1], [0], [0], [1], [0, 0, 1, 1], [], []>} : vector<16x288xbf16>, vector<288x32xbf16>, vector<16x32xf32> -> vector<16x32xf32>
    %261 = vector.broadcast %235 : vector<1x32xf32> to vector<16x32xf32>
    %262 = arith.addf %260, %261 : vector<16x32xf32>
    %cst_69 = arith.constant 0.000000e+00 : f32
    %263 = vector.broadcast %cst_69 : f32 to vector<16x32xf32>
    %264 = arith.maximumf %262, %263 : vector<16x32xf32>
    %265 = vector.shape_cast %264 : vector<16x32xf32> to vector<4x4x32xf32>
    %266 = vector.shape_cast %265 : vector<4x4x32xf32> to vector<2x2x4x32xf32>
    %cst_70 = arith.constant dense<0xFF800000> : vector<2x4x32xf32>
    %267 = vector.multi_reduction <maximumf>, %266, %cst_70 [1] : vector<2x2x4x32xf32> to vector<2x4x32xf32>
    %268 = vector.shape_cast %267 : vector<2x4x32xf32> to vector<2x2x2x32xf32>
    %cst_71 = arith.constant dense<0xFF800000> : vector<2x2x32xf32>
    %269 = vector.multi_reduction <maximumf>, %268, %cst_71 [2] : vector<2x2x2x32xf32> to vector<2x2x32xf32>
    %c0_72 = arith.constant 0 : index
    %c0_73 = arith.constant 0 : index
    %270 = vector.load %arg18[%c0_72, %c0_73] : memref<288x64xbf16, #tpu.memory_space<vmem>>, vector<288x64xbf16>
    %c0_74 = arith.constant 0 : index
    %c0_75 = arith.constant 0 : index
    %271 = vector.load %arg19[%c0_74, %c0_75] : memref<1x64xf32, #tpu.memory_space<vmem>>, vector<1x64xf32>
    %272 = arith.truncf %269 : vector<2x2x32xf32> to vector<2x2x32xbf16>
    %cst_76 = arith.constant 0.000000e+00 : bf16
    %273 = vector.broadcast %cst_76 : bf16 to vector<1x2x32xbf16>
    %274 = tpu.concatenate %273, %272, %273 in 0 : vector<1x2x32xbf16>, vector<2x2x32xbf16>, vector<1x2x32xbf16> -> vector<4x2x32xbf16>
    %cst_77 = arith.constant 0.000000e+00 : bf16
    %275 = vector.broadcast %cst_77 : bf16 to vector<4x1x32xbf16>
    %276 = tpu.concatenate %275, %274, %275 in 1 : vector<4x1x32xbf16>, vector<4x2x32xbf16>, vector<4x1x32xbf16> -> vector<4x4x32xbf16>
    %277 = vector.extract_strided_slice %276 {offsets = [0, 0, 0], sizes = [2, 2, 32], strides = [1, 1, 1]} : vector<4x4x32xbf16> to vector<2x2x32xbf16>
    %278 = vector.shape_cast %277 : vector<2x2x32xbf16> to vector<4x32xbf16>
    %279 = vector.extract_strided_slice %276 {offsets = [0, 1, 0], sizes = [2, 2, 32], strides = [1, 1, 1]} : vector<4x4x32xbf16> to vector<2x2x32xbf16>
    %280 = vector.shape_cast %279 : vector<2x2x32xbf16> to vector<4x32xbf16>
    %281 = vector.extract_strided_slice %276 {offsets = [0, 2, 0], sizes = [2, 2, 32], strides = [1, 1, 1]} : vector<4x4x32xbf16> to vector<2x2x32xbf16>
    %282 = vector.shape_cast %281 : vector<2x2x32xbf16> to vector<4x32xbf16>
    %283 = vector.extract_strided_slice %276 {offsets = [1, 0, 0], sizes = [2, 2, 32], strides = [1, 1, 1]} : vector<4x4x32xbf16> to vector<2x2x32xbf16>
    %284 = vector.shape_cast %283 : vector<2x2x32xbf16> to vector<4x32xbf16>
    %285 = vector.extract_strided_slice %276 {offsets = [1, 1, 0], sizes = [2, 2, 32], strides = [1, 1, 1]} : vector<4x4x32xbf16> to vector<2x2x32xbf16>
    %286 = vector.shape_cast %285 : vector<2x2x32xbf16> to vector<4x32xbf16>
    %287 = vector.extract_strided_slice %276 {offsets = [1, 2, 0], sizes = [2, 2, 32], strides = [1, 1, 1]} : vector<4x4x32xbf16> to vector<2x2x32xbf16>
    %288 = vector.shape_cast %287 : vector<2x2x32xbf16> to vector<4x32xbf16>
    %289 = vector.extract_strided_slice %276 {offsets = [2, 0, 0], sizes = [2, 2, 32], strides = [1, 1, 1]} : vector<4x4x32xbf16> to vector<2x2x32xbf16>
    %290 = vector.shape_cast %289 : vector<2x2x32xbf16> to vector<4x32xbf16>
    %291 = vector.extract_strided_slice %276 {offsets = [2, 1, 0], sizes = [2, 2, 32], strides = [1, 1, 1]} : vector<4x4x32xbf16> to vector<2x2x32xbf16>
    %292 = vector.shape_cast %291 : vector<2x2x32xbf16> to vector<4x32xbf16>
    %293 = vector.extract_strided_slice %276 {offsets = [2, 2, 0], sizes = [2, 2, 32], strides = [1, 1, 1]} : vector<4x4x32xbf16> to vector<2x2x32xbf16>
    %294 = vector.shape_cast %293 : vector<2x2x32xbf16> to vector<4x32xbf16>
    %295 = tpu.concatenate %278, %280, %282, %284, %286, %288, %290, %292, %294 in 1 : vector<4x32xbf16>, vector<4x32xbf16>, vector<4x32xbf16>, vector<4x32xbf16>, vector<4x32xbf16>, vector<4x32xbf16>, vector<4x32xbf16>, vector<4x32xbf16>, vector<4x32xbf16> -> vector<4x288xbf16>
    %cst_78 = arith.constant dense<0.000000e+00> : vector<4x64xf32>
    %296 = tpu.matmul %295, %270, %cst_78 {dimension_numbers = #tpu.dot_dimension_numbers<[1], [0], [0], [1], [0, 0, 1, 1], [], []>} : vector<4x288xbf16>, vector<288x64xbf16>, vector<4x64xf32> -> vector<4x64xf32>
    %297 = vector.broadcast %271 : vector<1x64xf32> to vector<4x64xf32>
    %298 = arith.addf %296, %297 : vector<4x64xf32>
    %cst_79 = arith.constant 0.000000e+00 : f32
    %299 = vector.broadcast %cst_79 : f32 to vector<4x64xf32>
    %300 = arith.maximumf %298, %299 : vector<4x64xf32>
    %301 = vector.shape_cast %300 : vector<4x64xf32> to vector<2x2x64xf32>
    %c0_80 = arith.constant 0 : index
    %c0_81 = arith.constant 0 : index
    %302 = vector.load %arg20[%c0_80, %c0_81] : memref<576x64xbf16, #tpu.memory_space<vmem>>, vector<576x64xbf16>
    %c0_82 = arith.constant 0 : index
    %c0_83 = arith.constant 0 : index
    %303 = vector.load %arg21[%c0_82, %c0_83] : memref<1x64xf32, #tpu.memory_space<vmem>>, vector<1x64xf32>
    %304 = arith.truncf %301 : vector<2x2x64xf32> to vector<2x2x64xbf16>
    %cst_84 = arith.constant 0.000000e+00 : bf16
    %305 = vector.broadcast %cst_84 : bf16 to vector<1x2x64xbf16>
    %306 = tpu.concatenate %305, %304, %305 in 0 : vector<1x2x64xbf16>, vector<2x2x64xbf16>, vector<1x2x64xbf16> -> vector<4x2x64xbf16>
    %cst_85 = arith.constant 0.000000e+00 : bf16
    %307 = vector.broadcast %cst_85 : bf16 to vector<4x1x64xbf16>
    %308 = tpu.concatenate %307, %306, %307 in 1 : vector<4x1x64xbf16>, vector<4x2x64xbf16>, vector<4x1x64xbf16> -> vector<4x4x64xbf16>
    %309 = vector.extract_strided_slice %308 {offsets = [0, 0, 0], sizes = [2, 2, 64], strides = [1, 1, 1]} : vector<4x4x64xbf16> to vector<2x2x64xbf16>
    %310 = vector.shape_cast %309 : vector<2x2x64xbf16> to vector<4x64xbf16>
    %311 = vector.extract_strided_slice %308 {offsets = [0, 1, 0], sizes = [2, 2, 64], strides = [1, 1, 1]} : vector<4x4x64xbf16> to vector<2x2x64xbf16>
    %312 = vector.shape_cast %311 : vector<2x2x64xbf16> to vector<4x64xbf16>
    %313 = vector.extract_strided_slice %308 {offsets = [0, 2, 0], sizes = [2, 2, 64], strides = [1, 1, 1]} : vector<4x4x64xbf16> to vector<2x2x64xbf16>
    %314 = vector.shape_cast %313 : vector<2x2x64xbf16> to vector<4x64xbf16>
    %315 = vector.extract_strided_slice %308 {offsets = [1, 0, 0], sizes = [2, 2, 64], strides = [1, 1, 1]} : vector<4x4x64xbf16> to vector<2x2x64xbf16>
    %316 = vector.shape_cast %315 : vector<2x2x64xbf16> to vector<4x64xbf16>
    %317 = vector.extract_strided_slice %308 {offsets = [1, 1, 0], sizes = [2, 2, 64], strides = [1, 1, 1]} : vector<4x4x64xbf16> to vector<2x2x64xbf16>
    %318 = vector.shape_cast %317 : vector<2x2x64xbf16> to vector<4x64xbf16>
    %319 = vector.extract_strided_slice %308 {offsets = [1, 2, 0], sizes = [2, 2, 64], strides = [1, 1, 1]} : vector<4x4x64xbf16> to vector<2x2x64xbf16>
    %320 = vector.shape_cast %319 : vector<2x2x64xbf16> to vector<4x64xbf16>
    %321 = vector.extract_strided_slice %308 {offsets = [2, 0, 0], sizes = [2, 2, 64], strides = [1, 1, 1]} : vector<4x4x64xbf16> to vector<2x2x64xbf16>
    %322 = vector.shape_cast %321 : vector<2x2x64xbf16> to vector<4x64xbf16>
    %323 = vector.extract_strided_slice %308 {offsets = [2, 1, 0], sizes = [2, 2, 64], strides = [1, 1, 1]} : vector<4x4x64xbf16> to vector<2x2x64xbf16>
    %324 = vector.shape_cast %323 : vector<2x2x64xbf16> to vector<4x64xbf16>
    %325 = vector.extract_strided_slice %308 {offsets = [2, 2, 0], sizes = [2, 2, 64], strides = [1, 1, 1]} : vector<4x4x64xbf16> to vector<2x2x64xbf16>
    %326 = vector.shape_cast %325 : vector<2x2x64xbf16> to vector<4x64xbf16>
    %327 = tpu.concatenate %310, %312, %314, %316, %318, %320, %322, %324, %326 in 1 : vector<4x64xbf16>, vector<4x64xbf16>, vector<4x64xbf16>, vector<4x64xbf16>, vector<4x64xbf16>, vector<4x64xbf16>, vector<4x64xbf16>, vector<4x64xbf16>, vector<4x64xbf16> -> vector<4x576xbf16>
    %cst_86 = arith.constant dense<0.000000e+00> : vector<4x64xf32>
    %328 = tpu.matmul %327, %302, %cst_86 {dimension_numbers = #tpu.dot_dimension_numbers<[1], [0], [0], [1], [0, 0, 1, 1], [], []>} : vector<4x576xbf16>, vector<576x64xbf16>, vector<4x64xf32> -> vector<4x64xf32>
    %329 = vector.broadcast %303 : vector<1x64xf32> to vector<4x64xf32>
    %330 = arith.addf %328, %329 : vector<4x64xf32>
    %cst_87 = arith.constant 0.000000e+00 : f32
    %331 = vector.broadcast %cst_87 : f32 to vector<4x64xf32>
    %332 = arith.maximumf %330, %331 : vector<4x64xf32>
    %333 = vector.shape_cast %332 : vector<4x64xf32> to vector<2x2x64xf32>
    %c0_88 = arith.constant 0 : index
    %c0_89 = arith.constant 0 : index
    %334 = vector.load %arg22[%c0_88, %c0_89] : memref<576x64xbf16, #tpu.memory_space<vmem>>, vector<576x64xbf16>
    %c0_90 = arith.constant 0 : index
    %c0_91 = arith.constant 0 : index
    %335 = vector.load %arg23[%c0_90, %c0_91] : memref<1x64xf32, #tpu.memory_space<vmem>>, vector<1x64xf32>
    %336 = arith.truncf %333 : vector<2x2x64xf32> to vector<2x2x64xbf16>
    %cst_92 = arith.constant 0.000000e+00 : bf16
    %337 = vector.broadcast %cst_92 : bf16 to vector<1x2x64xbf16>
    %338 = tpu.concatenate %337, %336, %337 in 0 : vector<1x2x64xbf16>, vector<2x2x64xbf16>, vector<1x2x64xbf16> -> vector<4x2x64xbf16>
    %cst_93 = arith.constant 0.000000e+00 : bf16
    %339 = vector.broadcast %cst_93 : bf16 to vector<4x1x64xbf16>
    %340 = tpu.concatenate %339, %338, %339 in 1 : vector<4x1x64xbf16>, vector<4x2x64xbf16>, vector<4x1x64xbf16> -> vector<4x4x64xbf16>
    %341 = vector.extract_strided_slice %340 {offsets = [0, 0, 0], sizes = [2, 2, 64], strides = [1, 1, 1]} : vector<4x4x64xbf16> to vector<2x2x64xbf16>
    %342 = vector.shape_cast %341 : vector<2x2x64xbf16> to vector<4x64xbf16>
    %343 = vector.extract_strided_slice %340 {offsets = [0, 1, 0], sizes = [2, 2, 64], strides = [1, 1, 1]} : vector<4x4x64xbf16> to vector<2x2x64xbf16>
    %344 = vector.shape_cast %343 : vector<2x2x64xbf16> to vector<4x64xbf16>
    %345 = vector.extract_strided_slice %340 {offsets = [0, 2, 0], sizes = [2, 2, 64], strides = [1, 1, 1]} : vector<4x4x64xbf16> to vector<2x2x64xbf16>
    %346 = vector.shape_cast %345 : vector<2x2x64xbf16> to vector<4x64xbf16>
    %347 = vector.extract_strided_slice %340 {offsets = [1, 0, 0], sizes = [2, 2, 64], strides = [1, 1, 1]} : vector<4x4x64xbf16> to vector<2x2x64xbf16>
    %348 = vector.shape_cast %347 : vector<2x2x64xbf16> to vector<4x64xbf16>
    %349 = vector.extract_strided_slice %340 {offsets = [1, 1, 0], sizes = [2, 2, 64], strides = [1, 1, 1]} : vector<4x4x64xbf16> to vector<2x2x64xbf16>
    %350 = vector.shape_cast %349 : vector<2x2x64xbf16> to vector<4x64xbf16>
    %351 = vector.extract_strided_slice %340 {offsets = [1, 2, 0], sizes = [2, 2, 64], strides = [1, 1, 1]} : vector<4x4x64xbf16> to vector<2x2x64xbf16>
    %352 = vector.shape_cast %351 : vector<2x2x64xbf16> to vector<4x64xbf16>
    %353 = vector.extract_strided_slice %340 {offsets = [2, 0, 0], sizes = [2, 2, 64], strides = [1, 1, 1]} : vector<4x4x64xbf16> to vector<2x2x64xbf16>
    %354 = vector.shape_cast %353 : vector<2x2x64xbf16> to vector<4x64xbf16>
    %355 = vector.extract_strided_slice %340 {offsets = [2, 1, 0], sizes = [2, 2, 64], strides = [1, 1, 1]} : vector<4x4x64xbf16> to vector<2x2x64xbf16>
    %356 = vector.shape_cast %355 : vector<2x2x64xbf16> to vector<4x64xbf16>
    %357 = vector.extract_strided_slice %340 {offsets = [2, 2, 0], sizes = [2, 2, 64], strides = [1, 1, 1]} : vector<4x4x64xbf16> to vector<2x2x64xbf16>
    %358 = vector.shape_cast %357 : vector<2x2x64xbf16> to vector<4x64xbf16>
    %359 = tpu.concatenate %342, %344, %346, %348, %350, %352, %354, %356, %358 in 1 : vector<4x64xbf16>, vector<4x64xbf16>, vector<4x64xbf16>, vector<4x64xbf16>, vector<4x64xbf16>, vector<4x64xbf16>, vector<4x64xbf16>, vector<4x64xbf16>, vector<4x64xbf16> -> vector<4x576xbf16>
    %cst_94 = arith.constant dense<0.000000e+00> : vector<4x64xf32>
    %360 = tpu.matmul %359, %334, %cst_94 {dimension_numbers = #tpu.dot_dimension_numbers<[1], [0], [0], [1], [0, 0, 1, 1], [], []>} : vector<4x576xbf16>, vector<576x64xbf16>, vector<4x64xf32> -> vector<4x64xf32>
    %361 = vector.broadcast %335 : vector<1x64xf32> to vector<4x64xf32>
    %362 = arith.addf %360, %361 : vector<4x64xf32>
    %cst_95 = arith.constant 0.000000e+00 : f32
    %363 = vector.broadcast %cst_95 : f32 to vector<4x64xf32>
    %364 = arith.maximumf %362, %363 : vector<4x64xf32>
    %365 = vector.shape_cast %364 : vector<4x64xf32> to vector<2x2x64xf32>
    %c0_96 = arith.constant 0 : index
    %c0_97 = arith.constant 0 : index
    %366 = vector.load %arg24[%c0_96, %c0_97] : memref<576x64xbf16, #tpu.memory_space<vmem>>, vector<576x64xbf16>
    %c0_98 = arith.constant 0 : index
    %c0_99 = arith.constant 0 : index
    %367 = vector.load %arg25[%c0_98, %c0_99] : memref<1x64xf32, #tpu.memory_space<vmem>>, vector<1x64xf32>
    %368 = arith.truncf %365 : vector<2x2x64xf32> to vector<2x2x64xbf16>
    %cst_100 = arith.constant 0.000000e+00 : bf16
    %369 = vector.broadcast %cst_100 : bf16 to vector<1x2x64xbf16>
    %370 = tpu.concatenate %369, %368, %369 in 0 : vector<1x2x64xbf16>, vector<2x2x64xbf16>, vector<1x2x64xbf16> -> vector<4x2x64xbf16>
    %cst_101 = arith.constant 0.000000e+00 : bf16
    %371 = vector.broadcast %cst_101 : bf16 to vector<4x1x64xbf16>
    %372 = tpu.concatenate %371, %370, %371 in 1 : vector<4x1x64xbf16>, vector<4x2x64xbf16>, vector<4x1x64xbf16> -> vector<4x4x64xbf16>
    %373 = vector.extract_strided_slice %372 {offsets = [0, 0, 0], sizes = [2, 2, 64], strides = [1, 1, 1]} : vector<4x4x64xbf16> to vector<2x2x64xbf16>
    %374 = vector.shape_cast %373 : vector<2x2x64xbf16> to vector<4x64xbf16>
    %375 = vector.extract_strided_slice %372 {offsets = [0, 1, 0], sizes = [2, 2, 64], strides = [1, 1, 1]} : vector<4x4x64xbf16> to vector<2x2x64xbf16>
    %376 = vector.shape_cast %375 : vector<2x2x64xbf16> to vector<4x64xbf16>
    %377 = vector.extract_strided_slice %372 {offsets = [0, 2, 0], sizes = [2, 2, 64], strides = [1, 1, 1]} : vector<4x4x64xbf16> to vector<2x2x64xbf16>
    %378 = vector.shape_cast %377 : vector<2x2x64xbf16> to vector<4x64xbf16>
    %379 = vector.extract_strided_slice %372 {offsets = [1, 0, 0], sizes = [2, 2, 64], strides = [1, 1, 1]} : vector<4x4x64xbf16> to vector<2x2x64xbf16>
    %380 = vector.shape_cast %379 : vector<2x2x64xbf16> to vector<4x64xbf16>
    %381 = vector.extract_strided_slice %372 {offsets = [1, 1, 0], sizes = [2, 2, 64], strides = [1, 1, 1]} : vector<4x4x64xbf16> to vector<2x2x64xbf16>
    %382 = vector.shape_cast %381 : vector<2x2x64xbf16> to vector<4x64xbf16>
    %383 = vector.extract_strided_slice %372 {offsets = [1, 2, 0], sizes = [2, 2, 64], strides = [1, 1, 1]} : vector<4x4x64xbf16> to vector<2x2x64xbf16>
    %384 = vector.shape_cast %383 : vector<2x2x64xbf16> to vector<4x64xbf16>
    %385 = vector.extract_strided_slice %372 {offsets = [2, 0, 0], sizes = [2, 2, 64], strides = [1, 1, 1]} : vector<4x4x64xbf16> to vector<2x2x64xbf16>
    %386 = vector.shape_cast %385 : vector<2x2x64xbf16> to vector<4x64xbf16>
    %387 = vector.extract_strided_slice %372 {offsets = [2, 1, 0], sizes = [2, 2, 64], strides = [1, 1, 1]} : vector<4x4x64xbf16> to vector<2x2x64xbf16>
    %388 = vector.shape_cast %387 : vector<2x2x64xbf16> to vector<4x64xbf16>
    %389 = vector.extract_strided_slice %372 {offsets = [2, 2, 0], sizes = [2, 2, 64], strides = [1, 1, 1]} : vector<4x4x64xbf16> to vector<2x2x64xbf16>
    %390 = vector.shape_cast %389 : vector<2x2x64xbf16> to vector<4x64xbf16>
    %391 = tpu.concatenate %374, %376, %378, %380, %382, %384, %386, %388, %390 in 1 : vector<4x64xbf16>, vector<4x64xbf16>, vector<4x64xbf16>, vector<4x64xbf16>, vector<4x64xbf16>, vector<4x64xbf16>, vector<4x64xbf16>, vector<4x64xbf16>, vector<4x64xbf16> -> vector<4x576xbf16>
    %cst_102 = arith.constant dense<0.000000e+00> : vector<4x64xf32>
    %392 = tpu.matmul %391, %366, %cst_102 {dimension_numbers = #tpu.dot_dimension_numbers<[1], [0], [0], [1], [0, 0, 1, 1], [], []>} : vector<4x576xbf16>, vector<576x64xbf16>, vector<4x64xf32> -> vector<4x64xf32>
    %393 = vector.broadcast %367 : vector<1x64xf32> to vector<4x64xf32>
    %394 = arith.addf %392, %393 : vector<4x64xf32>
    %cst_103 = arith.constant 0.000000e+00 : f32
    %395 = vector.broadcast %cst_103 : f32 to vector<4x64xf32>
    %396 = arith.maximumf %394, %395 : vector<4x64xf32>
    %397 = vector.shape_cast %396 : vector<4x64xf32> to vector<2x2x64xf32>
    %398 = vector.shape_cast %397 : vector<2x2x64xf32> to vector<1x2x2x64xf32>
    %cst_104 = arith.constant dense<0xFF800000> : vector<1x2x64xf32>
    %399 = vector.multi_reduction <maximumf>, %398, %cst_104 [1] : vector<1x2x2x64xf32> to vector<1x2x64xf32>
    %400 = vector.shape_cast %399 : vector<1x2x64xf32> to vector<1x1x2x64xf32>
    %cst_105 = arith.constant dense<0xFF800000> : vector<1x1x64xf32>
    %401 = vector.multi_reduction <maximumf>, %400, %cst_105 [2] : vector<1x1x2x64xf32> to vector<1x1x64xf32>
    %c0_106 = arith.constant 0 : index
    %c0_107 = arith.constant 0 : index
    %402 = vector.load %arg26[%c0_106, %c0_107] : memref<576x64xbf16, #tpu.memory_space<vmem>>, vector<576x64xbf16>
    %c0_108 = arith.constant 0 : index
    %c0_109 = arith.constant 0 : index
    %403 = vector.load %arg27[%c0_108, %c0_109] : memref<1x64xf32, #tpu.memory_space<vmem>>, vector<1x64xf32>
    %404 = arith.truncf %401 : vector<1x1x64xf32> to vector<1x1x64xbf16>
    %cst_110 = arith.constant 0.000000e+00 : bf16
    %405 = vector.broadcast %cst_110 : bf16 to vector<1x1x64xbf16>
    %406 = tpu.concatenate %405, %404, %405 in 0 : vector<1x1x64xbf16>, vector<1x1x64xbf16>, vector<1x1x64xbf16> -> vector<3x1x64xbf16>
    %cst_111 = arith.constant 0.000000e+00 : bf16
    %407 = vector.broadcast %cst_111 : bf16 to vector<3x1x64xbf16>
    %408 = tpu.concatenate %407, %406, %407 in 1 : vector<3x1x64xbf16>, vector<3x1x64xbf16>, vector<3x1x64xbf16> -> vector<3x3x64xbf16>
    %409 = vector.extract_strided_slice %408 {offsets = [0, 0, 0], sizes = [1, 1, 64], strides = [1, 1, 1]} : vector<3x3x64xbf16> to vector<1x1x64xbf16>
    %410 = vector.shape_cast %409 : vector<1x1x64xbf16> to vector<1x64xbf16>
    %411 = vector.extract_strided_slice %408 {offsets = [0, 1, 0], sizes = [1, 1, 64], strides = [1, 1, 1]} : vector<3x3x64xbf16> to vector<1x1x64xbf16>
    %412 = vector.shape_cast %411 : vector<1x1x64xbf16> to vector<1x64xbf16>
    %413 = vector.extract_strided_slice %408 {offsets = [0, 2, 0], sizes = [1, 1, 64], strides = [1, 1, 1]} : vector<3x3x64xbf16> to vector<1x1x64xbf16>
    %414 = vector.shape_cast %413 : vector<1x1x64xbf16> to vector<1x64xbf16>
    %415 = vector.extract_strided_slice %408 {offsets = [1, 0, 0], sizes = [1, 1, 64], strides = [1, 1, 1]} : vector<3x3x64xbf16> to vector<1x1x64xbf16>
    %416 = vector.shape_cast %415 : vector<1x1x64xbf16> to vector<1x64xbf16>
    %417 = vector.extract_strided_slice %408 {offsets = [1, 1, 0], sizes = [1, 1, 64], strides = [1, 1, 1]} : vector<3x3x64xbf16> to vector<1x1x64xbf16>
    %418 = vector.shape_cast %417 : vector<1x1x64xbf16> to vector<1x64xbf16>
    %419 = vector.extract_strided_slice %408 {offsets = [1, 2, 0], sizes = [1, 1, 64], strides = [1, 1, 1]} : vector<3x3x64xbf16> to vector<1x1x64xbf16>
    %420 = vector.shape_cast %419 : vector<1x1x64xbf16> to vector<1x64xbf16>
    %421 = vector.extract_strided_slice %408 {offsets = [2, 0, 0], sizes = [1, 1, 64], strides = [1, 1, 1]} : vector<3x3x64xbf16> to vector<1x1x64xbf16>
    %422 = vector.shape_cast %421 : vector<1x1x64xbf16> to vector<1x64xbf16>
    %423 = vector.extract_strided_slice %408 {offsets = [2, 1, 0], sizes = [1, 1, 64], strides = [1, 1, 1]} : vector<3x3x64xbf16> to vector<1x1x64xbf16>
    %424 = vector.shape_cast %423 : vector<1x1x64xbf16> to vector<1x64xbf16>
    %425 = vector.extract_strided_slice %408 {offsets = [2, 2, 0], sizes = [1, 1, 64], strides = [1, 1, 1]} : vector<3x3x64xbf16> to vector<1x1x64xbf16>
    %426 = vector.shape_cast %425 : vector<1x1x64xbf16> to vector<1x64xbf16>
    %427 = tpu.concatenate %410, %412, %414, %416, %418, %420, %422, %424, %426 in 1 : vector<1x64xbf16>, vector<1x64xbf16>, vector<1x64xbf16>, vector<1x64xbf16>, vector<1x64xbf16>, vector<1x64xbf16>, vector<1x64xbf16>, vector<1x64xbf16>, vector<1x64xbf16> -> vector<1x576xbf16>
    %cst_112 = arith.constant dense<0.000000e+00> : vector<1x64xf32>
    %428 = tpu.matmul %427, %402, %cst_112 {dimension_numbers = #tpu.dot_dimension_numbers<[1], [0], [0], [1], [0, 0, 1, 1], [], []>} : vector<1x576xbf16>, vector<576x64xbf16>, vector<1x64xf32> -> vector<1x64xf32>
    %429 = arith.addf %428, %403 : vector<1x64xf32>
    %cst_113 = arith.constant 0.000000e+00 : f32
    %430 = vector.broadcast %cst_113 : f32 to vector<1x64xf32>
    %431 = arith.maximumf %429, %430 : vector<1x64xf32>
    %432 = vector.shape_cast %431 : vector<1x64xf32> to vector<1x1x64xf32>
    %c0_114 = arith.constant 0 : index
    %c0_115 = arith.constant 0 : index
    %433 = vector.load %arg28[%c0_114, %c0_115] : memref<576x64xbf16, #tpu.memory_space<vmem>>, vector<576x64xbf16>
    %c0_116 = arith.constant 0 : index
    %c0_117 = arith.constant 0 : index
    %434 = vector.load %arg29[%c0_116, %c0_117] : memref<1x64xf32, #tpu.memory_space<vmem>>, vector<1x64xf32>
    %435 = arith.truncf %432 : vector<1x1x64xf32> to vector<1x1x64xbf16>
    %cst_118 = arith.constant 0.000000e+00 : bf16
    %436 = vector.broadcast %cst_118 : bf16 to vector<1x1x64xbf16>
    %437 = tpu.concatenate %436, %435, %436 in 0 : vector<1x1x64xbf16>, vector<1x1x64xbf16>, vector<1x1x64xbf16> -> vector<3x1x64xbf16>
    %cst_119 = arith.constant 0.000000e+00 : bf16
    %438 = vector.broadcast %cst_119 : bf16 to vector<3x1x64xbf16>
    %439 = tpu.concatenate %438, %437, %438 in 1 : vector<3x1x64xbf16>, vector<3x1x64xbf16>, vector<3x1x64xbf16> -> vector<3x3x64xbf16>
    %440 = vector.extract_strided_slice %439 {offsets = [0, 0, 0], sizes = [1, 1, 64], strides = [1, 1, 1]} : vector<3x3x64xbf16> to vector<1x1x64xbf16>
    %441 = vector.shape_cast %440 : vector<1x1x64xbf16> to vector<1x64xbf16>
    %442 = vector.extract_strided_slice %439 {offsets = [0, 1, 0], sizes = [1, 1, 64], strides = [1, 1, 1]} : vector<3x3x64xbf16> to vector<1x1x64xbf16>
    %443 = vector.shape_cast %442 : vector<1x1x64xbf16> to vector<1x64xbf16>
    %444 = vector.extract_strided_slice %439 {offsets = [0, 2, 0], sizes = [1, 1, 64], strides = [1, 1, 1]} : vector<3x3x64xbf16> to vector<1x1x64xbf16>
    %445 = vector.shape_cast %444 : vector<1x1x64xbf16> to vector<1x64xbf16>
    %446 = vector.extract_strided_slice %439 {offsets = [1, 0, 0], sizes = [1, 1, 64], strides = [1, 1, 1]} : vector<3x3x64xbf16> to vector<1x1x64xbf16>
    %447 = vector.shape_cast %446 : vector<1x1x64xbf16> to vector<1x64xbf16>
    %448 = vector.extract_strided_slice %439 {offsets = [1, 1, 0], sizes = [1, 1, 64], strides = [1, 1, 1]} : vector<3x3x64xbf16> to vector<1x1x64xbf16>
    %449 = vector.shape_cast %448 : vector<1x1x64xbf16> to vector<1x64xbf16>
    %450 = vector.extract_strided_slice %439 {offsets = [1, 2, 0], sizes = [1, 1, 64], strides = [1, 1, 1]} : vector<3x3x64xbf16> to vector<1x1x64xbf16>
    %451 = vector.shape_cast %450 : vector<1x1x64xbf16> to vector<1x64xbf16>
    %452 = vector.extract_strided_slice %439 {offsets = [2, 0, 0], sizes = [1, 1, 64], strides = [1, 1, 1]} : vector<3x3x64xbf16> to vector<1x1x64xbf16>
    %453 = vector.shape_cast %452 : vector<1x1x64xbf16> to vector<1x64xbf16>
    %454 = vector.extract_strided_slice %439 {offsets = [2, 1, 0], sizes = [1, 1, 64], strides = [1, 1, 1]} : vector<3x3x64xbf16> to vector<1x1x64xbf16>
    %455 = vector.shape_cast %454 : vector<1x1x64xbf16> to vector<1x64xbf16>
    %456 = vector.extract_strided_slice %439 {offsets = [2, 2, 0], sizes = [1, 1, 64], strides = [1, 1, 1]} : vector<3x3x64xbf16> to vector<1x1x64xbf16>
    %457 = vector.shape_cast %456 : vector<1x1x64xbf16> to vector<1x64xbf16>
    %458 = tpu.concatenate %441, %443, %445, %447, %449, %451, %453, %455, %457 in 1 : vector<1x64xbf16>, vector<1x64xbf16>, vector<1x64xbf16>, vector<1x64xbf16>, vector<1x64xbf16>, vector<1x64xbf16>, vector<1x64xbf16>, vector<1x64xbf16>, vector<1x64xbf16> -> vector<1x576xbf16>
    %cst_120 = arith.constant dense<0.000000e+00> : vector<1x64xf32>
    %459 = tpu.matmul %458, %433, %cst_120 {dimension_numbers = #tpu.dot_dimension_numbers<[1], [0], [0], [1], [0, 0, 1, 1], [], []>} : vector<1x576xbf16>, vector<576x64xbf16>, vector<1x64xf32> -> vector<1x64xf32>
    %460 = arith.addf %459, %434 : vector<1x64xf32>
    %cst_121 = arith.constant 0.000000e+00 : f32
    %461 = vector.broadcast %cst_121 : f32 to vector<1x64xf32>
    %462 = arith.maximumf %460, %461 : vector<1x64xf32>
    %463 = vector.shape_cast %462 : vector<1x64xf32> to vector<1x1x64xf32>
    %c0_122 = arith.constant 0 : index
    %c0_123 = arith.constant 0 : index
    %464 = vector.load %arg30[%c0_122, %c0_123] : memref<576x64xbf16, #tpu.memory_space<vmem>>, vector<576x64xbf16>
    %c0_124 = arith.constant 0 : index
    %c0_125 = arith.constant 0 : index
    %465 = vector.load %arg31[%c0_124, %c0_125] : memref<1x64xf32, #tpu.memory_space<vmem>>, vector<1x64xf32>
    %466 = arith.truncf %463 : vector<1x1x64xf32> to vector<1x1x64xbf16>
    %cst_126 = arith.constant 0.000000e+00 : bf16
    %467 = vector.broadcast %cst_126 : bf16 to vector<1x1x64xbf16>
    %468 = tpu.concatenate %467, %466, %467 in 0 : vector<1x1x64xbf16>, vector<1x1x64xbf16>, vector<1x1x64xbf16> -> vector<3x1x64xbf16>
    %cst_127 = arith.constant 0.000000e+00 : bf16
    %469 = vector.broadcast %cst_127 : bf16 to vector<3x1x64xbf16>
    %470 = tpu.concatenate %469, %468, %469 in 1 : vector<3x1x64xbf16>, vector<3x1x64xbf16>, vector<3x1x64xbf16> -> vector<3x3x64xbf16>
    %471 = vector.extract_strided_slice %470 {offsets = [0, 0, 0], sizes = [1, 1, 64], strides = [1, 1, 1]} : vector<3x3x64xbf16> to vector<1x1x64xbf16>
    %472 = vector.shape_cast %471 : vector<1x1x64xbf16> to vector<1x64xbf16>
    %473 = vector.extract_strided_slice %470 {offsets = [0, 1, 0], sizes = [1, 1, 64], strides = [1, 1, 1]} : vector<3x3x64xbf16> to vector<1x1x64xbf16>
    %474 = vector.shape_cast %473 : vector<1x1x64xbf16> to vector<1x64xbf16>
    %475 = vector.extract_strided_slice %470 {offsets = [0, 2, 0], sizes = [1, 1, 64], strides = [1, 1, 1]} : vector<3x3x64xbf16> to vector<1x1x64xbf16>
    %476 = vector.shape_cast %475 : vector<1x1x64xbf16> to vector<1x64xbf16>
    %477 = vector.extract_strided_slice %470 {offsets = [1, 0, 0], sizes = [1, 1, 64], strides = [1, 1, 1]} : vector<3x3x64xbf16> to vector<1x1x64xbf16>
    %478 = vector.shape_cast %477 : vector<1x1x64xbf16> to vector<1x64xbf16>
    %479 = vector.extract_strided_slice %470 {offsets = [1, 1, 0], sizes = [1, 1, 64], strides = [1, 1, 1]} : vector<3x3x64xbf16> to vector<1x1x64xbf16>
    %480 = vector.shape_cast %479 : vector<1x1x64xbf16> to vector<1x64xbf16>
    %481 = vector.extract_strided_slice %470 {offsets = [1, 2, 0], sizes = [1, 1, 64], strides = [1, 1, 1]} : vector<3x3x64xbf16> to vector<1x1x64xbf16>
    %482 = vector.shape_cast %481 : vector<1x1x64xbf16> to vector<1x64xbf16>
    %483 = vector.extract_strided_slice %470 {offsets = [2, 0, 0], sizes = [1, 1, 64], strides = [1, 1, 1]} : vector<3x3x64xbf16> to vector<1x1x64xbf16>
    %484 = vector.shape_cast %483 : vector<1x1x64xbf16> to vector<1x64xbf16>
    %485 = vector.extract_strided_slice %470 {offsets = [2, 1, 0], sizes = [1, 1, 64], strides = [1, 1, 1]} : vector<3x3x64xbf16> to vector<1x1x64xbf16>
    %486 = vector.shape_cast %485 : vector<1x1x64xbf16> to vector<1x64xbf16>
    %487 = vector.extract_strided_slice %470 {offsets = [2, 2, 0], sizes = [1, 1, 64], strides = [1, 1, 1]} : vector<3x3x64xbf16> to vector<1x1x64xbf16>
    %488 = vector.shape_cast %487 : vector<1x1x64xbf16> to vector<1x64xbf16>
    %489 = tpu.concatenate %472, %474, %476, %478, %480, %482, %484, %486, %488 in 1 : vector<1x64xbf16>, vector<1x64xbf16>, vector<1x64xbf16>, vector<1x64xbf16>, vector<1x64xbf16>, vector<1x64xbf16>, vector<1x64xbf16>, vector<1x64xbf16>, vector<1x64xbf16> -> vector<1x576xbf16>
    %cst_128 = arith.constant dense<0.000000e+00> : vector<1x64xf32>
    %490 = tpu.matmul %489, %464, %cst_128 {dimension_numbers = #tpu.dot_dimension_numbers<[1], [0], [0], [1], [0, 0, 1, 1], [], []>} : vector<1x576xbf16>, vector<576x64xbf16>, vector<1x64xf32> -> vector<1x64xf32>
    %491 = arith.addf %490, %465 : vector<1x64xf32>
    %cst_129 = arith.constant 0.000000e+00 : f32
    %492 = vector.broadcast %cst_129 : f32 to vector<1x64xf32>
    %493 = arith.maximumf %491, %492 : vector<1x64xf32>
    %494 = vector.shape_cast %493 : vector<1x64xf32> to vector<1x1x64xf32>
    %c0_130 = arith.constant 0 : index
    %c0_131 = arith.constant 0 : index
    %495 = vector.load %arg32[%c0_130, %c0_131] : memref<576x64xbf16, #tpu.memory_space<vmem>>, vector<576x64xbf16>
    %c0_132 = arith.constant 0 : index
    %c0_133 = arith.constant 0 : index
    %496 = vector.load %arg33[%c0_132, %c0_133] : memref<1x64xf32, #tpu.memory_space<vmem>>, vector<1x64xf32>
    %497 = arith.truncf %494 : vector<1x1x64xf32> to vector<1x1x64xbf16>
    %cst_134 = arith.constant 0.000000e+00 : bf16
    %498 = vector.broadcast %cst_134 : bf16 to vector<1x1x64xbf16>
    %499 = tpu.concatenate %498, %497, %498 in 0 : vector<1x1x64xbf16>, vector<1x1x64xbf16>, vector<1x1x64xbf16> -> vector<3x1x64xbf16>
    %cst_135 = arith.constant 0.000000e+00 : bf16
    %500 = vector.broadcast %cst_135 : bf16 to vector<3x1x64xbf16>
    %501 = tpu.concatenate %500, %499, %500 in 1 : vector<3x1x64xbf16>, vector<3x1x64xbf16>, vector<3x1x64xbf16> -> vector<3x3x64xbf16>
    %502 = vector.extract_strided_slice %501 {offsets = [0, 0, 0], sizes = [1, 1, 64], strides = [1, 1, 1]} : vector<3x3x64xbf16> to vector<1x1x64xbf16>
    %503 = vector.shape_cast %502 : vector<1x1x64xbf16> to vector<1x64xbf16>
    %504 = vector.extract_strided_slice %501 {offsets = [0, 1, 0], sizes = [1, 1, 64], strides = [1, 1, 1]} : vector<3x3x64xbf16> to vector<1x1x64xbf16>
    %505 = vector.shape_cast %504 : vector<1x1x64xbf16> to vector<1x64xbf16>
    %506 = vector.extract_strided_slice %501 {offsets = [0, 2, 0], sizes = [1, 1, 64], strides = [1, 1, 1]} : vector<3x3x64xbf16> to vector<1x1x64xbf16>
    %507 = vector.shape_cast %506 : vector<1x1x64xbf16> to vector<1x64xbf16>
    %508 = vector.extract_strided_slice %501 {offsets = [1, 0, 0], sizes = [1, 1, 64], strides = [1, 1, 1]} : vector<3x3x64xbf16> to vector<1x1x64xbf16>
    %509 = vector.shape_cast %508 : vector<1x1x64xbf16> to vector<1x64xbf16>
    %510 = vector.extract_strided_slice %501 {offsets = [1, 1, 0], sizes = [1, 1, 64], strides = [1, 1, 1]} : vector<3x3x64xbf16> to vector<1x1x64xbf16>
    %511 = vector.shape_cast %510 : vector<1x1x64xbf16> to vector<1x64xbf16>
    %512 = vector.extract_strided_slice %501 {offsets = [1, 2, 0], sizes = [1, 1, 64], strides = [1, 1, 1]} : vector<3x3x64xbf16> to vector<1x1x64xbf16>
    %513 = vector.shape_cast %512 : vector<1x1x64xbf16> to vector<1x64xbf16>
    %514 = vector.extract_strided_slice %501 {offsets = [2, 0, 0], sizes = [1, 1, 64], strides = [1, 1, 1]} : vector<3x3x64xbf16> to vector<1x1x64xbf16>
    %515 = vector.shape_cast %514 : vector<1x1x64xbf16> to vector<1x64xbf16>
    %516 = vector.extract_strided_slice %501 {offsets = [2, 1, 0], sizes = [1, 1, 64], strides = [1, 1, 1]} : vector<3x3x64xbf16> to vector<1x1x64xbf16>
    %517 = vector.shape_cast %516 : vector<1x1x64xbf16> to vector<1x64xbf16>
    %518 = vector.extract_strided_slice %501 {offsets = [2, 2, 0], sizes = [1, 1, 64], strides = [1, 1, 1]} : vector<3x3x64xbf16> to vector<1x1x64xbf16>
    %519 = vector.shape_cast %518 : vector<1x1x64xbf16> to vector<1x64xbf16>
    %520 = tpu.concatenate %503, %505, %507, %509, %511, %513, %515, %517, %519 in 1 : vector<1x64xbf16>, vector<1x64xbf16>, vector<1x64xbf16>, vector<1x64xbf16>, vector<1x64xbf16>, vector<1x64xbf16>, vector<1x64xbf16>, vector<1x64xbf16>, vector<1x64xbf16> -> vector<1x576xbf16>
    %cst_136 = arith.constant dense<0.000000e+00> : vector<1x64xf32>
    %521 = tpu.matmul %520, %495, %cst_136 {dimension_numbers = #tpu.dot_dimension_numbers<[1], [0], [0], [1], [0, 0, 1, 1], [], []>} : vector<1x576xbf16>, vector<576x64xbf16>, vector<1x64xf32> -> vector<1x64xf32>
    %522 = arith.addf %521, %496 : vector<1x64xf32>
    %cst_137 = arith.constant 0.000000e+00 : f32
    %523 = vector.broadcast %cst_137 : f32 to vector<1x64xf32>
    %524 = arith.maximumf %522, %523 : vector<1x64xf32>
    %525 = vector.shape_cast %524 : vector<1x64xf32> to vector<1x1x64xf32>
    %c0_138 = arith.constant 0 : index
    %c0_139 = arith.constant 0 : index
    %c0_140 = arith.constant 0 : index
    %c0_141 = arith.constant 0 : index
    %526 = vector.load %arg34[%c0_138, %c0_139, %c0_140, %c0_141] : memref<1x1x1x64xf32, #tpu.memory_space<vmem>>, vector<1x1x1x64xf32>
    %527 = vector.shape_cast %526 : vector<1x1x1x64xf32> to vector<1x1x64xf32>
    %528 = vector.shape_cast %525 : vector<1x1x64xf32> to vector<1x1x1x64xf32>
    tpu.vector_store %arg34[%c0_138, %c0_139, %c0_140, %c0_141], %528 {strides = array<i32>} : memref<1x1x1x64xf32, #tpu.memory_space<vmem>>, vector<1x1x1x64xf32>,
    return
  }
  func.func @transform_0(%arg0: i32) -> (i32, i32, i32, i32) {
    %c0_i32 = arith.constant 0 : i32
    %c0_i32_0 = arith.constant 0 : i32
    %c0_i32_1 = arith.constant 0 : i32
    %c0_i32_2 = arith.constant 0 : i32
    return %arg0, %c0_i32, %c0_i32_0, %c0_i32_1 : i32, i32, i32, i32
  }
  func.func @transform_1(%arg0: i32) -> (i32, i32) {
    %c0_i32 = arith.constant 0 : i32
    %c0_i32_0 = arith.constant 0 : i32
    %c0_i32_1 = arith.constant 0 : i32
    return %c0_i32, %c0_i32_0 : i32, i32
  }
  func.func @transform_2(%arg0: i32) -> (i32, i32) {
    %c0_i32 = arith.constant 0 : i32
    %c0_i32_0 = arith.constant 0 : i32
    %c0_i32_1 = arith.constant 0 : i32
    return %c0_i32, %c0_i32_0 : i32, i32
  }
  func.func @transform_3(%arg0: i32) -> (i32, i32) {
    %c0_i32 = arith.constant 0 : i32
    %c0_i32_0 = arith.constant 0 : i32
    %c0_i32_1 = arith.constant 0 : i32
    return %c0_i32, %c0_i32_0 : i32, i32
  }
  func.func @transform_4(%arg0: i32) -> (i32, i32) {
    %c0_i32 = arith.constant 0 : i32
    %c0_i32_0 = arith.constant 0 : i32
    %c0_i32_1 = arith.constant 0 : i32
    return %c0_i32, %c0_i32_0 : i32, i32
  }
  func.func @transform_5(%arg0: i32) -> (i32, i32) {
    %c0_i32 = arith.constant 0 : i32
    %c0_i32_0 = arith.constant 0 : i32
    %c0_i32_1 = arith.constant 0 : i32
    return %c0_i32, %c0_i32_0 : i32, i32
  }
  func.func @transform_6(%arg0: i32) -> (i32, i32) {
    %c0_i32 = arith.constant 0 : i32
    %c0_i32_0 = arith.constant 0 : i32
    %c0_i32_1 = arith.constant 0 : i32
    return %c0_i32, %c0_i32_0 : i32, i32
  }
  func.func @transform_7(%arg0: i32) -> (i32, i32) {
    %c0_i32 = arith.constant 0 : i32
    %c0_i32_0 = arith.constant 0 : i32
    %c0_i32_1 = arith.constant 0 : i32
    return %c0_i32, %c0_i32_0 : i32, i32
  }
  func.func @transform_8(%arg0: i32) -> (i32, i32) {
    %c0_i32 = arith.constant 0 : i32
    %c0_i32_0 = arith.constant 0 : i32
    %c0_i32_1 = arith.constant 0 : i32
    return %c0_i32, %c0_i32_0 : i32, i32
  }
  func.func @transform_9(%arg0: i32) -> (i32, i32) {
    %c0_i32 = arith.constant 0 : i32
    %c0_i32_0 = arith.constant 0 : i32
    %c0_i32_1 = arith.constant 0 : i32
    return %c0_i32, %c0_i32_0 : i32, i32
  }
  func.func @transform_10(%arg0: i32) -> (i32, i32) {
    %c0_i32 = arith.constant 0 : i32
    %c0_i32_0 = arith.constant 0 : i32
    %c0_i32_1 = arith.constant 0 : i32
    return %c0_i32, %c0_i32_0 : i32, i32
  }
  func.func @transform_11(%arg0: i32) -> (i32, i32) {
    %c0_i32 = arith.constant 0 : i32
    %c0_i32_0 = arith.constant 0 : i32
    %c0_i32_1 = arith.constant 0 : i32
    return %c0_i32, %c0_i32_0 : i32, i32
  }
  func.func @transform_12(%arg0: i32) -> (i32, i32) {
    %c0_i32 = arith.constant 0 : i32
    %c0_i32_0 = arith.constant 0 : i32
    %c0_i32_1 = arith.constant 0 : i32
    return %c0_i32, %c0_i32_0 : i32, i32
  }
  func.func @transform_13(%arg0: i32) -> (i32, i32) {
    %c0_i32 = arith.constant 0 : i32
    %c0_i32_0 = arith.constant 0 : i32
    %c0_i32_1 = arith.constant 0 : i32
    return %c0_i32, %c0_i32_0 : i32, i32
  }
  func.func @transform_14(%arg0: i32) -> (i32, i32) {
    %c0_i32 = arith.constant 0 : i32
    %c0_i32_0 = arith.constant 0 : i32
    %c0_i32_1 = arith.constant 0 : i32
    return %c0_i32, %c0_i32_0 : i32, i32
  }
  func.func @transform_15(%arg0: i32) -> (i32, i32) {
    %c0_i32 = arith.constant 0 : i32
    %c0_i32_0 = arith.constant 0 : i32
    %c0_i32_1 = arith.constant 0 : i32
    return %c0_i32, %c0_i32_0 : i32, i32
  }
  func.func @transform_16(%arg0: i32) -> (i32, i32) {
    %c0_i32 = arith.constant 0 : i32
    %c0_i32_0 = arith.constant 0 : i32
    %c0_i32_1 = arith.constant 0 : i32
    return %c0_i32, %c0_i32_0 : i32, i32
  }
  func.func @transform_17(%arg0: i32) -> (i32, i32) {
    %c0_i32 = arith.constant 0 : i32
    %c0_i32_0 = arith.constant 0 : i32
    %c0_i32_1 = arith.constant 0 : i32
    return %c0_i32, %c0_i32_0 : i32, i32
  }
  func.func @transform_18(%arg0: i32) -> (i32, i32) {
    %c0_i32 = arith.constant 0 : i32
    %c0_i32_0 = arith.constant 0 : i32
    %c0_i32_1 = arith.constant 0 : i32
    return %c0_i32, %c0_i32_0 : i32, i32
  }
  func.func @transform_19(%arg0: i32) -> (i32, i32) {
    %c0_i32 = arith.constant 0 : i32
    %c0_i32_0 = arith.constant 0 : i32
    %c0_i32_1 = arith.constant 0 : i32
    return %c0_i32, %c0_i32_0 : i32, i32
  }
  func.func @transform_20(%arg0: i32) -> (i32, i32) {
    %c0_i32 = arith.constant 0 : i32
    %c0_i32_0 = arith.constant 0 : i32
    %c0_i32_1 = arith.constant 0 : i32
    return %c0_i32, %c0_i32_0 : i32, i32
  }
  func.func @transform_21(%arg0: i32) -> (i32, i32) {
    %c0_i32 = arith.constant 0 : i32
    %c0_i32_0 = arith.constant 0 : i32
    %c0_i32_1 = arith.constant 0 : i32
    return %c0_i32, %c0_i32_0 : i32, i32
  }
  func.func @transform_22(%arg0: i32) -> (i32, i32) {
    %c0_i32 = arith.constant 0 : i32
    %c0_i32_0 = arith.constant 0 : i32
    %c0_i32_1 = arith.constant 0 : i32
    return %c0_i32, %c0_i32_0 : i32, i32
  }
  func.func @transform_23(%arg0: i32) -> (i32, i32) {
    %c0_i32 = arith.constant 0 : i32
    %c0_i32_0 = arith.constant 0 : i32
    %c0_i32_1 = arith.constant 0 : i32
    return %c0_i32, %c0_i32_0 : i32, i32
  }
  func.func @transform_24(%arg0: i32) -> (i32, i32) {
    %c0_i32 = arith.constant 0 : i32
    %c0_i32_0 = arith.constant 0 : i32
    %c0_i32_1 = arith.constant 0 : i32
    return %c0_i32, %c0_i32_0 : i32, i32
  }
  func.func @transform_25(%arg0: i32) -> (i32, i32) {
    %c0_i32 = arith.constant 0 : i32
    %c0_i32_0 = arith.constant 0 : i32
    %c0_i32_1 = arith.constant 0 : i32
    return %c0_i32, %c0_i32_0 : i32, i32
  }
  func.func @transform_26(%arg0: i32) -> (i32, i32) {
    %c0_i32 = arith.constant 0 : i32
    %c0_i32_0 = arith.constant 0 : i32
    %c0_i32_1 = arith.constant 0 : i32
    return %c0_i32, %c0_i32_0 : i32, i32
  }
  func.func @transform_27(%arg0: i32) -> (i32, i32) {
    %c0_i32 = arith.constant 0 : i32
    %c0_i32_0 = arith.constant 0 : i32
    %c0_i32_1 = arith.constant 0 : i32
    return %c0_i32, %c0_i32_0 : i32, i32
  }
  func.func @transform_28(%arg0: i32) -> (i32, i32) {
    %c0_i32 = arith.constant 0 : i32
    %c0_i32_0 = arith.constant 0 : i32
    %c0_i32_1 = arith.constant 0 : i32
    return %c0_i32, %c0_i32_0 : i32, i32
  }
  func.func @transform_29(%arg0: i32) -> (i32, i32) {
    %c0_i32 = arith.constant 0 : i32
    %c0_i32_0 = arith.constant 0 : i32
    %c0_i32_1 = arith.constant 0 : i32
    return %c0_i32, %c0_i32_0 : i32, i32
  }
  func.func @transform_30(%arg0: i32) -> (i32, i32) {
    %c0_i32 = arith.constant 0 : i32
    %c0_i32_0 = arith.constant 0 : i32
    %c0_i32_1 = arith.constant 0 : i32
    return %c0_i32, %c0_i32_0 : i32, i32
  }
  func.func @transform_31(%arg0: i32) -> (i32, i32) {
    %c0_i32 = arith.constant 0 : i32
    %c0_i32_0 = arith.constant 0 : i32
    %c0_i32_1 = arith.constant 0 : i32
    return %c0_i32, %c0_i32_0 : i32, i32
  }
  func.func @transform_32(%arg0: i32) -> (i32, i32) {
    %c0_i32 = arith.constant 0 : i32
    %c0_i32_0 = arith.constant 0 : i32
    %c0_i32_1 = arith.constant 0 : i32
    return %c0_i32, %c0_i32_0 : i32, i32
  }
  func.func @transform_33(%arg0: i32) -> (i32, i32, i32, i32) {
    %c0_i32 = arith.constant 0 : i32
    %c0_i32_0 = arith.constant 0 : i32
    %c0_i32_1 = arith.constant 0 : i32
    %c0_i32_2 = arith.constant 0 : i32
    return %arg0, %c0_i32, %c0_i32_0, %c0_i32_1 : i32, i32, i32, i32
  }
}

</mosaic_0001>

<bundles_post_ra>
// kernel: feature_extractor_pallas.1
= control target key start
LH: loop header
LB: loop body
LE: loop exit
PB: predicated region body
PF: predicated region fallthrough
CT: control target
= control target key end

     0   :  { %s14605_s6 = smov 1   ;;  %s14606_s10 = smov 2   ;;  %s18547_s0 = inlined_call_operand.smem [shape: u32[34], index: -1, kind: input, shape index: {}] }
   0x1   :  { %s14663_s5 = sld [smem:[%s18547_s0]]   ;;  %s14607_s14 = smov 3  }
   0x2   :  { %s14668_s9 = sld [smem:[%s18547_s0 + %s14605_s6]]   ;;  %s14608_s18 = smov 4  }
   0x3   :  { %s14673_s13 = sld [smem:[%s18547_s0 + %s14606_s10]]   ;;  %s14609_s22 = smov 5  }
   0x4   :  { %s14678_s17 = sld [smem:[%s18547_s0 + %s14607_s14]]   ;;  %s14610_s26 = smov 6  }
   0x5   :  { %s14683_s21 = sld [smem:[%s18547_s0 + %s14608_s18]]   ;;  %s14611_s30 = smov 7  }
   0x6   :  { %s14688_s25 = sld [smem:[%s18547_s0 + %s14609_s22]]   ;;  %s14612_s4 = smov 8  }
   0x7   :  { %18597 = sst [smem:[#allocation5_spill]] %s14663_s5  ;;  %s14613_s10 = smov 9  }
   0x8   :  { %18598 = sst [smem:[#allocation6_spill]] %s14668_s9  ;;  %s14614_s15 = smov 10  }
   0x9   :  { %18599 = sst [smem:[#allocation7_spill]] %s14673_s13  ;;  %s14615_s20 = smov 11  }
   0xa   :  { %s14693_s29 = sld [smem:[%s18547_s0 + %s14610_s26]]   ;;  %s14616_s26 = smov 12  }
   0xb   :  { %s14698_s3 = sld [smem:[%s18547_s0 + %s14611_s30]]   ;;  %s14617_s1 = smov 13  }
   0xc   :  { %s14703_s8 = sld [smem:[%s18547_s0 + %s14612_s4]]   ;;  %s14618_s7 = smov 14  }
   0xd   :  { %s14708_s14 = sld [smem:[%s18547_s0 + %s14613_s10]]   ;;  %s14620_s22 = smov 16  }
   0xe   :  { %s14713_s19 = sld [smem:[%s18547_s0 + %s14614_s15]]   ;;  %s14619_s15 = smov 15  }
   0xf   :  { %s14718_s24 = sld [smem:[%s18547_s0 + %s14615_s20]]   ;;  %s14621_s28 = smov 17  }
  0x10   :  { %s14723_s30 = sld [smem:[%s18547_s0 + %s14616_s26]]  }
  0x11   :  { %18600 = sst [smem:[#allocation8_spill]] %s14698_s3 }
  0x12   :  { %18601 = sst [smem:[#allocation9_spill]] %s14703_s8 }
  0x13   :  { %s14728_s6 = sld [smem:[%s18547_s0 + %s14617_s1]]  }
  0x14   :  { %s14733_s12 = sld [smem:[%s18547_s0 + %s14618_s7]]   ;;  %s14622_s7 = smov 18  }
  0x15   :  { %s14738_s20 = sld [smem:[%s18547_s0 + %s14619_s15]]   ;;  %s14623_s15 = smov 19  }
  0x16   :  { %s14743_s27 = sld [smem:[%s18547_s0 + %s14620_s22]]   ;;  %s14624_s22 = smov 20  }
  0x17   :  { %s14748_s4 = sld [smem:[%s18547_s0 + %s14621_s28]]   ;;  %s14625_s28 = smov 21  }
  0x19   :  { %18602 = sst [smem:[#allocation10_spill]] %s14728_s6 }
  0x1a   :  { %18603 = sst [smem:[#allocation11_spill]] %s14733_s12 }
  0x1b   :  { %18604 = sst [smem:[#allocation12_spill]] %s14738_s20 }
  0x1c   :  { %18605 = sst [smem:[#allocation13_spill]] %s14743_s27 }
  0x1d   :  { %18606 = sst [smem:[#allocation14_spill]] %s14748_s4 }
  0x1e   :  { %s14753_s12 = sld [smem:[%s18547_s0 + %s14622_s7]]   ;;  %s14626_s7 = smov 22  }
  0x1f   :  { %s14758_s20 = sld [smem:[%s18547_s0 + %s14623_s15]]   ;;  %s14627_s15 = smov 23  }
  0x20   :  { %s14763_s27 = sld [smem:[%s18547_s0 + %s14624_s22]]   ;;  %s14628_s22 = smov 24  }
  0x21   :  { %s14768_s4 = sld [smem:[%s18547_s0 + %s14625_s28]]   ;;  %s14629_s28 = smov 25  }
  0x24   :  { %18607 = sst [smem:[#allocation15_spill]] %s14753_s12 }
  0x25   :  { %18608 = sst [smem:[#allocation16_spill]] %s14758_s20 }
  0x26   :  { %18609 = sst [smem:[#allocation17_spill]] %s14763_s27 }
  0x27   :  { %18610 = sst [smem:[#allocation18_spill]] %s14768_s4 }
  0x28   :  { %s14773_s12 = sld [smem:[%s18547_s0 + %s14626_s7]]   ;;  %s14630_s7 = smov 26  }
  0x29   :  { %s14778_s20 = sld [smem:[%s18547_s0 + %s14627_s15]]   ;;  %s14631_s15 = smov 27  }
  0x2a   :  { %s14783_s27 = sld [smem:[%s18547_s0 + %s14628_s22]]   ;;  %s14632_s22 = smov 28  }
  0x2b   :  { %s14788_s4 = sld [smem:[%s18547_s0 + %s14629_s28]]   ;;  %s14633_s28 = smov 29  }
  0x2e   :  { %18611 = sst [smem:[#allocation19_spill]] %s14773_s12 }
  0x2f   :  { %18612 = sst [smem:[#allocation20_spill]] %s14778_s20 }
  0x30   :  { %18613 = sst [smem:[#allocation21_spill]] %s14783_s27 }
  0x31   :  { %18614 = sst [smem:[#allocation22_spill]] %s14788_s4 }
  0x32   :  { %s14793_s12 = sld [smem:[%s18547_s0 + %s14630_s7]]   ;;  %s14634_s7 = smov 30  }
  0x33   :  { %s14798_s20 = sld [smem:[%s18547_s0 + %s14631_s15]]   ;;  %s14635_s15 = smov 31  }
  0x34   :  { %s14803_s27 = sld [smem:[%s18547_s0 + %s14632_s22]]   ;;  %s14636_s22 = smov 32  }
  0x35   :  { %s14808_s4 = sld [smem:[%s18547_s0 + %s14633_s28]]   ;;  %s14637_s28 = smov 33  }
  0x38   :  { %18615 = sst [smem:[#allocation23_spill]] %s14793_s12 }
  0x39   :  { %18616 = sst [smem:[#allocation24_spill]] %s14798_s20 }
  0x3a   :  { %18617 = sst [smem:[#allocation25_spill]] %s14803_s27 }
  0x3b   :  { %18618 = sst [smem:[#allocation26_spill]] %s14808_s4 }
  0x3c   :  { %s14813_s12 = sld [smem:[%s18547_s0 + %s14634_s7]]  }
  0x3d   :  { %s14818_s20 = sld [smem:[%s18547_s0 + %s14635_s15]]  }
  0x3e   :  { %s14823_s27 = sld [smem:[%s18547_s0 + %s14636_s22]]  }
  0x3f   :  { %s14828_s4 = sld [smem:[%s18547_s0 + %s14637_s28]]  }
  0x42   :  { %18619 = sst [smem:[#allocation27_spill]] %s14813_s12 }
  0x43   :  { %72 = vsyncpa [#allocation3], 0 }
  0x44   :  { %74 = vsyncpa [#allocation3 + $0x1], 0  ;;  %s14830_s7 = smov 0   ;;  %s14832_s10 = smov 0  }
  0x45   :  { %s14834_s11 = smov 0   ;;  %s14836_s15 = smov 0  }
  0x46 LB: > { %s18620_s13 = sld [smem:[#allocation7_spill]]  ;;  %s18621_s6 = sld [smem:[#allocation10_spill]]  ;;  %s14603_s15 = sphi %s14836_s15, %s18800_s15   ;;  %s14599_s11 = sphi %s14834_s11, %s18802_s11   ;;  %s14595_s10 = sphi %s14832_s10, %s18804_s10   ;;  %s14591_s7 = sphi %s14830_s7, %s18803_s7  }
  0x47   : > { %s18622_s3 = sld [smem:[#allocation8_spill]]  ;;  %s18623_s9 = sld [smem:[#allocation6_spill]] }
  0x48   : > { %18624 = sst [smem:[#allocation28_spill]] %s14599_s11  ;;  %s14851_s0 = sadd.s32 4294967295, %s14603_s15  }
  0x49   : > { %s12801_s16 = sadd.s32 4294967294, %s14603_s15   ;;  %s14855_s18 = sadd.s32 1, %s14603_s15  }
  0x4a   : > { %18625 = sst [smem:[#allocation29_spill]] %s14855_s18  ;;  %s785_s22 = sadd.s32 1, %s14599_s11 }
  0x4b   : > { %s782_s23 = ssub.s32 %s14603_s15, %s14855_s18  ;;  %p795_p0 = scmp.ne.s32.totalorder %s14599_s11, %s14595_s10 }
  0x4c   : > { %p783_p1 = scmp.eq.s32.totalorder %s782_s23, 0  ;;  %p796_p2 = scmp.eq.s32.totalorder %s14851_s0, 1 }
  0x4d   : > { %p801_p3 = scmp.ne.s32.totalorder %s14595_s10, %s14591_s7  ;;  %p802_p4 = scmp.eq.s32.totalorder %s12801_s16, 1 }
  0x4e   : > { %s14866_s26 = scalar_select %p783_p1, %s14599_s11, %s785_s22  }
  0x4f   : > { %p14868_p5 = por %p796_p2, %p795_p0  ;;  %p14872_p6 = por %p802_p4, %p801_p3 }
  0x50   : > { %18626 = sst [smem:[#allocation30_spill]] %s14866_s26  ;;  %p12804_p7 = scmp.ge.s32.totalorder %s14603_s15, 1 }
  0x51   : > { %p924_p8 = scmp.lt.s32.totalorder %s14603_s15, 3 }
  0x53   : > { %p925_p9 = pnand %p12804_p7, %p924_p8 }
  0x54   : > { %vm18579_vm0 = vcmask (!%p925_p9), 1040384   ;;  %vm18578_vm1 = vsmask.f32 (!%p925_p9), 256  ;;  %v18572_v0 = vmov (!%p925_p9), 0   ;;  %s18629_s5 = sld [smem:[#allocation5_spill]] (!%p925_p9)  ;;  %p1007_p10 = scmp.lt.s32.totalorder (!%p925_p9), %s14851_s0, 1 }
  0x55   : > { %928 = sbr.rel (%p925_p9) target bundleno = 6386 (0x18f2), region = 152  ;;  %v1074_v1 = vrot.slane (!%p925_p9), %v18572_v0, 7  ;;  %vm14881_vm2 = vmand (!%p925_p9), %vm18579_vm0, %vm18578_vm1  ;;  %vm1486_vm3 = vcmask (!%p925_p9), 1046528   ;;  %s18560_s22 = smov (!%p925_p9), 16   ;;  %vm1261_vm4 = vsmask.f32 (!%p925_p9), 7424 }
  0x56   : > { %v14182_v35 = vld [vmem:[%s18623_s9] sm:$0xff] (!%p925_p9)   ;;  %v14183_v42 = vld [vmem:[%s18623_s9 + $0x8] sm:$0xff] (!%p925_p9)   ;;  %v14184_v54 = vld [vmem:[%s18623_s9 + $0x10] sm:$0xff] (!%p925_p9)   ;;  %vm2138_vm5 = vcmask (!%p925_p9), 1043456   ;;  %s18637_s26 = smov (!%p925_p9), 8   ;;  %s18638_s11 = smov (!%p925_p9), 64  }
  0x57   : > { %v14888_v3 = vsel (!%p925_p9), %vm14881_vm2, 0, %v1074_v1  ;;  %v1244_v4 = vsel (!%p925_p9), %vm14881_vm2, %v1074_v1, 0  ;;  %13873 = vmatprep.subr.bf16.mxu0 (!%p925_p9), %v14182_v35  ;;  %s18639_s18 = smov (!%p925_p9), 32   ;;  %vm1808_vm6 = vcmask (!%p925_p9), 64512   ;;  %vm18588_vm7 = vcmask (!%p925_p9), 130048   ;;  %s18699_s8 = sld [smem:[#allocation9_spill]] (!%p925_p9) }
  0x58   : > { %v1487_v5 = vrot.slane (!%p925_p9), %v14888_v3, 1  ;;  %v1488_v6 = vrot.slane (!%p925_p9), %v1244_v4, 1  ;;  %v1263_v8 = vshrl.u32 (!%p925_p9), %v14888_v3, 16  ;;  %v1265_v9 = vshll.u32 (!%p925_p9), %v14888_v3, 16  ;;  %13874 = vmatpush3.bf16.msra.mxu0 (!%p925_p9), %v14182_v35  ;;  %s18795_s12 = sld [smem:[#allocation27_spill]] (!%p925_p9) }
  0x59   : > { %v1270_v10 = vshll.u32 (!%p925_p9), %v1244_v4, 16  ;;  %13875 = vmatprep.subr.bf16.mxu0 (!%p925_p9), %v14183_v42  ;;  %vm18586_vm8 = vcmask (!%p925_p9), 195584   ;;  %vm18585_vm9 = vcmask (!%p925_p9), 261120   ;;  %vm18584_vm10 = vcmask (!%p925_p9), 326656  }
  0x5a   : > { %v14895_v7 = vsel (!%p925_p9), %vm1486_vm3, %v1487_v5, %v1488_v6  ;;  %v1267_v14 = vrot.slane (!%p925_p9), %v1265_v9, 1  ;;  %vm18583_vm11 = vcmask (!%p925_p9), 392192   ;;  %vm18582_vm12 = vcmask (!%p925_p9), 457728  }
  0x5b   : > { %1584 = vrot.lane.b32.xlu1 (!%p925_p9), %v14895_v7, %s18560_s22  ;;  %v1272_v15 = vrot.slane (!%p925_p9), %v1270_v10, 1  ;;  %vm18581_vm13 = vcmask (!%p925_p9), 523264   ;;  %vm18580_vm14 = vcmask (!%p925_p9), 588800   ;;  %vm4759_vm15 = vcmask (!%p925_p9), 1044480  }
  0x5c   : > { %s1008_s2 = scalar_select %p1007_p10, %s14851_s0, 1  ;;  %v1268_v22 = vor.u32 %v1267_v14, %v1263_v8  ;;  %13876 = vmatpush3.bf16.msra.mxu0 %v14183_v42  ;;  %v14185_v8 = vld [vmem:[%s18623_s9 + $0x18] sm:$0xff]   ;;  %vm4620_vm0 = vcmask 1043459  }
  0x5d   : > { %13877 = vmatprep.subr.bf16.mxu0 %v14184_v54 }
  0x5e   : > { %s13378_s16 = sshll.u32 %s1008_s2, 8  ;;  %v14911_v28 = vsel %vm1261_vm4, %v1268_v22, %v1272_v15  ;;  %s18568_s2 = smov 8  }
  0x5f   : > { %s14902_s23 = scalar_lea.vmem %s18629_s5, %s13378_s16  ;;  %1552 = vrot.lane.b32.xlu0 %v14911_v28, %s18568_s2  ;;  %s18556_s16 = smov 24  }
  0x60   : > { %v1015_v11 = vld [vmem:[%s14902_s23 + $0x10] sm:$0xff]  ;;  %v1016_v12 = vld [vmem:[%s14902_s23 + $0x18] sm:$0xff]  ;;  %v1013_v13 = vld [vmem:[%s14902_s23] sm:$0xff]  ;;  %13878 = vmatpush3.bf16.msra.mxu0 %v14184_v54  ;;  %s18635_s5 = smov 48  }
  0x61   : > { %v1056_v16 = vpack.c.bf16 %v1016_v12, %v1015_v11  ;;  %v1014_v17 = vld [vmem:[%s14902_s23 + $0x8] sm:$0xff]  ;;  %v1017_v18 = vld [vmem:[%s14902_s23 + $0x20] sm:$0xff]  ;;  %v1019_v31 = vld [vmem:[%s14902_s23 + $0x30] sm:$0xff]  ;;  %13879 = vmatprep.subr.bf16.mxu0 %v14185_v8 }
  0x62   : > { %v1018_v19 = vld [vmem:[%s14902_s23 + $0x28] sm:$0xff]  ;;  %v1055_v20 = vpack.c.bf16 %v1014_v17, %v1013_v13  ;;  %v1020_v34 = vld [vmem:[%s14902_s23 + $0x38] sm:$0xff]  ;;  %v1021_v59 = vld [vmem:[%s14902_s23 + $0x40] sm:$0xff] }
  0x63   : > { %v1057_v21 = vpack.c.bf16 %v1018_v19, %v1017_v18  ;;  %v1086_v23 = vshrl.u32 %v1056_v16, 16  ;;  %v1089_v24 = vshll.u32 %v1056_v16, 16  ;;  %v1058_v41 = vpack.c.bf16 %v1020_v34, %v1019_v31  ;;  %v1022_v60 = vld [vmem:[%s14902_s23 + $0x48] sm:$0xff]  ;;  %v1028_v31 = vld [vmem:[%s14902_s23 + $0x78] sm:$0xff] }
  0x64   : > { %v1079_v25 = vshrl.u32 %v1055_v20, 16  ;;  %v1082_v26 = vshll.u32 %v1055_v20, 16  ;;  %v1059_v12 = vpack.c.bf16 %v1022_v60, %v1021_v59  ;;  %13880 = vmatpush3.bf16.msra.mxu0 %v14185_v8  ;;  %v1031_v59 = vld [vmem:[%s14902_s23 + $0x90] sm:$0xff]  ;;  %v1032_v60 = vld [vmem:[%s14902_s23 + $0x98] sm:$0xff] }
  0x65   : > { %v1093_v27 = vshrl.u32 %v1057_v21, 16  ;;  %v1088_v29 = vrot.slane %v1086_v23, 7  ;;  %v1096_v30 = vshll.u32 %v1057_v21, 16  ;;  %v1100_v53 = vshrl.u32 %v1058_v41, 16  ;;  %v1023_v23 = vld [vmem:[%s14902_s23 + $0x50] sm:$0xff] }
  0x66   : > { %v1081_v32 = vrot.slane %v1079_v25, 7  ;;  %v1103_v6 = vshll.u32 %v1058_v41, 16  ;;  %v1107_v22 = vshrl.u32 %v1059_v12, 16  ;;  %v1025_v25 = vld [vmem:[%s14902_s23 + $0x60] sm:$0xff]  ;;  %v1110_v34 = vshll.u32 %v1059_v12, 16 }
  0x67   : > { %v1095_v33 = vrot.slane %v1093_v27, 7  ;;  %v1091_v36 = vor.u32 %v1089_v24, %v1088_v29  ;;  %v1246_v44 = vsel %vm14881_vm2, %v1088_v29, 0  ;;  %v1102_v11 = vrot.slane %v1100_v53, 7  ;;  %v1024_v24 = vld [vmem:[%s14902_s23 + $0x58] sm:$0xff] }
  0x68   : > { %v1084_v37 = vor.u32 %v1082_v26, %v1081_v32  ;;  %v1245_v39 = vsel %vm14881_vm2, %v1081_v32, 0  ;;  %v1494_v56 = vrot.slane %v1246_v44, 1  ;;  %v1294_v58 = vshll.u32 %v1246_v44, 16  ;;  %v1026_v26 = vld [vmem:[%s14902_s23 + $0x68] sm:$0xff] }
  0x69   : > { %v1098_v38 = vor.u32 %v1096_v30, %v1095_v33  ;;  %v14922_v40 = vsel %vm14881_vm2, 0, %v1091_v36  ;;  %v1491_v47 = vrot.slane %v1245_v39, 1  ;;  %v1282_v50 = vshll.u32 %v1245_v39, 16  ;;  %v1027_v30 = vld [vmem:[%s14902_s23 + $0x70] sm:$0xff]  ;;  %v1029_v36 = vld [vmem:[%s14902_s23 + $0x80] sm:$0xff] }
  0x6a   : > { %1618 = vrot.lane.b32.xlu1 %v14922_v40, %s18556_s16  ;;  %v14929_v43 = vsel %vm14881_vm2, 0, %v1084_v37  ;;  %v1289_v51 = vshll.u32 %v14922_v40, 16  ;;  %v1493_v55 = vrot.slane %v14922_v40, 1  ;;  %v1287_v57 = vshrl.u32 %v14922_v40, 16  ;;  %v1030_v37 = vld [vmem:[%s14902_s23 + $0x88] sm:$0xff] }
  0x6b   : > { %1616 = vrot.lane.b32.xlu0 %v14929_v43, %s18556_s16  ;;  %v14937_v45 = vsel %vm14881_vm2, 0, %v1098_v38  ;;  %v1490_v46 = vrot.slane %v14929_v43, 1  ;;  %v1277_v48 = vshll.u32 %v14929_v43, 16  ;;  %v1275_v49 = vshrl.u32 %v14929_v43, 16  ;;  %s18558_s16 = smov 48  }
  0x6c   : > { %v1291_v62 = vrot.slane %v1289_v51, 1  ;;  %v1301_v63 = vshll.u32 %v14937_v45, 16  ;;  %v1284_v4 = vrot.slane %v1282_v50, 1  ;;  %v14956_v5 = vsel %vm14881_vm2, %v1095_v33, 0 }
  0x6d   : > { %v1279_v52 = vrot.slane %v1277_v48, 1  ;;  %v1492_v61 = vsel %vm1486_vm3, %v1490_v46, %v1491_v47  ;;  %v14961_v9 = vsel %vm1486_vm3, %v1493_v55, %v1494_v56  ;;  %v1299_v10 = vshrl.u32 %v14937_v45, 16 }
  0x6e   : > { %1714 = vrot.lane.b32.xlu1 %v14937_v45, %s18558_s16  ;;  %v1292_v13 = vor.u32 %v1291_v62, %v1287_v57  ;;  %v1296_v14 = vrot.slane %v1294_v58, 1  ;;  %v1303_v15 = vrot.slane %v1301_v63, 1  ;;  %v1306_v16 = vshll.u32 %v14956_v5, 16 }
  0x6f   : > { %1712 = vrot.lane.b32.xlu0 %v14922_v40, %s18558_s16  ;;  %v1280_v1 = vor.u32 %v1279_v52, %v1275_v49  ;;  %s18562_s16 = smov 40   ;;  %v1105_v18 = vor.u32 %v1103_v6, %v1102_v11  ;;  %v1060_v29 = vpack.c.bf16 %v1024_v24, %v1023_v23  ;;  %v1109_v33 = vrot.slane %v1107_v22, 7 }
  0x70   : > { %v1297_v19 = vsel %vm1261_vm4, %v1292_v13, %v1296_v14  ;;  %v1304_v20 = vor.u32 %v1303_v15, %v1299_v10  ;;  %v1308_v21 = vrot.slane %v1306_v16, 1  ;;  %v1061_v35 = vpack.c.bf16 %v1026_v26, %v1025_v25 }
  0x71   : > { %v1285_v17 = vsel %vm1261_vm4, %v1280_v1, %v1284_v4  ;;  %v14978_v27 = vsel %vm14881_vm2, 0, %v1105_v18  ;;  %v14990_v38 = vsel %vm14881_vm2, %v1102_v11, 0  ;;  %v1062_v39 = vpack.c.bf16 %v1028_v31, %v1027_v30  ;;  %v14186_v11 = vld [vmem:[%s18623_s9 + $0x20] ss:$0 sps:$4 sm:$0xff]   ;;  %s18636_s9 = smov 56  }
  0x72   : > { %1586 = vrot.lane.b32.xlu1 %v1492_v61, %s18560_s22  ;;  %s18570_s22 = smov 32   ;;  %v14984_v32 = vsel %vm1261_vm4, %v1304_v20, %v1308_v21  ;;  %v1313_v41 = vshll.u32 %v14978_v27, 16  ;;  %v1114_v42 = vshrl.u32 %v1060_v29, 16  ;;  %v1112_v44 = vor.u32 %v1110_v34, %v1109_v33  ;;  %14091 = vmatprep.subr.msk.bf16.mxu0 %vm2138_vm5, %v14186_v11  ;;  %v1033_v34 = vld [vmem:[%s14902_s23 + $0xa0] sm:$0xff] }
  0x73   : > { %1680 = vrot.lane.b32.xlu0 %v1492_v61, %s18562_s16  ;;  %v1121_v46 = vshrl.u32 %v1061_v35, 16  ;;  %v1063_v47 = vpack.c.bf16 %v1030_v37, %v1029_v36  ;;  %v1496_v48 = vrot.slane %v14937_v45, 1  ;;  %v1497_v49 = vrot.slane %v14956_v5, 1 }
  0x74   : > { %v1318_v50 = vshll.u32 %v14990_v38, 16  ;;  %v1311_v51 = vshrl.u32 %v14978_v27, 16  ;;  %v1499_v52 = vrot.slane %v14978_v27, 1  ;;  %v15003_v53 = vsel %vm14881_vm2, %v1109_v33, 0 }
  0x75   : > { %v1128_v54 = vshrl.u32 %v1062_v39, 16  ;;  %v1315_v55 = vrot.slane %v1313_v41, 1  ;;  %v1500_v56 = vrot.slane %v14990_v38, 1  ;;  %v1116_v57 = vrot.slane %v1114_v42, 7  ;;  %v1034_v41 = vld [vmem:[%s14902_s23 + $0xa8] sm:$0xff] }
  0x76   : > { %1682 = vrot.lane.b32.xlu1 %v14961_v9, %s18562_s16  ;;  %s18564_s16 = smov 56   ;;  %v1117_v58 = vshll.u32 %v1060_v29, 16  ;;  %v15013_v61 = vsel %vm14881_vm2, 0, %v1112_v44  ;;  %v1123_v62 = vrot.slane %v1121_v46, 7  ;;  %v1124_v63 = vshll.u32 %v1061_v35, 16 }
  0x77   : > { %1554 = vrot.lane.b32.xlu0 %v1285_v17, %s18568_s2  ;;  %v1135_v1 = vshrl.u32 %v1063_v47, 16  ;;  %v15016_v4 = vsel %vm1486_vm3, %v1496_v48, %v1497_v49  ;;  %v1320_v5 = vrot.slane %v1318_v50, 1  ;;  %v1330_v6 = vshll.u32 %v15003_v53, 16 }
  0x78   : > { %v1130_v8 = vrot.slane %v1128_v54, 7  ;;  %v1131_v10 = vshll.u32 %v1062_v39, 16  ;;  %v1316_v12 = vor.u32 %v1315_v55, %v1311_v51  ;;  %v1325_v13 = vshll.u32 %v15013_v61, 16 }
  0x79   : > { %v1119_v14 = vor.u32 %v1117_v58, %v1116_v57  ;;  %v15025_v15 = vsel %vm14881_vm2, %v1116_v57, 0  ;;  %v1126_v16 = vor.u32 %v1124_v63, %v1123_v62  ;;  %v1138_v18 = vshll.u32 %v1063_v47, 16 }
  0x7a   : > { %1650 = vrot.lane.b32.xlu1 %v1297_v19, %s18570_s22  ;;  %v15029_v20 = vrot.slane %v1330_v6, 1  ;;  %v1503_v21 = vrot.slane %v15003_v53, 1  ;;  %v15034_v22 = vsel %vm14881_vm2, %v1123_v62, 0  ;;  %v1323_v23 = vshrl.u32 %v15013_v61, 16 }
  0x7b   : > { %1648 = vrot.lane.b32.xlu0 %v1285_v17, %s18570_s22  ;;  %v1137_v17 = vrot.slane %v1135_v1, 7  ;;  %v1502_v24 = vrot.slane %v15013_v61, 1  ;;  %v1342_v25 = vshll.u32 %v15025_v15, 16  ;;  %v1133_v26 = vor.u32 %v1131_v10, %v1130_v8  ;;  %v1035_v1 = vld [vmem:[%s14902_s23 + $0xb0] sm:$0xff] }
  0x7c   : > { %v1327_v29 = vrot.slane %v1325_v13, 1  ;;  %v15044_v30 = vsel %vm14881_vm2, 0, %v1119_v14  ;;  %v1506_v31 = vrot.slane %v15025_v15, 1  ;;  %v15052_v35 = vsel %vm14881_vm2, 0, %v1126_v16 }
  0x7d   : > { %v1354_v36 = vshll.u32 %v15034_v22, 16  ;;  %v1140_v37 = vor.u32 %v1138_v18, %v1137_v17  ;;  %v2140_v39 = vsel %vm2138_vm5, %v14186_v11, 0  ;;  %v15058_v42 = vsel %vm1261_vm4, %v1316_v12, %v1320_v5  ;;  %v1036_v5 = vld [vmem:[%s14902_s23 + $0xb8] sm:$0xff] }
  0x7e   : > { %1746 = vrot.lane.b32.xlu1 %v14984_v32, %s18564_s16  ;;  %v1335_v44 = vshrl.u32 %v15044_v30, 16  ;;  %v1509_v46 = vrot.slane %v15034_v22, 1  ;;  %13882 = vmatpush3.bf16.msra.mxu0 %v2140_v39  ;;  %v15063_v47 = vrot.slane %v1342_v25, 1  ;;  %v15067_v48 = vsel %vm14881_vm2, 0, %v1133_v26 }
  0x7f   : > { %1744 = vrot.lane.b32.xlu0 %v1297_v19, %s18564_s16  ;;  %s18566_s16 = smov 64   ;;  %v15071_v49 = vsel %vm14881_vm2, %v1130_v8, 0  ;;  %v1349_v50 = vshll.u32 %v15052_v35, 16  ;;  %v15078_v51 = vsel %vm14881_vm2, %v1137_v17, 0  ;;  %v1505_v57 = vrot.slane %v15044_v30, 1 }
  0x80   : > { %v15083_v58 = vrot.slane %v1354_v36, 1  ;;  %v1361_v62 = vshll.u32 %v15067_v48, 16  ;;  %v1366_v63 = vshll.u32 %v15071_v49, 16  ;;  %v1347_v8 = vshrl.u32 %v15052_v35, 16 }
  0x81   : > { %v1508_v10 = vrot.slane %v15052_v35, 1  ;;  %v1378_v11 = vshll.u32 %v15078_v51, 16  ;;  %v15100_v12 = vrot.slane %v1349_v50, 1  ;;  %v1359_v13 = vshrl.u32 %v15067_v48, 16 }
  0x82   : > { %1556 = vrot.lane.b32.xlu1 %v1297_v19, %s18568_s2  ;;  %v1064_v19 = vpack.c.bf16 %v1032_v60, %v1031_v59  ;;  %v15087_v59 = vsel %vm14881_vm2, 0, %v1140_v37  ;;  %v1065_v60 = vpack.c.bf16 %v1034_v41, %v1033_v34  ;;  %v1501_v17 = vsel %vm1486_vm3, %v1499_v52, %v1500_v56 }
  0x83   : > { %1776 = vrot.lane.b32.xlu0 %v14961_v9, %s18566_s16  ;;  %v1373_v14 = vshll.u32 %v15087_v59, 16  ;;  %v1066_v25 = vpack.c.bf16 %v1036_v5, %v1035_v1  ;;  %v15115_v26 = vrot.slane %v1361_v62, 1  ;;  %v1511_v34 = vrot.slane %v15067_v48, 1  ;;  %v1038_v5 = vld [vmem:[%s14902_s23 + $0xc8] sm:$0xff] }
  0x84   : > { %v1142_v33 = vshrl.u32 %v1064_v19, 16  ;;  %v1145_v55 = vshll.u32 %v1064_v19, 16  ;;  %v1149_v19 = vshrl.u32 %v1065_v60, 16  ;;  %v1371_v38 = vshrl.u32 %v15087_v59, 16 }
  0x85   : > { %v15122_v36 = vrot.slane %v1378_v11, 1  ;;  %v1514_v52 = vrot.slane %v15087_v59, 1  ;;  %v1515_v56 = vrot.slane %v15078_v51, 1  ;;  %v15127_v37 = vrot.slane %v1373_v14, 1 }
  0x86   : > { %1558 = vrot.lane.b32.xlu1 %v14984_v32, %s18568_s2  ;;  %s18633_s2 = smov 24   ;;  %v1144_v54 = vrot.slane %v1142_v33, 7  ;;  %v15117_v33 = vrot.slane %v1366_v63, 1  ;;  %v1328_v50 = vor.u32 %v1327_v29, %v1323_v23  ;;  %v1156_v62 = vshrl.u32 %v1066_v25, 16  ;;  %v1037_v63 = vld [vmem:[%s14902_s23 + $0xc0] sm:$0xff] }
  0x87   : > { %1778 = vrot.lane.b32.xlu0 %v15016_v4, %s18566_s16  ;;  %s18632_s16 = smov 16   ;;  %v1159_v1 = vshll.u32 %v1066_v25, 16  ;;  %v1364_v22 = vor.u32 %v15115_v26, %v1359_v13 }
  0x88   : > { %v1147_v16 = vor.u32 %v1145_v55, %v1144_v54  ;;  %v15113_v18 = vsel %vm14881_vm2, %v1144_v54, 0  ;;  %v1151_v55 = vrot.slane %v1149_v19, 7  ;;  %v1333_v23 = vsel %vm1261_vm4, %v1328_v50, %v15029_v20  ;;  %v1039_v50 = vld [vmem:[%s14902_s23 + $0xd0] sm:$0xff] }
  0x89   : > { %v1390_v41 = vshll.u32 %v15113_v18, 16  ;;  %v1158_v25 = vrot.slane %v1156_v62, 7 }
  0x8a   : > { %1590 = vrot.lane.b32.xlu1 %v15016_v4, %s18632_s16  ;;  %v15131_v39 = vsel %vm14881_vm2, 0, %v1147_v16  ;;  %v1067_v16 = vpack.c.bf16 %v1038_v5, %v1037_v63  ;;  %v1504_v63 = vsel %vm1486_vm3, %v1502_v24, %v1503_v21  ;;  %v1042_v5 = vld [vmem:[%s14902_s23 + $0xe8] sm:$0xff] }
  0x8b   : > { %1588 = vrot.lane.b32.xlu0 %v14961_v9, %s18632_s16  ;;  %v1337_v9 = vshll.u32 %v15044_v30, 16  ;;  %v1385_v14 = vshll.u32 %v15131_v39, 16  ;;  %v1161_v20 = vor.u32 %v1159_v1, %v1158_v25 }
  0x8c   : > { %v1163_v11 = vshrl.u32 %v1067_v16, 16  ;;  %v1166_v19 = vshll.u32 %v1067_v16, 16 }
  0x8d   : > { %v15093_v6 = vrot.slane %v1337_v9, 1  ;;  %v1152_v9 = vshll.u32 %v1065_v60, 16  ;;  %v15145_v60 = vrot.slane %v1390_v41, 1  ;;  %v15156_v0 = vrot.slane %v1385_v14, 1 }
  0x8e   : > { %1622 = vrot.lane.b32.xlu1 %v14978_v27, %s18633_s2  ;;  %v15195_v24 = vsel %vm14881_vm2, 0, %v1161_v20  ;;  %v1041_v20 = vld [vmem:[%s14902_s23 + $0xe0] sm:$0xff] }
  0x8f   : > { %1620 = vrot.lane.b32.xlu0 %v14937_v45, %s18633_s2  ;;  %v1154_v29 = vor.u32 %v1152_v9, %v1151_v55  ;;  %v15171_v9 = vsel %vm14881_vm2, %v1158_v25, 0  ;;  %v1340_v53 = vor.u32 %v15093_v6, %v1335_v44  ;;  %v1409_v44 = vshll.u32 %v15195_v24, 16 }
  0x90   : > { %v1414_v14 = vshll.u32 %v15171_v9, 16 }
  0x91   : > { %v15164_v54 = vsel %vm14881_vm2, 0, %v1154_v29  ;;  %v1165_v29 = vrot.slane %v1163_v11, 7  ;;  %v15236_v15 = vrot.slane %v1409_v44, 1  ;;  %v1043_v44 = vld [vmem:[%s14902_s23 + $0xf0] sm:$0xff] }
  0x92   : > { %1654 = vrot.lane.b32.xlu1 %v15058_v42, %s18570_s22  ;;  %v1520_v1 = vrot.slane %v15164_v54, 1  ;;  %v15205_v6 = vrot.slane %v1414_v14, 1  ;;  %v1523_v14 = vrot.slane %v15195_v24, 1 }
  0x93   : > { %1652 = vrot.lane.b32.xlu0 %v14984_v32, %s18570_s22  ;;  %v1512_v32 = vrot.slane %v15071_v49, 1  ;;  %s18634_s22 = smov 40   ;;  %v1168_v16 = vor.u32 %v1166_v19, %v1165_v29  ;;  %v1345_v19 = vsel %vm1261_vm4, %v1340_v53, %v15063_v47  ;;  %v1507_v47 = vsel %vm1486_vm3, %v1505_v57, %v1506_v31 }
  0x95   : > { %v15215_v11 = vsel %vm14881_vm2, 0, %v1168_v16 }
  0x96   : > { %1686 = vrot.lane.b32.xlu1 %v1501_v17, %s18634_s22 }
  0x97   : > { %1684 = vrot.lane.b32.xlu0 %v15016_v4, %s18634_s22  ;;  %v15149_v4 = vsel %vm14881_vm2, %v1151_v55, 0  ;;  %v1040_v55 = vld [vmem:[%s14902_s23 + $0xd8] sm:$0xff] }
  0x98   : > { %v1402_v41 = vshll.u32 %v15149_v4, 16  ;;  %v1068_v62 = vpack.c.bf16 %v1040_v55, %v1039_v50  ;;  %v15219_v55 = vsel %vm14881_vm2, %v1165_v29, 0 }
  0x9a   : > { %1718 = vrot.lane.b32.xlu1 %v15013_v61, %s18635_s5  ;;  %v1170_v50 = vshrl.u32 %v1068_v62, 16  ;;  %v15191_v21 = vrot.slane %v1402_v41, 1  ;;  %v1173_v41 = vshll.u32 %v1068_v62, 16 }
  0x9b   : > { %1716 = vrot.lane.b32.xlu0 %v14978_v27, %s18635_s5 }
  0x9e   : > { %1750 = vrot.lane.b32.xlu1 %v1333_v23, %s18636_s9 }
  0x9f   : > { %1748 = vrot.lane.b32.xlu0 %v15058_v42, %s18636_s9 }
  0xa2   : > { %1560 = vrot.lane.b32.xlu1 %v15058_v42, %s18637_s26  ;;  %v1397_v42 = vshll.u32 %v15164_v54, 16 }
  0xa3   : > { %1780 = vrot.lane.b32.xlu0 %v1501_v17, %s18638_s11 }
  0xa4   : > { %v15199_v25 = vrot.slane %v1397_v42, 1  ;;  %v1069_v42 = vpack.c.bf16 %v1042_v5, %v1041_v20  ;;  %v1421_v5 = vshll.u32 %v15215_v11, 16 }
  0xa6   : > { %1562 = vrot.lane.b32.xlu1 %v1333_v23, %s18637_s26  ;;  %v1177_v62 = vshrl.u32 %v1069_v42, 16  ;;  %v1180_v16 = vshll.u32 %v1069_v42, 16  ;;  %v15245_v42 = vrot.slane %v1421_v5, 1 }
  0xa7   : > { %1782 = vrot.lane.b32.xlu0 %v1504_v63, %s18638_s11 }
  0xa8   : > { %v1179_v29 = vrot.slane %v1177_v62, 7 }
  0xaa   : > { %1594 = vrot.lane.b32.xlu1 %v1504_v63, %s18632_s16 }
  0xab   : > { %1592 = vrot.lane.b32.xlu0 %v1501_v17, %s18632_s16  ;;  %v1172_v17 = vrot.slane %v1170_v50, 7  ;;  %v1426_v50 = vshll.u32 %v15219_v55, 16 }
  0xad   : > { %v1175_v53 = vor.u32 %v1173_v41, %v1172_v17  ;;  %v15243_v20 = vrot.slane %v1426_v50, 1  ;;  %v1182_v41 = vor.u32 %v1180_v16, %v1179_v29  ;;  %v15273_v16 = vsel %vm14881_vm2, %v1179_v29, 0 }
  0xae   : > { %1626 = vrot.lane.b32.xlu1 %v15044_v30, %s18633_s2 }
  0xaf   : > { %1624 = vrot.lane.b32.xlu0 %v15013_v61, %s18633_s2  ;;  %v15240_v31 = vsel %vm14881_vm2, 0, %v1175_v53  ;;  %v15264_v50 = vsel %vm14881_vm2, 0, %v1182_v41  ;;  %v1510_v41 = vsel %vm1486_vm3, %v1508_v10, %v1509_v46 }
  0xb0   : > { %v1433_v62 = vshll.u32 %v15240_v31, 16 }
  0xb2   : > { %1658 = vrot.lane.b32.xlu1 %v1345_v19, %s18639_s18  ;;  %v15269_v53 = vrot.slane %v1433_v62, 1  ;;  %v1450_v62 = vshll.u32 %v15273_v16, 16 }
  0xb3   : > { %1656 = vrot.lane.b32.xlu0 %v1333_v23, %s18639_s18  ;;  %v1352_v23 = vor.u32 %v15100_v12, %v1347_v8 }
  0xb4   : > { %v15309_v13 = vrot.slane %v1450_v62, 1  ;;  %v1513_v62 = vsel %vm1486_vm3, %v1511_v34, %v1512_v32 }
  0xb5   : > { %v1357_v5 = vsel %vm1261_vm4, %v1352_v23, %v15083_v58  ;;  %v1044_v58 = vld [vmem:[%s14902_s23 + $0xf8] sm:$0xff]  ;;  %s18737_s23 = sld [smem:[#allocation11_spill]] }
  0xb6   : > { %1690 = vrot.lane.b32.xlu1 %v1507_v47, %s18634_s22  ;;  %v1070_v23 = vpack.c.bf16 %v1044_v58, %v1043_v44 }
  0xb7   : > { %1688 = vrot.lane.b32.xlu0 %v1504_v63, %s18634_s22  ;;  %v15249_v63 = vsel %vm14881_vm2, %v1172_v17, 0 }
  0xb8   : > { %v1438_v17 = vshll.u32 %v15249_v63, 16  ;;  %v1184_v12 = vshrl.u32 %v1070_v23, 16  ;;  %v1187_v57 = vshll.u32 %v1070_v23, 16 }
  0xba   : > { %1722 = vrot.lane.b32.xlu1 %v15052_v35, %s18635_s5  ;;  %v15283_v8 = vrot.slane %v1438_v17, 1  ;;  %v1186_v29 = vrot.slane %v1184_v12, 7  ;;  %v1530_v17 = vrot.slane %v15249_v63, 1 }
  0xbb   : > { %1720 = vrot.lane.b32.xlu0 %v15044_v30, %s18635_s5 }
  0xbc   : > { %v1189_v44 = vor.u32 %v1187_v57, %v1186_v29  ;;  %v15305_v57 = vsel %vm14881_vm2, %v1186_v29, 0 }
  0xbe   : > { %1754 = vrot.lane.b32.xlu1 %v1357_v5, %s18636_s9  ;;  %v15297_v10 = vsel %vm14881_vm2, 0, %v1189_v44  ;;  %v1543_v44 = vshll.u32 %v15305_v57, 16 }
  0xbf   : > { %1752 = vrot.lane.b32.xlu0 %v1345_v19, %s18636_s9  ;;  %v1538_v23 = vshll.u32 %v15297_v10, 16 }
  0xc1   : > { %v15327_v26 = vrot.slane %v1538_v23, 1 }
  0xc2   : > { %1564 = vrot.lane.b32.xlu1 %v1345_v19, %s18637_s26  ;;  %v1445_v19 = vshll.u32 %v15264_v50, 16 }
  0xc3   : > { %1784 = vrot.lane.b32.xlu0 %v1507_v47, %s18638_s11 }
  0xc4   : > { %v15301_v58 = vrot.slane %v1445_v19, 1  ;;  %v1369_v19 = vsel %vm1261_vm4, %v1364_v22, %v15117_v33  ;;  %v1376_v22 = vor.u32 %v15127_v37, %v1371_v38 }
  0xc6   : > { %1566 = vrot.lane.b32.xlu1 %v1357_v5, %s18637_s26  ;;  %v1381_v49 = vsel %vm1261_vm4, %v1376_v22, %v15122_v36  ;;  %v1516_v36 = vsel %vm1486_vm3, %v1514_v52, %v1515_v56  ;;  %v18640_v52 = vshrl.u32 %v15131_v39, 16 }
  0xc7   : > { %1786 = vrot.lane.b32.xlu0 %v1510_v41, %s18638_s11 }
  0xc8   : > { %v1388_v56 = vor.u32 %v15156_v0, %v18640_v52 }
  0xca   : > { %1598 = vrot.lane.b32.xlu1 %v1510_v41, %s18632_s16  ;;  %v1393_v0 = vsel %vm1261_vm4, %v1388_v56, %v15145_v60 }
  0xcb   : > { %1596 = vrot.lane.b32.xlu0 %v1507_v47, %s18632_s16  ;;  %v15329_v47 = vrot.slane %v1543_v44, 1 }
  0xcd   : > { %v1585_v33 = vpop.permute.xlu1 %1584 }
  0xce   : > { %1630 = vrot.lane.b32.xlu1 %v15067_v48, %s18633_s2 }
  0xcf   : > { %1628 = vrot.lane.b32.xlu0 %v15052_v35, %s18633_s2 }
  0xd2   : > { %1662 = vrot.lane.b32.xlu1 %v1369_v19, %s18639_s18 }
  0xd3   : > { %1660 = vrot.lane.b32.xlu0 %v1357_v5, %s18639_s18  ;;  %v1553_v5 = vpop.permute.xlu0 %1552 }
  0xd6   : > { %1694 = vrot.lane.b32.xlu1 %v1513_v62, %s18634_s22 }
  0xd7   : > { %1692 = vrot.lane.b32.xlu0 %v1510_v41, %s18634_s22 }
  0xda   : > { %1726 = vrot.lane.b32.xlu1 %v15087_v59, %s18635_s5 }
  0xdb   : > { %1724 = vrot.lane.b32.xlu0 %v15067_v48, %s18635_s5 }
  0xdc   : > { %v1619_v34 = vpop.permute.xlu1 %1618 }
  0xdd   : > { %v1617_v32 = vpop.permute.xlu0 %1616 }
  0xde   : > { %1758 = vrot.lane.b32.xlu1 %v1381_v49, %s18636_s9 }
  0xdf   : > { %1756 = vrot.lane.b32.xlu0 %v1369_v19, %s18636_s9 }
  0xe0   : > { %v1715_v41 = vpop.permute.xlu1 %1714 }
  0xe1   : > { %v1713_v38 = vpop.permute.xlu0 %1712 }
  0xe2   : > { %1568 = vrot.lane.b32.xlu1 %v1369_v19, %s18637_s26  ;;  %v1810_v19 = vsel %vm1808_vm6, %v14888_v3, %v1553_v5 }
  0xe3   : > { %1788 = vrot.lane.b32.xlu0 %v1513_v62, %s18638_s11  ;;  %v15364_v12 = vsel %vm18588_vm7, %v1810_v19, %v1585_v33  ;;  %v18642_v19 = vrot.slane %v15131_v39, 1 }
  0xe4   : > { %v1587_v37 = vpop.permute.xlu1 %1586 }
  0xe5   : > { %v1681_v23 = vpop.permute.xlu0 %1680 }
  0xe6   : > { %1570 = vrot.lane.b32.xlu1 %v1381_v49, %s18637_s26 }
  0xe7   : > { %1790 = vrot.lane.b32.xlu0 %v1516_v36, %s18638_s11 }
  0xe8   : > { %v1683_v44 = vpop.permute.xlu1 %1682 }
  0xe9   : > { %v1555_v22 = vpop.permute.xlu0 %1554 }
  0xea   : > { %v1812_v29 = vsel %vm1808_vm6, %v14929_v43, %v1555_v22  ;;  %1602 = vrot.lane.b32.xlu1 %v1516_v36, %s18632_s16  ;;  %v1876_v43 = vsel %vm18586_vm8, %v15364_v12, %v1617_v32 }
  0xeb   : > { %v1845_v51 = vsel %vm18588_vm7, %v1812_v29, %v1587_v37  ;;  %1600 = vrot.lane.b32.xlu0 %v1513_v62, %s18632_s16 }
  0xec   : > { %v1651_v5 = vpop.permute.xlu1 %1650  ;;  %v1878_v22 = vsel %vm18586_vm8, %v1845_v51, %v1619_v34 }
  0xed   : > { %v1649_v46 = vpop.permute.xlu0 %1648  ;;  %v1911_v33 = vsel %vm18585_vm9, %v1878_v22, %v1651_v5 }
  0xee   : > { %v1909_v29 = vsel %vm18585_vm9, %v1876_v43, %v1649_v46  ;;  %1634 = vrot.lane.b32.xlu1 %v15131_v39, %s18633_s2  ;;  %v1944_v46 = vsel %vm18584_vm10, %v1911_v33, %v1683_v44 }
  0xef   : > { %v1942_v62 = vsel %vm18584_vm10, %v1909_v29, %v1681_v23  ;;  %1632 = vrot.lane.b32.xlu0 %v15087_v59, %s18633_s2  ;;  %v18641_v23 = vrot.slane %v15113_v18, 1  ;;  %v1977_v5 = vsel %vm18583_vm11, %v1944_v46, %v1715_v41  ;;  %v18643_v18 = vshrl.u32 %v15164_v54, 16 }
  0xf0   : > { %v1747_v37 = vpop.permute.xlu1 %1746  ;;  %v1975_v34 = vsel %vm18583_vm11, %v1942_v62, %v1713_v38 }
  0xf1   : > { %v1745_v32 = vpop.permute.xlu0 %1744  ;;  %v1519_v51 = vsel %vm1486_vm3, %v18642_v19, %v18641_v23  ;;  %v2010_v43 = vsel %vm18582_vm12, %v1977_v5, %v1747_v37 }
  0xf2   : > { %1666 = vrot.lane.b32.xlu1 %v1393_v0, %s18639_s18  ;;  %v2008_v60 = vsel %vm18582_vm12, %v1975_v34, %v1745_v32  ;;  %v18644_v32 = vrot.slane %v15149_v4, 1 }
  0xf3   : > { %1664 = vrot.lane.b32.xlu0 %v1381_v49, %s18639_s18  ;;  %v1400_v49 = vor.u32 %v15199_v25, %v18643_v18 }
  0xf4   : > { %v1557_v52 = vpop.permute.xlu1 %1556  ;;  %v1522_v34 = vsel %vm1486_vm3, %v1520_v1, %v18644_v32 }
  0xf5   : > { %v1777_v56 = vpop.permute.xlu0 %1776  ;;  %v1405_v41 = vsel %vm1261_vm4, %v1400_v49, %v15191_v21  ;;  %v1814_v1 = vsel %vm1808_vm6, %v14922_v40, %v1557_v52  ;;  %v18646_v52 = vrot.slane %v15171_v9, 1 }
  0xf6   : > { %1698 = vrot.lane.b32.xlu1 %v1519_v51, %s18634_s22  ;;  %v2041_v38 = vsel %vm18581_vm13, %v2008_v60, %v1777_v56 }
  0xf7   : > { %1696 = vrot.lane.b32.xlu0 %v1516_v36, %s18634_s22  ;;  %13883 = vmatprep.mubr.msk.bf16.mxu0 %vm18580_vm14, %v2041_v38 }
  0xf8   : > { %v1559_v44 = vpop.permute.xlu1 %1558 }
  0xf9   : > { %v1779_v22 = vpop.permute.xlu0 %1778 }
  0xfa   : > { %v2043_v29 = vsel %vm18581_vm13, %v2010_v43, %v1779_v22  ;;  %1730 = vrot.lane.b32.xlu1 %v15164_v54, %s18635_s5 }
  0xfb   : > { %1728 = vrot.lane.b32.xlu0 %v15131_v39, %s18635_s5  ;;  %13884 = vmatmul.mubr.msk.bf16.vlgmr.msra.gmra.mrb[0].mxu0 %vm18580_vm14, %v2043_v29 }
  0xfc   : > { %v1591_v36 = vpop.permute.xlu1 %1590 }
  0xfd   : > { %v1589_v62 = vpop.permute.xlu0 %1588 }
  0xfe   : > { %1762 = vrot.lane.b32.xlu1 %v1405_v41, %s18636_s9 }
  0xff   : > { %1760 = vrot.lane.b32.xlu0 %v1393_v0, %s18636_s9 }
 0x100   : > { %v1623_v25 = vpop.permute.xlu1 %1622 }
 0x101   : > { %v1621_v33 = vpop.permute.xlu0 %1620 }
 0x102   : > { %1572 = vrot.lane.b32.xlu1 %v1393_v0, %s18637_s26  ;;  %v18645_v0 = vshrl.u32 %v15195_v24, 16 }
 0x103   : > { %1792 = vrot.lane.b32.xlu0 %v1519_v51, %s18638_s11 }
 0x104   : > { %v1655_v37 = vpop.permute.xlu1 %1654  ;;  %v1412_v19 = vor.u32 %v15236_v15, %v18645_v0  ;;  %v1816_v15 = vsel %vm1808_vm6, %v14937_v45, %v1559_v44 }
 0x105   : > { %v1653_v21 = vpop.permute.xlu0 %1652  ;;  %v1849_v43 = vsel %vm18588_vm7, %v1816_v15, %v1591_v36 }
 0x106   : > { %1574 = vrot.lane.b32.xlu1 %v1405_v41, %s18637_s26  ;;  %v1417_v56 = vsel %vm1261_vm4, %v1412_v19, %v15205_v6  ;;  %v1525_v6 = vsel %vm1486_vm3, %v1523_v14, %v18646_v52  ;;  %v1882_v22 = vsel %vm18586_vm8, %v1849_v43, %v1623_v25  ;;  %v18647_v14 = vshrl.u32 %v15215_v11, 16 }
 0x107   : > { %1794 = vrot.lane.b32.xlu0 %v1522_v34, %s18638_s11 }
 0x108   : > { %v1687_v46 = vpop.permute.xlu1 %1686  ;;  %v1424_v36 = vor.u32 %v15245_v42, %v18647_v14 }
 0x109   : > { %v1685_v23 = vpop.permute.xlu0 %1684 }
 0x10a   : > { %1606 = vrot.lane.b32.xlu1 %v1522_v34, %s18632_s16 }
 0x10b   : > { %1604 = vrot.lane.b32.xlu0 %v1519_v51, %s18632_s16  ;;  %v1847_v51 = vsel %vm18588_vm7, %v1814_v1, %v1589_v62  ;;  %v18649_v1 = vrot.slane %v15215_v11, 1 }
 0x10c   : > { %v1719_v4 = vpop.permute.xlu1 %1718  ;;  %v1880_v38 = vsel %vm18586_vm8, %v1847_v51, %v1621_v33  ;;  %v1915_v33 = vsel %vm18585_vm9, %v1882_v22, %v1655_v37 }
 0x10d   : > { %v1717_v60 = vpop.permute.xlu0 %1716  ;;  %v1913_v49 = vsel %vm18585_vm9, %v1880_v38, %v1653_v21  ;;  %v1948_v9 = vsel %vm18584_vm10, %v1915_v33, %v1687_v46 }
 0x10e   : > { %1638 = vrot.lane.b32.xlu1 %v15195_v24, %s18633_s2  ;;  %v1946_v40 = vsel %vm18584_vm10, %v1913_v49, %v1685_v23  ;;  %v1981_v25 = vsel %vm18583_vm11, %v1948_v9, %v1719_v4 }
 0x10f   : > { %1636 = vrot.lane.b32.xlu0 %v15164_v54, %s18633_s2  ;;  %v1979_v45 = vsel %vm18583_vm11, %v1946_v40, %v1717_v60  ;;  %v18648_v60 = vrot.slane %v15219_v55, 1 }
 0x110   : > { %v1751_v5 = vpop.permute.xlu1 %1750 }
 0x111   : > { %v1749_v18 = vpop.permute.xlu0 %1748  ;;  %v2014_v21 = vsel %vm18582_vm12, %v1981_v25, %v1751_v5  ;;  %v1528_v51 = vsel %vm1486_vm3, %v18649_v1, %v18648_v60  ;;  %v18653_v60 = vrot.slane %v15273_v16, 1  ;;  %v18654_v1 = vrot.slane %v15264_v50, 1 }
 0x112   : > { %1670 = vrot.lane.b32.xlu1 %v1417_v56, %s18639_s18  ;;  %v2012_v29 = vsel %vm18582_vm12, %v1979_v45, %v1749_v18 }
 0x113   : > { %1668 = vrot.lane.b32.xlu0 %v1405_v41, %s18639_s18 }
 0x114   : > { %v1561_v44 = vpop.permute.xlu1 %1560 }
 0x115   : > { %v1781_v62 = vpop.permute.xlu0 %1780  ;;  %v1818_v49 = vsel %vm1808_vm6, %v14978_v27, %v1561_v44 }
 0x116   : > { %v2045_v41 = vsel %vm18581_vm13, %v2012_v29, %v1781_v62  ;;  %1702 = vrot.lane.b32.xlu1 %v1525_v6, %s18634_s22 }
 0x117   : > { %1700 = vrot.lane.b32.xlu0 %v1522_v34, %s18634_s22  ;;  %13887 = vmatprep.mubr.msk.bf16.mxu0 %vm18580_vm14, %v2045_v41  ;;  %v1429_v34 = vsel %vm1261_vm4, %v1424_v36, %v15243_v20 }
 0x118   : > { %v1563_v32 = vpop.permute.xlu1 %1562 }
 0x119   : > { %v1783_v37 = vpop.permute.xlu0 %1782 }
 0x11a   : > { %v2047_v23 = vsel %vm18581_vm13, %v2014_v21, %v1783_v37  ;;  %1734 = vrot.lane.b32.xlu1 %v15215_v11, %s18635_s5 }
 0x11b   : > { %1732 = vrot.lane.b32.xlu0 %v15195_v24, %s18635_s5  ;;  %13888 = vmatmul.mubr.msk.bf16.gmra.mrb[4].mxu0 %vm18580_vm14, %v2047_v23 }
 0x11c   : > { %v1595_v42 = vpop.permute.xlu1 %1594 }
 0x11d   : > { %v1593_v46 = vpop.permute.xlu0 %1592 }
 0x11e   : > { %1766 = vrot.lane.b32.xlu1 %v1429_v34, %s18636_s9  ;;  %v1851_v52 = vsel %vm18588_vm7, %v1818_v49, %v1593_v46 }
 0x11f   : > { %1764 = vrot.lane.b32.xlu0 %v1417_v56, %s18636_s9 }
 0x120   : > { %v1627_v0 = vpop.permute.xlu1 %1626 }
 0x121   : > { %v1625_v19 = vpop.permute.xlu0 %1624 }
 0x122   : > { %1576 = vrot.lane.b32.xlu1 %v1417_v56, %s18637_s26  ;;  %v18650_v56 = vshrl.u32 %v15240_v31, 16  ;;  %v1884_v43 = vsel %vm18586_vm8, %v1851_v52, %v1625_v19 }
 0x123   : > { %1796 = vrot.lane.b32.xlu0 %v1525_v6, %s18638_s11 }
 0x124   : > { %v1659_v4 = vpop.permute.xlu1 %1658  ;;  %v1436_v38 = vor.u32 %v15269_v53, %v18650_v56  ;;  %v1820_v53 = vsel %vm1808_vm6, %v15013_v61, %v1563_v32 }
 0x125   : > { %v1657_v20 = vpop.permute.xlu0 %1656  ;;  %v1853_v29 = vsel %vm18588_vm7, %v1820_v53, %v1595_v42 }
 0x126   : > { %1578 = vrot.lane.b32.xlu1 %v1429_v34, %s18637_s26  ;;  %v1441_v40 = vsel %vm1261_vm4, %v1436_v38, %v15283_v8  ;;  %v1917_v22 = vsel %vm18585_vm9, %v1884_v43, %v1657_v20  ;;  %v18651_v8 = vrot.slane %v15240_v31, 1  ;;  %v1886_v33 = vsel %vm18586_vm8, %v1853_v29, %v1627_v0 }
 0x127   : > { %1798 = vrot.lane.b32.xlu0 %v1528_v51, %s18638_s11  ;;  %v1919_v14 = vsel %vm18585_vm9, %v1886_v33, %v1659_v4 }
 0x128   : > { %v1691_v5 = vpop.permute.xlu1 %1690  ;;  %v1531_v44 = vsel %vm1486_vm3, %v18651_v8, %v1530_v17  ;;  %v18652_v17 = vshrl.u32 %v15264_v50, 16 }
 0x129   : > { %v1689_v15 = vpop.permute.xlu0 %1688  ;;  %v1952_v63 = vsel %vm18584_vm10, %v1919_v14, %v1691_v5 }
 0x12a   : > { %1610 = vrot.lane.b32.xlu1 %v1528_v51, %s18632_s16  ;;  %v1950_v27 = vsel %vm18584_vm10, %v1917_v22, %v1689_v15  ;;  %v1448_v25 = vor.u32 %v15301_v58, %v18652_v17  ;;  %v18655_v15 = vshrl.u32 %v15297_v10, 16 }
 0x12b   : > { %1608 = vrot.lane.b32.xlu0 %v1525_v6, %s18632_s16 }
 0x12c   : > { %v1723_v55 = vpop.permute.xlu1 %1722  ;;  %v1453_v42 = vsel %vm1261_vm4, %v1448_v25, %v15309_v13  ;;  %v1541_v56 = vor.u32 %v15327_v26, %v18655_v15 }
 0x12d   : > { %v1721_v18 = vpop.permute.xlu0 %1720  ;;  %v1985_v32 = vsel %vm18583_vm11, %v1952_v63, %v1723_v55  ;;  %v1549_v55 = vrot.slane %v15297_v10, 1 }
 0x12e   : > { %1642 = vrot.lane.b32.xlu1 %v15240_v31, %s18633_s2  ;;  %v1983_v61 = vsel %vm18583_vm11, %v1950_v27, %v1721_v18  ;;  %v1550_v18 = vrot.slane %v15305_v57, 1 }
 0x12f   : > { %1640 = vrot.lane.b32.xlu0 %v15215_v11, %s18633_s2 }
 0x130   : > { %v1755_v6 = vpop.permute.xlu1 %1754 }
 0x131   : > { %v1753_v45 = vpop.permute.xlu0 %1752  ;;  %v2018_v37 = vsel %vm18582_vm12, %v1985_v32, %v1755_v6 }
 0x132   : > { %1674 = vrot.lane.b32.xlu1 %v1441_v40, %s18639_s18  ;;  %v2016_v41 = vsel %vm18582_vm12, %v1983_v61, %v1753_v45  ;;  %v1551_v45 = vsel %vm1486_vm3, %v1549_v55, %v1550_v18 }
 0x133   : > { %1672 = vrot.lane.b32.xlu0 %v1429_v34, %s18639_s18 }
 0x134   : > { %v1565_v62 = vpop.permute.xlu1 %1564 }
 0x135   : > { %v1785_v9 = vpop.permute.xlu0 %1784  ;;  %v1822_v49 = vsel %vm1808_vm6, %v15044_v30, %v1565_v62 }
 0x136   : > { %v2049_v36 = vsel %vm18581_vm13, %v2016_v41, %v1785_v9  ;;  %1706 = vrot.lane.b32.xlu1 %v1531_v44, %s18634_s22 }
 0x137   : > { %1704 = vrot.lane.b32.xlu0 %v1528_v51, %s18634_s22  ;;  %13891 = vmatprep.mubr.msk.bf16.mxu0 %vm18580_vm14, %v2049_v36  ;;  %v1534_v51 = vsel %vm1486_vm3, %v18654_v1, %v18653_v60 }
 0x138   : > { %v1567_v21 = vpop.permute.xlu1 %1566 }
 0x139   : > { %v1787_v23 = vpop.permute.xlu0 %1786  ;;  %v1824_v6 = vsel %vm1808_vm6, %v15052_v35, %v1567_v21 }
 0x13a   : > { %v2051_v34 = vsel %vm18581_vm13, %v2018_v37, %v1787_v23  ;;  %1738 = vrot.lane.b32.xlu1 %v15264_v50, %s18635_s5 }
 0x13b   : > { %1736 = vrot.lane.b32.xlu0 %v15240_v31, %s18635_s5  ;;  %13892 = vmatmul.mubr.msk.bf16.gmra.mrb[8].mxu0 %vm18580_vm14, %v2051_v34 }
 0x13c   : > { %v1599_v58 = vpop.permute.xlu1 %1598 }
 0x13d   : > { %v1597_v46 = vpop.permute.xlu0 %1596 }
 0x13e   : > { %1770 = vrot.lane.b32.xlu1 %v1453_v42, %s18636_s9  ;;  %v1855_v26 = vsel %vm18588_vm7, %v1822_v49, %v1597_v46 }
 0x13f   : > { %1768 = vrot.lane.b32.xlu0 %v1441_v40, %s18636_s9 }
 0x140   : > { %v1631_v0 = vpop.permute.xlu1 %1630 }
 0x141   : > { %v1629_v19 = vpop.permute.xlu0 %1628 }
 0x142   : > { %1580 = vrot.lane.b32.xlu1 %v1441_v40, %s18637_s26  ;;  %v1546_v40 = vsel %vm1261_vm4, %v1541_v56, %v15329_v47  ;;  %v1888_v53 = vsel %vm18586_vm8, %v1855_v26, %v1629_v19  ;;  %v1857_v47 = vsel %vm18588_vm7, %v1824_v6, %v1599_v58 }
 0x143   : > { %1800 = vrot.lane.b32.xlu0 %v1531_v44, %s18638_s11  ;;  %v1890_v35 = vsel %vm18586_vm8, %v1857_v47, %v1631_v0 }
 0x144   : > { %v1663_v4 = vpop.permute.xlu1 %1662 }
 0x145   : > { %v1661_v13 = vpop.permute.xlu0 %1660  ;;  %v1923_v29 = vsel %vm18585_vm9, %v1890_v35, %v1663_v4 }
 0x146   : > { %1582 = vrot.lane.b32.xlu1 %v1453_v42, %s18637_s26  ;;  %v1921_v57 = vsel %vm18585_vm9, %v1888_v53, %v1661_v13 }
 0x147   : > { %1802 = vrot.lane.b32.xlu0 %v1534_v51, %s18638_s11 }
 0x148   : > { %v1695_v20 = vpop.permute.xlu1 %1694 }
 0x149   : > { %v1693_v5 = vpop.permute.xlu0 %1692  ;;  %v1956_v62 = vsel %vm18584_vm10, %v1923_v29, %v1695_v20 }
 0x14a   : > { %1614 = vrot.lane.b32.xlu1 %v1534_v51, %s18632_s16  ;;  %v1954_v30 = vsel %vm18584_vm10, %v1921_v57, %v1693_v5 }
 0x14b   : > { %1612 = vrot.lane.b32.xlu0 %v1531_v44, %s18632_s16 }
 0x14c   : > { %v1727_v16 = vpop.permute.xlu1 %1726 }
 0x14d   : > { %v1725_v38 = vpop.permute.xlu0 %1724  ;;  %v1989_v33 = vsel %vm18583_vm11, %v1956_v62, %v1727_v16 }
 0x14e   : > { %1646 = vrot.lane.b32.xlu1 %v15297_v10, %s18633_s2  ;;  %v1987_v22 = vsel %vm18583_vm11, %v1954_v30, %v1725_v38 }
 0x14f   : > { %1644 = vrot.lane.b32.xlu0 %v15264_v50, %s18633_s2 }
 0x150   : > { %v1759_v52 = vpop.permute.xlu1 %1758 }
 0x151   : > { %v1757_v43 = vpop.permute.xlu0 %1756  ;;  %v2022_v9 = vsel %vm18582_vm12, %v1989_v33, %v1759_v52 }
 0x152   : > { %1678 = vrot.lane.b32.xlu1 %v1546_v40, %s18639_s18  ;;  %v2020_v8 = vsel %vm18582_vm12, %v1987_v22, %v1757_v43 }
 0x153   : > { %1676 = vrot.lane.b32.xlu0 %v1453_v42, %s18639_s18 }
 0x154   : > { %v1569_v27 = vpop.permute.xlu1 %1568 }
 0x155   : > { %v1789_v44 = vpop.permute.xlu0 %1788  ;;  %v1826_v58 = vsel %vm1808_vm6, %v15067_v48, %v1569_v27 }
 0x156   : > { %v2053_v61 = vsel %vm18581_vm13, %v2020_v8, %v1789_v44  ;;  %1710 = vrot.lane.b32.xlu1 %v1551_v45, %s18634_s22 }
 0x157   : > { %1708 = vrot.lane.b32.xlu0 %v1534_v51, %s18634_s22  ;;  %13895 = vmatprep.mubr.msk.bf16.mxu0 %vm18580_vm14, %v2053_v61 }
 0x158   : > { %v1571_v41 = vpop.permute.xlu1 %1570 }
 0x159   : > { %v1791_v14 = vpop.permute.xlu0 %1790  ;;  %v1828_v0 = vsel %vm1808_vm6, %v15087_v59, %v1571_v41 }
 0x15a   : > { %v2055_v36 = vsel %vm18581_vm13, %v2022_v9, %v1791_v14  ;;  %1742 = vrot.lane.b32.xlu1 %v14888_v3, %s18635_s5 }
 0x15b   : > { %1740 = vrot.lane.b32.xlu0 %v15297_v10, %s18635_s5  ;;  %13896 = vmatmul.mubr.msk.bf16.gmra.mrb[12].mxu0 %vm18580_vm14, %v2055_v36 }
 0x15c   : > { %v1603_v63 = vpop.permute.xlu1 %1602 }
 0x15d   : > { %v1601_v17 = vpop.permute.xlu0 %1600  ;;  %v1861_v1 = vsel %vm18588_vm7, %v1828_v0, %v1603_v63 }
 0x15e   : > { %1774 = vrot.lane.b32.xlu1 %v14911_v28, %s18636_s9  ;;  %v1859_v28 = vsel %vm18588_vm7, %v1826_v58, %v1601_v17 }
 0x15f   : > { %1772 = vrot.lane.b32.xlu0 %v1546_v40, %s18636_s9 }
 0x160   : > { %v1635_v25 = vpop.permute.xlu1 %1634 }
 0x161   : > { %v1633_v32 = vpop.permute.xlu0 %1632  ;;  %v1894_v48 = vsel %vm18586_vm8, %v1861_v1, %v1635_v25 }
 0x162   : > { %1806 = vrot.lane.b32.xlu1 %v14895_v7, %s18638_s11  ;;  %v1892_v19 = vsel %vm18586_vm8, %v1859_v28, %v1633_v32 }
 0x163   : > { %1804 = vrot.lane.b32.xlu0 %v1551_v45, %s18638_s11 }
 0x164   : > { %v1667_v21 = vpop.permute.xlu1 %1666 }
 0x165   : > { %v1665_v37 = vpop.permute.xlu0 %1664  ;;  %v1927_v15 = vsel %vm18585_vm9, %v1894_v48, %v1667_v21 }
 0x166   : > { %v1925_v4 = vsel %vm18585_vm9, %v1892_v19, %v1665_v37 }
 0x168   : > { %v1699_v23 = vpop.permute.xlu1 %1698 }
 0x169   : > { %v1697_v10 = vpop.permute.xlu0 %1696  ;;  %v1960_v56 = vsel %vm18584_vm10, %v1927_v15, %v1699_v23 }
 0x16a   : > { %v1958_v60 = vsel %vm18584_vm10, %v1925_v4, %v1697_v10 }
 0x16c   : > { %v1731_v34 = vpop.permute.xlu1 %1730 }
 0x16d   : > { %v1729_v42 = vpop.permute.xlu0 %1728  ;;  %v1993_v16 = vsel %vm18583_vm11, %v1960_v56, %v1731_v34 }
 0x16e   : > { %v1991_v51 = vsel %vm18583_vm11, %v1958_v60, %v1729_v42 }
 0x170   : > { %v1763_v46 = vpop.permute.xlu1 %1762 }
 0x171   : > { %v1761_v7 = vpop.permute.xlu0 %1760  ;;  %v2026_v55 = vsel %vm18582_vm12, %v1993_v16, %v1763_v46 }
 0x172   : > { %v2024_v20 = vsel %vm18582_vm12, %v1991_v51, %v1761_v7 }
 0x174   : > { %v1573_v13 = vpop.permute.xlu1 %1572 }
 0x175   : > { %v1793_v5 = vpop.permute.xlu0 %1792  ;;  %v1830_v22 = vsel %vm1808_vm6, %v15131_v39, %v1573_v13 }
 0x176   : > { %v2057_v59 = vsel %vm18581_vm13, %v2024_v20, %v1793_v5 }
 0x177   : > { %13899 = vmatprep.mubr.msk.bf16.mxu0 %vm18580_vm14, %v2057_v59 }
 0x178   : > { %v1575_v38 = vpop.permute.xlu1 %1574 }
 0x179   : > { %v1795_v18 = vpop.permute.xlu0 %1794  ;;  %v1832_v8 = vsel %vm1808_vm6, %v15164_v54, %v1575_v38 }
 0x17a   : > { %v2059_v49 = vsel %vm18581_vm13, %v2026_v55, %v1795_v18 }
 0x17b   : > { %13900 = vmatmul.mubr.msk.bf16.gmra.mrb[16].mxu0 %vm18580_vm14, %v2059_v49 }
 0x17c   : > { %v1607_v40 = vpop.permute.xlu1 %1606 }
 0x17d   : > { %v1605_v26 = vpop.permute.xlu0 %1604  ;;  %v1865_v33 = vsel %vm18588_vm7, %v1832_v8, %v1607_v40 }
 0x17e   : > { %v1863_v27 = vsel %vm18588_vm7, %v1830_v22, %v1605_v26 }
 0x180   : > { %v1639_v52 = vpop.permute.xlu1 %1638 }
 0x181   : > { %v1637_v6 = vpop.permute.xlu0 %1636  ;;  %v1898_v39 = vsel %vm18586_vm8, %v1865_v33, %v1639_v52 }
 0x182   : > { %v1896_v44 = vsel %vm18586_vm8, %v1863_v27, %v1637_v6 }
 0x184   : > { %v1671_v53 = vpop.permute.xlu1 %1670 }
 0x185   : > { %v1669_v43 = vpop.permute.xlu0 %1668  ;;  %v1931_v63 = vsel %vm18585_vm9, %v1898_v39, %v1671_v53 }
 0x186   : > { %v1929_v61 = vsel %vm18585_vm9, %v1896_v44, %v1669_v43 }
 0x188   : > { %v1703_v57 = vpop.permute.xlu1 %1702 }
 0x189   : > { %v1701_v30 = vpop.permute.xlu0 %1700  ;;  %v1964_v17 = vsel %vm18584_vm10, %v1931_v63, %v1703_v57 }
 0x18a   : > { %v1962_v62 = vsel %vm18584_vm10, %v1929_v61, %v1701_v30 }
 0x18c   : > { %v1735_v45 = vpop.permute.xlu1 %1734 }
 0x18d   : > { %v1733_v47 = vpop.permute.xlu0 %1732  ;;  %v1997_v25 = vsel %vm18583_vm11, %v1964_v17, %v1735_v45 }
 0x18e   : > { %v1995_v41 = vsel %vm18583_vm11, %v1962_v62, %v1733_v47 }
 0x190   : > { %v1767_v35 = vpop.permute.xlu1 %1766 }
 0x191   : > { %v1765_v29 = vpop.permute.xlu0 %1764  ;;  %v2030_v21 = vsel %vm18582_vm12, %v1997_v25, %v1767_v35 }
 0x192   : > { %v2028_v14 = vsel %vm18582_vm12, %v1995_v41, %v1765_v29  ;;  %v15649_v29 = vld [vmem:[%s18620_s13] ss:$0 sm:$0xff] }
 0x194   : > { %v1577_v9 = vpop.permute.xlu1 %1576 }
 0x195   : > { %v1797_v36 = vpop.permute.xlu0 %1796  ;;  %v1834_v60 = vsel %vm1808_vm6, %v15195_v24, %v1577_v9 }
 0x196   : > { %v2061_v54 = vsel %vm18581_vm13, %v2028_v14, %v1797_v36 }
 0x197   : > { %13903 = vmatprep.mubr.msk.bf16.mxu0 %vm18580_vm14, %v2061_v54 }
 0x198   : > { %v1579_v32 = vpop.permute.xlu1 %1578 }
 0x199   : > { %v1799_v37 = vpop.permute.xlu0 %1798  ;;  %v1836_v13 = vsel %vm1808_vm6, %v15215_v11, %v1579_v32 }
 0x19a   : > { %v2063_v23 = vsel %vm18581_vm13, %v2030_v21, %v1799_v37 }
 0x19b   : > { %13904 = vmatmul.mubr.msk.bf16.gmra.mrb[20].mxu0 %vm18580_vm14, %v2063_v23 }
 0x19c   : > { %v1611_v10 = vpop.permute.xlu1 %1610 }
 0x19d   : > { %v1609_v34 = vpop.permute.xlu0 %1608  ;;  %v1869_v59 = vsel %vm18588_vm7, %v1836_v13, %v1611_v10 }
 0x19e   : > { %v1867_v1 = vsel %vm18588_vm7, %v1834_v60, %v1609_v34 }
 0x1a0   : > { %v1643_v42 = vpop.permute.xlu1 %1642 }
 0x1a1   : > { %v1641_v58 = vpop.permute.xlu0 %1640  ;;  %v1902_v24 = vsel %vm18586_vm8, %v1869_v59, %v1643_v42 }
 0x1a2   : > { %v1900_v48 = vsel %vm18586_vm8, %v1867_v1, %v1641_v58 }
 0x1a4   : > { %v1675_v28 = vpop.permute.xlu1 %1674 }
 0x1a5   : > { %v1673_v46 = vpop.permute.xlu0 %1672  ;;  %v1935_v18 = vsel %vm18585_vm9, %v1902_v24, %v1675_v28 }
 0x1a6   : > { %v1933_v5 = vsel %vm18585_vm9, %v1900_v48, %v1673_v46 }
 0x1a8   : > { %v1707_v0 = vpop.permute.xlu1 %1706 }
 0x1a9   : > { %v1705_v19 = vpop.permute.xlu0 %1704  ;;  %v1968_v49 = vsel %vm18584_vm10, %v1935_v18, %v1707_v0 }
 0x1aa   : > { %v1966_v15 = vsel %vm18584_vm10, %v1933_v5, %v1705_v19 }
 0x1ac   : > { %v1739_v7 = vpop.permute.xlu1 %1738 }
 0x1ad   : > { %v1737_v4 = vpop.permute.xlu0 %1736  ;;  %v2001_v40 = vsel %vm18583_vm11, %v1968_v49, %v1739_v7 }
 0x1ae   : > { %v1999_v56 = vsel %vm18583_vm11, %v1966_v15, %v1737_v4 }
 0x1b0   : > { %v1771_v51 = vpop.permute.xlu1 %1770 }
 0x1b1   : > { %v1769_v20 = vpop.permute.xlu0 %1768  ;;  %v2034_v52 = vsel %vm18582_vm12, %v2001_v40, %v1771_v51 }
 0x1b2   : > { %v2032_v38 = vsel %vm18582_vm12, %v1999_v56, %v1769_v20 }
 0x1b4   : > { %v1581_v16 = vpop.permute.xlu1 %1580 }
 0x1b5   : > { %v1801_v55 = vpop.permute.xlu0 %1800  ;;  %v1838_v33 = vsel %vm1808_vm6, %v15240_v31, %v1581_v16 }
 0x1b6   : > { %v2065_v11 = vsel %vm18581_vm13, %v2032_v38, %v1801_v55 }
 0x1b7   : > { %13907 = vmatprep.mubr.msk.bf16.mxu0 %vm18580_vm14, %v2065_v11 }
 0x1b8   : > { %v1583_v26 = vpop.permute.xlu1 %1582 }
 0x1b9   : > { %v1803_v6 = vpop.permute.xlu0 %1802  ;;  %v1840_v8 = vsel %vm1808_vm6, %v15264_v50, %v1583_v26 }
 0x1ba   : > { %v2067_v53 = vsel %vm18581_vm13, %v2034_v52, %v1803_v6 }
 0x1bb   : > { %13908 = vmatmul.mubr.msk.bf16.gmra.mrb[24].mxu0 %vm18580_vm14, %v2067_v53 }
 0x1bc   : > { %v1615_v43 = vpop.permute.xlu1 %1614 }
 0x1bd   : > { %v1613_v57 = vpop.permute.xlu0 %1612  ;;  %v1873_v41 = vsel %vm18588_vm7, %v1840_v8, %v1615_v43 }
 0x1be   : > { %v1871_v14 = vsel %vm18588_vm7, %v1838_v33, %v1613_v57 }
 0x1c0   : > { %v1647_v30 = vpop.permute.xlu1 %1646 }
 0x1c1   : > { %v1645_v45 = vpop.permute.xlu0 %1644  ;;  %v1906_v36 = vsel %vm18586_vm8, %v1873_v41, %v1647_v30 }
 0x1c2   : > { %v1904_v17 = vsel %vm18586_vm8, %v1871_v14, %v1645_v45 }
 0x1c4   : > { %v1679_v47 = vpop.permute.xlu1 %1678 }
 0x1c5   : > { %v1677_v22 = vpop.permute.xlu0 %1676  ;;  %v1939_v25 = vsel %vm18585_vm9, %v1906_v36, %v1679_v47 }
 0x1c6   : > { %v1937_v37 = vsel %vm18585_vm9, %v1904_v17, %v1677_v22 }
 0x1c8   : > { %v1711_v27 = vpop.permute.xlu1 %1710 }
 0x1c9   : > { %v1709_v35 = vpop.permute.xlu0 %1708  ;;  %v1972_v23 = vsel %vm18584_vm10, %v1939_v25, %v1711_v27 }
 0x1ca   : > { %v1970_v34 = vsel %vm18584_vm10, %v1937_v37, %v1709_v35 }
 0x1cc   : > { %v15646_v44 = vpop.permute.xlu1 %1742 }
 0x1cd   : > { %v1741_v61 = vpop.permute.xlu0 %1740  ;;  %v2005_v42 = vsel %vm18583_vm11, %v1972_v23, %v15646_v44 }
 0x1ce   : > { %v13885_v62 = vpop.f32.mrb[0].mxu0  ;;  %v2003_v46 = vsel %vm18583_vm11, %v1970_v34, %v1741_v61 }
 0x1cf   : > { %v2185_v9 = vadd.f32 %v13885_v62, %v15649_v29  ;;  %v2176_v39 = vpop.f32.mrb[1].mxu0 }
 0x1d0   : > { %v2177_v50 = vadd.f32 %v15649_v29, %v2176_v39  ;;  %v13886_v63 = vpop.f32.mrb[2].mxu0  ;;  %v15658_v54 = vpop.permute.xlu1 %1774 }
 0x1d1   : > { %v2188_v31 = vadd.f32 %v13886_v63, %v15649_v29  ;;  %v2179_v32 = vpop.f32.mrb[3].mxu0  ;;  %v1773_v21 = vpop.permute.xlu0 %1772  ;;  %v2305_v58 = vmax.f32 %v2185_v9, 0.0  ;;  %v2038_v19 = vsel %vm18582_vm12, %v2005_v42, %v15658_v54 }
 0x1d2   : > { %v2180_v10 = vadd.f32 %v15649_v29, %v2179_v32  ;;  %v2303_v0 = vmax.f32 %v2177_v50, 0.0  ;;  %v2036_v1 = vsel %vm18582_vm12, %v2003_v46, %v1773_v21 }
 0x1d3   : > { %v2306_v28 = vmax.f32 %v2188_v31, 0.0 }
 0x1d4   : > { %v2304_v7 = vmax.f32 %v2180_v10, 0.0  ;;  %v15672_v4 = vpop.permute.xlu1 %1806 }
 0x1d5   : > { %v2346_v60 = vpack.c.bf16 %v2306_v28, %v2305_v58  ;;  %v1805_v51 = vpop.permute.xlu0 %1804  ;;  %v2071_v13 = vsel %vm18581_vm13, %v2038_v19, %v15672_v4  ;;  %v14187_v28 = vld [vmem:[%s14678_s17] sm:$0xff]  }
 0x1d6   : > { %v2345_v48 = vpack.c.bf16 %v2304_v7, %v2303_v0  ;;  %v2069_v20 = vsel %vm18581_vm13, %v2036_v1, %v1805_v51  ;;  %13915 = vmatprep.subr.bf16.mxu1 %v14187_v28  ;;  %v14188_v1 = vld [vmem:[%s14678_s17 + $0x8] sm:$0xff]  }
 0x1d7   : > { %v2369_v5 = vshrl.u32 %v2346_v60, 16  ;;  %13911 = vmatprep.mubr.msk.bf16.mxu0 %vm18580_vm14, %v2069_v20  ;;  %v2372_v56 = vshll.u32 %v2346_v60, 16  ;;  %13916 = vmatpush3.bf16.msra.mxu1 %v14187_v28 }
 0x1d8   : > { %v2362_v15 = vshrl.u32 %v2345_v48, 16  ;;  %13912 = vmatmul.mubr.msk.bf16.gmra.mrb[28].mxu0 %vm18580_vm14, %v2071_v13  ;;  %v2365_v24 = vshll.u32 %v2345_v48, 16  ;;  %13917 = vmatprep.subr.bf16.mxu1 %v14188_v1 }
 0x1d9   : > { %v2371_v59 = vrot.slane %v2369_v5, 7  ;;  %v14189_v5 = vld [vmem:[%s14678_s17 + $0x10] sm:$0xff]  }
 0x1da   : > { %v2364_v16 = vrot.slane %v2362_v15, 7 }
 0x1db   : > { %v2374_v38 = vor.u32 %v2372_v56, %v2371_v59  ;;  %v2522_v55 = vsel %vm14881_vm2, %v2371_v59, 0  ;;  %13918 = vmatpush3.bf16.msra.mxu1 %v14188_v1 }
 0x1dc   : > { %v2367_v18 = vor.u32 %v2365_v24, %v2364_v16  ;;  %v2751_v40 = vrot.slane %v2522_v55, 1  ;;  %v2521_v6 = vsel %vm14881_vm2, %v2364_v16, 0  ;;  %v2557_v47 = vshll.u32 %v2522_v55, 16  ;;  %13919 = vmatprep.subr.bf16.mxu1 %v14189_v5  ;;  %v14190_v24 = vld [vmem:[%s14678_s17 + $0x18] sm:$0xff]  }
 0x1dd   : > { %v15684_v11 = vsel %vm14881_vm2, 0, %v2374_v38  ;;  %v2748_v30 = vrot.slane %v2521_v6, 1  ;;  %v2545_v14 = vshll.u32 %v2521_v6, 16 }
 0x1de   : > { %2871 = vrot.lane.b32.xlu1 %v15684_v11, %s18633_s2  ;;  %2965 = vrot.lane.b32.xlu0 %v15684_v11, %s18635_s5  ;;  %v2750_v49 = vrot.slane %v15684_v11, 1  ;;  %v15693_v26 = vsel %vm14881_vm2, 0, %v2367_v18  ;;  %v2552_v52 = vshll.u32 %v15684_v11, 16  ;;  %v2550_v45 = vshrl.u32 %v15684_v11, 16 }
 0x1df   : > { %v2747_v43 = vrot.slane %v15693_v26, 1  ;;  %v2559_v35 = vrot.slane %v2557_v47, 1  ;;  %v2540_v61 = vshll.u32 %v15693_v26, 16  ;;  %v2538_v39 = vshrl.u32 %v15693_v26, 16  ;;  %13920 = vmatpush3.bf16.msra.mxu1 %v14189_v5 }
 0x1e0   : > { %v2752_v53 = vsel %vm1486_vm3, %v2750_v49, %v2751_v40  ;;  %v2554_v57 = vrot.slane %v2552_v52, 1  ;;  %v2547_v37 = vrot.slane %v2545_v14, 1  ;;  %13921 = vmatprep.subr.bf16.mxu1 %v14190_v24  ;;  %v14191_v52 = vld [vmem:[%s14678_s17 + $0x20] ss:$0 sps:$4 sm:$0xff]  }
 0x1e1   : > { %v2749_v22 = vsel %vm1486_vm3, %v2747_v43, %v2748_v30  ;;  %v2542_v62 = vrot.slane %v2540_v61, 1 }
 0x1e2   : > { %2935 = vrot.lane.b32.xlu1 %v2752_v53, %s18634_s22  ;;  %2869 = vrot.lane.b32.xlu0 %v15693_v26, %s18633_s2  ;;  %v2555_v27 = vor.u32 %v2554_v57, %v2550_v45  ;;  %v3370_v57 = vsel %vm2138_vm5, %v14191_v52, 0 }
 0x1e3   : > { %v2543_v25 = vor.u32 %v2542_v62, %v2538_v39  ;;  %13922 = vmatpush3.bf16.msra.mxu1 %v14190_v24 }
 0x1e4   : > { %v2560_v8 = vsel %vm1261_vm4, %v2555_v27, %v2559_v35  ;;  %14092 = vmatprep.subr.msk.bf16.mxu1 %vm2138_vm5, %v14191_v52  ;;  %v18656_v27 = vmov 0  }
 0x1e5   : > { %v2548_v42 = vsel %vm1261_vm4, %v2543_v25, %v2547_v37 }
 0x1e6   : > { %2839 = vrot.lane.b32.xlu1 %v2749_v22, %s18632_s16  ;;  %3025 = vrot.lane.b32.xlu0 %v2752_v53, %s18638_s11 }
 0x1e7   : > { %13924 = vmatpush3.bf16.msra.mxu1 %v3370_v57 }
 0x1e8   : > { %5807 = vmatprep.subr.bf16.mxu1 %v18656_v27 }
 0x1ea   : > { %2903 = vrot.lane.b32.xlu1 %v2560_v8, %s18639_s18  ;;  %2841 = vrot.lane.b32.xlu0 %v2752_v53, %s18632_s16 }
 0x1ee   : > { %2811 = vrot.lane.b32.xlu1 %v2560_v8, %s18637_s26  ;;  %v13889_v33 = vpop.f32.mrb[4].mxu0  ;;  %2933 = vrot.lane.b32.xlu0 %v2749_v22, %s18634_s22 }
 0x1ef   : > { %v2201_v41 = vadd.f32 %v13889_v33, %v15649_v29  ;;  %v2192_v9 = vpop.f32.mrb[5].mxu0 }
 0x1f0   : > { %v2193_v36 = vadd.f32 %v15649_v29, %v2192_v9  ;;  %v13890_v50 = vpop.f32.mrb[6].mxu0 }
 0x1f1   : > { %v2204_v63 = vadd.f32 %v13890_v50, %v15649_v29  ;;  %v2195_v17 = vpop.f32.mrb[7].mxu0  ;;  %v2309_v32 = vmax.f32 %v2201_v41, 0.0 }
 0x1f2   : > { %v2196_v31 = vadd.f32 %v15649_v29, %v2195_v17  ;;  %2995 = vrot.lane.b32.xlu0 %v2560_v8, %s18636_s9  ;;  %v2307_v23 = vmax.f32 %v2193_v36, 0.0 }
 0x1f3   : > { %v2310_v21 = vmax.f32 %v2204_v63, 0.0 }
 0x1f4   : > { %v2308_v10 = vmax.f32 %v2196_v31, 0.0 }
 0x1f5   : > { %v2348_v34 = vpack.c.bf16 %v2310_v21, %v2309_v32 }
 0x1f6   : > { %v2347_v58 = vpack.c.bf16 %v2308_v10, %v2307_v23  ;;  %2809 = vrot.lane.b32.xlu0 %v2548_v42, %s18637_s26 }
 0x1f7   : > { %v2383_v46 = vshrl.u32 %v2348_v34, 16  ;;  %v2386_v7 = vshll.u32 %v2348_v34, 16 }
 0x1f8   : > { %v2376_v0 = vshrl.u32 %v2347_v58, 16  ;;  %v2379_v13 = vshll.u32 %v2347_v58, 16 }
 0x1f9   : > { %v2385_v19 = vrot.slane %v2383_v46, 7 }
 0x1fa   : > { %v2378_v60 = vrot.slane %v2376_v0, 7  ;;  %2901 = vrot.lane.b32.xlu0 %v2548_v42, %s18639_s18 }
 0x1fb   : > { %v2388_v51 = vor.u32 %v2386_v7, %v2385_v19  ;;  %v2524_v15 = vsel %vm14881_vm2, %v2385_v19, 0 }
 0x1fc   : > { %v2381_v48 = vor.u32 %v2379_v13, %v2378_v60  ;;  %v2757_v38 = vrot.slane %v2524_v15, 1  ;;  %v2523_v55 = vsel %vm14881_vm2, %v2378_v60, 0  ;;  %v2581_v43 = vshll.u32 %v2524_v15, 16 }
 0x1fd   : > { %v15726_v20 = vsel %vm14881_vm2, 0, %v2388_v51  ;;  %v2754_v6 = vrot.slane %v2523_v55, 1  ;;  %v2569_v9 = vshll.u32 %v2523_v55, 16 }
 0x1fe   : > { %2875 = vrot.lane.b32.xlu1 %v15726_v20, %s18633_s2  ;;  %2969 = vrot.lane.b32.xlu0 %v15726_v20, %s18635_s5  ;;  %v15737_v59 = vsel %vm14881_vm2, 0, %v2381_v48  ;;  %v2756_v56 = vrot.slane %v15726_v20, 1  ;;  %v2576_v16 = vshll.u32 %v15726_v20, 16  ;;  %v2574_v53 = vshrl.u32 %v15726_v20, 16 }
 0x1ff   : > { %v2753_v49 = vrot.slane %v15737_v59, 1  ;;  %v2564_v47 = vshll.u32 %v15737_v59, 16  ;;  %v2583_v22 = vrot.slane %v2581_v43, 1  ;;  %v2562_v41 = vshrl.u32 %v15737_v59, 16 }
 0x200   : > { %v2758_v18 = vsel %vm1486_vm3, %v2756_v56, %v2757_v38  ;;  %v2578_v40 = vrot.slane %v2576_v16, 1  ;;  %v2571_v32 = vrot.slane %v2569_v9, 1 }
 0x201   : > { %v2755_v30 = vsel %vm1486_vm3, %v2753_v49, %v2754_v6  ;;  %v2566_v8 = vrot.slane %v2564_v47, 1 }
 0x202   : > { %2967 = vrot.lane.b32.xlu1 %v15737_v59, %s18635_s5  ;;  %2873 = vrot.lane.b32.xlu0 %v15737_v59, %s18633_s2  ;;  %v2579_v45 = vor.u32 %v2578_v40, %v2574_v53 }
 0x203   : > { %v2567_v63 = vor.u32 %v2566_v8, %v2562_v41 }
 0x204   : > { %v2584_v35 = vsel %vm1261_vm4, %v2579_v45, %v2583_v22 }
 0x205   : > { %v2572_v10 = vsel %vm1261_vm4, %v2567_v63, %v2571_v32 }
 0x206   : > { %2939 = vrot.lane.b32.xlu1 %v2758_v18, %s18634_s22  ;;  %3029 = vrot.lane.b32.xlu0 %v2758_v18, %s18638_s11 }
 0x20a   : > { %2843 = vrot.lane.b32.xlu1 %v2755_v30, %s18632_s16  ;;  %2845 = vrot.lane.b32.xlu0 %v2758_v18, %s18632_s16 }
 0x20e   : > { %2907 = vrot.lane.b32.xlu1 %v2584_v35, %s18639_s18  ;;  %v13893_v61 = vpop.f32.mrb[8].mxu0  ;;  %3027 = vrot.lane.b32.xlu0 %v2755_v30, %s18638_s11 }
 0x20f   : > { %v2217_v62 = vadd.f32 %v13893_v61, %v15649_v29  ;;  %v2208_v33 = vpop.f32.mrb[9].mxu0 }
 0x210   : > { %v2209_v39 = vadd.f32 %v15649_v29, %v2208_v33  ;;  %v13894_v14 = vpop.f32.mrb[10].mxu0 }
 0x211   : > { %v2220_v36 = vadd.f32 %v13894_v14, %v15649_v29  ;;  %v2211_v50 = vpop.f32.mrb[11].mxu0  ;;  %v2313_v25 = vmax.f32 %v2217_v62, 0.0 }
 0x212   : > { %v2212_v17 = vadd.f32 %v15649_v29, %v2211_v50  ;;  %2815 = vrot.lane.b32.xlu1 %v2584_v35, %s18637_s26  ;;  %2937 = vrot.lane.b32.xlu0 %v2755_v30, %s18634_s22  ;;  %v2311_v21 = vmax.f32 %v2209_v39, 0.0 }
 0x213   : > { %v2314_v31 = vmax.f32 %v2220_v36, 0.0 }
 0x214   : > { %v2312_v37 = vmax.f32 %v2212_v17, 0.0 }
 0x215   : > { %v2350_v23 = vpack.c.bf16 %v2314_v31, %v2313_v25 }
 0x216   : > { %v2349_v34 = vpack.c.bf16 %v2312_v37, %v2311_v21  ;;  %2997 = vrot.lane.b32.xlu1 %v2572_v10, %s18636_s9  ;;  %2999 = vrot.lane.b32.xlu0 %v2584_v35, %s18636_s9 }
 0x217   : > { %v2397_v42 = vshrl.u32 %v2350_v23, 16  ;;  %v2400_v46 = vshll.u32 %v2350_v23, 16 }
 0x218   : > { %v2390_v58 = vshrl.u32 %v2349_v34, 16  ;;  %v2393_v7 = vshll.u32 %v2349_v34, 16 }
 0x219   : > { %v2399_v28 = vrot.slane %v2397_v42, 7 }
 0x21a   : > { %v2392_v0 = vrot.slane %v2390_v58, 7  ;;  %2813 = vrot.lane.b32.xlu1 %v2572_v10, %s18637_s26  ;;  %2905 = vrot.lane.b32.xlu0 %v2572_v10, %s18639_s18 }
 0x21b   : > { %v2402_v19 = vor.u32 %v2400_v46, %v2399_v28  ;;  %v2526_v51 = vsel %vm14881_vm2, %v2399_v28, 0 }
 0x21c   : > { %v2395_v60 = vor.u32 %v2393_v7, %v2392_v0  ;;  %v2763_v15 = vrot.slane %v2526_v51, 1  ;;  %v2525_v56 = vsel %vm14881_vm2, %v2392_v0, 0  ;;  %v2605_v49 = vshll.u32 %v2526_v51, 16 }
 0x21d   : > { %v15778_v1 = vsel %vm14881_vm2, 0, %v2402_v19  ;;  %v2760_v55 = vrot.slane %v2525_v56, 1  ;;  %v2593_v35 = vshll.u32 %v2525_v56, 16 }
 0x21e   : > { %2879 = vrot.lane.b32.xlu1 %v15778_v1, %s18633_s2  ;;  %2973 = vrot.lane.b32.xlu0 %v15778_v1, %s18635_s5  ;;  %v15788_v13 = vsel %vm14881_vm2, 0, %v2395_v60  ;;  %v2762_v48 = vrot.slane %v15778_v1, 1  ;;  %v2600_v5 = vshll.u32 %v15778_v1, 16  ;;  %v2598_v18 = vshrl.u32 %v15778_v1, 16 }
 0x21f   : > { %v2759_v24 = vrot.slane %v15788_v13, 1  ;;  %v2588_v6 = vshll.u32 %v15788_v13, 16  ;;  %v2607_v53 = vrot.slane %v2605_v49, 1  ;;  %v2586_v22 = vshrl.u32 %v15788_v13, 16 }
 0x220   : > { %v2764_v16 = vsel %vm1486_vm3, %v2762_v48, %v2763_v15  ;;  %v2602_v38 = vrot.slane %v2600_v5, 1  ;;  %v2595_v36 = vrot.slane %v2593_v35, 1 }
 0x221   : > { %v2761_v40 = vsel %vm1486_vm3, %v2759_v24, %v2760_v55  ;;  %v2590_v57 = vrot.slane %v2588_v6, 1 }
 0x222   : > { %2971 = vrot.lane.b32.xlu1 %v15788_v13, %s18635_s5  ;;  %2877 = vrot.lane.b32.xlu0 %v15788_v13, %s18633_s2  ;;  %v2603_v52 = vor.u32 %v2602_v38, %v2598_v18 }
 0x223   : > { %v2591_v41 = vor.u32 %v2590_v57, %v2586_v22 }
 0x224   : > { %v2608_v43 = vsel %vm1261_vm4, %v2603_v52, %v2607_v53 }
 0x225   : > { %v2596_v25 = vsel %vm1261_vm4, %v2591_v41, %v2595_v36 }
 0x226   : > { %2943 = vrot.lane.b32.xlu1 %v2764_v16, %s18634_s22  ;;  %3033 = vrot.lane.b32.xlu0 %v2764_v16, %s18638_s11 }
 0x22a   : > { %2847 = vrot.lane.b32.xlu1 %v2761_v40, %s18632_s16  ;;  %2849 = vrot.lane.b32.xlu0 %v2764_v16, %s18632_s16 }
 0x22e   : > { %2911 = vrot.lane.b32.xlu1 %v2608_v43, %s18639_s18  ;;  %v13897_v30 = vpop.f32.mrb[12].mxu0  ;;  %3031 = vrot.lane.b32.xlu0 %v2761_v40, %s18638_s11 }
 0x22f   : > { %v2233_v45 = vadd.f32 %v13897_v30, %v15649_v29  ;;  %v2224_v47 = vpop.f32.mrb[13].mxu0 }
 0x230   : > { %v2225_v8 = vadd.f32 %v15649_v29, %v2224_v47  ;;  %v13898_v61 = vpop.f32.mrb[14].mxu0 }
 0x231   : > { %v2236_v62 = vadd.f32 %v13898_v61, %v15649_v29  ;;  %v2227_v33 = vpop.f32.mrb[15].mxu0  ;;  %v2317_v39 = vmax.f32 %v2233_v45, 0.0 }
 0x232   : > { %v2228_v9 = vadd.f32 %v15649_v29, %v2227_v33  ;;  %2819 = vrot.lane.b32.xlu1 %v2608_v43, %s18637_s26  ;;  %2941 = vrot.lane.b32.xlu0 %v2761_v40, %s18634_s22  ;;  %v2315_v50 = vmax.f32 %v2225_v8, 0.0 }
 0x233   : > { %v2318_v14 = vmax.f32 %v2236_v62, 0.0 }
 0x234   : > { %v2316_v63 = vmax.f32 %v2228_v9, 0.0 }
 0x235   : > { %v2352_v17 = vpack.c.bf16 %v2318_v14, %v2317_v39 }
 0x236   : > { %v2351_v31 = vpack.c.bf16 %v2316_v63, %v2315_v50  ;;  %3001 = vrot.lane.b32.xlu1 %v2596_v25, %s18636_s9  ;;  %3003 = vrot.lane.b32.xlu0 %v2608_v43, %s18636_s9 }
 0x237   : > { %v2411_v32 = vshrl.u32 %v2352_v17, 16  ;;  %v2414_v23 = vshll.u32 %v2352_v17, 16 }
 0x238   : > { %v2404_v21 = vshrl.u32 %v2351_v31, 16  ;;  %v2407_v42 = vshll.u32 %v2351_v31, 16 }
 0x239   : > { %v2413_v37 = vrot.slane %v2411_v32, 7 }
 0x23a   : > { %v2406_v10 = vrot.slane %v2404_v21, 7  ;;  %2817 = vrot.lane.b32.xlu1 %v2596_v25, %s18637_s26  ;;  %2909 = vrot.lane.b32.xlu0 %v2596_v25, %s18639_s18 }
 0x23b   : > { %v2416_v34 = vor.u32 %v2414_v23, %v2413_v37  ;;  %v2528_v46 = vsel %vm14881_vm2, %v2413_v37, 0 }
 0x23c   : > { %v2409_v58 = vor.u32 %v2407_v42, %v2406_v10  ;;  %v2769_v60 = vrot.slane %v2528_v46, 1  ;;  %v2527_v51 = vsel %vm14881_vm2, %v2406_v10, 0  ;;  %v2629_v24 = vshll.u32 %v2528_v46, 16 }
 0x23d   : > { %v15824_v28 = vsel %vm14881_vm2, 0, %v2416_v34  ;;  %v2766_v56 = vrot.slane %v2527_v51, 1  ;;  %v2617_v30 = vshll.u32 %v2527_v51, 16 }
 0x23e   : > { %2883 = vrot.lane.b32.xlu1 %v15824_v28, %s18633_s2  ;;  %2977 = vrot.lane.b32.xlu0 %v15824_v28, %s18635_s5  ;;  %v15834_v0 = vsel %vm14881_vm2, 0, %v2409_v58  ;;  %v2768_v19 = vrot.slane %v15824_v28, 1  ;;  %v2624_v7 = vshll.u32 %v15824_v28, 16  ;;  %v2622_v16 = vshrl.u32 %v15824_v28, 16 }
 0x23f   : > { %v2765_v5 = vrot.slane %v15834_v0, 1  ;;  %v2612_v18 = vshll.u32 %v15834_v0, 16  ;;  %v2631_v49 = vrot.slane %v2629_v24, 1  ;;  %v2610_v57 = vshrl.u32 %v15834_v0, 16 }
 0x240   : > { %v2770_v48 = vsel %vm1486_vm3, %v2768_v19, %v2769_v60  ;;  %v2626_v15 = vrot.slane %v2624_v7, 1  ;;  %v2619_v9 = vrot.slane %v2617_v30, 1 }
 0x241   : > { %v2767_v38 = vsel %vm1486_vm3, %v2765_v5, %v2766_v56  ;;  %v2614_v52 = vrot.slane %v2612_v18, 1 }
 0x242   : > { %2975 = vrot.lane.b32.xlu1 %v15834_v0, %s18635_s5  ;;  %2881 = vrot.lane.b32.xlu0 %v15834_v0, %s18633_s2  ;;  %v2627_v55 = vor.u32 %v2626_v15, %v2622_v16 }
 0x243   : > { %v2615_v61 = vor.u32 %v2614_v52, %v2610_v57 }
 0x244   : > { %v2632_v40 = vsel %vm1261_vm4, %v2627_v55, %v2631_v49 }
 0x245   : > { %v2620_v17 = vsel %vm1261_vm4, %v2615_v61, %v2619_v9 }
 0x246   : > { %2947 = vrot.lane.b32.xlu1 %v2770_v48, %s18634_s22  ;;  %3037 = vrot.lane.b32.xlu0 %v2770_v48, %s18638_s11 }
 0x24a   : > { %2851 = vrot.lane.b32.xlu1 %v2767_v38, %s18632_s16  ;;  %2853 = vrot.lane.b32.xlu0 %v2770_v48, %s18632_s16 }
 0x24e   : > { %2915 = vrot.lane.b32.xlu1 %v2632_v40, %s18639_s18  ;;  %v13901_v6 = vpop.f32.mrb[16].mxu0  ;;  %3035 = vrot.lane.b32.xlu0 %v2767_v38, %s18638_s11 }
 0x24f   : > { %v2249_v53 = vadd.f32 %v13901_v6, %v15649_v29  ;;  %v2240_v43 = vpop.f32.mrb[17].mxu0 }
 0x250   : > { %v2241_v45 = vadd.f32 %v15649_v29, %v2240_v43  ;;  %v13902_v47 = vpop.f32.mrb[18].mxu0  ;;  %v15860_v35 = vpop.permute.xlu0 %2965 }
 0x251   : > { %v2252_v22 = vadd.f32 %v13902_v47, %v15649_v29  ;;  %v2243_v8 = vpop.f32.mrb[19].mxu0  ;;  %v2321_v33 = vmax.f32 %v2249_v53, 0.0  ;;  %v15865_v14 = vpop.permute.xlu1 %2871 }
 0x252   : > { %v2244_v62 = vadd.f32 %v15649_v29, %v2243_v8  ;;  %2823 = vrot.lane.b32.xlu1 %v2632_v40, %s18637_s26  ;;  %2945 = vrot.lane.b32.xlu0 %v2767_v38, %s18634_s22  ;;  %v2319_v39 = vmax.f32 %v2241_v45, 0.0 }
 0x253   : > { %v2322_v41 = vmax.f32 %v2252_v22, 0.0 }
 0x254   : > { %v2320_v36 = vmax.f32 %v2244_v62, 0.0  ;;  %v2870_v63 = vpop.permute.xlu0 %2869 }
 0x255   : > { %v2354_v50 = vpack.c.bf16 %v2322_v41, %v2321_v33  ;;  %v15872_v34 = vpop.permute.xlu1 %2935  ;;  %v3116_v8 = vsel %vm18586_vm8, %v15364_v12, %v2870_v63 }
 0x256   : > { %v2353_v25 = vpack.c.bf16 %v2320_v36, %v2319_v39  ;;  %3005 = vrot.lane.b32.xlu1 %v2620_v17, %s18636_s9  ;;  %3007 = vrot.lane.b32.xlu0 %v2632_v40, %s18636_s9 }
 0x257   : > { %v2425_v31 = vshrl.u32 %v2354_v50, 16  ;;  %v2428_v37 = vshll.u32 %v2354_v50, 16 }
 0x258   : > { %v2418_v32 = vshrl.u32 %v2353_v25, 16  ;;  %v15870_v23 = vpop.permute.xlu0 %3025  ;;  %v2421_v58 = vshll.u32 %v2353_v25, 16 }
 0x259   : > { %v2427_v21 = vrot.slane %v2425_v31, 7  ;;  %v15888_v51 = vpop.permute.xlu1 %2839 }
 0x25a   : > { %v2420_v10 = vrot.slane %v2418_v32, 7  ;;  %2821 = vrot.lane.b32.xlu1 %v2620_v17, %s18637_s26  ;;  %2913 = vrot.lane.b32.xlu0 %v2620_v17, %s18639_s18 }
 0x25b   : > { %v2430_v42 = vor.u32 %v2428_v37, %v2427_v21  ;;  %v2530_v60 = vsel %vm14881_vm2, %v2427_v21, 0 }
 0x25c   : > { %v2423_v46 = vor.u32 %v2421_v58, %v2420_v10  ;;  %v15876_v19 = vpop.permute.xlu0 %2841  ;;  %v2775_v16 = vrot.slane %v2530_v60, 1  ;;  %v2529_v24 = vsel %vm14881_vm2, %v2420_v10, 0  ;;  %v2653_v53 = vshll.u32 %v2530_v60, 16 }
 0x25d   : > { %v15880_v7 = vsel %vm14881_vm2, 0, %v2430_v42  ;;  %v15904_v40 = vpop.permute.xlu1 %2903  ;;  %v2772_v52 = vrot.slane %v2529_v24, 1  ;;  %v2641_v25 = vshll.u32 %v2529_v24, 16 }
 0x25e   : > { %2887 = vrot.lane.b32.xlu1 %v15880_v7, %s18633_s2  ;;  %2981 = vrot.lane.b32.xlu0 %v15880_v7, %s18635_s5  ;;  %v15892_v5 = vsel %vm14881_vm2, 0, %v2423_v46  ;;  %v2774_v15 = vrot.slane %v15880_v7, 1  ;;  %v2648_v56 = vshll.u32 %v15880_v7, 16  ;;  %v2646_v6 = vshrl.u32 %v15880_v7, 16 }
 0x25f   : > { %v2771_v18 = vrot.slane %v15892_v5, 1  ;;  %v2636_v45 = vshll.u32 %v15892_v5, 16  ;;  %v2655_v47 = vrot.slane %v2653_v53, 1  ;;  %v2634_v17 = vshrl.u32 %v15892_v5, 16 }
 0x260   : > { %v2934_v48 = vpop.permute.xlu0 %2933  ;;  %v2776_v55 = vsel %vm1486_vm3, %v2774_v15, %v2775_v16  ;;  %v2650_v49 = vrot.slane %v2648_v56, 1 }
 0x261   : > { %v2773_v57 = vsel %vm1486_vm3, %v2771_v18, %v2772_v52  ;;  %v15913_v22 = vpop.permute.xlu1 %2811  ;;  %v2638_v33 = vrot.slane %v2636_v45, 1 }
 0x262   : > { %2979 = vrot.lane.b32.xlu1 %v15892_v5, %s18635_s5  ;;  %2885 = vrot.lane.b32.xlu0 %v15892_v5, %s18633_s2  ;;  %v2651_v30 = vor.u32 %v2650_v49, %v2646_v6 }
 0x263   : > { %v2639_v58 = vor.u32 %v2638_v33, %v2634_v17 }
 0x264   : > { %v2996_v38 = vpop.permute.xlu0 %2995  ;;  %v2656_v62 = vsel %vm1261_vm4, %v2651_v30, %v2655_v47 }
 0x266   : > { %2951 = vrot.lane.b32.xlu1 %v2776_v55, %s18634_s22  ;;  %3041 = vrot.lane.b32.xlu0 %v2776_v55, %s18638_s11 }
 0x268   : > { %v2810_v43 = vpop.permute.xlu0 %2809 }
 0x269   : > { %v3056_v47 = vsel %vm1808_vm6, %v15693_v26, %v2810_v43 }
 0x26a   : > { %2855 = vrot.lane.b32.xlu1 %v2773_v57, %s18632_s16  ;;  %2857 = vrot.lane.b32.xlu0 %v2776_v55, %s18632_s16 }
 0x26c   : > { %v2902_v61 = vpop.permute.xlu0 %2901 }
 0x26d   : > { %v3148_v41 = vsel %vm18585_vm9, %v3116_v8, %v2902_v61 }
 0x26e   : > { %2919 = vrot.lane.b32.xlu1 %v2656_v62, %s18639_s18  ;;  %v13905_v9 = vpop.f32.mrb[20].mxu0  ;;  %3039 = vrot.lane.b32.xlu0 %v2773_v57, %s18638_s11  ;;  %v3180_v39 = vsel %vm18584_vm10, %v3148_v41, %v2934_v48 }
 0x26f   : > { %v2265_v36 = vadd.f32 %v13905_v9, %v15649_v29  ;;  %v2256_v50 = vpop.f32.mrb[21].mxu0  ;;  %v3212_v32 = vsel %vm18583_vm11, %v3180_v39, %v15860_v35  ;;  %v2643_v35 = vrot.slane %v2641_v25, 1  ;;  %v3086_v9 = vsel %vm18588_vm7, %v3056_v47, %v15888_v51 }
 0x270   : > { %v2257_v12 = vadd.f32 %v15649_v29, %v2256_v50  ;;  %v15925_v63 = vpop.permute.xlu1 %2875  ;;  %v13906_v31 = vpop.f32.mrb[22].mxu0  ;;  %v3243_v42 = vsel %vm18582_vm12, %v3212_v32, %v2996_v38  ;;  %v3118_v25 = vsel %vm18586_vm8, %v3086_v9, %v15865_v14 }
 0x271   : > { %v2268_v21 = vadd.f32 %v13906_v31, %v15649_v29  ;;  %v15930_v37 = vpop.permute.xlu0 %2969  ;;  %v2259_v10 = vpop.f32.mrb[23].mxu0  ;;  %v3274_v60 = vsel %vm18581_vm13, %v3243_v42, %v15870_v23  ;;  %v2325_v48 = vmax.f32 %v2265_v36, 0.0  ;;  %v2644_v18 = vsel %vm1261_vm4, %v2639_v58, %v2643_v35 }
 0x272   : > { %v2260_v46 = vadd.f32 %v15649_v29, %v2259_v10  ;;  %2827 = vrot.lane.b32.xlu1 %v2656_v62, %s18637_s26  ;;  %2949 = vrot.lane.b32.xlu0 %v2773_v57, %s18634_s22  ;;  %v2323_v56 = vmax.f32 %v2257_v12, 0.0  ;;  %v3150_v42 = vsel %vm18585_vm9, %v3118_v25, %v15904_v40  ;;  %v3058_v40 = vsel %vm1808_vm6, %v15684_v11, %v15913_v22 }
 0x273   : > { %v2326_v15 = vmax.f32 %v2268_v21, 0.0  ;;  %13925 = vmatprep.mubr.msk.bf16.mxu1 %vm18580_vm14, %v3274_v60  ;;  %v3088_v11 = vsel %vm18588_vm7, %v3058_v40, %v15876_v19 }
 0x274   : > { %v2324_v16 = vmax.f32 %v2260_v46, 0.0  ;;  %v2968_v24 = vpop.permute.xlu1 %2967 }
 0x275   : > { %v2356_v55 = vpack.c.bf16 %v2326_v15, %v2325_v48  ;;  %v15939_v38 = vpop.permute.xlu0 %2873  ;;  %v3182_v48 = vsel %vm18584_vm10, %v3150_v42, %v15872_v34 }
 0x276   : > { %v2355_v49 = vpack.c.bf16 %v2324_v16, %v2323_v56  ;;  %3009 = vrot.lane.b32.xlu1 %v2644_v18, %s18636_s9  ;;  %3011 = vrot.lane.b32.xlu0 %v2656_v62, %s18636_s9  ;;  %v3214_v35 = vsel %vm18583_vm11, %v3182_v48, %v2968_v24 }
 0x277   : > { %v2439_v52 = vshrl.u32 %v2356_v55, 16  ;;  %v2442_v8 = vshll.u32 %v2356_v55, 16 }
 0x278   : > { %v2432_v23 = vshrl.u32 %v2355_v49, 16  ;;  %v15944_v6 = vpop.permute.xlu1 %2939  ;;  %v2435_v45 = vshll.u32 %v2355_v49, 16 }
 0x279   : > { %v15946_v53 = vpop.permute.xlu0 %3029  ;;  %v2441_v57 = vrot.slane %v2439_v52, 7 }
 0x27a   : > { %v2434_v30 = vrot.slane %v2432_v23, 7  ;;  %2825 = vrot.lane.b32.xlu1 %v2644_v18, %s18637_s26  ;;  %2917 = vrot.lane.b32.xlu0 %v2644_v18, %s18639_s18 }
 0x27b   : > { %v2444_v39 = vor.u32 %v2442_v8, %v2441_v57  ;;  %v2532_v16 = vsel %vm14881_vm2, %v2441_v57, 0  ;;  %v3120_v57 = vsel %vm18586_vm8, %v3088_v11, %v15939_v38 }
 0x27c   : > { %v2437_v61 = vor.u32 %v2435_v45, %v2434_v30  ;;  %v2531_v62 = vsel %vm14881_vm2, %v2434_v30, 0  ;;  %v15954_v33 = vpop.permute.xlu1 %2843  ;;  %v2677_v23 = vshll.u32 %v2532_v16, 16 }
 0x27d   : > { %v15956_v41 = vpop.permute.xlu0 %2845  ;;  %v2778_v43 = vrot.slane %v2531_v62, 1  ;;  %v15976_v32 = vsel %vm14881_vm2, 0, %v2444_v39  ;;  %v2665_v10 = vshll.u32 %v2531_v62, 16 }
 0x27e   : > { %v15962_v36 = vsel %vm14881_vm2, 0, %v2437_v61  ;;  %v2672_v60 = vshll.u32 %v15976_v32, 16  ;;  %v2670_v24 = vshrl.u32 %v15976_v32, 16 }
 0x27f   : > { %2983 = vrot.lane.b32.xlu1 %v15962_v36, %s18635_s5  ;;  %v2777_v26 = vrot.slane %v15962_v36, 1  ;;  %v2660_v50 = vshll.u32 %v15962_v36, 16  ;;  %v2658_v21 = vshrl.u32 %v15962_v36, 16  ;;  %v2667_v15 = vrot.slane %v2665_v10, 1 }
 0x280   : > { %v15968_v17 = vpop.permute.xlu1 %2907  ;;  %v2674_v52 = vrot.slane %v2672_v60, 1  ;;  %v2780_v10 = vrot.slane %v15976_v32, 1 }
 0x281   : > { %v3028_v12 = vpop.permute.xlu0 %3027  ;;  %v2779_v51 = vsel %vm1486_vm3, %v2777_v26, %v2778_v43  ;;  %v2662_v31 = vrot.slane %v2660_v50, 1  ;;  %v2679_v43 = vrot.slane %v2677_v23, 1 }
 0x282   : > { %3043 = vrot.lane.b32.xlu0 %v2779_v51, %s18638_s11  ;;  %v2675_v8 = vor.u32 %v2674_v52, %v2670_v24 }
 0x283   : > { %2891 = vrot.lane.b32.xlu1 %v15976_v32, %s18633_s2  ;;  %v2663_v46 = vor.u32 %v2662_v31, %v2658_v21 }
 0x284   : > { %v15983_v14 = vpop.permute.xlu1 %2815  ;;  %v2680_v21 = vsel %vm1261_vm4, %v2675_v8, %v2679_v43 }
 0x285   : > { %v2938_v58 = vpop.permute.xlu0 %2937  ;;  %v2668_v49 = vsel %vm1261_vm4, %v2663_v46, %v2667_v15 }
 0x286   : > { %2889 = vrot.lane.b32.xlu0 %v15962_v36, %s18633_s2 }
 0x287   : > { %2859 = vrot.lane.b32.xlu1 %v2779_v51, %s18632_s16 }
 0x288   : > { %v2998_v56 = vpop.permute.xlu1 %2997 }
 0x289   : > { %v3245_v55 = vsel %vm18582_vm12, %v3214_v35, %v2998_v56  ;;  %v3000_v18 = vpop.permute.xlu0 %2999 }
 0x28a   : > { %2921 = vrot.lane.b32.xlu0 %v2668_v49, %s18639_s18  ;;  %v3276_v34 = vsel %vm18581_vm13, %v3245_v55, %v3028_v12 }
 0x28b   : > { %3013 = vrot.lane.b32.xlu1 %v2668_v49, %s18636_s9  ;;  %13926 = vmatmul.mubr.msk.bf16.vlgmr.msra.gmra.mrb[0].mxu1 %vm18580_vm14, %v3276_v34 }
 0x28c   : > { %v2814_v22 = vpop.permute.xlu1 %2813 }
 0x28d   : > { %v2906_v30 = vpop.permute.xlu0 %2905 }
 0x28e   : > { %v3152_v45 = vsel %vm18585_vm9, %v3120_v57, %v2906_v30  ;;  %v13909_v47 = vpop.f32.mrb[24].mxu0  ;;  %2953 = vrot.lane.b32.xlu0 %v2779_v51, %s18634_s22 }
 0x28f   : > { %v3184_v61 = vsel %vm18584_vm10, %v3152_v45, %v2938_v58  ;;  %v2281_v62 = vadd.f32 %v13909_v47, %v15649_v29  ;;  %2829 = vrot.lane.b32.xlu1 %v2668_v49, %s18637_s26  ;;  %v2272_v19 = vpop.f32.mrb[25].mxu0 }
 0x290   : > { %v3216_v9 = vsel %vm18583_vm11, %v3184_v61, %v15930_v37  ;;  %v2273_v39 = vadd.f32 %v15649_v29, %v2272_v19  ;;  %v16016_v38 = vpop.permute.xlu1 %2879  ;;  %v13910_v26 = vpop.f32.mrb[26].mxu0 }
 0x291   : > { %v2284_v50 = vadd.f32 %v13910_v26, %v15649_v29  ;;  %v16019_v25 = vpop.permute.xlu0 %2973  ;;  %v2275_v12 = vpop.f32.mrb[27].mxu0  ;;  %v3247_v51 = vsel %vm18582_vm12, %v3216_v9, %v3000_v18  ;;  %v2329_v42 = vmax.f32 %v2281_v62, 0.0 }
 0x292   : > { %v2276_v31 = vadd.f32 %v15649_v29, %v2275_v12  ;;  %2985 = vrot.lane.b32.xlu0 %v15976_v32, %s18635_s5  ;;  %v3278_v37 = vsel %vm18581_vm13, %v3247_v51, %v15946_v53  ;;  %v2327_v46 = vmax.f32 %v2273_v39, 0.0  ;;  %v2781_v29 = vrot.slane %v2532_v16, 1 }
 0x293   : > { %v2330_v58 = vmax.f32 %v2284_v50, 0.0  ;;  %13929 = vmatprep.mubr.msk.bf16.mxu1 %vm18580_vm14, %v3278_v37  ;;  %2923 = vrot.lane.b32.xlu1 %v2680_v21, %s18639_s18  ;;  %v3060_v16 = vsel %vm1808_vm6, %v15737_v59, %v2814_v22 }
 0x294   : > { %v2328_v60 = vmax.f32 %v2276_v31, 0.0  ;;  %v2972_v48 = vpop.permute.xlu1 %2971  ;;  %v2782_v53 = vsel %vm1486_vm3, %v2780_v10, %v2781_v29  ;;  %v3090_v57 = vsel %vm18588_vm7, %v3060_v16, %v15954_v33 }
 0x295   : > { %v2358_v15 = vpack.c.bf16 %v2330_v58, %v2329_v42  ;;  %v2878_v35 = vpop.permute.xlu0 %2877  ;;  %v3122_v62 = vsel %vm18586_vm8, %v3090_v57, %v15925_v63 }
 0x296   : > { %v2357_v56 = vpack.c.bf16 %v2328_v60, %v2327_v46  ;;  %3015 = vrot.lane.b32.xlu0 %v2680_v21, %s18636_s9  ;;  %v3154_v51 = vsel %vm18585_vm9, %v3122_v62, %v15968_v17  ;;  %v3062_v17 = vsel %vm1808_vm6, %v15726_v20, %v15983_v14  ;;  %v14539_v14 = vld [vmem:[%s18620_s13] ss:$0 sm:$0xff] }
 0x297   : > { %2955 = vrot.lane.b32.xlu1 %v2782_v53, %s18634_s22  ;;  %v2453_v30 = vshrl.u32 %v2358_v15, 16  ;;  %v2456_v12 = vshll.u32 %v2358_v15, 16  ;;  %v3186_v42 = vsel %vm18584_vm10, %v3154_v51, %v15944_v6  ;;  %v3092_v20 = vsel %vm18588_vm7, %v3062_v17, %v15956_v41 }
 0x298   : > { %v2446_v40 = vshrl.u32 %v2357_v56, 16  ;;  %v16034_v55 = vpop.permute.xlu1 %2943  ;;  %v2449_v34 = vshll.u32 %v2357_v56, 16  ;;  %v3218_v58 = vsel %vm18583_vm11, %v3186_v42, %v2972_v48 }
 0x299   : > { %v16036_v18 = vpop.permute.xlu0 %3033  ;;  %v2455_v26 = vrot.slane %v2453_v30, 7 }
 0x29a   : > { %v2448_v49 = vrot.slane %v2446_v40, 7  ;;  %3045 = vrot.lane.b32.xlu0 %v2782_v53, %s18638_s11 }
 0x29b   : > { %v2458_v10 = vor.u32 %v2456_v12, %v2455_v26 }
 0x29c   : > { %v2451_v52 = vor.u32 %v2449_v34, %v2448_v49  ;;  %v2533_v11 = vsel %vm14881_vm2, %v2448_v49, 0  ;;  %v16043_v24 = vpop.permute.xlu1 %2847 }
 0x29d   : > { %v16045_v23 = vpop.permute.xlu0 %2849  ;;  %v2784_v22 = vrot.slane %v2533_v11, 1  ;;  %v2689_v8 = vshll.u32 %v2533_v11, 16  ;;  %v16084_v6 = vsel %vm14881_vm2, 0, %v2458_v10 }
 0x29e   : > { %v16051_v45 = vsel %vm14881_vm2, 0, %v2451_v52  ;;  %v2696_v52 = vshll.u32 %v16084_v6, 16 }
 0x29f   : > { %2987 = vrot.lane.b32.xlu1 %v16051_v45, %s18635_s5  ;;  %v2783_v59 = vrot.slane %v16051_v45, 1  ;;  %v2684_v47 = vshll.u32 %v16051_v45, 16  ;;  %v2682_v9 = vshrl.u32 %v16051_v45, 16  ;;  %v2691_v50 = vrot.slane %v2689_v8, 1 }
 0x2a0   : > { %v16057_v61 = vpop.permute.xlu1 %2911 }
 0x2a1   : > { %v3032_v33 = vpop.permute.xlu0 %3031  ;;  %v2785_v19 = vsel %vm1486_vm3, %v2783_v59, %v2784_v22  ;;  %v2686_v39 = vrot.slane %v2684_v47, 1  ;;  %v2534_v22 = vsel %vm14881_vm2, %v2455_v26, 0 }
 0x2a2   : > { %3047 = vrot.lane.b32.xlu0 %v2785_v19, %s18638_s11 }
 0x2a3   : > { %v2687_v43 = vor.u32 %v2686_v39, %v2682_v9 }
 0x2a4   : > { %v16066_v31 = vpop.permute.xlu1 %2819 }
 0x2a5   : > { %v2942_v37 = vpop.permute.xlu0 %2941  ;;  %v2692_v63 = vsel %vm1261_vm4, %v2687_v43, %v2691_v50  ;;  %v2698_v50 = vrot.slane %v2696_v52, 1 }
 0x2a6   : > { %3017 = vrot.lane.b32.xlu1 %v2692_v63, %s18636_s9  ;;  %2861 = vrot.lane.b32.xlu0 %v2782_v53, %s18632_s16 }
 0x2a8   : > { %v3002_v46 = vpop.permute.xlu1 %3001 }
 0x2a9   : > { %v3249_v60 = vsel %vm18582_vm12, %v3218_v58, %v3002_v46  ;;  %v3004_v29 = vpop.permute.xlu0 %3003 }
 0x2aa   : > { %2831 = vrot.lane.b32.xlu1 %v2680_v21, %s18637_s26  ;;  %2893 = vrot.lane.b32.xlu0 %v16051_v45, %s18633_s2  ;;  %v3280_v15 = vsel %vm18581_vm13, %v3249_v60, %v3032_v33  ;;  %v3124_v21 = vsel %vm18586_vm8, %v3092_v20, %v2878_v35 }
 0x2ab   : > { %v13913_v48 = vpop.f32.mrb[28].mxu0  ;;  %13930 = vmatmul.mubr.msk.bf16.gmra.mrb[4].mxu1 %vm18580_vm14, %v3280_v15 }
 0x2ac   : > { %v2297_v56 = vadd.f32 %v14539_v14, %v13913_v48  ;;  %v2818_v53 = vpop.permute.xlu1 %2817  ;;  %v2288_v40 = vpop.f32.mrb[29].mxu0  ;;  %v2786_v48 = vrot.slane %v16084_v6, 1 }
 0x2ad   : > { %v2289_v49 = vadd.f32 %v14539_v14, %v2288_v40  ;;  %v2910_v34 = vpop.permute.xlu0 %2909  ;;  %v13914_v16 = vpop.f32.mrb[30].mxu0  ;;  %v3064_v20 = vsel %vm1808_vm6, %v15788_v13, %v2818_v53 }
 0x2ae   : > { %v3156_v11 = vsel %vm18585_vm9, %v3124_v21, %v2910_v34  ;;  %v2300_v57 = vadd.f32 %v14539_v14, %v13914_v16  ;;  %2833 = vrot.lane.b32.xlu1 %v2692_v63, %s18637_s26  ;;  %v2291_v30 = vpop.f32.mrb[31].mxu0  ;;  %2925 = vrot.lane.b32.xlu0 %v2692_v63, %s18639_s18  ;;  %v2333_v35 = vmax.f32 %v2297_v56, 0.0  ;;  %v3094_v13 = vsel %vm18588_vm7, %v3064_v20, %v16043_v24 }
 0x2af   : > { %v3188_v41 = vsel %vm18584_vm10, %v3156_v11, %v2942_v37  ;;  %v2292_v59 = vadd.f32 %v14539_v14, %v2291_v30  ;;  %v2331_v33 = vmax.f32 %v2289_v49, 0.0  ;;  %v2701_v37 = vshll.u32 %v2534_v22, 16 }
 0x2b0   : > { %v3220_v47 = vsel %vm18583_vm11, %v3188_v41, %v16019_v25  ;;  %v2334_v8 = vmax.f32 %v2300_v57, 0.0  ;;  %v16100_v62 = vpop.permute.xlu1 %2883  ;;  %v2694_v25 = vshrl.u32 %v16084_v6, 16  ;;  %v2787_v14 = vrot.slane %v2534_v22, 1 }
 0x2b1   : > { %v2332_v9 = vmax.f32 %v2292_v59, 0.0  ;;  %v16102_v39 = vpop.permute.xlu0 %2977  ;;  %v3251_v43 = vsel %vm18582_vm12, %v3220_v47, %v3004_v29  ;;  %v2703_v17 = vrot.slane %v2701_v37, 1  ;;  %v3126_v22 = vsel %vm18586_vm8, %v3094_v13, %v16016_v38 }
 0x2b2   : > { %v2360_v12 = vpack.c.bf16 %v2334_v8, %v2333_v35  ;;  %2863 = vrot.lane.b32.xlu1 %v2785_v19, %s18632_s16  ;;  %2957 = vrot.lane.b32.xlu0 %v2785_v19, %s18634_s22  ;;  %v3282_v26 = vsel %vm18581_vm13, %v3251_v43, %v16036_v18  ;;  %v2699_v58 = vor.u32 %v2698_v50, %v2694_v25 }
 0x2b3   : > { %v2359_v51 = vpack.c.bf16 %v2332_v9, %v2331_v33  ;;  %13933 = vmatprep.mubr.msk.bf16.mxu1 %vm18580_vm14, %v3282_v26  ;;  %v2788_v16 = vsel %vm1486_vm3, %v2786_v48, %v2787_v14  ;;  %v3158_v43 = vsel %vm18585_vm9, %v3126_v22, %v16057_v61  ;;  %v3066_v61 = vsel %vm1808_vm6, %v15778_v1, %v16066_v31 }
 0x2b4   : > { %v2976_v63 = vpop.permute.xlu1 %2975  ;;  %v2704_v15 = vsel %vm1261_vm4, %v2699_v58, %v2703_v17  ;;  %v2467_v53 = vshrl.u32 %v2360_v12, 16  ;;  %v2470_v9 = vshll.u32 %v2360_v12, 16  ;;  %v3190_v25 = vsel %vm18584_vm10, %v3158_v43, %v16034_v55 }
 0x2b5   : > { %v2460_v10 = vshrl.u32 %v2359_v51, 16  ;;  %v2882_v42 = vpop.permute.xlu0 %2881  ;;  %v2463_v46 = vshll.u32 %v2359_v51, 16  ;;  %v3222_v37 = vsel %vm18583_vm11, %v3190_v25, %v2976_v63  ;;  %v3096_v63 = vsel %vm18588_vm7, %v3066_v61, %v16045_v23 }
 0x2b6   : > { %2895 = vrot.lane.b32.xlu1 %v16084_v6, %s18633_s2  ;;  %2989 = vrot.lane.b32.xlu0 %v16084_v6, %s18635_s5  ;;  %v2469_v24 = vrot.slane %v2467_v53, 7  ;;  %v3128_v1 = vsel %vm18586_vm8, %v3096_v63, %v2882_v42 }
 0x2b7   : > { %v2462_v19 = vrot.slane %v2460_v10, 7 }
 0x2b8   : > { %v16115_v18 = vpop.permute.xlu1 %2947  ;;  %v2472_v51 = vor.u32 %v2470_v9, %v2469_v24  ;;  %v2536_v48 = vsel %vm14881_vm2, %v2469_v24, 0 }
 0x2b9   : > { %v2465_v60 = vor.u32 %v2463_v46, %v2462_v19  ;;  %v16117_v29 = vpop.permute.xlu0 %3037  ;;  %v2535_v40 = vsel %vm14881_vm2, %v2462_v19, 0 }
 0x2ba   : > { %2927 = vrot.lane.b32.xlu1 %v2704_v15, %s18639_s18  ;;  %3019 = vrot.lane.b32.xlu0 %v2704_v15, %s18636_s9  ;;  %v2790_v57 = vrot.slane %v2535_v40, 1  ;;  %v2713_v41 = vshll.u32 %v2535_v40, 16  ;;  %v2520_v55 = vsel %vm14881_vm2, 0, %v2472_v51 }
 0x2bb   : > { %v16127_v56 = vsel %vm14881_vm2, 0, %v2465_v60  ;;  %v2795_v17 = vshll.u32 %v2520_v55, 16 }
 0x2bc   : > { %v16131_v21 = vpop.permute.xlu1 %2851  ;;  %v2708_v49 = vshll.u32 %v16127_v56, 16  ;;  %v2789_v52 = vrot.slane %v16127_v56, 1  ;;  %v2706_v30 = vshrl.u32 %v16127_v56, 16  ;;  %v2715_v33 = vrot.slane %v2713_v41, 1 }
 0x2bd   : > { %v16134_v34 = vpop.permute.xlu0 %2853  ;;  %v2797_v40 = vrot.slane %v2795_v17, 1 }
 0x2be   : > { %2959 = vrot.lane.b32.xlu1 %v2788_v16, %s18634_s22  ;;  %3049 = vrot.lane.b32.xlu0 %v2788_v16, %s18638_s11  ;;  %v2710_v11 = vrot.slane %v2708_v49, 1  ;;  %v2791_v47 = vsel %vm1486_vm3, %v2789_v52, %v2790_v57  ;;  %v2800_v52 = vshll.u32 %v2536_v48, 16 }
 0x2c0   : > { %v16143_v59 = vpop.permute.xlu1 %2915  ;;  %v2711_v8 = vor.u32 %v2710_v11, %v2706_v30  ;;  %v2802_v57 = vrot.slane %v2800_v52, 1  ;;  %v2807_v30 = vrot.slane %v2536_v48, 1 }
 0x2c1   : > { %v3036_v35 = vpop.permute.xlu0 %3035 }
 0x2c2   : > { %2991 = vrot.lane.b32.xlu1 %v16127_v56, %s18635_s5  ;;  %3051 = vrot.lane.b32.xlu0 %v2791_v47, %s18638_s11  ;;  %v2716_v38 = vsel %vm1261_vm4, %v2711_v8, %v2715_v33 }
 0x2c4   : > { %v16153_v50 = vpop.permute.xlu1 %2823 }
 0x2c5   : > { %v2946_v26 = vpop.permute.xlu0 %2945 }
 0x2c6   : > { %3021 = vrot.lane.b32.xlu1 %v2716_v38, %s18636_s9  ;;  %2865 = vrot.lane.b32.xlu0 %v2788_v16, %s18632_s16  ;;  %v2793_v16 = vshrl.u32 %v2520_v55, 16 }
 0x2c8   : > { %v3006_v10 = vpop.permute.xlu1 %3005  ;;  %v2798_v11 = vor.u32 %v2797_v40, %v2793_v16 }
 0x2c9   : > { %v3253_v12 = vsel %vm18582_vm12, %v3222_v37, %v3006_v10  ;;  %v3008_v58 = vpop.permute.xlu0 %3007  ;;  %v3070_v10 = vsel %vm1808_vm6, %v15824_v28, %v16153_v50 }
 0x2ca   : > { %2835 = vrot.lane.b32.xlu1 %v2704_v15, %s18637_s26  ;;  %2897 = vrot.lane.b32.xlu0 %v16127_v56, %s18633_s2  ;;  %v3284_v19 = vsel %vm18581_vm13, %v3253_v12, %v3036_v35  ;;  %v2803_v35 = vsel %vm1261_vm4, %v2798_v11, %v2802_v57  ;;  %vm3965_vm4 = vcmask 58368  }
 0x2cb   : > { %13934 = vmatmul.mubr.msk.bf16.gmra.mrb[8].mxu1 %vm18580_vm14, %v3284_v19 }
 0x2cc   : > { %v2822_v46 = vpop.permute.xlu1 %2821 }
 0x2cd   : > { %v2914_v31 = vpop.permute.xlu0 %2913 }
 0x2ce   : > { %v3160_v60 = vsel %vm18585_vm9, %v3128_v1, %v2914_v31  ;;  %2837 = vrot.lane.b32.xlu1 %v2716_v38, %s18637_s26  ;;  %2929 = vrot.lane.b32.xlu0 %v2716_v38, %s18639_s18 }
 0x2cf   : > { %v3192_v15 = vsel %vm18584_vm10, %v3160_v60, %v2946_v26 }
 0x2d0   : > { %v3224_v20 = vsel %vm18583_vm11, %v3192_v15, %v16102_v39  ;;  %v2888_v23 = vpop.permute.xlu1 %2887  ;;  %v2806_v39 = vrot.slane %v2520_v55, 1 }
 0x2d1   : > { %v2982_v14 = vpop.permute.xlu0 %2981  ;;  %v3255_v42 = vsel %vm18582_vm12, %v3224_v20, %v3008_v58 }
 0x2d2   : > { %2867 = vrot.lane.b32.xlu1 %v2791_v47, %s18632_s16  ;;  %2961 = vrot.lane.b32.xlu0 %v2791_v47, %s18634_s22  ;;  %v3286_v49 = vsel %vm18581_vm13, %v3255_v42, %v16117_v29  ;;  %v2808_v29 = vsel %vm1486_vm3, %v2806_v39, %v2807_v30  ;;  %v3068_v47 = vsel %vm1808_vm6, %v15834_v0, %v2822_v46  ;;  %vm4760_vm3 = vsmask.f32 4352 }
 0x2d3   : > { %13937 = vmatprep.mubr.msk.bf16.mxu1 %vm18580_vm14, %v3286_v49  ;;  %v3098_v33 = vsel %vm18588_vm7, %v3068_v47, %v16131_v21  ;;  %vm16312_vm1 = vmand %vm4759_vm15, %vm4760_vm3  ;;  %vm4616_vm15 = vcmask 1041409   ;;  %vm4618_vm3 = vcmask 1042434  }
 0x2d4   : > { %v2980_v13 = vpop.permute.xlu1 %2979  ;;  %v3130_v43 = vsel %vm18586_vm8, %v3098_v33, %v16100_v62 }
 0x2d5   : > { %v2886_v53 = vpop.permute.xlu0 %2885  ;;  %v3162_v38 = vsel %vm18585_vm9, %v3130_v43, %v16143_v59  ;;  %v3100_v59 = vsel %vm18588_vm7, %v3070_v10, %v16134_v34 }
 0x2d6   : > { %2899 = vrot.lane.b32.xlu1 %v2520_v55, %s18633_s2  ;;  %2993 = vrot.lane.b32.xlu0 %v2520_v55, %s18635_s5  ;;  %v3194_v0 = vsel %vm18584_vm10, %v3162_v38, %v16115_v18  ;;  %v3132_v18 = vsel %vm18586_vm8, %v3100_v59, %v2886_v53 }
 0x2d7   : > { %v3226_v37 = vsel %vm18583_vm11, %v3194_v0, %v2980_v13 }
 0x2d8   : > { %v2952_v41 = vpop.permute.xlu1 %2951 }
 0x2d9   : > { %v3042_v22 = vpop.permute.xlu0 %3041 }
 0x2da   : > { %2931 = vrot.lane.b32.xlu1 %v2803_v35, %s18639_s18  ;;  %3053 = vrot.lane.b32.xlu0 %v2808_v29, %s18638_s11 }
 0x2dc   : > { %v2856_v8 = vpop.permute.xlu1 %2855 }
 0x2dd   : > { %v2858_v24 = vpop.permute.xlu0 %2857 }
 0x2de   : > { %2963 = vrot.lane.b32.xlu1 %v2808_v29, %s18634_s22 }
 0x2e0   : > { %v2920_v9 = vpop.permute.xlu1 %2919 }
 0x2e1   : > { %v3040_v26 = vpop.permute.xlu0 %3039 }
 0x2e2   : > { %3023 = vrot.lane.b32.xlu1 %v2803_v35, %s18636_s9 }
 0x2e4   : > { %v2828_v51 = vpop.permute.xlu1 %2827 }
 0x2e5   : > { %v2950_v25 = vpop.permute.xlu0 %2949 }
 0x2e8   : > { %v3010_v21 = vpop.permute.xlu1 %3009 }
 0x2e9   : > { %v3257_v62 = vsel %vm18582_vm12, %v3226_v37, %v3010_v21  ;;  %v3012_v61 = vpop.permute.xlu0 %3011 }
 0x2ea   : > { %v3288_v12 = vsel %vm18581_vm13, %v3257_v62, %v3040_v26 }
 0x2eb   : > { %13938 = vmatmul.mubr.msk.bf16.gmra.mrb[12].mxu1 %vm18580_vm14, %v3288_v12 }
 0x2ec   : > { %v2826_v58 = vpop.permute.xlu1 %2825 }
 0x2ed   : > { %v2918_v19 = vpop.permute.xlu0 %2917  ;;  %v3072_v55 = vsel %vm1808_vm6, %v15892_v5, %v2826_v58 }
 0x2ee   : > { %v3164_v63 = vsel %vm18585_vm9, %v3132_v18, %v2918_v19  ;;  %v3102_v46 = vsel %vm18588_vm7, %v3072_v55, %v2856_v8 }
 0x2ef   : > { %v3196_v28 = vsel %vm18584_vm10, %v3164_v63, %v2950_v25  ;;  %v3134_v17 = vsel %vm18586_vm8, %v3102_v46, %v2888_v23  ;;  %v3074_v23 = vsel %vm1808_vm6, %v15880_v7, %v2828_v51 }
 0x2f0   : > { %v3228_v50 = vsel %vm18583_vm11, %v3196_v28, %v2982_v14  ;;  %v3166_v5 = vsel %vm18585_vm9, %v3134_v17, %v2920_v9  ;;  %v3104_v39 = vsel %vm18588_vm7, %v3074_v23, %v2858_v24 }
 0x2f1   : > { %v2984_v1 = vpop.permute.xlu1 %2983  ;;  %v3259_v31 = vsel %vm18582_vm12, %v3228_v50, %v3012_v61  ;;  %v3198_v42 = vsel %vm18584_vm10, %v3166_v5, %v2952_v41 }
 0x2f2   : > { %v3290_v34 = vsel %vm18581_vm13, %v3259_v31, %v3042_v22  ;;  %v3230_v40 = vsel %vm18583_vm11, %v3198_v42, %v2984_v1 }
 0x2f3   : > { %13941 = vmatprep.mubr.msk.bf16.mxu1 %vm18580_vm14, %v3290_v34 }
 0x2f4   : > { %v3044_v60 = vpop.permute.xlu0 %3043 }
 0x2f5   : > { %v2892_v15 = vpop.permute.xlu1 %2891 }
 0x2f8   : > { %v2890_v48 = vpop.permute.xlu0 %2889 }
 0x2f9   : > { %v2860_v20 = vpop.permute.xlu1 %2859  ;;  %v3136_v57 = vsel %vm18586_vm8, %v3104_v39, %v2890_v48 }
 0x2fc   : > { %v2922_v14 = vpop.permute.xlu0 %2921 }
 0x2fd   : > { %v3014_v49 = vpop.permute.xlu1 %3013  ;;  %v3168_v41 = vsel %vm18585_vm9, %v3136_v57, %v2922_v14 }
 0x2fe   : > { %v3261_v16 = vsel %vm18582_vm12, %v3230_v40, %v3014_v49 }
 0x2ff   : > { %v3292_v52 = vsel %vm18581_vm13, %v3261_v16, %v3044_v60 }
 0x300   : > { %13942 = vmatmul.mubr.msk.bf16.gmra.mrb[16].mxu1 %vm18580_vm14, %v3292_v52  ;;  %v2954_v13 = vpop.permute.xlu0 %2953 }
 0x301   : > { %v2830_v53 = vpop.permute.xlu1 %2829  ;;  %v3200_v22 = vsel %vm18584_vm10, %v3168_v41, %v2954_v13 }
 0x302   : > { %v3076_v7 = vsel %vm1808_vm6, %v15962_v36, %v2830_v53 }
 0x303   : > { %v3106_v24 = vsel %vm18588_vm7, %v3076_v7, %v2860_v20 }
 0x304   : > { %v2986_v11 = vpop.permute.xlu0 %2985  ;;  %v3138_v43 = vsel %vm18586_vm8, %v3106_v24, %v2892_v15 }
 0x305   : > { %v2924_v35 = vpop.permute.xlu1 %2923  ;;  %v3232_v29 = vsel %vm18583_vm11, %v3200_v22, %v2986_v11 }
 0x306   : > { %v3170_v51 = vsel %vm18585_vm9, %v3138_v43, %v2924_v35 }
 0x308   : > { %v3016_v30 = vpop.permute.xlu0 %3015 }
 0x309   : > { %v3263_v47 = vsel %vm18582_vm12, %v3232_v29, %v3016_v30  ;;  %v2956_v9 = vpop.permute.xlu1 %2955 }
 0x30a   : > { %v3202_v25 = vsel %vm18584_vm10, %v3170_v51, %v2956_v9 }
 0x30c   : > { %v3046_v8 = vpop.permute.xlu0 %3045 }
 0x30d   : > { %v3294_v33 = vsel %vm18581_vm13, %v3263_v47, %v3046_v8 }
 0x30e   : > { %13945 = vmatprep.mubr.msk.bf16.mxu1 %vm18580_vm14, %v3294_v33 }
 0x311   : > { %v2988_v26 = vpop.permute.xlu1 %2987 }
 0x312   : > { %v3234_v0 = vsel %vm18583_vm11, %v3202_v25, %v2988_v26 }
 0x314   : > { %v3048_v38 = vpop.permute.xlu0 %3047 }
 0x318   : > { %v3018_v37 = vpop.permute.xlu1 %3017  ;;  %v2862_v21 = vpop.permute.xlu0 %2861 }
 0x319   : > { %v3265_v36 = vsel %vm18582_vm12, %v3234_v0, %v3018_v37 }
 0x31a   : > { %v3296_v10 = vsel %vm18581_vm13, %v3265_v36, %v3048_v38 }
 0x31b   : > { %13946 = vmatmul.mubr.msk.bf16.gmra.mrb[20].mxu1 %vm18580_vm14, %v3296_v10 }
 0x31c   : > { %v2832_v62 = vpop.permute.xlu1 %2831  ;;  %v2894_v61 = vpop.permute.xlu0 %2893 }
 0x31d   : > { %v3078_v58 = vsel %vm1808_vm6, %v15976_v32, %v2832_v62 }
 0x31e   : > { %v3108_v55 = vsel %vm18588_vm7, %v3078_v58, %v2862_v21  ;;  %v16297_v58 = vld [vmem:[%s14683_s21] ss:$0 sm:$0xff] }
 0x31f   : > { %v3140_v50 = vsel %vm18586_vm8, %v3108_v55, %v2894_v61 }
 0x320   : > { %v2834_v12 = vpop.permute.xlu1 %2833  ;;  %v2926_v59 = vpop.permute.xlu0 %2925 }
 0x321   : > { %v3172_v31 = vsel %vm18585_vm9, %v3140_v50, %v2926_v59  ;;  %v3080_v48 = vsel %vm1808_vm6, %v16051_v45, %v2834_v12  ;;  %v14647_v12 = vmov 1983009808  }
 0x322   : > { %v3631_v59 = vunpack.c.l.s4 %v14647_v12 }
 0x324   : > { %v2864_v18 = vpop.permute.xlu1 %2863  ;;  %v2958_v19 = vpop.permute.xlu0 %2957 }
 0x325   : > { %v3204_v34 = vsel %vm18584_vm10, %v3172_v31, %v2958_v19  ;;  %v3110_v20 = vsel %vm18588_vm7, %v3080_v48, %v2864_v18 }
 0x328   : > { %v2896_v63 = vpop.permute.xlu1 %2895  ;;  %v2990_v28 = vpop.permute.xlu0 %2989 }
 0x329   : > { %v3236_v17 = vsel %vm18583_vm11, %v3204_v34, %v2990_v28  ;;  %v3142_v40 = vsel %vm18586_vm8, %v3110_v20, %v2896_v63  ;;  %v3632_v63 = vunpack.c.0.s8 %v3631_v59 }
 0x32c   : > { %v2928_v46 = vpop.permute.xlu1 %2927  ;;  %v3020_v1 = vpop.permute.xlu0 %3019 }
 0x32d   : > { %v3267_v60 = vsel %vm18582_vm12, %v3236_v17, %v3020_v1  ;;  %v3174_v49 = vsel %vm18585_vm9, %v3142_v40, %v2928_v46 }
 0x330   : > { %v2960_v15 = vpop.permute.xlu1 %2959  ;;  %v3050_v32 = vpop.permute.xlu0 %3049 }
 0x331   : > { %v3298_v5 = vsel %vm18581_vm13, %v3267_v60, %v3050_v32  ;;  %v3206_v16 = vsel %vm18584_vm10, %v3174_v49, %v2960_v15 }
 0x332   : > { %13949 = vmatprep.mubr.msk.bf16.mxu1 %vm18580_vm14, %v3298_v5 }
 0x334   : > { %v2992_v42 = vpop.permute.xlu1 %2991  ;;  %v3052_v14 = vpop.permute.xlu0 %3051 }
 0x335   : > { %v3238_v52 = vsel %vm18583_vm11, %v3206_v16, %v2992_v42 }
 0x338   : > { %v3022_v13 = vpop.permute.xlu1 %3021  ;;  %v2866_v23 = vpop.permute.xlu0 %2865 }
 0x339   : > { %v3269_v53 = vsel %vm18582_vm12, %v3238_v52, %v3022_v13 }
 0x33a   : > { %v3300_v11 = vsel %vm18581_vm13, %v3269_v53, %v3052_v14 }
 0x33b   : > { %13950 = vmatmul.mubr.msk.bf16.gmra.mrb[24].mxu1 %vm18580_vm14, %v3300_v11  ;;  %v16322_v11 = vsel %vm16312_vm1, %v14888_v3, 0 }
 0x33c   : > { %v2836_v45 = vpop.permute.xlu1 %2835  ;;  %v2898_v39 = vpop.permute.xlu0 %2897 }
 0x33d   : > { %v3082_v35 = vsel %vm1808_vm6, %v16084_v6, %v2836_v45 }
 0x33e   : > { %v3112_v47 = vsel %vm18588_vm7, %v3082_v35, %v2866_v23 }
 0x33f   : > { %v3144_v24 = vsel %vm18586_vm8, %v3112_v47, %v2898_v39 }
 0x340   : > { %v2838_v57 = vpop.permute.xlu1 %2837  ;;  %v2930_v30 = vpop.permute.xlu0 %2929 }
 0x341   : > { %v3084_v7 = vsel %vm1808_vm6, %v16127_v56, %v2838_v57  ;;  %v3176_v6 = vsel %vm18585_vm9, %v3144_v24, %v2930_v30 }
 0x344   : > { %v2868_v41 = vpop.permute.xlu1 %2867  ;;  %v2962_v29 = vpop.permute.xlu0 %2961 }
 0x345   : > { %v3114_v33 = vsel %vm18588_vm7, %v3084_v7, %v2868_v41  ;;  %v3208_v56 = vsel %vm18584_vm10, %v3176_v6, %v2962_v29 }
 0x348   : > { %v2900_v22 = vpop.permute.xlu1 %2899  ;;  %v2994_v43 = vpop.permute.xlu0 %2993 }
 0x349   : > { %v3146_v9 = vsel %vm18586_vm8, %v3114_v33, %v2900_v22  ;;  %v3240_v0 = vsel %vm18583_vm11, %v3208_v56, %v2994_v43 }
 0x34c   : > { %v2932_v8 = vpop.permute.xlu1 %2931  ;;  %v3054_v36 = vpop.permute.xlu0 %3053 }
 0x34d   : > { %v3178_v26 = vsel %vm18585_vm9, %v3146_v9, %v2932_v8  ;;  %vm4927_vm9 = vcmask 1046532  }
 0x350   : > { %v2964_v38 = vpop.permute.xlu1 %2963 }
 0x351   : > { %v3210_v51 = vsel %vm18584_vm10, %v3178_v26, %v2964_v38  ;;  %vm4628_vm10 = vcmask 1047559  }
 0x352   : > { %v3241_v25 = vsel %vm18583_vm11, %v3210_v51, %v15646_v44  ;;  %v3633_v44 = vlaneseq  ;;  %vm18589_vm11 = vcmask 1046534  }
 0x353   : > { %v3272_v21 = vsel %vm18582_vm12, %v3241_v25, %v15658_v54 }
 0x354   : > { %v3024_v37 = vpop.permute.xlu1 %3023  ;;  %v3303_v61 = vsel %vm18581_vm13, %v3272_v21, %v15672_v4  ;;  %v16299_v19 = vshrl.u32 %v3633_v44, 7 }
 0x355   : > { %v3271_v10 = vsel %vm18582_vm12, %v3240_v0, %v3024_v37  ;;  %vm18587_vm12 = vcmask 1042432  }
 0x356   : > { %v3302_v62 = vsel %vm18581_vm13, %v3271_v10, %v3054_v36  ;;  %v16307_v60 = vsub.s32 %v3632_v63, %v16299_v19  ;;  %vm4624_vm13 = vcmask 1045509   ;;  %vm16357_vm8 = vmor %vm18587_vm12, %vm4927_vm9  ;;  %vm4811_vm9 = vsmask.f32 3328 }
 0x357   : > { %13953 = vmatprep.mubr.msk.bf16.mxu1 %vm18580_vm14, %v3302_v62  ;;  %vm4812_vm12 = vsmask.f32 7440 }
 0x358   : > { %13954 = vmatmul.mubr.msk.bf16.gmra.mrb[28].mxu1 %vm18580_vm14, %v3303_v61  ;;  %vm18590_vm14 = vcmask 1044484   ;;  %vm16421_vm7 = vmor %vm4811_vm9, %vm4812_vm12  ;;  %vm18664_vm12 = vcmask 195584   ;;  %vm18668_vm9 = vcmask 457728  }
 0x35e   : > { %v13927_v18 = vpop.f32.mrb[0].mxu1 }
 0x35f   : > { %v3415_v54 = vadd.f32 %v13927_v18, %v16297_v58  ;;  %v3406_v55 = vpop.f32.mrb[1].mxu1 }
 0x360   : > { %v3407_v28 = vadd.f32 %v16297_v58, %v3406_v55  ;;  %v13928_v50 = vpop.f32.mrb[2].mxu1 }
 0x361   : > { %v3535_v46 = vmax.f32 %v3415_v54, 0.0  ;;  %v3418_v4 = vadd.f32 %v13928_v50, %v16297_v58  ;;  %v3409_v1 = vpop.f32.mrb[3].mxu1 }
 0x362   : > { %v3533_v31 = vmax.f32 %v3407_v28, 0.0  ;;  %v3410_v34 = vadd.f32 %v16297_v58, %v3409_v1 }
 0x363   : > { %v3566_v17 = vsel %vm1808_vm6, %v3535_v46, -inf  ;;  %v3536_v15 = vmax.f32 %v3418_v4, 0.0 }
 0x364   : > { %v3565_v32 = vsel %vm1808_vm6, %v3533_v31, -inf  ;;  %v3534_v5 = vmax.f32 %v3410_v34, 0.0 }
 0x365   : > { %v3567_v48 = vmax.f32 %v3565_v32, %v3566_v17  ;;  %v3569_v20 = vsel %vm1808_vm6, %v3536_v15, -inf }
 0x366   : > { %v3568_v42 = vsel %vm1808_vm6, %v3534_v5, -inf }
 0x367   : > { %v3629_v40 = vcombine.high %v3567_v48, %v3567_v48  ;;  %v3636_v49 = vrot.slane %v3567_v48, %v16307_v60  ;;  %v3570_v16 = vmax.f32 %v3568_v42, %v3569_v20 }
 0x369   : > { %v3643_v52 = vrot.slane %v3629_v40, %v16307_v60  ;;  %v3644_v13 = vcombine.high %v3636_v49, %v3636_v49  ;;  %v3966_v23 = vsel %vm3965_vm4, %v3636_v49, -inf  ;;  %v3646_v53 = vcombine.high %v3570_v16, %v3570_v16 }
 0x36a   : > { %v3967_v45 = vrot.slane %v3966_v23, 4  ;;  %v3653_v39 = vrot.slane %v3570_v16, %v16307_v60 }
 0x36b   : > { %v3645_v57 = vcombine.high %v3643_v52, %v3643_v52  ;;  %v3973_v30 = vsel %vm3965_vm4, %v3644_v13, -inf  ;;  %v3980_v41 = vsel %vm3965_vm4, %v3643_v52, -inf  ;;  %v3660_v22 = vrot.slane %v3646_v53, %v16307_v60 }
 0x36c   : > { %v3968_v35 = vmax.f32 %v3966_v23, %v3967_v45  ;;  %v3974_v29 = vrot.slane %v3973_v30, 4  ;;  %v3981_v47 = vrot.slane %v3980_v41, 4  ;;  %v3661_v8 = vcombine.high %v3653_v39, %v3653_v39 }
 0x36d   : > { %v3987_v7 = vsel %vm3965_vm4, %v3645_v57, -inf  ;;  %v3662_v33 = vcombine.high %v3660_v22, %v3660_v22  ;;  %v3994_v24 = vsel %vm3965_vm4, %v3653_v39, -inf  ;;  %v4008_v9 = vsel %vm3965_vm4, %v3660_v22, -inf }
 0x36e   : > { %v3969_v43 = vrot.slane %v3968_v35, 2  ;;  %v3975_v26 = vmax.f32 %v3973_v30, %v3974_v29  ;;  %v3982_v38 = vmax.f32 %v3980_v41, %v3981_v47  ;;  %v3988_v51 = vrot.slane %v3987_v7, 4 }
 0x36f   : > { %v3995_v6 = vrot.slane %v3994_v24, 4  ;;  %v4001_v25 = vsel %vm3965_vm4, %v3661_v8, -inf  ;;  %v4009_v56 = vrot.slane %v4008_v9, 4  ;;  %v4015_v0 = vsel %vm3965_vm4, %v3662_v33, -inf }
 0x370   : > { %v3970_v37 = vmax.f32 %v3968_v35, %v3969_v43  ;;  %v3976_v21 = vrot.slane %v3975_v26, 2  ;;  %v3983_v36 = vrot.slane %v3982_v38, 2  ;;  %v3989_v10 = vmax.f32 %v3987_v7, %v3988_v51 }
 0x371   : > { %v3996_v62 = vmax.f32 %v3994_v24, %v3995_v6  ;;  %v4002_v61 = vrot.slane %v4001_v25, 4  ;;  %v4010_v44 = vmax.f32 %v4008_v9, %v4009_v56  ;;  %v4016_v12 = vrot.slane %v4015_v0, 4 }
 0x372   : > { %v3971_v59 = vrot.slane %v3970_v37, 1  ;;  %v3977_v18 = vmax.f32 %v3975_v26, %v3976_v21  ;;  %v3984_v54 = vmax.f32 %v3982_v38, %v3983_v36  ;;  %v3990_v55 = vrot.slane %v3989_v10, 2 }
 0x373   : > { %v3997_v63 = vrot.slane %v3996_v62, 2  ;;  %v4003_v28 = vmax.f32 %v4001_v25, %v4002_v61  ;;  %v4011_v50 = vrot.slane %v4010_v44, 2  ;;  %v4017_v46 = vmax.f32 %v4015_v0, %v4016_v12 }
 0x374   : > { %v3972_v4 = vmax.f32 %v3970_v37, %v3971_v59  ;;  %v3978_v1 = vrot.slane %v3977_v18, 1  ;;  %v3985_v31 = vrot.slane %v3984_v54, 1  ;;  %v3991_v34 = vmax.f32 %v3989_v10, %v3990_v55 }
 0x375   : > { %v3998_v17 = vmax.f32 %v3996_v62, %v3997_v63  ;;  %v4004_v15 = vrot.slane %v4003_v28, 2  ;;  %v4012_v32 = vmax.f32 %v4010_v44, %v4011_v50  ;;  %v4018_v5 = vrot.slane %v4017_v46, 2 }
 0x376   : > { %v3979_v48 = vmax.f32 %v3977_v18, %v3978_v1  ;;  %v3986_v20 = vmax.f32 %v3984_v54, %v3985_v31  ;;  %v3992_v42 = vrot.slane %v3991_v34, 1  ;;  %v4424_v40 = vpack.c.bf16 %v3972_v4, %v3972_v4 }
 0x377   : > { %v3999_v49 = vrot.slane %v3998_v17, 1  ;;  %v4005_v16 = vmax.f32 %v4003_v28, %v4004_v15  ;;  %v4013_v52 = vrot.slane %v4012_v32, 1  ;;  %v4019_v13 = vmax.f32 %v4017_v46, %v4018_v5 }
 0x378   : > { %v3993_v23 = vmax.f32 %v3991_v34, %v3992_v42  ;;  %v4425_v53 = vpack.c.bf16 %v3979_v48, %v3979_v48  ;;  %v4426_v45 = vpack.c.bf16 %v3986_v20, %v3986_v20  ;;  %v4552_v35 = vunpack.c.l.b16 %v4424_v40 }
 0x379   : > { %v4000_v39 = vmax.f32 %v3998_v17, %v3999_v49  ;;  %v4006_v57 = vrot.slane %v4005_v16, 1  ;;  %v4014_v30 = vmax.f32 %v4012_v32, %v4013_v52  ;;  %v4020_v41 = vrot.slane %v4019_v13, 1 }
 0x37a   : > { %v4427_v22 = vpack.c.bf16 %v3993_v23, %v3993_v23  ;;  %v4553_v29 = vunpack.c.l.b16 %v4425_v53  ;;  %v4554_v47 = vunpack.c.l.b16 %v4426_v45  ;;  %v12851_v24 = vcombine.low %v16322_v11, %v16322_v11 }
 0x37b   : > { %v4007_v8 = vmax.f32 %v4005_v16, %v4006_v57  ;;  %v4021_v7 = vmax.f32 %v4019_v13, %v4020_v41  ;;  %v4428_v33 = vpack.c.bf16 %v4000_v39, %v4000_v39  ;;  %v4430_v26 = vpack.c.bf16 %v4014_v30, %v4014_v30 }
 0x37c   : > { %v4555_v9 = vunpack.c.l.b16 %v4427_v22  ;;  %v4617_v43 = vsel %vm4616_vm15, %v4553_v29, %v4552_v35  ;;  %v12852_v37 = vcombine.high %v16322_v11, %v16322_v11  ;;  %v4815_v61 = vshrl.u32 %v12851_v24, 16 }
 0x37d   : > { %v4619_v38 = vsel %vm4618_vm3, %v4554_v47, %v4617_v43  ;;  %v4429_v51 = vpack.c.bf16 %v4007_v8, %v4007_v8  ;;  %v4431_v6 = vpack.c.bf16 %v4021_v7, %v4021_v7  ;;  %v4556_v25 = vunpack.c.l.b16 %v4428_v33 }
 0x37e   : > { %v4621_v56 = vsel %vm4620_vm0, %v4555_v9, %v4619_v38  ;;  %v13931_v0 = vpop.f32.mrb[4].mxu1  ;;  %v4558_v44 = vunpack.c.l.b16 %v4430_v26  ;;  %v12867_v18 = vrot.slane %v12851_v24, 9  ;;  %v4818_v54 = vshll.u32 %v12851_v24, 16 }
 0x37f   : > { %v4557_v21 = vunpack.c.l.b16 %v4429_v51  ;;  %v4623_v36 = vsel %vm18590_vm14, %v4556_v25, %v4621_v56  ;;  %v3431_v10 = vadd.f32 %v13931_v0, %v16297_v58  ;;  %v3422_v62 = vpop.f32.mrb[5].mxu1  ;;  %v4559_v55 = vunpack.c.l.b16 %v4431_v6 }
 0x380   : > { %v3423_v12 = vadd.f32 %v16297_v58, %v3422_v62  ;;  %v13932_v59 = vpop.f32.mrb[6].mxu1  ;;  %v4931_v34 = vrot.slane %v12852_v37, 5  ;;  %v16349_v5 = vrot.slane %v4815_v61, 4  ;;  %v16352_v40 = vrot.slane %v4818_v54, 5 }
 0x381   : > { %v4625_v63 = vsel %vm4624_vm13, %v4557_v21, %v4623_v36  ;;  %v3539_v28 = vmax.f32 %v3431_v10, 0.0  ;;  %v3434_v50 = vadd.f32 %v13932_v59, %v16297_v58  ;;  %v3425_v46 = vpop.f32.mrb[7].mxu1  ;;  %v4824_v53 = vshll.u32 %v12852_v37, 16 }
 0x382   : > { %v4627_v4 = vsel %vm18589_vm11, %v4558_v44, %v4625_v63  ;;  %v3537_v1 = vmax.f32 %v3423_v12, 0.0  ;;  %v3426_v31 = vadd.f32 %v16297_v58, %v3425_v46  ;;  %v16365_v22 = vsel %vm16357_vm8, %v12867_v18, %v4931_v34 }
 0x383   : > { %v4629_v17 = vsel %vm4628_vm10, %v4559_v55, %v4627_v4  ;;  %v3572_v15 = vsel %vm1808_vm6, %v3539_v28, -inf  ;;  %v3540_v32 = vmax.f32 %v3434_v50, 0.0  ;;  %v4821_v35 = vor.u32 %v16352_v40, %v16349_v5 }
 0x384   : > { %v4679_v48 = vpack.c.b16 %v4629_v17, %v4629_v17  ;;  %v3571_v20 = vsel %vm1808_vm6, %v3537_v1, -inf  ;;  %v3538_v42 = vmax.f32 %v3426_v31, 0.0  ;;  %v16374_v43 = vrot.slane %v4824_v53, 5 }
 0x385   : > { %v3573_v49 = vmax.f32 %v3571_v20, %v3572_v15  ;;  %v3575_v16 = vsel %vm1808_vm6, %v3540_v32, -inf }
 0x386   : > { %v3574_v13 = vsel %vm1808_vm6, %v3538_v42, -inf  ;;  %v4688_v23 = vshrl.u32 %v4679_v48, 16  ;;  %v4691_v41 = vshll.u32 %v4679_v48, 16 }
 0x387   : > { %v3663_v45 = vcombine.high %v3573_v49, %v3573_v49  ;;  %v3670_v39 = vrot.slane %v3573_v49, %v16307_v60  ;;  %v3576_v57 = vmax.f32 %v3574_v13, %v3575_v16 }
 0x388   : > { %v4690_v30 = vrot.slane %v4688_v23, 7 }
 0x389   : > { %v3677_v29 = vrot.slane %v3663_v45, %v16307_v60  ;;  %v3678_v47 = vcombine.high %v3670_v39, %v3670_v39  ;;  %v4022_v8 = vsel %vm3965_vm4, %v3670_v39, -inf  ;;  %v3680_v7 = vcombine.high %v3576_v57, %v3576_v57 }
 0x38a   : > { %v4023_v33 = vrot.slane %v4022_v8, 4  ;;  %v3687_v24 = vrot.slane %v3576_v57, %v16307_v60  ;;  %v16372_v9 = vor.u32 %v4691_v41, %v4690_v30 }
 0x38b   : > { %v3679_v26 = vcombine.high %v3677_v29, %v3677_v29  ;;  %v4029_v38 = vsel %vm3965_vm4, %v3678_v47, -inf  ;;  %v4036_v51 = vsel %vm3965_vm4, %v3677_v29, -inf  ;;  %v3694_v6 = vrot.slane %v3680_v7, %v16307_v60 }
 0x38c   : > { %v4024_v25 = vmax.f32 %v4022_v8, %v4023_v33  ;;  %v4030_v56 = vrot.slane %v4029_v38, 4  ;;  %v4037_v0 = vrot.slane %v4036_v51, 4  ;;  %v3695_v37 = vcombine.high %v3687_v24, %v3687_v24 }
 0x38d   : > { %v4043_v21 = vsel %vm3965_vm4, %v3679_v26, -inf  ;;  %v3696_v36 = vcombine.high %v3694_v6, %v3694_v6  ;;  %v4050_v10 = vsel %vm3965_vm4, %v3687_v24, -inf  ;;  %v4064_v62 = vsel %vm3965_vm4, %v3694_v6, -inf }
 0x38e   : > { %v4025_v61 = vrot.slane %v4024_v25, 2  ;;  %v4031_v44 = vmax.f32 %v4029_v38, %v4030_v56  ;;  %v4038_v12 = vmax.f32 %v4036_v51, %v4037_v0  ;;  %v4044_v59 = vrot.slane %v4043_v21, 4 }
 0x38f   : > { %v4051_v18 = vrot.slane %v4050_v10, 4  ;;  %v4057_v54 = vsel %vm3965_vm4, %v3695_v37, -inf  ;;  %v4065_v55 = vrot.slane %v4064_v62, 4  ;;  %v4071_v63 = vsel %vm3965_vm4, %v3696_v36, -inf }
 0x390   : > { %v4026_v28 = vmax.f32 %v4024_v25, %v4025_v61  ;;  %v4032_v50 = vrot.slane %v4031_v44, 2  ;;  %v4039_v46 = vrot.slane %v4038_v12, 2  ;;  %v4045_v4 = vmax.f32 %v4043_v21, %v4044_v59 }
 0x391   : > { %v4052_v1 = vmax.f32 %v4050_v10, %v4051_v18  ;;  %v4058_v31 = vrot.slane %v4057_v54, 4  ;;  %v4066_v34 = vmax.f32 %v4064_v62, %v4065_v55  ;;  %v4072_v17 = vrot.slane %v4071_v63, 4 }
 0x392   : > { %v4027_v15 = vrot.slane %v4026_v28, 1  ;;  %v4033_v32 = vmax.f32 %v4031_v44, %v4032_v50  ;;  %v4040_v48 = vmax.f32 %v4038_v12, %v4039_v46  ;;  %v4046_v20 = vrot.slane %v4045_v4, 2 }
 0x393   : > { %v4053_v42 = vrot.slane %v4052_v1, 2  ;;  %v4059_v49 = vmax.f32 %v4057_v54, %v4058_v31  ;;  %v4067_v16 = vrot.slane %v4066_v34, 2  ;;  %v4073_v13 = vmax.f32 %v4071_v63, %v4072_v17 }
 0x394   : > { %v4028_v23 = vmax.f32 %v4026_v28, %v4027_v15  ;;  %v4034_v53 = vrot.slane %v4033_v32, 1  ;;  %v4041_v45 = vrot.slane %v4040_v48, 1  ;;  %v4047_v39 = vmax.f32 %v4045_v4, %v4046_v20 }
 0x395   : > { %v4054_v57 = vmax.f32 %v4052_v1, %v4053_v42  ;;  %v4060_v30 = vrot.slane %v4059_v49, 2  ;;  %v4068_v41 = vmax.f32 %v4066_v34, %v4067_v16  ;;  %v4074_v29 = vrot.slane %v4073_v13, 2 }
 0x396   : > { %v4035_v47 = vmax.f32 %v4033_v32, %v4034_v53  ;;  %v4042_v8 = vmax.f32 %v4040_v48, %v4041_v45  ;;  %v4048_v7 = vrot.slane %v4047_v39, 1  ;;  %v4432_v33 = vpack.c.bf16 %v4028_v23, %v4028_v23 }
 0x397   : > { %v4055_v24 = vrot.slane %v4054_v57, 1  ;;  %v4061_v26 = vmax.f32 %v4059_v49, %v4060_v30  ;;  %v4069_v38 = vrot.slane %v4068_v41, 1  ;;  %v4075_v51 = vmax.f32 %v4073_v13, %v4074_v29 }
 0x398   : > { %v4049_v6 = vmax.f32 %v4047_v39, %v4048_v7  ;;  %v4433_v25 = vpack.c.bf16 %v4035_v47, %v4035_v47  ;;  %v4434_v56 = vpack.c.bf16 %v4042_v8, %v4042_v8  ;;  %v4560_v0 = vunpack.c.l.b16 %v4432_v33 }
 0x399   : > { %v4056_v37 = vmax.f32 %v4054_v57, %v4055_v24  ;;  %v4062_v21 = vrot.slane %v4061_v26, 1  ;;  %v4070_v36 = vmax.f32 %v4068_v41, %v4069_v38  ;;  %v4076_v10 = vrot.slane %v4075_v51, 1 }
 0x39a   : > { %v4435_v62 = vpack.c.bf16 %v4049_v6, %v4049_v6  ;;  %v4561_v61 = vunpack.c.l.b16 %v4433_v25  ;;  %v4562_v44 = vunpack.c.l.b16 %v4434_v56  ;;  %v4751_v12 = vsel %vm14881_vm2, 0, %v16372_v9 }
 0x39b   : > { %v4063_v59 = vmax.f32 %v4061_v26, %v4062_v21  ;;  %v4077_v18 = vmax.f32 %v4075_v51, %v4076_v10  ;;  %v4436_v54 = vpack.c.bf16 %v4056_v37, %v4056_v37  ;;  %v4438_v55 = vpack.c.bf16 %v4070_v36, %v4070_v36 }
 0x39c   : > { %v4563_v63 = vunpack.c.l.b16 %v4435_v62  ;;  %v4630_v28 = vsel %vm4616_vm15, %v4561_v61, %v4560_v0  ;;  %v16390_v50 = vsel %vm16312_vm1, %v4751_v12, 0  ;;  %v4822_v46 = vrot.slane %v4821_v35, 4 }
 0x39d   : > { %v4631_v4 = vsel %vm4618_vm3, %v4562_v44, %v4630_v28  ;;  %v4437_v9 = vpack.c.bf16 %v4063_v59, %v4063_v59  ;;  %v4439_v1 = vpack.c.bf16 %v4077_v18, %v4077_v18  ;;  %v4564_v31 = vunpack.c.l.b16 %v4436_v54 }
 0x39e   : > { %v4566_v34 = vunpack.c.l.b16 %v4438_v55  ;;  %v4632_v17 = vsel %vm4620_vm0, %v4563_v63, %v4631_v4  ;;  %v12853_v15 = vcombine.low %v16390_v50, %v16390_v50  ;;  %v12854_v32 = vcombine.high %v16390_v50, %v16390_v50  ;;  %v13935_v48 = vpop.f32.mrb[8].mxu1 }
 0x39f   : > { %v4565_v20 = vunpack.c.l.b16 %v4437_v9  ;;  %v4567_v42 = vunpack.c.l.b16 %v4439_v1  ;;  %v4633_v5 = vsel %vm18590_vm14, %v4564_v31, %v4632_v17  ;;  %v3447_v40 = vadd.f32 %v13935_v48, %v16297_v58  ;;  %v3438_v35 = vpop.f32.mrb[9].mxu1 }
 0x3a0   : > { %v12868_v49 = vrot.slane %v12853_v15, 9  ;;  %v4935_v16 = vrot.slane %v12854_v32, 5  ;;  %v3439_v13 = vadd.f32 %v16297_v58, %v3438_v35  ;;  %v13936_v23 = vpop.f32.mrb[10].mxu1  ;;  %v4829_v53 = vshrl.u32 %v12853_v15, 16 }
 0x3a1   : > { %v4634_v45 = vsel %vm4624_vm13, %v4565_v20, %v4633_v5  ;;  %v3543_v39 = vmax.f32 %v3447_v40, 0.0  ;;  %v3450_v57 = vadd.f32 %v13936_v23, %v16297_v58  ;;  %v3441_v30 = vpop.f32.mrb[11].mxu1  ;;  %v4832_v41 = vshll.u32 %v12853_v15, 16 }
 0x3a2   : > { %v4635_v29 = vsel %vm18589_vm11, %v4566_v34, %v4634_v45  ;;  %v16409_v47 = vsel %vm16357_vm8, %v12868_v49, %v4935_v16  ;;  %v3541_v8 = vmax.f32 %v3439_v13, 0.0  ;;  %v3442_v7 = vadd.f32 %v16297_v58, %v3441_v30 }
 0x3a3   : > { %v12886_v33 = vcombine.low %v16365_v22, %v16409_v47  ;;  %v3578_v24 = vsel %vm1808_vm6, %v3543_v39, -inf  ;;  %v3544_v26 = vmax.f32 %v3450_v57, 0.0  ;;  %v4636_v38 = vsel %vm4628_vm10, %v4567_v42, %v4635_v29 }
 0x3a4   : > { %v3577_v51 = vsel %vm1808_vm6, %v3541_v8, -inf  ;;  %v3542_v6 = vmax.f32 %v3442_v7, 0.0  ;;  %v4680_v25 = vpack.c.b16 %v4636_v38, %v4636_v38  ;;  %v4831_v56 = vrot.slane %v4829_v53, 4 }
 0x3a5   : > { %5020 = vrot.lane.b32.xlu1 %v12886_v33, %s18632_s16  ;;  %v3579_v0 = vmax.f32 %v3577_v51, %v3578_v24  ;;  %v3581_v37 = vsel %vm1808_vm6, %v3544_v26, -inf  ;;  %v4834_v36 = vrot.slane %v4832_v41, 5  ;;  %v4838_v10 = vshll.u32 %v12854_v32, 16 }
 0x3a6   : > { %v3580_v62 = vsel %vm1808_vm6, %v3542_v6, -inf  ;;  %v4695_v61 = vshrl.u32 %v4680_v25, 16  ;;  %v4698_v55 = vshll.u32 %v4680_v25, 16  ;;  %v16430_v63 = vsel %vm16421_vm7, %v4822_v46, %v16374_v43 }
 0x3a7   : > { %v3697_v44 = vcombine.high %v3579_v0, %v3579_v0  ;;  %v3704_v12 = vrot.slane %v3579_v0, %v16307_v60  ;;  %v3582_v59 = vmax.f32 %v3580_v62, %v3581_v37  ;;  %v4835_v18 = vor.u32 %v4834_v36, %v4831_v56 }
 0x3a8   : > { %v4697_v54 = vrot.slane %v4695_v61, 7  ;;  %v16432_v28 = vrot.slane %v4838_v10, 5 }
 0x3a9   : > { %v3711_v4 = vrot.slane %v3697_v44, %v16307_v60  ;;  %v3712_v9 = vcombine.high %v3704_v12, %v3704_v12  ;;  %v4078_v1 = vsel %vm3965_vm4, %v3704_v12, -inf  ;;  %v3714_v31 = vcombine.high %v3582_v59, %v3582_v59 }
 0x3aa   : > { %v4079_v34 = vrot.slane %v4078_v1, 4  ;;  %v3721_v17 = vrot.slane %v3582_v59, %v16307_v60  ;;  %v16437_v15 = vor.u32 %v4698_v55, %v4697_v54  ;;  %v16439_v32 = vrot.slane %v4835_v18, 4 }
 0x3ab   : > { %v3713_v48 = vcombine.high %v3711_v4, %v3711_v4  ;;  %v4085_v20 = vsel %vm3965_vm4, %v3712_v9, -inf  ;;  %v4092_v43 = vsel %vm3965_vm4, %v3711_v4, -inf  ;;  %v3728_v46 = vrot.slane %v3714_v31, %v16307_v60 }
 0x3ac   : > { %v4080_v42 = vmax.f32 %v4078_v1, %v4079_v34  ;;  %v4086_v5 = vrot.slane %v4085_v20, 4  ;;  %v4093_v40 = vrot.slane %v4092_v43, 4  ;;  %v3729_v35 = vcombine.high %v3721_v17, %v3721_v17 }
 0x3ad   : > { %v4099_v49 = vsel %vm3965_vm4, %v3713_v48, -inf  ;;  %v3730_v16 = vcombine.high %v3728_v46, %v3728_v46  ;;  %v4106_v13 = vsel %vm3965_vm4, %v3721_v17, -inf  ;;  %v4120_v23 = vsel %vm3965_vm4, %v3728_v46, -inf }
 0x3ae   : > { %v4081_v53 = vrot.slane %v4080_v42, 2  ;;  %v4087_v45 = vmax.f32 %v4085_v20, %v4086_v5  ;;  %v4094_v39 = vmax.f32 %v4092_v43, %v4093_v40  ;;  %v4100_v57 = vrot.slane %v4099_v49, 4 }
 0x3af   : > { %v4107_v30 = vrot.slane %v4106_v13, 4  ;;  %v4113_v41 = vsel %vm3965_vm4, %v3729_v35, -inf  ;;  %v4121_v29 = vrot.slane %v4120_v23, 4  ;;  %v4127_v8 = vsel %vm3965_vm4, %v3730_v16, -inf }
 0x3b0   : > { %v4082_v7 = vmax.f32 %v4080_v42, %v4081_v53  ;;  %v4088_v33 = vrot.slane %v4087_v45, 2  ;;  %v4095_v24 = vrot.slane %v4094_v39, 2  ;;  %v4101_v26 = vmax.f32 %v4099_v49, %v4100_v57 }
 0x3b1   : > { %v4108_v38 = vmax.f32 %v4106_v13, %v4107_v30  ;;  %v4114_v51 = vrot.slane %v4113_v41, 4  ;;  %v4122_v6 = vmax.f32 %v4120_v23, %v4121_v29  ;;  %v4128_v25 = vrot.slane %v4127_v8, 4 }
 0x3b2   : > { %v4083_v56 = vrot.slane %v4082_v7, 1  ;;  %v4089_v0 = vmax.f32 %v4087_v45, %v4088_v33  ;;  %v4096_v37 = vmax.f32 %v4094_v39, %v4095_v24  ;;  %v4102_v36 = vrot.slane %v4101_v26, 2 }
 0x3b3   : > { %v4109_v10 = vrot.slane %v4108_v38, 2  ;;  %v4115_v62 = vmax.f32 %v4113_v41, %v4114_v51  ;;  %v4123_v61 = vrot.slane %v4122_v6, 2  ;;  %v4129_v44 = vmax.f32 %v4127_v8, %v4128_v25 }
 0x3b4   : > { %v4084_v12 = vmax.f32 %v4082_v7, %v4083_v56  ;;  %v4090_v59 = vrot.slane %v4089_v0, 1  ;;  %v4097_v18 = vrot.slane %v4096_v37, 1  ;;  %v4103_v54 = vmax.f32 %v4101_v26, %v4102_v36 }
 0x3b5   : > { %v4110_v55 = vmax.f32 %v4108_v38, %v4109_v10  ;;  %v4116_v4 = vrot.slane %v4115_v62, 2  ;;  %v4124_v9 = vmax.f32 %v4122_v6, %v4123_v61  ;;  %v4130_v1 = vrot.slane %v4129_v44, 2 }
 0x3b6   : > { %v4091_v31 = vmax.f32 %v4089_v0, %v4090_v59  ;;  %v4098_v34 = vmax.f32 %v4096_v37, %v4097_v18  ;;  %v4104_v17 = vrot.slane %v4103_v54, 1  ;;  %v4440_v48 = vpack.c.bf16 %v4084_v12, %v4084_v12 }
 0x3b7   : > { %v4111_v20 = vrot.slane %v4110_v55, 1  ;;  %v4117_v43 = vmax.f32 %v4115_v62, %v4116_v4  ;;  %v4125_v46 = vrot.slane %v4124_v9, 1  ;;  %v4131_v42 = vmax.f32 %v4129_v44, %v4130_v1 }
 0x3b8   : > { %v4105_v5 = vmax.f32 %v4103_v54, %v4104_v17  ;;  %v4441_v40 = vpack.c.bf16 %v4091_v31, %v4091_v31  ;;  %v4442_v35 = vpack.c.bf16 %v4098_v34, %v4098_v34  ;;  %v4568_v49 = vunpack.c.l.b16 %v4440_v48 }
 0x3b9   : > { %v4112_v16 = vmax.f32 %v4110_v55, %v4111_v20  ;;  %v4118_v13 = vrot.slane %v4117_v43, 1  ;;  %v4126_v23 = vmax.f32 %v4124_v9, %v4125_v46  ;;  %v4132_v53 = vrot.slane %v4131_v42, 1 }
 0x3ba   : > { %v4443_v45 = vpack.c.bf16 %v4105_v5, %v4105_v5  ;;  %v4569_v39 = vunpack.c.l.b16 %v4441_v40  ;;  %v4570_v57 = vunpack.c.l.b16 %v4442_v35  ;;  %v4752_v30 = vsel %vm14881_vm2, 0, %v16437_v15 }
 0x3bb   : > { %v4119_v41 = vmax.f32 %v4117_v43, %v4118_v13  ;;  %v4133_v29 = vmax.f32 %v4131_v42, %v4132_v53  ;;  %v4444_v8 = vpack.c.bf16 %v4112_v16, %v4112_v16  ;;  %v4446_v7 = vpack.c.bf16 %v4126_v23, %v4126_v23 }
 0x3bc   : > { %v4571_v33 = vunpack.c.l.b16 %v4443_v45  ;;  %v4637_v24 = vsel %vm4616_vm15, %v4569_v39, %v4568_v49  ;;  %v16455_v26 = vsel %vm16312_vm1, %v4752_v30, 0  ;;  %v16461_v38 = vsel %vm16421_vm7, %v16439_v32, %v16432_v28 }
 0x3bd   : > { %v4638_v51 = vsel %vm4618_vm3, %v4570_v57, %v4637_v24  ;;  %v4445_v15 = vpack.c.bf16 %v4119_v41, %v4119_v41  ;;  %v4447_v6 = vpack.c.bf16 %v4133_v29, %v4133_v29  ;;  %v4572_v25 = vunpack.c.l.b16 %v4444_v8 }
 0x3be   : > { %v4574_v56 = vunpack.c.l.b16 %v4446_v7  ;;  %v4639_v0 = vsel %vm4620_vm0, %v4571_v33, %v4638_v51  ;;  %v12890_v37 = vcombine.low %v16390_v50, %v16455_v26  ;;  %v12855_v36 = vcombine.low %v16455_v26, %v16455_v26  ;;  %v13939_v10 = vpop.f32.mrb[12].mxu1 }
 0x3bf   : > { %v4573_v62 = vunpack.c.l.b16 %v4445_v15  ;;  %v4575_v61 = vunpack.c.l.b16 %v4447_v6  ;;  %v4640_v28 = vsel %vm18590_vm14, %v4572_v25, %v4639_v0  ;;  %v12882_v32 = vcombine.low %v16430_v63, %v16461_v38  ;;  %v3454_v44 = vpop.f32.mrb[13].mxu1 }
 0x3c0   : > { %5032 = vrot.lane.b32.xlu1 %v12890_v37, %s18633_s2  ;;  %v12856_v12 = vcombine.high %v16455_v26, %v16455_v26  ;;  %v12869_v59 = vrot.slane %v12855_v36, 9  ;;  %v3463_v18 = vadd.f32 %v13939_v10, %v16297_v58  ;;  %v3455_v54 = vadd.f32 %v16297_v58, %v3454_v44  ;;  %v13940_v55 = vpop.f32.mrb[14].mxu1 }
 0x3c1   : > { %v4641_v4 = vsel %vm4624_vm13, %v4573_v62, %v4640_v28  ;;  %v3466_v9 = vadd.f32 %v13940_v55, %v16297_v58  ;;  %v3457_v1 = vpop.f32.mrb[15].mxu1  ;;  %v4843_v31 = vshrl.u32 %v12855_v36, 16  ;;  %v4846_v34 = vshll.u32 %v12855_v36, 16 }
 0x3c2   : > { %v4642_v17 = vsel %vm18589_vm11, %v4574_v56, %v4641_v4  ;;  %v4939_v48 = vrot.slane %v12856_v12, 5  ;;  %v3547_v20 = vmax.f32 %v3463_v18, 0.0  ;;  %v3545_v43 = vmax.f32 %v3455_v54, 0.0 }
 0x3c3   : > { %v3548_v46 = vmax.f32 %v3466_v9, 0.0  ;;  %v3458_v42 = vadd.f32 %v16297_v58, %v3457_v1  ;;  %v4643_v5 = vsel %vm4628_vm10, %v4575_v61, %v4642_v17  ;;  %v4845_v40 = vrot.slane %v4843_v31, 4 }
 0x3c4   : > { %5000 = vrot.lane.b32.xlu1 %v12882_v32, %s18637_s26  ;;  %v16485_v35 = vsel %vm16357_vm8, %v12869_v59, %v4939_v48  ;;  %v3584_v49 = vsel %vm1808_vm6, %v3547_v20, -inf  ;;  %v3583_v16 = vsel %vm1808_vm6, %v3545_v43, -inf  ;;  %v4681_v13 = vpack.c.b16 %v4643_v5, %v4643_v5 }
 0x3c5   : > { %v12898_v23 = vcombine.low %v16409_v47, %v16485_v35  ;;  %v3585_v53 = vmax.f32 %v3583_v16, %v3584_v49  ;;  %v3587_v58 = vsel %vm1808_vm6, %v3548_v46, -inf  ;;  %v3546_v45 = vmax.f32 %v3458_v42, 0.0 }
 0x3c6   : > { %v4702_v39 = vshrl.u32 %v4681_v13, 16  ;;  %v4848_v57 = vrot.slane %v4846_v34, 5  ;;  %v4852_v30 = vshll.u32 %v12856_v12, 16  ;;  %v4705_v24 = vshll.u32 %v4681_v13, 16 }
 0x3c7   : > { %v3731_v41 = vcombine.high %v3585_v53, %v3585_v53  ;;  %v3738_v29 = vrot.slane %v3585_v53, %v16307_v60  ;;  %v3586_v8 = vsel %vm1808_vm6, %v3546_v45, -inf }
 0x3c8   : > { %5058 = vrot.lane.b32.xlu1 %v12898_v23, %s18634_s22  ;;  %v3588_v7 = vmax.f32 %v3586_v8, %v3587_v58  ;;  %v4704_v33 = vrot.slane %v4702_v39, 7  ;;  %v4849_v51 = vor.u32 %v4848_v57, %v4845_v40  ;;  %v16497_v25 = vrot.slane %v4852_v30, 5 }
 0x3c9   : > { %v3745_v47 = vrot.slane %v3731_v41, %v16307_v60  ;;  %v3746_v15 = vcombine.high %v3738_v29, %v3738_v29  ;;  %v4134_v6 = vsel %vm3965_vm4, %v3738_v29, -inf }
 0x3ca   : > { %v4135_v56 = vrot.slane %v4134_v6, 4  ;;  %v3748_v0 = vcombine.high %v3588_v7, %v3588_v7  ;;  %v3755_v37 = vrot.slane %v3588_v7, %v16307_v60  ;;  %v16500_v36 = vor.u32 %v4705_v24, %v4704_v33 }
 0x3cb   : > { %v3747_v10 = vcombine.high %v3745_v47, %v3745_v47  ;;  %v4141_v62 = vsel %vm3965_vm4, %v3746_v15, -inf  ;;  %v4148_v61 = vsel %vm3965_vm4, %v3745_v47, -inf  ;;  %v16504_v28 = vrot.slane %v4849_v51, 4 }
 0x3cc   : > { %v4136_v32 = vmax.f32 %v4134_v6, %v4135_v56  ;;  %v4142_v44 = vrot.slane %v4141_v62, 4  ;;  %v4149_v12 = vrot.slane %v4148_v61, 4  ;;  %v3762_v59 = vrot.slane %v3748_v0, %v16307_v60 }
 0x3cd   : > { %v4155_v18 = vsel %vm3965_vm4, %v3747_v10, -inf  ;;  %v3763_v54 = vcombine.high %v3755_v37, %v3755_v37  ;;  %v4162_v55 = vsel %vm3965_vm4, %v3755_v37, -inf  ;;  %v4753_v4 = vsel %vm14881_vm2, 0, %v16500_v36 }
 0x3ce   : > { %v4137_v9 = vrot.slane %v4136_v32, 2  ;;  %v4143_v1 = vmax.f32 %v4141_v62, %v4142_v44  ;;  %v4150_v31 = vmax.f32 %v4148_v61, %v4149_v12  ;;  %v4156_v34 = vrot.slane %v4155_v18, 4 }
 0x3cf   : > { %v3764_v17 = vcombine.high %v3762_v59, %v3762_v59  ;;  %v4163_v48 = vrot.slane %v4162_v55, 4  ;;  %v4169_v20 = vsel %vm3965_vm4, %v3763_v54, -inf  ;;  %v4176_v43 = vsel %vm3965_vm4, %v3762_v59, -inf }
 0x3d0   : > { %v4138_v46 = vmax.f32 %v4136_v32, %v4137_v9  ;;  %v4144_v42 = vrot.slane %v4143_v1, 2  ;;  %v4151_v5 = vrot.slane %v4150_v31, 2  ;;  %v4157_v40 = vmax.f32 %v4155_v18, %v4156_v34 }
 0x3d1   : > { %v4164_v49 = vmax.f32 %v4162_v55, %v4163_v48  ;;  %v4170_v16 = vrot.slane %v4169_v20, 4  ;;  %v4177_v13 = vrot.slane %v4176_v43, 4  ;;  %v4183_v23 = vsel %vm3965_vm4, %v3764_v17, -inf }
 0x3d2   : > { %v4139_v53 = vrot.slane %v4138_v46, 1  ;;  %v4145_v58 = vmax.f32 %v4143_v1, %v4144_v42  ;;  %v4152_v45 = vmax.f32 %v4150_v31, %v4151_v5  ;;  %v4158_v39 = vrot.slane %v4157_v40, 2 }
 0x3d3   : > { %v4165_v57 = vrot.slane %v4164_v49, 2  ;;  %v4171_v30 = vmax.f32 %v4169_v20, %v4170_v16  ;;  %v4178_v41 = vmax.f32 %v4176_v43, %v4177_v13  ;;  %v4184_v29 = vrot.slane %v4183_v23, 4  ;;  %v13943_v8 = vpop.f32.mrb[16].mxu1 }
 0x3d4   : > { %v4140_v7 = vmax.f32 %v4138_v46, %v4139_v53  ;;  %v4146_v33 = vrot.slane %v4145_v58, 1  ;;  %v4153_v24 = vrot.slane %v4152_v45, 1  ;;  %v4159_v51 = vmax.f32 %v4157_v40, %v4158_v39  ;;  %v3470_v47 = vpop.f32.mrb[17].mxu1 }
 0x3d5   : > { %v4166_v15 = vmax.f32 %v4164_v49, %v4165_v57  ;;  %v4172_v6 = vrot.slane %v4171_v30, 2  ;;  %v4179_v56 = vrot.slane %v4178_v41, 2  ;;  %v4185_v0 = vmax.f32 %v4183_v23, %v4184_v29  ;;  %v13944_v37 = vpop.f32.mrb[18].mxu1  ;;  %v16537_v29 = vld [vmem:[%s14683_s21] ss:$0 sm:$0xff] }
 0x3d6   : > { %v4147_v36 = vmax.f32 %v4145_v58, %v4146_v33  ;;  %v4154_v10 = vmax.f32 %v4152_v45, %v4153_v24  ;;  %v4160_v62 = vrot.slane %v4159_v51, 1  ;;  %v4448_v61 = vpack.c.bf16 %v4140_v7, %v4140_v7  ;;  %v3473_v32 = vpop.f32.mrb[19].mxu1 }
 0x3d7   : > { %v4167_v44 = vrot.slane %v4166_v15, 1  ;;  %v4173_v12 = vmax.f32 %v4171_v30, %v4172_v6  ;;  %v4180_v59 = vmax.f32 %v4178_v41, %v4179_v56  ;;  %v4186_v18 = vrot.slane %v4185_v0, 2 }
 0x3d8   : > { %v4161_v54 = vmax.f32 %v4159_v51, %v4160_v62  ;;  %v4449_v55 = vpack.c.bf16 %v4147_v36, %v4147_v36  ;;  %v4450_v9 = vpack.c.bf16 %v4154_v10, %v4154_v10  ;;  %v4576_v1 = vunpack.c.l.b16 %v4448_v61 }
 0x3d9   : > { %v4168_v31 = vmax.f32 %v4166_v15, %v4167_v44  ;;  %v4174_v34 = vrot.slane %v4173_v12, 1  ;;  %v4181_v17 = vrot.slane %v4180_v59, 1  ;;  %v4187_v48 = vmax.f32 %v4185_v0, %v4186_v18 }
 0x3da   : > { %v4451_v20 = vpack.c.bf16 %v4161_v54, %v4161_v54  ;;  %v4577_v43 = vunpack.c.l.b16 %v4449_v55  ;;  %v4578_v46 = vunpack.c.l.b16 %v4450_v9  ;;  %v16517_v42 = vsel %vm16312_vm1, %v4753_v4, 0 }
 0x3db   : > { %v4175_v5 = vmax.f32 %v4173_v12, %v4174_v34  ;;  %v4182_v40 = vmax.f32 %v4180_v59, %v4181_v17  ;;  %v4188_v49 = vrot.slane %v4187_v48, 1  ;;  %v4452_v16 = vpack.c.bf16 %v4168_v31, %v4168_v31 }
 0x3dc   : > { %v4579_v13 = vunpack.c.l.b16 %v4451_v20  ;;  %v4644_v23 = vsel %vm4616_vm15, %v4577_v43, %v4576_v1  ;;  %v16522_v53 = vcombine.low %v16455_v26, %v16517_v42  ;;  %v12857_v58 = vcombine.low %v16517_v42, %v16517_v42 }
 0x3dd   : > { %v4645_v45 = vsel %vm4618_vm3, %v4578_v46, %v4644_v23  ;;  %v4189_v39 = vmax.f32 %v4187_v48, %v4188_v49  ;;  %v4453_v4 = vpack.c.bf16 %v4175_v5, %v4175_v5  ;;  %v4454_v57 = vpack.c.bf16 %v4182_v40, %v4182_v40 }
 0x3de   : > { %v4580_v30 = vunpack.c.l.b16 %v4452_v16  ;;  %v4646_v41 = vsel %vm4620_vm0, %v4579_v13, %v4645_v45  ;;  %5067 = vrot.lane.b32.xlu1 %v16522_v53, %s18635_s5  ;;  %v16534_v26 = vsel %vm16421_vm7, %v16504_v28, %v16497_v25  ;;  %v3479_v7 = vadd.f32 %v16537_v29, %v13943_v8 }
 0x3df   : > { %v4455_v33 = vpack.c.bf16 %v4189_v39, %v4189_v39  ;;  %v4581_v24 = vunpack.c.l.b16 %v4453_v4  ;;  %v4582_v51 = vunpack.c.l.b16 %v4454_v57  ;;  %v12894_v15 = vcombine.low %v16461_v38, %v16534_v26 }
 0x3e0   : > { %v4647_v6 = vsel %vm18590_vm14, %v4580_v30, %v4646_v41  ;;  %v3551_v56 = vmax.f32 %v3479_v7, 0.0  ;;  %v12858_v0 = vcombine.high %v16517_v42, %v16517_v42  ;;  %v12870_v36 = vrot.slane %v12857_v58, 9 }
 0x3e1   : > { %v4583_v10 = vunpack.c.l.b16 %v4455_v33  ;;  %v4648_v25 = vsel %vm4624_vm13, %v4581_v24, %v4647_v6  ;;  %v3471_v28 = vadd.f32 %v16537_v29, %v3470_v47  ;;  %v3482_v8 = vadd.f32 %v16537_v29, %v13944_v37 }
 0x3e2   : > { %v4649_v62 = vsel %vm18589_vm11, %v4582_v51, %v4648_v25  ;;  %5045 = vrot.lane.b32.xlu1 %v12894_v15, %s18639_s18  ;;  %v3590_v38 = vsel %vm1808_vm6, %v3551_v56, -inf  ;;  %v4943_v61 = vrot.slane %v12858_v0, 5  ;;  %v3474_v44 = vadd.f32 %v16537_v29, %v3473_v32 }
 0x3e3   : > { %v3549_v12 = vmax.f32 %v3471_v28, 0.0  ;;  %v3552_v59 = vmax.f32 %v3482_v8, 0.0  ;;  %v4857_v18 = vshrl.u32 %v12857_v58, 16  ;;  %v4860_v54 = vshll.u32 %v12857_v58, 16 }
 0x3e4   : > { %v16554_v55 = vsel %vm16357_vm8, %v12870_v36, %v4943_v61  ;;  %v3550_v47 = vmax.f32 %v3474_v44, 0.0  ;;  %v4866_v9 = vshll.u32 %v12858_v0, 16  ;;  %v4650_v37 = vsel %vm4628_vm10, %v4583_v10, %v4649_v62 }
 0x3e5   : > { %v12887_v1 = vcombine.low %v16485_v35, %v16554_v55  ;;  %v3589_v31 = vsel %vm1808_vm6, %v3549_v12, -inf  ;;  %v3593_v34 = vsel %vm1808_vm6, %v3552_v59, -inf  ;;  %v4859_v32 = vrot.slane %v4857_v18, 4 }
 0x3e6   : > { %v3591_v17 = vmax.f32 %v3589_v31, %v3590_v38  ;;  %v3592_v48 = vsel %vm1808_vm6, %v3550_v47, -inf  ;;  %v4862_v20 = vrot.slane %v4860_v54, 5  ;;  %v16564_v46 = vpack.c.b16 %v4650_v37, %v4650_v37 }
 0x3e7   : > { %5022 = vrot.lane.b32.xlu0 %v12887_v1, %s18632_s16  ;;  %v3594_v43 = vmax.f32 %v3592_v48, %v3593_v34  ;;  %5085 = vrot.lane.b32.xlu1 %v12887_v1, %s18638_s11  ;;  %v16567_v49 = vrot.slane %v4866_v9, 5 }
 0x3e8   : > { %v3765_v5 = vcombine.high %v3591_v17, %v3591_v17  ;;  %v3772_v40 = vrot.slane %v3591_v17, %v16307_v60  ;;  %v4863_v35 = vor.u32 %v4862_v20, %v4859_v32  ;;  %v4709_v23 = vshrl.u32 %v16564_v46, 16 }
 0x3e9   : > { %v3782_v16 = vcombine.high %v3594_v43, %v3594_v43  ;;  %v3789_v13 = vrot.slane %v3594_v43, %v16307_v60  ;;  %v4712_v58 = vshll.u32 %v16564_v46, 16 }
 0x3ea   : > { %v3779_v45 = vrot.slane %v3765_v5, %v16307_v60  ;;  %v3780_v39 = vcombine.high %v3772_v40, %v3772_v40  ;;  %v4190_v4 = vsel %vm3965_vm4, %v3772_v40, -inf  ;;  %v16574_v57 = vrot.slane %v4863_v35, 4 }
 0x3eb   : > { %v4191_v30 = vrot.slane %v4190_v4, 4  ;;  %v3796_v41 = vrot.slane %v3782_v16, %v16307_v60  ;;  %v3797_v7 = vcombine.high %v3789_v13, %v3789_v13  ;;  %v4218_v33 = vsel %vm3965_vm4, %v3789_v13, -inf }
 0x3ec   : > { %v3781_v24 = vcombine.high %v3779_v45, %v3779_v45  ;;  %v4197_v51 = vsel %vm3965_vm4, %v3780_v39, -inf  ;;  %v4204_v15 = vsel %vm3965_vm4, %v3779_v45, -inf  ;;  %v4219_v6 = vrot.slane %v4218_v33, 4 }
 0x3ed   : > { %v4192_v56 = vmax.f32 %v4190_v4, %v4191_v30  ;;  %v4198_v0 = vrot.slane %v4197_v51, 4  ;;  %v4205_v36 = vrot.slane %v4204_v15, 4  ;;  %v3798_v10 = vcombine.high %v3796_v41, %v3796_v41 }
 0x3ee   : > { %v4211_v25 = vsel %vm3965_vm4, %v3781_v24, -inf  ;;  %v4220_v28 = vmax.f32 %v4218_v33, %v4219_v6  ;;  %v4225_v8 = vsel %vm3965_vm4, %v3797_v7, -inf  ;;  %v4232_v62 = vsel %vm3965_vm4, %v3796_v41, -inf  ;;  %v16583_v38 = vpop.f32.mrb[20].mxu1 }
 0x3ef   : > { %v4193_v61 = vrot.slane %v4192_v56, 2  ;;  %v4199_v44 = vmax.f32 %v4197_v51, %v4198_v0  ;;  %v4206_v12 = vmax.f32 %v4204_v15, %v4205_v36  ;;  %v4212_v59 = vrot.slane %v4211_v25, 4  ;;  %v16585_v18 = vpop.f32.mrb[21].mxu1 }
 0x3f0   : > { %v4221_v54 = vrot.slane %v4220_v28, 2  ;;  %v4226_v47 = vrot.slane %v4225_v8, 4  ;;  %v4233_v9 = vrot.slane %v4232_v62, 4  ;;  %v4239_v37 = vsel %vm3965_vm4, %v3798_v10, -inf  ;;  %v16588_v1 = vpop.f32.mrb[22].mxu1 }
 0x3f1   : > { %v4194_v31 = vmax.f32 %v4192_v56, %v4193_v61  ;;  %v4200_v34 = vrot.slane %v4199_v44, 2  ;;  %v4207_v32 = vrot.slane %v4206_v12, 2  ;;  %v4213_v17 = vmax.f32 %v4211_v25, %v4212_v59  ;;  %v3489_v48 = vpop.f32.mrb[23].mxu1 }
 0x3f2   : > { %v4222_v20 = vmax.f32 %v4220_v28, %v4221_v54  ;;  %v4227_v43 = vmax.f32 %v4225_v8, %v4226_v47  ;;  %v4234_v5 = vmax.f32 %v4232_v62, %v4233_v9  ;;  %v4240_v40 = vrot.slane %v4239_v37, 4 }
 0x3f3   : > { %v4195_v35 = vrot.slane %v4194_v31, 1  ;;  %v4201_v16 = vmax.f32 %v4199_v44, %v4200_v34  ;;  %v4208_v13 = vmax.f32 %v4206_v12, %v4207_v32  ;;  %v4214_v45 = vrot.slane %v4213_v17, 2 }
 0x3f4   : > { %v4223_v39 = vrot.slane %v4222_v20, 1  ;;  %v4228_v4 = vrot.slane %v4227_v43, 2  ;;  %v4235_v30 = vrot.slane %v4234_v5, 2  ;;  %v4241_v41 = vmax.f32 %v4239_v37, %v4240_v40 }
 0x3f5   : > { %v4196_v7 = vmax.f32 %v4194_v31, %v4195_v35  ;;  %v4202_v33 = vrot.slane %v4201_v16, 1  ;;  %v4209_v24 = vrot.slane %v4208_v13, 1  ;;  %v4215_v51 = vmax.f32 %v4213_v17, %v4214_v45 }
 0x3f6   : > { %v4224_v15 = vmax.f32 %v4222_v20, %v4223_v39  ;;  %v4229_v6 = vmax.f32 %v4227_v43, %v4228_v4  ;;  %v4236_v56 = vmax.f32 %v4234_v5, %v4235_v30  ;;  %v4242_v0 = vrot.slane %v4241_v41, 2 }
 0x3f7   : > { %v4203_v36 = vmax.f32 %v4201_v16, %v4202_v33  ;;  %v4210_v10 = vmax.f32 %v4208_v13, %v4209_v24  ;;  %v4216_v25 = vrot.slane %v4215_v51, 1  ;;  %v4456_v28 = vpack.c.bf16 %v4196_v7, %v4196_v7 }
 0x3f8   : > { %v4230_v8 = vrot.slane %v4229_v6, 1  ;;  %v4237_v62 = vrot.slane %v4236_v56, 1  ;;  %v4243_v61 = vmax.f32 %v4241_v41, %v4242_v0  ;;  %v4460_v44 = vpack.c.bf16 %v4224_v15, %v4224_v15 }
 0x3f9   : > { %v4217_v12 = vmax.f32 %v4215_v51, %v4216_v25  ;;  %v4457_v59 = vpack.c.bf16 %v4203_v36, %v4203_v36  ;;  %v4458_v54 = vpack.c.bf16 %v4210_v10, %v4210_v10  ;;  %v4584_v47 = vunpack.c.l.b16 %v4456_v28 }
 0x3fa   : > { %v4231_v9 = vmax.f32 %v4229_v6, %v4230_v8  ;;  %v4238_v37 = vmax.f32 %v4236_v56, %v4237_v62  ;;  %v4244_v31 = vrot.slane %v4243_v61, 1  ;;  %v4588_v34 = vunpack.c.l.b16 %v4460_v44 }
 0x3fb   : > { %v4459_v32 = vpack.c.bf16 %v4217_v12, %v4217_v12  ;;  %v4585_v17 = vunpack.c.l.b16 %v4457_v59  ;;  %v4586_v20 = vunpack.c.l.b16 %v4458_v54  ;;  %v16594_v43 = vsel %vm16421_vm7, %v16574_v57, %v16567_v49 }
 0x3fc   : > { %v4245_v5 = vmax.f32 %v4243_v61, %v4244_v31  ;;  %v4461_v40 = vpack.c.bf16 %v4231_v9, %v4231_v9  ;;  %v4462_v35 = vpack.c.bf16 %v4238_v37, %v4238_v37  ;;  %v12883_v16 = vcombine.low %v16534_v26, %v16594_v43  ;;  %v14192_v31 = vld [vmem:[%s14688_s25] sm:$0xff]  }
 0x3fd   : > { %v4587_v13 = vunpack.c.l.b16 %v4459_v32  ;;  %v4651_v45 = vsel %vm4616_vm15, %v4585_v17, %v4584_v47  ;;  %v3495_v39 = vadd.f32 %v16537_v29, %v16583_v38  ;;  %v4711_v4 = vrot.slane %v4709_v23, 7  ;;  %13957 = vmatprep.subr.bf16.mxu0 %v14192_v31 }
 0x3fe   : > { %v4652_v30 = vsel %vm4618_vm3, %v4586_v20, %v4651_v45  ;;  %v4463_v41 = vpack.c.bf16 %v4245_v5, %v4245_v5  ;;  %v4589_v49 = vunpack.c.l.b16 %v4461_v40  ;;  %v4590_v57 = vunpack.c.l.b16 %v4462_v35  ;;  %5076 = vrot.lane.b32.xlu1 %v12883_v16, %s18636_s9  ;;  %13958 = vmatpush3.bf16.msra.mxu0 %v14192_v31 }
 0x3ff   : > { %v4653_v7 = vsel %vm4620_vm0, %v4587_v13, %v4652_v30  ;;  %v3555_v33 = vmax.f32 %v3495_v39, 0.0  ;;  %v4714_v26 = vor.u32 %v4712_v58, %v4711_v4  ;;  %v3487_v24 = vadd.f32 %v16537_v29, %v16585_v18 }
 0x400   : > { %v4591_v38 = vunpack.c.l.b16 %v4463_v41  ;;  %v4654_v51 = vsel %vm18590_vm14, %v4588_v34, %v4653_v7  ;;  %v3498_v23 = vadd.f32 %v16537_v29, %v16588_v1  ;;  %v3490_v15 = vadd.f32 %v16537_v29, %v3489_v48 }
 0x401   : > { %v4655_v6 = vsel %vm4624_vm13, %v4589_v49, %v4654_v51  ;;  %v3596_v56 = vsel %vm1808_vm6, %v3555_v33, -inf  ;;  %v4754_v0 = vsel %vm14881_vm2, 0, %v4714_v26  ;;  %v3553_v46 = vmax.f32 %v3487_v24, 0.0  ;;  %v14193_v33 = vld [vmem:[%s14688_s25 + $0x8] sm:$0xff]  }
 0x402   : > { %v4656_v58 = vsel %vm18589_vm11, %v4590_v57, %v4655_v6  ;;  %v16621_v18 = vsel %vm16312_vm1, %v4754_v0, 0  ;;  %v3556_v36 = vmax.f32 %v3498_v23, 0.0  ;;  %v3554_v10 = vmax.f32 %v3490_v15, 0.0  ;;  %13959 = vmatprep.subr.bf16.mxu0 %v14193_v33 }
 0x403   : > { %v12891_v1 = vcombine.low %v16517_v42, %v16621_v18  ;;  %v16627_v48 = vcombine.low %v16621_v18, %v16621_v18  ;;  %v3595_v25 = vsel %vm1808_vm6, %v3553_v46, -inf  ;;  %v16632_v28 = vcombine.high %v16621_v18, %v16621_v18  ;;  %13960 = vmatpush3.bf16.msra.mxu0 %v14193_v33 }
 0x404   : > { %v3597_v8 = vmax.f32 %v3595_v25, %v3596_v56  ;;  %v3599_v62 = vsel %vm1808_vm6, %v3556_v36, -inf  ;;  %v3598_v61 = vsel %vm1808_vm6, %v3554_v10, -inf  ;;  %v4657_v44 = vsel %vm4628_vm10, %v4591_v38, %v4656_v58 }
 0x405   : > { %5034 = vrot.lane.b32.xlu0 %v12891_v1, %s18633_s2  ;;  %v3600_v42 = vmax.f32 %v3598_v61, %v3599_v62  ;;  %v12871_v12 = vrot.slane %v16627_v48, 9  ;;  %v4947_v59 = vrot.slane %v16632_v28, 5  ;;  %v16640_v54 = vpack.c.b16 %v4657_v44, %v4657_v44 }
 0x406   : > { %v3799_v47 = vcombine.high %v3597_v8, %v3597_v8  ;;  %v3806_v9 = vrot.slane %v3597_v8, %v16307_v60  ;;  %v4871_v37 = vshrl.u32 %v16627_v48, 16 }
 0x407   : > { %v3816_v34 = vcombine.high %v3600_v42, %v3600_v42  ;;  %v3823_v32 = vrot.slane %v3600_v42, %v16307_v60  ;;  %v16648_v17 = vsel %vm16357_vm8, %v12871_v12, %v4947_v59  ;;  %v4716_v20 = vshrl.u32 %v16640_v54, 16 }
 0x408   : > { %v3813_v5 = vrot.slane %v3799_v47, %v16307_v60  ;;  %v3814_v40 = vcombine.high %v3806_v9, %v3806_v9  ;;  %v4246_v35 = vsel %vm3965_vm4, %v3806_v9, -inf  ;;  %v12899_v13 = vcombine.low %v16554_v55, %v16648_v17 }
 0x409   : > { %v4247_v45 = vrot.slane %v4246_v35, 4  ;;  %v3830_v39 = vrot.slane %v3816_v34, %v16307_v60  ;;  %v3831_v4 = vcombine.high %v3823_v32, %v3823_v32  ;;  %v4274_v30 = vsel %vm3965_vm4, %v3823_v32, -inf  ;;  %5002 = vrot.lane.b32.xlu0 %v12883_v16, %s18637_s26 }
 0x40a   : > { %v3815_v41 = vcombine.high %v3813_v5, %v3813_v5  ;;  %v4253_v49 = vsel %vm3965_vm4, %v3814_v40, -inf  ;;  %v4260_v57 = vsel %vm3965_vm4, %v3813_v5, -inf  ;;  %v4275_v7 = vrot.slane %v4274_v30, 4 }
 0x40b   : > { %v4248_v26 = vmax.f32 %v4246_v35, %v4247_v45  ;;  %v4254_v24 = vrot.slane %v4253_v49, 4  ;;  %v4261_v55 = vrot.slane %v4260_v57, 4  ;;  %v3832_v38 = vcombine.high %v3830_v39, %v3830_v39 }
 0x40c   : > { %v4267_v51 = vsel %vm3965_vm4, %v3815_v41, -inf  ;;  %v4276_v23 = vmax.f32 %v4274_v30, %v4275_v7  ;;  %v4281_v15 = vsel %vm3965_vm4, %v3831_v4, -inf  ;;  %v4288_v6 = vsel %vm3965_vm4, %v3830_v39, -inf }
 0x40d   : > { %v4249_v16 = vrot.slane %v4248_v26, 2  ;;  %v4255_v56 = vmax.f32 %v4253_v49, %v4254_v24  ;;  %v4262_v0 = vmax.f32 %v4260_v57, %v4261_v55  ;;  %v4268_v46 = vrot.slane %v4267_v51, 4  ;;  %5060 = vrot.lane.b32.xlu0 %v12899_v13, %s18634_s22 }
 0x40e   : > { %v4277_v58 = vrot.slane %v4276_v23, 2  ;;  %v4282_v36 = vrot.slane %v4281_v15, 4  ;;  %v4289_v10 = vrot.slane %v4288_v6, 4  ;;  %v4295_v1 = vsel %vm3965_vm4, %v3832_v38, -inf  ;;  %v16666_v25 = vpop.f32.mrb[24].mxu1 }
 0x40f   : > { %v4250_v8 = vmax.f32 %v4248_v26, %v4249_v16  ;;  %v4256_v62 = vrot.slane %v4255_v56, 2  ;;  %v4263_v61 = vrot.slane %v4262_v0, 2  ;;  %v4269_v44 = vmax.f32 %v4267_v51, %v4268_v46  ;;  %v16668_v42 = vpop.f32.mrb[25].mxu1 }
 0x410   : > { %v4278_v12 = vmax.f32 %v4276_v23, %v4277_v58  ;;  %v4283_v59 = vmax.f32 %v4281_v15, %v4282_v36  ;;  %v4290_v47 = vmax.f32 %v4288_v6, %v4289_v10  ;;  %v4296_v9 = vrot.slane %v4295_v1, 4  ;;  %v16670_v31 = vpop.f32.mrb[26].mxu1  ;;  %v14194_v15 = vld [vmem:[%s14688_s25 + $0x10] sm:$0xff]  }
 0x411   : > { %v4251_v34 = vrot.slane %v4250_v8, 1  ;;  %v4257_v32 = vmax.f32 %v4255_v56, %v4256_v62  ;;  %v4264_v5 = vmax.f32 %v4262_v0, %v4263_v61  ;;  %v4270_v40 = vrot.slane %v4269_v44, 2  ;;  %v16672_v35 = vpop.f32.mrb[27].mxu1  ;;  %13961 = vmatprep.subr.bf16.mxu0 %v14194_v15 }
 0x412   : > { %v4279_v13 = vrot.slane %v4278_v12, 1  ;;  %v4284_v45 = vrot.slane %v4283_v59, 2  ;;  %v4291_v39 = vrot.slane %v4290_v47, 2  ;;  %v4297_v4 = vmax.f32 %v4295_v1, %v4296_v9  ;;  %13962 = vmatpush3.bf16.msra.mxu0 %v14194_v15 }
 0x413   : > { %v4252_v30 = vmax.f32 %v4250_v8, %v4251_v34  ;;  %v4258_v41 = vrot.slane %v4257_v32, 1  ;;  %v4265_v49 = vrot.slane %v4264_v5, 1  ;;  %v4271_v57 = vmax.f32 %v4269_v44, %v4270_v40 }
 0x414   : > { %v4280_v7 = vmax.f32 %v4278_v12, %v4279_v13  ;;  %v4285_v33 = vmax.f32 %v4283_v59, %v4284_v45  ;;  %v4292_v26 = vmax.f32 %v4290_v47, %v4291_v39  ;;  %v4298_v24 = vrot.slane %v4297_v4, 2 }
 0x415   : > { %v4259_v55 = vmax.f32 %v4257_v32, %v4258_v41  ;;  %v4266_v38 = vmax.f32 %v4264_v5, %v4265_v49  ;;  %v4272_v51 = vrot.slane %v4271_v57, 1  ;;  %v4464_v23 = vpack.c.bf16 %v4252_v30, %v4252_v30 }
 0x416   : > { %v4286_v6 = vrot.slane %v4285_v33, 1  ;;  %v4293_v16 = vrot.slane %v4292_v26, 1  ;;  %v4299_v56 = vmax.f32 %v4297_v4, %v4298_v24  ;;  %v4874_v0 = vshll.u32 %v16627_v48, 16  ;;  %v14195_v4 = vld [vmem:[%s14688_s25 + $0x18] sm:$0xff]  }
 0x417   : > { %v4273_v46 = vmax.f32 %v4271_v57, %v4272_v51  ;;  %v4465_v58 = vpack.c.bf16 %v4259_v55, %v4259_v55  ;;  %v4466_v36 = vpack.c.bf16 %v4266_v38, %v4266_v38  ;;  %v4468_v10 = vpack.c.bf16 %v4280_v7, %v4280_v7  ;;  %13963 = vmatprep.subr.bf16.mxu0 %v14195_v4 }
 0x418   : > { %v4592_v1 = vunpack.c.l.b16 %v4464_v23  ;;  %v4287_v8 = vmax.f32 %v4285_v33, %v4286_v6  ;;  %v4294_v62 = vmax.f32 %v4292_v26, %v4293_v16  ;;  %v4300_v61 = vrot.slane %v4299_v56, 1  ;;  %13964 = vmatpush3.bf16.msra.mxu0 %v14195_v4 }
 0x419   : > { %v4467_v44 = vpack.c.bf16 %v4273_v46, %v4273_v46  ;;  %v4593_v12 = vunpack.c.l.b16 %v4465_v58  ;;  %v4594_v59 = vunpack.c.l.b16 %v4466_v36  ;;  %v4718_v47 = vrot.slane %v4716_v20, 7 }
 0x41a   : > { %v4301_v9 = vmax.f32 %v4299_v56, %v4300_v61  ;;  %v4469_v34 = vpack.c.bf16 %v4287_v8, %v4287_v8  ;;  %v4470_v32 = vpack.c.bf16 %v4294_v62, %v4294_v62  ;;  %v4719_v5 = vshll.u32 %v16640_v54, 16  ;;  %v14196_v54 = vld [vmem:[%s14688_s25 + $0x20] ss:$0 sps:$4 sm:$0xff]  }
 0x41b   : > { %v4595_v40 = vunpack.c.l.b16 %v4467_v44  ;;  %v4658_v13 = vsel %vm4616_vm15, %v4593_v12, %v4592_v1  ;;  %v4873_v45 = vrot.slane %v4871_v37, 4  ;;  %v4876_v39 = vrot.slane %v4874_v0, 5  ;;  %14093 = vmatprep.subr.msk.bf16.mxu0 %vm2138_vm5, %v14196_v54 }
 0x41c   : > { %v4659_v30 = vsel %vm4618_vm3, %v4594_v59, %v4658_v13  ;;  %v4471_v41 = vpack.c.bf16 %v4301_v9, %v4301_v9  ;;  %v4596_v49 = vunpack.c.l.b16 %v4468_v10  ;;  %v4597_v57 = vunpack.c.l.b16 %v4469_v34 }
 0x41d   : > { %v4660_v20 = vsel %vm4620_vm0, %v4595_v40, %v4659_v30  ;;  %v4721_v7 = vor.u32 %v4719_v5, %v4718_v47  ;;  %v4877_v33 = vor.u32 %v4876_v39, %v4873_v45  ;;  %v4880_v26 = vshll.u32 %v16632_v28, 16 }
 0x41e   : > { %v4598_v24 = vunpack.c.l.b16 %v4470_v32  ;;  %v4661_v55 = vsel %vm18590_vm14, %v4596_v49, %v4660_v20  ;;  %v3511_v48 = vadd.f32 %v16537_v29, %v16666_v25  ;;  %v3503_v37 = vadd.f32 %v16537_v29, %v16668_v42 }
 0x41f   : > { %v4662_v38 = vsel %vm4624_vm13, %v4597_v57, %v4661_v55  ;;  %v4755_v51 = vsel %vm14881_vm2, 0, %v4721_v7  ;;  %v4878_v23 = vrot.slane %v4877_v33, 4  ;;  %v4882_v15 = vrot.slane %v4880_v26, 5 }
 0x420   : > { %v4663_v28 = vsel %vm18589_vm11, %v4598_v24, %v4662_v38  ;;  %v16699_v6 = vsel %vm16312_vm1, %v4755_v51, 0  ;;  %v3559_v25 = vmax.f32 %v3511_v48, 0.0  ;;  %v3557_v16 = vmax.f32 %v3503_v37, 0.0 }
 0x421   : > { %v16703_v42 = vcombine.low %v16621_v18, %v16699_v6  ;;  %v12861_v56 = vcombine.low %v16699_v6, %v16699_v6  ;;  %v16709_v0 = vsel %vm16421_vm7, %v4878_v23, %v4882_v15  ;;  %v12862_v46 = vcombine.high %v16699_v6, %v16699_v6 }
 0x422   : > { %v12895_v58 = vcombine.low %v16594_v43, %v16709_v0  ;;  %v3602_v36 = vsel %vm1808_vm6, %v3559_v25, -inf  ;;  %v3601_v10 = vsel %vm1808_vm6, %v3557_v16, -inf  ;;  %v3514_v18 = vadd.f32 %v16537_v29, %v16670_v31 }
 0x423   : > { %5069 = vrot.lane.b32.xlu0 %v16703_v42, %s18635_s5  ;;  %v12872_v1 = vrot.slane %v12861_v56, 9  ;;  %v4951_v8 = vrot.slane %v12862_v46, 5  ;;  %v3603_v62 = vmax.f32 %v3601_v10, %v3602_v36  ;;  %v4885_v61 = vshrl.u32 %v12861_v56, 16 }
 0x424   : > { %v4599_v44 = vunpack.c.l.b16 %v4471_v41  ;;  %v4888_v12 = vshll.u32 %v12861_v56, 16  ;;  %v3560_v59 = vmax.f32 %v3514_v18, 0.0  ;;  %v3506_v43 = vadd.f32 %v16537_v29, %v16672_v35 }
 0x425   : > { %v16725_v47 = vsel %vm16357_vm8, %v12872_v1, %v4951_v8  ;;  %v3833_v9 = vcombine.high %v3603_v62, %v3603_v62  ;;  %v3840_v31 = vrot.slane %v3603_v62, %v16307_v60  ;;  %v4887_v34 = vrot.slane %v4885_v61, 4 }
 0x426   : > { %v12888_v32 = vcombine.low %v16648_v17, %v16725_v47  ;;  %v4890_v5 = vrot.slane %v4888_v12, 5  ;;  %v4894_v40 = vshll.u32 %v12862_v46, 16  ;;  %v3605_v13 = vsel %vm1808_vm6, %v3560_v59, -inf }
 0x427   : > { %5047 = vrot.lane.b32.xlu0 %v12895_v58, %s18639_s18  ;;  %v3847_v45 = vrot.slane %v3833_v9, %v16307_v60  ;;  %v3848_v35 = vcombine.high %v3840_v31, %v3840_v31  ;;  %v4302_v39 = vsel %vm3965_vm4, %v3840_v31, -inf  ;;  %v3558_v4 = vmax.f32 %v3506_v43, 0.0 }
 0x428   : > { %5024 = vrot.lane.b32.xlu1 %v12888_v32, %s18632_s16  ;;  %v4303_v30 = vrot.slane %v4302_v39, 4  ;;  %v4891_v41 = vor.u32 %v4890_v5, %v4887_v34  ;;  %v4664_v49 = vsel %vm4628_vm10, %v4599_v44, %v4663_v28  ;;  %v5203_v17 = vsel %vm2138_vm5, %v14196_v54, 0 }
 0x429   : > { %v3849_v57 = vcombine.high %v3847_v45, %v3847_v45  ;;  %v4309_v20 = vsel %vm3965_vm4, %v3848_v35, -inf  ;;  %v4316_v7 = vsel %vm3965_vm4, %v3847_v45, -inf  ;;  %v3604_v33 = vsel %vm1808_vm6, %v3558_v4, -inf  ;;  %13966 = vmatpush3.bf16.msra.mxu0 %v5203_v17 }
 0x42a   : > { %v4304_v26 = vmax.f32 %v4302_v39, %v4303_v30  ;;  %v4310_v24 = vrot.slane %v4309_v20, 4  ;;  %v4317_v55 = vrot.slane %v4316_v7, 4  ;;  %v4892_v48 = vrot.slane %v4891_v41, 4  ;;  %6589 = vmatprep.subr.bf16.mxu0 %v18656_v27 }
 0x42b   : > { %5087 = vrot.lane.b32.xlu0 %v12888_v32, %s18638_s11  ;;  %v4323_v37 = vsel %vm3965_vm4, %v3849_v57, -inf  ;;  %v4896_v38 = vrot.slane %v4894_v40, 5  ;;  %v3606_v54 = vmax.f32 %v3604_v33, %v3605_v13  ;;  %v16743_v51 = vpack.c.b16 %v4664_v49, %v4664_v49  ;;  %v16745_v23 = vpop.f32.mrb[28].mxu1 }
 0x42c   : > { %v4305_v15 = vrot.slane %v4304_v26, 2  ;;  %v4311_v28 = vmax.f32 %v4309_v20, %v4310_v24  ;;  %v4318_v25 = vmax.f32 %v4316_v7, %v4317_v55  ;;  %v4324_v16 = vrot.slane %v4323_v37, 4  ;;  %v16747_v56 = vpop.f32.mrb[29].mxu1 }
 0x42d   : > { %v16751_v46 = vsel %vm16421_vm7, %v4892_v48, %v4896_v38  ;;  %v3850_v58 = vcombine.high %v3606_v54, %v3606_v54  ;;  %v3857_v36 = vrot.slane %v3606_v54, %v16307_v60  ;;  %v4723_v10 = vshrl.u32 %v16743_v51, 16  ;;  %v16755_v18 = vpop.f32.mrb[30].mxu1 }
 0x42e   : > { %v4306_v1 = vmax.f32 %v4304_v26, %v4305_v15  ;;  %v4312_v8 = vrot.slane %v4311_v28, 2  ;;  %v4319_v62 = vrot.slane %v4318_v25, 2  ;;  %v4325_v61 = vmax.f32 %v4323_v37, %v4324_v16  ;;  %v16757_v44 = vpop.f32.mrb[31].mxu1 }
 0x42f   : > { %v16761_v12 = vcombine.low %v16709_v0, %v16751_v46  ;;  %v3864_v59 = vrot.slane %v3850_v58, %v16307_v60  ;;  %v3865_v43 = vcombine.high %v3857_v36, %v3857_v36  ;;  %v4330_v9 = vsel %vm3965_vm4, %v3857_v36, -inf }
 0x430   : > { %v4307_v31 = vrot.slane %v4306_v1, 1  ;;  %v4313_v34 = vmax.f32 %v4311_v28, %v4312_v8  ;;  %v4320_v32 = vmax.f32 %v4318_v25, %v4319_v62  ;;  %v4326_v5 = vrot.slane %v4325_v61, 2 }
 0x431   : > { %5078 = vrot.lane.b32.xlu0 %v16761_v12, %s18636_s9  ;;  %v3866_v40 = vcombine.high %v3864_v59, %v3864_v59  ;;  %v4331_v13 = vrot.slane %v4330_v9, 4  ;;  %v4337_v45 = vsel %vm3965_vm4, %v3865_v43, -inf  ;;  %v4344_v35 = vsel %vm3965_vm4, %v3864_v59, -inf }
 0x432   : > { %v4308_v0 = vmax.f32 %v4306_v1, %v4307_v31  ;;  %v4314_v39 = vrot.slane %v4313_v34, 1  ;;  %v4321_v4 = vrot.slane %v4320_v32, 1  ;;  %v4327_v30 = vmax.f32 %v4325_v61, %v4326_v5 }
 0x433   : > { %v4332_v41 = vmax.f32 %v4330_v9, %v4331_v13  ;;  %v4338_v49 = vrot.slane %v4337_v45, 4  ;;  %v4345_v17 = vrot.slane %v4344_v35, 4  ;;  %v4351_v57 = vsel %vm3965_vm4, %v3866_v40, -inf }
 0x434   : > { %v4315_v20 = vmax.f32 %v4313_v34, %v4314_v39  ;;  %v4322_v7 = vmax.f32 %v4320_v32, %v4321_v4  ;;  %v4328_v33 = vrot.slane %v4327_v30, 1  ;;  %v4472_v26 = vpack.c.bf16 %v4308_v0, %v4308_v0 }
 0x435   : > { %v4333_v24 = vrot.slane %v4332_v41, 2  ;;  %v4339_v55 = vmax.f32 %v4337_v45, %v4338_v49  ;;  %v4346_v48 = vmax.f32 %v4344_v35, %v4345_v17  ;;  %v4352_v37 = vrot.slane %v4351_v57, 4 }
 0x436   : > { %v4329_v38 = vmax.f32 %v4327_v30, %v4328_v33  ;;  %v4473_v54 = vpack.c.bf16 %v4315_v20, %v4315_v20  ;;  %v4474_v15 = vpack.c.bf16 %v4322_v7, %v4322_v7  ;;  %v4600_v28 = vunpack.c.l.b16 %v4472_v26 }
 0x437   : > { %v4334_v25 = vmax.f32 %v4332_v41, %v4333_v24  ;;  %v4340_v16 = vrot.slane %v4339_v55, 2  ;;  %v4347_v58 = vrot.slane %v4346_v48, 2  ;;  %v4353_v36 = vmax.f32 %v4351_v57, %v4352_v37 }
 0x438   : > { %v4475_v1 = vpack.c.bf16 %v4329_v38, %v4329_v38  ;;  %v4601_v8 = vunpack.c.l.b16 %v4473_v54  ;;  %v4602_v62 = vunpack.c.l.b16 %v4474_v15  ;;  %v4725_v61 = vrot.slane %v4723_v10, 7 }
 0x439   : > { %v4335_v59 = vrot.slane %v4334_v25, 1  ;;  %v4341_v43 = vmax.f32 %v4339_v55, %v4340_v16  ;;  %v4348_v9 = vmax.f32 %v4346_v48, %v4347_v58  ;;  %v4354_v31 = vrot.slane %v4353_v36, 2 }
 0x43a   : > { %v4603_v34 = vunpack.c.l.b16 %v4475_v1  ;;  %v4665_v32 = vsel %vm4616_vm15, %v4601_v8, %v4600_v28  ;;  %v4726_v5 = vshll.u32 %v16743_v51, 16  ;;  %v3527_v49 = vadd.f32 %v16537_v29, %v16745_v23 }
 0x43b   : > { %v4666_v40 = vsel %vm4618_vm3, %v4602_v62, %v4665_v32  ;;  %v4336_v13 = vmax.f32 %v4334_v25, %v4335_v59  ;;  %v4342_v45 = vrot.slane %v4341_v43, 1  ;;  %v4349_v35 = vrot.slane %v4348_v9, 1 }
 0x43c   : > { %v4355_v0 = vmax.f32 %v4353_v36, %v4354_v31  ;;  %v4667_v39 = vsel %vm4620_vm0, %v4603_v34, %v4666_v40  ;;  %v4728_v4 = vor.u32 %v4726_v5, %v4725_v61  ;;  %v3519_v51 = vadd.f32 %v16537_v29, %v16747_v56 }
 0x43d   : > { %v4343_v30 = vmax.f32 %v4341_v43, %v4342_v45  ;;  %v4350_v10 = vmax.f32 %v4348_v9, %v4349_v35  ;;  %v4476_v41 = vpack.c.bf16 %v4336_v13, %v4336_v13  ;;  %v3530_v20 = vadd.f32 %v16537_v29, %v16755_v18 }
 0x43e   : > { %v4356_v17 = vrot.slane %v4355_v0, 1  ;;  %v4756_v57 = vsel %vm14881_vm2, 0, %v4728_v4  ;;  %v3563_v54 = vmax.f32 %v3527_v49, 0.0  ;;  %v3561_v16 = vmax.f32 %v3519_v51, 0.0 }
 0x43f   : > { %v4477_v7 = vpack.c.bf16 %v4343_v30, %v4343_v30  ;;  %v4478_v33 = vpack.c.bf16 %v4350_v10, %v4350_v10  ;;  %v4604_v26 = vunpack.c.l.b16 %v4476_v41  ;;  %v16784_v24 = vsel %vm16312_vm1, %v4756_v57, 0  ;;  %v16822_v41 = vpop.permute.xlu1 %5020 }
 0x440   : > { %v4357_v55 = vmax.f32 %v4355_v0, %v4356_v17  ;;  %v12892_v23 = vcombine.low %v16699_v6, %v16784_v24  ;;  %v12863_v48 = vcombine.low %v16784_v24, %v16784_v24  ;;  %v16792_v56 = vcombine.high %v16784_v24, %v16784_v24 }
 0x441   : > { %v4605_v37 = vunpack.c.l.b16 %v4477_v7  ;;  %v4606_v18 = vunpack.c.l.b16 %v4478_v33  ;;  %v4668_v38 = vsel %vm18590_vm14, %v4604_v26, %v4667_v39  ;;  %v3608_v58 = vsel %vm1808_vm6, %v3563_v54, -inf }
 0x442   : > { %v4479_v15 = vpack.c.bf16 %v4357_v55, %v4357_v55  ;;  %5036 = vrot.lane.b32.xlu1 %v12892_v23, %s18633_s2  ;;  %v12873_v28 = vrot.slane %v12863_v48, 9  ;;  %v4955_v25 = vrot.slane %v16792_v56, 5  ;;  %v3564_v36 = vmax.f32 %v3530_v20, 0.0 }
 0x443   : > { %v4669_v6 = vsel %vm4624_vm13, %v4605_v37, %v4668_v38  ;;  %v3522_v1 = vadd.f32 %v16537_v29, %v16757_v44  ;;  %v3607_v59 = vsel %vm1808_vm6, %v3561_v16, -inf  ;;  %v4899_v44 = vshrl.u32 %v12863_v48, 16 }
 0x444   : > { %v4607_v8 = vunpack.c.l.b16 %v4479_v15  ;;  %v4670_v62 = vsel %vm18589_vm11, %v4606_v18, %v4669_v6  ;;  %v16804_v61 = vsel %vm16357_vm8, %v12873_v28, %v4955_v25  ;;  %v3609_v9 = vmax.f32 %v3607_v59, %v3608_v58  ;;  %v16833_v28 = vpop.permute.xlu1 %5032 }
 0x445   : > { %v12900_v43 = vcombine.low %v16725_v47, %v16804_v61  ;;  %v3611_v31 = vsel %vm1808_vm6, %v3564_v36, -inf  ;;  %v3562_v34 = vmax.f32 %v3522_v1, 0.0  ;;  %v4902_v32 = vshll.u32 %v12863_v48, 16 }
 0x446   : > { %5004 = vrot.lane.b32.xlu1 %v16761_v12, %s18637_s26  ;;  %v4671_v29 = vsel %vm4628_vm10, %v4607_v8, %v4670_v62  ;;  %v3867_v5 = vcombine.high %v3609_v9, %v3609_v9  ;;  %v3874_v40 = vrot.slane %v3609_v9, %v16307_v60  ;;  %v16815_v0 = vrot.slane %v4899_v44, 4 }
 0x447   : > { %v3610_v13 = vsel %vm1808_vm6, %v3562_v34, -inf  ;;  %v4685_v45 = vpack.c.b16 %v4671_v29, %v4671_v29  ;;  %v16817_v47 = vrot.slane %v4902_v32, 5  ;;  %v4908_v39 = vshll.u32 %v16792_v56, 16 }
 0x448   : > { %v3612_v35 = vmax.f32 %v3610_v13, %v3611_v31  ;;  %v3881_v4 = vrot.slane %v3867_v5, %v16307_v60  ;;  %v3882_v12 = vcombine.high %v3874_v40, %v3874_v40  ;;  %v4358_v30 = vsel %vm3965_vm4, %v3874_v40, -inf }
 0x449   : > { %v4730_v10 = vshrl.u32 %v4685_v45, 16  ;;  %v4359_v49 = vrot.slane %v4358_v30, 4  ;;  %v4733_v51 = vshll.u32 %v4685_v45, 16  ;;  %vm18663_vm5 = vcmask 130048  }
 0x44a   : > { %5062 = vrot.lane.b32.xlu1 %v12900_v43, %s18634_s22  ;;  %v3884_v17 = vcombine.high %v3612_v35, %v3612_v35  ;;  %v3891_v57 = vrot.slane %v3612_v35, %v16307_v60  ;;  %v3883_v20 = vcombine.high %v3881_v4, %v3881_v4  ;;  %v4365_v7 = vsel %vm3965_vm4, %v3882_v12, -inf }
 0x44b   : > { %v4372_v33 = vsel %vm3965_vm4, %v3881_v4, -inf  ;;  %v4732_v26 = vrot.slane %v4730_v10, 7  ;;  %v4360_v55 = vmax.f32 %v4358_v30, %v4359_v49  ;;  %v4366_v23 = vrot.slane %v4365_v7, 4  ;;  %v16838_v10 = vpop.permute.xlu1 %5000 }
 0x44c   : > { %v4373_v48 = vrot.slane %v4372_v33, 4  ;;  %v3898_v37 = vrot.slane %v3884_v17, %v16307_v60  ;;  %v4379_v18 = vsel %vm3965_vm4, %v3883_v20, -inf  ;;  %v3899_v38 = vcombine.high %v3891_v57, %v3891_v57 }
 0x44d   : > { %v4386_v54 = vsel %vm3965_vm4, %v3891_v57, -inf  ;;  %v16831_v15 = vor.u32 %v4733_v51, %v4732_v26  ;;  %v4361_v25 = vrot.slane %v4360_v55, 2  ;;  %v4367_v16 = vmax.f32 %v4365_v7, %v4366_v23 }
 0x44e   : > { %v4374_v6 = vmax.f32 %v4372_v33, %v4373_v48  ;;  %v4380_v58 = vrot.slane %v4379_v18, 4  ;;  %v3900_v36 = vcombine.high %v3898_v37, %v3898_v37  ;;  %v4387_v1 = vrot.slane %v4386_v54, 4 }
 0x44f   : > { %v4393_v8 = vsel %vm3965_vm4, %v3899_v38, -inf  ;;  %v4400_v62 = vsel %vm3965_vm4, %v3898_v37, -inf  ;;  %v4362_v59 = vmax.f32 %v4360_v55, %v4361_v25  ;;  %v4368_v43 = vrot.slane %v4367_v16, 2 }
 0x450   : > { %v4375_v9 = vrot.slane %v4374_v6, 2  ;;  %v4381_v31 = vmax.f32 %v4379_v18, %v4380_v58  ;;  %v4388_v34 = vmax.f32 %v4386_v54, %v4387_v1  ;;  %v4394_v29 = vrot.slane %v4393_v8, 4 }
 0x451   : > { %v4401_v44 = vrot.slane %v4400_v62, 4  ;;  %v4407_v32 = vsel %vm3965_vm4, %v3900_v36, -inf  ;;  %v4363_v5 = vrot.slane %v4362_v59, 1  ;;  %v4369_v40 = vmax.f32 %v4367_v16, %v4368_v43  ;;  %v16840_v43 = vpop.permute.xlu1 %5058 }
 0x452   : > { %v4376_v13 = vmax.f32 %v4374_v6, %v4375_v9  ;;  %v4382_v45 = vrot.slane %v4381_v31, 2  ;;  %v4389_v35 = vrot.slane %v4388_v34, 2  ;;  %v4395_v4 = vmax.f32 %v4393_v8, %v4394_v29 }
 0x453   : > { %v4402_v12 = vmax.f32 %v4400_v62, %v4401_v44  ;;  %v4408_v30 = vrot.slane %v4407_v32, 4  ;;  %v4364_v49 = vmax.f32 %v4362_v59, %v4363_v5  ;;  %v4370_v17 = vrot.slane %v4369_v40, 1 }
 0x454   : > { %v4377_v57 = vrot.slane %v4376_v13, 1  ;;  %v4383_v51 = vmax.f32 %v4381_v31, %v4382_v45  ;;  %v4390_v20 = vmax.f32 %v4388_v34, %v4389_v35  ;;  %v4396_v7 = vrot.slane %v4395_v4, 2 }
 0x455   : > { %v4403_v33 = vrot.slane %v4402_v12, 2  ;;  %v4409_v26 = vmax.f32 %v4407_v32, %v4408_v30  ;;  %v4371_v55 = vmax.f32 %v4369_v40, %v4370_v17  ;;  %v4480_v37 = vpack.c.bf16 %v4364_v49, %v4364_v49 }
 0x456   : > { %v4378_v23 = vmax.f32 %v4376_v13, %v4377_v57  ;;  %v4384_v48 = vrot.slane %v4383_v51, 1  ;;  %v4391_v18 = vrot.slane %v4390_v20, 1  ;;  %v4397_v38 = vmax.f32 %v4395_v4, %v4396_v7  ;;  %v5068_v7 = vpop.permute.xlu1 %5067 }
 0x457   : > { %v4404_v54 = vmax.f32 %v4402_v12, %v4403_v33  ;;  %v4410_v25 = vrot.slane %v4409_v26, 2  ;;  %v4481_v6 = vpack.c.bf16 %v4371_v55, %v4371_v55  ;;  %v4608_v36 = vunpack.c.l.b16 %v4480_v37 }
 0x458   : > { %v4385_v16 = vmax.f32 %v4383_v51, %v4384_v48  ;;  %v4482_v58 = vpack.c.bf16 %v4378_v23, %v4378_v23  ;;  %v4392_v1 = vmax.f32 %v4390_v20, %v4391_v18  ;;  %v4398_v8 = vrot.slane %v4397_v38, 1 }
 0x459   : > { %v4405_v62 = vrot.slane %v4404_v54, 1  ;;  %v4411_v59 = vmax.f32 %v4409_v26, %v4410_v25  ;;  %v4609_v31 = vunpack.c.l.b16 %v4481_v6  ;;  %v4757_v29 = vsel %vm14881_vm2, 0, %v16831_v15 }
 0x45a   : > { %v4483_v9 = vpack.c.bf16 %v4385_v16, %v4385_v16  ;;  %v4610_v34 = vunpack.c.l.b16 %v4482_v58  ;;  %v4399_v44 = vmax.f32 %v4397_v38, %v4398_v8  ;;  %v4484_v40 = vpack.c.bf16 %v4392_v1, %v4392_v1 }
 0x45b   : > { %v4406_v32 = vmax.f32 %v4404_v54, %v4405_v62  ;;  %v4412_v5 = vrot.slane %v4411_v59, 1  ;;  %v4672_v45 = vsel %vm4616_vm15, %v4609_v31, %v4608_v36  ;;  %v16848_v35 = vsel %vm16312_vm1, %v4757_v29, 0  ;;  %v5046_v36 = vpop.permute.xlu1 %5045 }
 0x45c   : > { %v4611_v13 = vunpack.c.l.b16 %v4483_v9  ;;  %v4905_v4 = vor.u32 %v16817_v47, %v16815_v0  ;;  %v4673_v12 = vsel %vm4618_vm3, %v4610_v34, %v4672_v45  ;;  %v4485_v49 = vpack.c.bf16 %v4399_v44, %v4399_v44 }
 0x45d   : > { %v4413_v30 = vmax.f32 %v4411_v59, %v4412_v5  ;;  %v4486_v17 = vpack.c.bf16 %v4406_v32, %v4406_v32  ;;  %v4612_v15 = vunpack.c.l.b16 %v4484_v40  ;;  %v16856_v51 = vcombine.low %v16784_v24, %v16848_v35 }
 0x45e   : > { %v4674_v57 = vsel %vm4620_vm0, %v4611_v13, %v4673_v12  ;;  %v12865_v20 = vcombine.low %v16848_v35, %v16848_v35  ;;  %v4613_v26 = vunpack.c.l.b16 %v4485_v49  ;;  %v4906_v55 = vrot.slane %v4905_v4, 4 }
 0x45f   : > { %v4487_v33 = vpack.c.bf16 %v4413_v30, %v4413_v30  ;;  %v4910_v0 = vrot.slane %v4908_v39, 5  ;;  %v4614_v47 = vunpack.c.l.b16 %v4486_v17  ;;  %v4675_v23 = vsel %vm18590_vm14, %v4612_v15, %v4674_v57  ;;  %5071 = vrot.lane.b32.xlu1 %v16856_v51, %s18635_s5  ;;  %v5086_v40 = vpop.permute.xlu1 %5085 }
 0x460   : > { %v12866_v24 = vcombine.high %v16848_v35, %v16848_v35  ;;  %v12874_v48 = vrot.slane %v12865_v20, 9  ;;  %v12878_v37 = vcombine.low %v16322_v11, %v16390_v50  ;;  %v4676_v18 = vsel %vm4624_vm13, %v4613_v26, %v4675_v23 }
 0x461   : > { %v4911_v38 = vsel %vm16421_vm7, %v4906_v55, %v4910_v0  ;;  %v4615_v56 = vunpack.c.l.b16 %v4487_v33  ;;  %v4677_v39 = vsel %vm18589_vm11, %v4614_v47, %v4676_v18  ;;  %v4913_v6 = vshrl.u32 %v12865_v20, 16 }
 0x462   : > { %v12896_v54 = vcombine.low %v16751_v46, %v4911_v38  ;;  %v4959_v25 = vrot.slane %v12866_v24, 5  ;;  %v5095_v16 = vsel %vm1808_vm6, %v12878_v37, %v16838_v10  ;;  %v4916_v58 = vshll.u32 %v12865_v20, 16 }
 0x463   : > { %v4678_v1 = vsel %vm4628_vm10, %v4615_v56, %v4677_v39  ;;  %v4915_v62 = vrot.slane %v4913_v6, 4  ;;  %v4922_v9 = vshll.u32 %v12866_v24, 16  ;;  %v5106_v46 = vsel %vm18663_vm5, %v5095_v16, %v16822_v41 }
 0x464   : > { %5049 = vrot.lane.b32.xlu1 %v12896_v54, %s18639_s18  ;;  %v4960_v50 = vsel %vm16357_vm8, %v12874_v48, %v4959_v25  ;;  %v4918_v59 = vrot.slane %v4916_v58, 5  ;;  %v4686_v31 = vpack.c.b16 %v4678_v1, %v4678_v1  ;;  %v5114_v29 = vsel %vm18664_vm12, %v5106_v46, %v16833_v28  ;;  %v5023_v25 = vpop.permute.xlu0 %5022 }
 0x465   : > { %v12889_v8 = vcombine.low %v16804_v61, %v4960_v50  ;;  %v4924_v32 = vrot.slane %v4922_v9, 5  ;;  %vm18665_vm13 = vcmask 261120   ;;  %vm18666_vm10 = vcmask 326656  }
 0x466   : > { %v4919_v10 = vor.u32 %v4918_v59, %v4915_v62  ;;  %v4737_v34 = vshrl.u32 %v4686_v31, 16  ;;  %v5122_v5 = vsel %vm18665_vm13, %v5114_v29, %v5046_v36  ;;  %v4740_v13 = vshll.u32 %v4686_v31, 16 }
 0x467   : > { %5026 = vrot.lane.b32.xlu0 %v12889_v8, %s18632_s16  ;;  %v5130_v12 = vsel %vm18666_vm10, %v5122_v5, %v16840_v43  ;;  %vm18667_vm4 = vcmask 392192   ;;  %vm18669_vm5 = vcmask 523264   ;;  %vm18670_vm12 = vcmask 588800  }
 0x468   : > { %v4920_v44 = vrot.slane %v4919_v10, 4  ;;  %v4739_v61 = vrot.slane %v4737_v34, 7  ;;  %v5138_v49 = vsel %vm18667_vm4, %v5130_v12, %v5068_v7  ;;  %vm18671_vm13 = vcmask 130048  }
 0x469   : > { %vm18672_vm10 = vcmask 195584   ;;  %vm18673_vm4 = vcmask 261120   ;;  %vm18677_vm11 = vcmask 523264   ;;  %vm18678_vm14 = vcmask 588800  }
 0x46a   : > { %v4925_v45 = vsel %vm16421_vm7, %v4920_v44, %v4924_v32  ;;  %v4742_v41 = vor.u32 %v4740_v13, %v4739_v61 }
 0x46b   : > { %v12885_v4 = vcombine.low %v4911_v38, %v4925_v45 }
 0x46c   : > { %v4758_v28 = vsel %vm14881_vm2, 0, %v4742_v41 }
 0x46d   : > { %5080 = vrot.lane.b32.xlu1 %v12885_v4, %s18636_s9  ;;  %v4770_v30 = vsel %vm16312_vm1, %v4758_v28, 0 }
 0x46e   : > { %v12893_v15 = vcombine.low %v16848_v35, %v4770_v30  ;;  %v12875_v57 = vcombine.low %v4770_v30, %v4770_v30  ;;  %v12876_v20 = vcombine.high %v4770_v30, %v4770_v30  ;;  %v12902_v7 = vcombine.low %v4770_v30, %v16322_v11 }
 0x470   : > { %v5077_v17 = vpop.permute.xlu1 %5076  ;;  %5038 = vrot.lane.b32.xlu0 %v12893_v15, %s18633_s2  ;;  %v12877_v26 = vrot.slane %v12875_v57, 9  ;;  %v4982_v55 = vrot.slane %v12876_v20, 5  ;;  %v4967_v0 = vshrl.u32 %v12875_v57, 16  ;;  %v4970_v47 = vshll.u32 %v12875_v57, 16  ;;  %s18740_s2 = sld [smem:[#allocation14_spill]] }
 0x471   : > { %v5146_v33 = vsel %vm18668_vm9, %v5138_v49, %v5077_v17  ;;  %5089 = vrot.lane.b32.xlu1 %v12889_v8, %s18638_s11  ;;  %v4976_v37 = vshll.u32 %v12876_v20, 16  ;;  %vm18674_vm9 = vcmask 326656  }
 0x472   : > { %v5154_v43 = vsel %vm18669_vm5, %v5146_v33, %v5086_v40  ;;  %v4983_v35 = vsel %vm16357_vm8, %v12877_v26, %v4982_v55  ;;  %v4969_v23 = vrot.slane %v4967_v0, 4  ;;  %v4972_v48 = vrot.slane %v4970_v47, 5 }
 0x473   : > { %13967 = vmatprep.mubr.msk.bf16.mxu0 %vm18670_vm12, %v5154_v43  ;;  %v12901_v24 = vcombine.low %v4960_v50, %v4983_v35  ;;  %v4978_v56 = vrot.slane %v4976_v37, 5  ;;  %v12904_v58 = vcombine.low %v4983_v35, %v16365_v22  ;;  %vm18675_vm5 = vcmask 392192  }
 0x474   : > { %5073 = vrot.lane.b32.xlu0 %v12902_v7, %s18635_s5  ;;  %v4973_v18 = vor.u32 %v4972_v48, %v4969_v23  ;;  %vm18676_vm12 = vcmask 457728  }
 0x476   : > { %v4974_v38 = vrot.slane %v4973_v18, 4 }
 0x477   : > { %v5035_v6 = vpop.permute.xlu0 %5034 }
 0x478   : > { %5006 = vrot.lane.b32.xlu0 %v12885_v4, %s18637_s26  ;;  %v4979_v39 = vsel %vm16421_vm7, %v4974_v38, %v4978_v56  ;;  %v14197_v56 = vld [vmem:[%s18622_s3] sm:$0xff]   ;;  %s14649_s26 = smov 80  }
 0x479   : > { %v12897_v54 = vcombine.low %v4925_v45, %v4979_v39  ;;  %v12903_v16 = vcombine.low %v4979_v39, %v16430_v63  ;;  %5808 = vmatpush1.bf16.msra.mxu1 %v14197_v56  ;;  %v14198_v39 = vld [vmem:[%s18622_s3 + $0x8] sm:$0xff]  }
 0x47a   : > { %5809 = vmatprep.subr.bf16.mxu1 %v18656_v27 }
 0x47b   : > { %v5003_v50 = vpop.permute.xlu0 %5002 }
 0x47c   : > { %5064 = vrot.lane.b32.xlu0 %v12901_v24, %s18634_s22  ;;  %v5098_v8 = vsel %vm1808_vm6, %v16522_v53, %v5003_v50  ;;  %s14650_s22 = smov 112  }
 0x47d   : > { %v5108_v62 = vsel %vm18671_vm13, %v5098_v8, %v5023_v25  ;;  %5810 = vmatpush1.bf16.msra.mxu1 %v14198_v39  ;;  %v16953_v25 = vld [vmem:[%s14693_s29] ss:$0 sm:$0xff]  ;;  %v14203_v39 = vld [vmem:[%s18622_s3 + $0x30] sm:$0xff]  }
 0x47e   : > { %v5116_v9 = vsel %vm18672_vm10, %v5108_v62, %v5035_v6  ;;  %5811 = vmatprep.subr.bf16.mxu1 %v18656_v27 }
 0x47f   : > { %v5061_v36 = vpop.permute.xlu0 %5060 }
 0x480   : > { %5051 = vrot.lane.b32.xlu0 %v12897_v54, %s18639_s18  ;;  %v14199_v54 = vld [vmem:[%s18622_s3 + $0x10] sm:$0xff]  }
 0x481   : > { %5812 = vmatpush1.bf16.msra.mxu1 %v14199_v54 }
 0x482   : > { %5813 = vmatprep.subr.bf16.mxu1 %v18656_v27 }
 0x484   : > { %5082 = vrot.lane.b32.xlu0 %v12903_v16, %s18636_s9  ;;  %s14648_s9 = smov 96  }
 0x488   : > { %5091 = vrot.lane.b32.xlu0 %v12904_v58, %s18638_s11 }
 0x495   : > { %v5070_v1 = vpop.permute.xlu0 %5069 }
 0x499   : > { %v5048_v59 = vpop.permute.xlu0 %5047 }
 0x49a   : > { %v5124_v46 = vsel %vm18673_vm4, %v5116_v9, %v5048_v59  ;;  %v5025_v53 = vpop.permute.xlu1 %5024 }
 0x49b   : > { %v5132_v10 = vsel %vm18674_vm9, %v5124_v46, %v5061_v36 }
 0x49c   : > { %v5140_v34 = vsel %vm18675_vm5, %v5132_v10, %v5070_v1  ;;  %v14200_v10 = vld [vmem:[%s18622_s3 + $0x18] sm:$0xff]  }
 0x49d   : > { %v5088_v31 = vpop.permute.xlu0 %5087  ;;  %5814 = vmatpush1.bf16.msra.mxu1 %v14200_v10 }
 0x49e   : > { %5815 = vmatprep.subr.bf16.mxu1 %v18656_v27 }
 0x4a3   : > { %v5079_v29 = vpop.permute.xlu0 %5078 }
 0x4a4   : > { %v5148_v44 = vsel %vm18676_vm12, %v5140_v34, %v5079_v29 }
 0x4a5   : > { %v5156_v32 = vsel %vm18677_vm11, %v5148_v44, %v5088_v31  ;;  %vm18679_vm11 = vmmov %vm18675_vm5  ;;  %vm18681_vm5 = vcmask 523264  }
 0x4a6   : > { %13968 = vmatmul.mubr.msk.bf16.vlgmr.msra.gmra.mrb[32].mxu0 %vm18678_vm14, %v5156_v32  ;;  %vm18680_vm14 = vmmov %vm18676_vm12  ;;  %vm18682_vm12 = vcmask 588800  }
 0x4b4   : > { %v5037_v5 = vpop.permute.xlu1 %5036 }
 0x4b8   : > { %v5005_v40 = vpop.permute.xlu1 %5004 }
 0x4b9   : > { %v5101_v45 = vsel %vm1808_vm6, %v16703_v42, %v5005_v40 }
 0x4ba   : > { %v5110_v4 = vsel %vm18671_vm13, %v5101_v45, %v5025_v53  ;;  %v14201_v45 = vld [vmem:[%s18622_s3 + $0x20] sm:$0xff]  }
 0x4bb   : > { %v5118_v12 = vsel %vm18672_vm10, %v5110_v4, %v5037_v5  ;;  %5816 = vmatpush1.bf16.msra.mxu1 %v14201_v45 }
 0x4bc   : > { %v5063_v61 = vpop.permute.xlu1 %5062  ;;  %5817 = vmatprep.subr.bf16.mxu1 %v18656_v27 }
 0x4d1   : > { %v5072_v13 = vpop.permute.xlu1 %5071 }
 0x4d6   : > { %v5050_v41 = vpop.permute.xlu1 %5049 }
 0x4d7   : > { %v5126_v28 = vsel %vm18673_vm4, %v5118_v12, %v5050_v41 }
 0x4d8   : > { %v5134_v30 = vsel %vm18674_vm9, %v5126_v28, %v5063_v61 }
 0x4d9   : > { %v5027_v49 = vpop.permute.xlu0 %5026  ;;  %v5142_v15 = vsel %vm18679_vm11, %v5134_v30, %v5072_v13 }
 0x4df   : > { %v5081_v17 = vpop.permute.xlu1 %5080 }
 0x4e0   : > { %v5150_v57 = vsel %vm18680_vm14, %v5142_v15, %v5081_v17 }
 0x4e2   : > { %v5039_v33 = vpop.permute.xlu0 %5038 }
 0x4e3   : > { %v5090_v20 = vpop.permute.xlu1 %5089 }
 0x4e4   : > { %v5158_v43 = vsel %vm18681_vm5, %v5150_v57, %v5090_v20 }
 0x4e5   : > { %13971 = vmatprep.mubr.msk.bf16.mxu0 %vm18682_vm12, %v5158_v43  ;;  %v14202_v43 = vld [vmem:[%s18622_s3 + $0x28] sm:$0xff]  }
 0x4e6   : > { %v5074_v42 = vpop.permute.xlu0 %5073  ;;  %5818 = vmatpush1.bf16.msra.mxu1 %v14202_v43 }
 0x4e7   : > { %5819 = vmatprep.subr.bf16.mxu1 %v18656_v27 }
 0x4ea   : > { %v5007_v26 = vpop.permute.xlu0 %5006  ;;  %5820 = vmatpush1.bf16.msra.mxu1 %v14203_v39 }
 0x4eb   : > { %v5104_v55 = vsel %vm1808_vm6, %v16856_v51, %v5007_v26  ;;  %vm18683_vm6 = vmmov %vm18681_vm5  ;;  %5821 = vmatprep.subr.bf16.mxu1 %v18656_v27 }
 0x4ec   : > { %v5112_v47 = vsel %vm18671_vm13, %v5104_v55, %v5027_v49  ;;  %vm18684_vm5 = vmmov %vm18682_vm12 }
 0x4ed   : > { %v5120_v7 = vsel %vm18672_vm10, %v5112_v47, %v5039_v33  ;;  %vm18685_vm12 = vmmov %vm18671_vm13  ;;  %vm5704_vm13 = vcmask 654336  }
 0x4ee   : > { %v5065_v0 = vpop.permute.xlu0 %5064  ;;  %vm18689_vm10 = vmmov %vm18683_vm6 }
 0x4f2   : > { %v5052_v35 = vpop.permute.xlu0 %5051 }
 0x4f3   : > { %v5128_v23 = vsel %vm18673_vm4, %v5120_v7, %v5052_v35 }
 0x4f4   : > { %v5136_v24 = vsel %vm18674_vm9, %v5128_v23, %v5065_v0  ;;  %vm5713_vm9 = vcmask 785408  }
 0x4f5   : > { %v5144_v37 = vsel %vm18679_vm11, %v5136_v24, %v5074_v42 }
 0x4f6   : > { %v5083_v48 = vpop.permute.xlu0 %5082 }
 0x4f7   : > { %v5152_v18 = vsel %vm18680_vm14, %v5144_v37, %v5083_v48  ;;  %vm5722_vm14 = vcmask 916480  }
 0x4fa   : > { %v5092_v38 = vpop.permute.xlu0 %5091 }
 0x4fb   : > { %v5160_v51 = vsel %vm18683_vm6, %v5152_v18, %v5092_v38 }
 0x4fc   : > { %13972 = vmatmul.mubr.msk.bf16.gmra.mrb[36].mxu0 %vm18684_vm5, %v5160_v51  ;;  %vm18693_vm5 = vmmov %vm18689_vm10 }
 0x579   : > { %v13969_v16 = vpop.f32.mrb[32].mxu0 }
 0x57a   : > { %v5248_v6 = vadd.f32 %v13969_v16, %v16953_v25  ;;  %v5239_v58 = vpop.f32.mrb[33].mxu0 }
 0x57b   : > { %v5240_v50 = vadd.f32 %v16953_v25, %v5239_v58  ;;  %v13970_v36 = vpop.f32.mrb[34].mxu0 }
 0x57c   : > { %v5272_v1 = vmax.f32 %v5248_v6, 0.0  ;;  %v5251_v8 = vadd.f32 %v13970_v36, %v16953_v25  ;;  %v5242_v62 = vpop.f32.mrb[35].mxu0 }
 0x57d   : > { %v5270_v59 = vmax.f32 %v5240_v50, 0.0  ;;  %v5243_v9 = vadd.f32 %v16953_v25, %v5242_v62 }
 0x57e   : > { %v5299_v46 = vpack.c.bf16 %v5272_v1, %v5272_v1  ;;  %v5273_v31 = vmax.f32 %v5251_v8, 0.0 }
 0x57f   : > { %v5297_v34 = vpack.c.bf16 %v5270_v59, %v5270_v59  ;;  %v5271_v29 = vmax.f32 %v5243_v9, 0.0 }
 0x580   : > { %v5320_v44 = vshrl.u32 %v5299_v46, 16  ;;  %v5300_v32 = vpack.c.bf16 %v5273_v31, %v5273_v31  ;;  %v5323_v61 = vshll.u32 %v5299_v46, 16 }
 0x581   : > { %v5306_v53 = vshrl.u32 %v5297_v34, 16  ;;  %v5298_v5 = vpack.c.bf16 %v5271_v29, %v5271_v29  ;;  %v5309_v41 = vshll.u32 %v5297_v34, 16 }
 0x582   : > { %v5322_v40 = vrot.slane %v5320_v44, 7  ;;  %v5327_v13 = vshrl.u32 %v5300_v32, 16  ;;  %v5330_v49 = vshll.u32 %v5300_v32, 16 }
 0x583   : > { %v5308_v4 = vrot.slane %v5306_v53, 7  ;;  %v5313_v12 = vshrl.u32 %v5298_v5, 16  ;;  %v5316_v57 = vshll.u32 %v5298_v5, 16 }
 0x584   : > { %v5325_v28 = vor.u32 %v5323_v61, %v5322_v40  ;;  %v5329_v30 = vrot.slane %v5327_v13, 7 }
 0x585   : > { %v5311_v17 = vor.u32 %v5309_v41, %v5308_v4  ;;  %v5315_v15 = vrot.slane %v5313_v12, 7  ;;  %v14204_v41 = vld [vmem:[%s18622_s3 + $0x38] sm:$0xff]  }
 0x586   : > { %v5371_v20 = vsel %vm14881_vm2, 0, %v5325_v28  ;;  %v5332_v33 = vor.u32 %v5330_v49, %v5329_v30  ;;  %5822 = vmatpush1.bf16.msra.mxu1 %v14204_v41 }
 0x587   : > { %v5379_v42 = vsel %vm16312_vm1, %v5371_v20, 0  ;;  %v5369_v26 = vsel %vm14881_vm2, 0, %v5311_v17  ;;  %v5318_v55 = vor.u32 %v5316_v57, %v5315_v15  ;;  %5823 = vmatprep.subr.bf16.mxu1 %v18656_v27 }
 0x588   : > { %v12919_v0 = vcombine.low %v5379_v42, %v5379_v42  ;;  %v16970_v47 = vcombine.high %v5379_v42, %v5379_v42  ;;  %v16974_v7 = vsel %vm16312_vm1, %v5369_v26, 0  ;;  %v5372_v35 = vsel %vm14881_vm2, 0, %v5332_v33 }
 0x589   : > { %v12915_v23 = vcombine.low %v16974_v7, %v16974_v7  ;;  %v12916_v24 = vcombine.high %v16974_v7, %v16974_v7  ;;  %v16984_v48 = vsel %vm16312_vm1, %v5372_v35, 0  ;;  %v5370_v37 = vsel %vm14881_vm2, 0, %v5318_v55 }
 0x58a   : > { %v16991_v18 = vcombine.low %v16984_v48, %v16984_v48  ;;  %v16995_v38 = vcombine.high %v16984_v48, %v16984_v48  ;;  %v5378_v51 = vsel %vm16312_vm1, %v5370_v37, 0  ;;  %v12952_v56 = vcombine.low %v5379_v42, %v16984_v48 }
 0x58b   : > { %v12917_v54 = vcombine.low %v5378_v51, %v5378_v51  ;;  %v12918_v16 = vcombine.high %v5378_v51, %v5378_v51  ;;  %v12951_v6 = vcombine.low %v16974_v7, %v5378_v51  ;;  %v17002_v58 = vcombine.low %v5378_v51, %v5379_v42 }
 0x58c   : > { %5617 = vrot.lane.b32.xlu0 %v12952_v56, %s18635_s5  ;;  %v12931_v50 = vrot.slane %v12919_v0, 9  ;;  %v5528_v36 = vrot.slane %v16970_v47, 5  ;;  %v12929_v1 = vrot.slane %v12915_v23, 9  ;;  %v5520_v8 = vrot.slane %v12916_v24, 5 }
 0x58d   : > { %5615 = vrot.lane.b32.xlu1 %v12951_v6, %s18635_s5  ;;  %v12930_v62 = vrot.slane %v12917_v54, 9  ;;  %v5524_v59 = vrot.slane %v12918_v16, 5  ;;  %v12932_v9 = vrot.slane %v16991_v18, 9  ;;  %v5532_v31 = vrot.slane %v16995_v38, 5 }
 0x58e   : > { %v5521_v46 = vsel %vm16357_vm8, %v12929_v1, %v5520_v8  ;;  %v5421_v10 = vshrl.u32 %v12915_v23, 16  ;;  %v5424_v34 = vshll.u32 %v12915_v23, 16  ;;  %v5529_v44 = vsel %vm16357_vm8, %v12931_v50, %v5528_v36 }
 0x58f   : > { %v5525_v29 = vsel %vm16357_vm8, %v12930_v62, %v5524_v59  ;;  %v5430_v40 = vshll.u32 %v12916_v24, 16  ;;  %v12947_v61 = vcombine.low %v16365_v22, %v5521_v46  ;;  %v5435_v45 = vshrl.u32 %v12917_v54, 16  ;;  %v14205_v24 = vld [vmem:[%s18622_s3 + $0x40] sm:$0xff]  }
 0x590   : > { %5650 = vrot.lane.b32.xlu0 %v17002_v58, %s14648_s9  ;;  %v12948_v32 = vcombine.low %v5525_v29, %v5529_v44  ;;  %v12959_v53 = vcombine.low %v5521_v46, %v5525_v29  ;;  %v5423_v5 = vrot.slane %v5421_v10, 4  ;;  %v5426_v13 = vrot.slane %v5424_v34, 5  ;;  %5824 = vmatpush1.bf16.msra.mxu1 %v14205_v24 }
 0x591   : > { %v5438_v4 = vshll.u32 %v12917_v54, 16  ;;  %v17024_v12 = vsel %vm16357_vm8, %v12932_v9, %v5532_v31  ;;  %v5444_v28 = vshll.u32 %v12918_v16, 16  ;;  %v5449_v30 = vshrl.u32 %v12919_v0, 16 }
 0x592   : > { %12976 = vmatprep.mubr.msk.bf16.mxu1 %vm18685_vm12, %v12948_v32  ;;  %5641 = vrot.lane.b32.xlu1 %v12959_v53, %s14649_s26  ;;  %v5452_v49 = vshll.u32 %v12919_v0, 16  ;;  %v5427_v17 = vor.u32 %v5426_v13, %v5423_v5  ;;  %v5437_v15 = vrot.slane %v5435_v45, 4  ;;  %v5463_v20 = vshrl.u32 %v16991_v18, 16 }
 0x593   : > { %v5440_v57 = vrot.slane %v5438_v4, 5  ;;  %v5432_v33 = vrot.slane %v5430_v40, 5  ;;  %v5451_v43 = vrot.slane %v5449_v30, 4  ;;  %v5458_v26 = vshll.u32 %v16970_v47, 16 }
 0x594   : > { %5603 = vrot.lane.b32.xlu0 %v12947_v61, %s18639_s18  ;;  %v5454_v42 = vrot.slane %v5452_v49, 5  ;;  %v5428_v55 = vrot.slane %v5427_v17, 4  ;;  %v5465_v23 = vrot.slane %v5463_v20, 4  ;;  %v5466_v0 = vshll.u32 %v16991_v18, 16 }
 0x595   : > { %v5441_v35 = vor.u32 %v5440_v57, %v5437_v15  ;;  %v12960_v37 = vcombine.low %v5529_v44, %v17024_v12  ;;  %v5446_v51 = vrot.slane %v5444_v28, 5  ;;  %v5472_v47 = vshll.u32 %v16995_v38, 16 }
 0x596   : > { %5605 = vrot.lane.b32.xlu1 %v12948_v32, %s18639_s18  ;;  %v5455_v56 = vor.u32 %v5454_v42, %v5451_v43  ;;  %v5433_v39 = vsel %vm16421_vm7, %v5428_v55, %v5432_v33  ;;  %v5468_v16 = vrot.slane %v5466_v0, 5  ;;  %v5460_v50 = vrot.slane %v5458_v26, 5 }
 0x597   : > { %v5442_v54 = vrot.slane %v5441_v35, 4  ;;  %v12943_v6 = vcombine.low %v16430_v63, %v5433_v39  ;;  %v5474_v9 = vrot.slane %v5472_v47, 5 }
 0x598   : > { %5643 = vrot.lane.b32.xlu0 %v12960_v37, %s14649_s26  ;;  %v5456_v18 = vrot.slane %v5455_v56, 4  ;;  %v5469_v1 = vor.u32 %v5468_v16, %v5465_v23 }
 0x599   : > { %v5447_v36 = vsel %vm16421_vm7, %v5442_v54, %v5446_v51 }
 0x59a   : > { %5584 = vrot.lane.b32.xlu1 %v12943_v6, %s18632_s16  ;;  %v12955_v8 = vcombine.low %v5433_v39, %v5447_v36  ;;  %v5461_v62 = vsel %vm16421_vm7, %v5456_v18, %v5460_v50  ;;  %v5470_v59 = vrot.slane %v5469_v1, 4 }
 0x59b   : > { %v12944_v38 = vcombine.low %v5447_v36, %v5461_v62 }
 0x59c   : > { %5628 = vrot.lane.b32.xlu0 %v12955_v8, %s18638_s11  ;;  %v17047_v46 = vsel %vm16421_vm7, %v5470_v59, %v5474_v9 }
 0x59d   : > { %v12956_v31 = vcombine.low %v5461_v62, %v17047_v46 }
 0x59f   : > { %5630 = vrot.lane.b32.xlu1 %v12956_v31, %s18638_s11 }
 0x5a0   : > { %5586 = vrot.lane.b32.xlu0 %v12944_v38, %s18632_s16 }
 0x5a3   : > { %5659 = vrot.lane.b32.xlu1 %v12944_v38, %s14650_s22 }
 0x5cf   : > { %v13973_v10 = vpop.f32.mrb[36].mxu0 }
 0x5d0   : > { %v5264_v34 = vadd.f32 %v13973_v10, %v16953_v25  ;;  %v5255_v29 = vpop.f32.mrb[37].mxu0 }
 0x5d1   : > { %v5256_v44 = vadd.f32 %v16953_v25, %v5255_v29  ;;  %v13974_v32 = vpop.f32.mrb[38].mxu0 }
 0x5d2   : > { %v5276_v53 = vmax.f32 %v5264_v34, 0.0  ;;  %v5267_v5 = vadd.f32 %v13974_v32, %v16953_v25  ;;  %v5258_v40 = vpop.f32.mrb[39].mxu0 }
 0x5d3   : > { %v5274_v61 = vmax.f32 %v5256_v44, 0.0  ;;  %v5259_v13 = vadd.f32 %v16953_v25, %v5258_v40 }
 0x5d4   : > { %v5303_v45 = vpack.c.bf16 %v5276_v53, %v5276_v53  ;;  %v5277_v4 = vmax.f32 %v5267_v5, 0.0 }
 0x5d5   : > { %v5301_v41 = vpack.c.bf16 %v5274_v61, %v5274_v61  ;;  %v5275_v28 = vmax.f32 %v5259_v13, 0.0 }
 0x5d6   : > { %v5348_v30 = vshrl.u32 %v5303_v45, 16  ;;  %v5304_v49 = vpack.c.bf16 %v5277_v4, %v5277_v4  ;;  %v5351_v20 = vshll.u32 %v5303_v45, 16 }
 0x5d7   : > { %v5334_v17 = vshrl.u32 %v5301_v41, 16  ;;  %v5302_v15 = vpack.c.bf16 %v5275_v28, %v5275_v28  ;;  %v5337_v42 = vshll.u32 %v5301_v41, 16 }
 0x5d8   : > { %v5350_v57 = vrot.slane %v5348_v30, 7  ;;  %v5355_v33 = vshrl.u32 %v5304_v49, 16  ;;  %v5358_v23 = vshll.u32 %v5304_v49, 16 }
 0x5d9   : > { %v5336_v43 = vrot.slane %v5334_v17, 7  ;;  %v5341_v26 = vshrl.u32 %v5302_v15, 16  ;;  %v5344_v25 = vshll.u32 %v5302_v15, 16 }
 0x5da   : > { %v5353_v55 = vor.u32 %v5351_v20, %v5350_v57  ;;  %v5357_v35 = vrot.slane %v5355_v33, 7 }
 0x5db   : > { %v5339_v0 = vor.u32 %v5337_v42, %v5336_v43  ;;  %v5343_v24 = vrot.slane %v5341_v26, 7 }
 0x5dc   : > { %v5375_v37 = vsel %vm14881_vm2, 0, %v5353_v55  ;;  %v5360_v51 = vor.u32 %v5358_v23, %v5357_v35 }
 0x5dd   : > { %v17061_v56 = vsel %vm16312_vm1, %v5375_v37, 0  ;;  %v5373_v39 = vsel %vm14881_vm2, 0, %v5339_v0  ;;  %v5346_v54 = vor.u32 %v5344_v25, %v5343_v24 }
 0x5de   : > { %v12927_v16 = vcombine.low %v17061_v56, %v17061_v56  ;;  %v17069_v47 = vcombine.high %v17061_v56, %v17061_v56  ;;  %v5381_v6 = vsel %vm16312_vm1, %v5373_v39, 0  ;;  %v5376_v18 = vsel %vm14881_vm2, 0, %v5360_v51 }
 0x5df   : > { %v12923_v50 = vcombine.low %v5381_v6, %v5381_v6  ;;  %v12924_v36 = vcombine.high %v5381_v6, %v5381_v6  ;;  %v17077_v1 = vsel %vm16312_vm1, %v5376_v18, 0  ;;  %v5374_v8 = vsel %vm14881_vm2, 0, %v5346_v54 }
 0x5e0   : > { %v17083_v62 = vcombine.low %v17077_v1, %v17077_v1  ;;  %v17087_v59 = vcombine.high %v17077_v1, %v17077_v1  ;;  %v5382_v9 = vsel %vm16312_vm1, %v5374_v8, 0  ;;  %v17092_v38 = vcombine.low %v16984_v48, %v5381_v6  ;;  %vm18686_vm1 = vmmov %vm18685_vm12 }
 0x5e1   : > { %v12925_v31 = vcombine.low %v5382_v9, %v5382_v9  ;;  %v12926_v10 = vcombine.high %v5382_v9, %v5382_v9  ;;  %v17095_v34 = vcombine.low %v5382_v9, %v17061_v56  ;;  %v12953_v29 = vcombine.low %v5381_v6, %v5382_v9  ;;  %vm18694_vm12 = vmmov %vm18686_vm1 }
 0x5e2   : > { %5652 = vrot.lane.b32.xlu1 %v17092_v38, %s14648_s9  ;;  %v12933_v44 = vrot.slane %v12923_v50, 9  ;;  %v5536_v32 = vrot.slane %v12924_v36, 5  ;;  %v5477_v53 = vshrl.u32 %v12923_v50, 16  ;;  %v5480_v5 = vshll.u32 %v12923_v50, 16 }
 0x5e3   : > { %5654 = vrot.lane.b32.xlu0 %v17095_v34, %s14648_s9  ;;  %v12934_v14 = vrot.slane %v12925_v31, 9  ;;  %v5540_v40 = vrot.slane %v12926_v10, 5  ;;  %v5486_v48 = vshll.u32 %v12924_v36, 16  ;;  %v12954_v61 = vcombine.low %v17061_v56, %v17077_v1 }
 0x5e4   : > { %v5537_v13 = vsel %vm16357_vm8, %v12933_v44, %v5536_v32  ;;  %v5479_v45 = vrot.slane %v5477_v53, 4  ;;  %v5482_v4 = vrot.slane %v5480_v5, 5  ;;  %v12935_v41 = vrot.slane %v12927_v16, 9 }
 0x5e5   : > { %v17106_v28 = vcombine.low %v17024_v12, %v5537_v13  ;;  %v5541_v30 = vsel %vm16357_vm8, %v12934_v14, %v5540_v40  ;;  %v5488_v49 = vrot.slane %v5486_v48, 5  ;;  %v5544_v17 = vrot.slane %v17069_v47, 5 }
 0x5e6   : > { %5619 = vrot.lane.b32.xlu1 %v12953_v29, %s18635_s5  ;;  %v12961_v15 = vcombine.low %v5537_v13, %v5541_v30  ;;  %v5483_v57 = vor.u32 %v5482_v4, %v5479_v45  ;;  %v5491_v20 = vshrl.u32 %v12925_v31, 16  ;;  %v5494_v33 = vshll.u32 %v12925_v31, 16 }
 0x5e7   : > { %5607 = vrot.lane.b32.xlu0 %v17106_v28, %s18639_s18  ;;  %v5545_v43 = vsel %vm16357_vm8, %v12935_v41, %v5544_v17  ;;  %v5500_v12 = vshll.u32 %v12926_v10, 16  ;;  %v5505_v42 = vshrl.u32 %v12927_v16, 16  ;;  %v5508_v26 = vshll.u32 %v12927_v16, 16 }
 0x5e8   : > { %v5484_v55 = vrot.slane %v5483_v57, 4  ;;  %v17116_v35 = vcombine.low %v5541_v30, %v5545_v43  ;;  %v5493_v23 = vrot.slane %v5491_v20, 4  ;;  %v5496_v0 = vrot.slane %v5494_v33, 5 }
 0x5e9   : > { %v5507_v24 = vrot.slane %v5505_v42, 4  ;;  %v5510_v25 = vrot.slane %v5508_v26, 5  ;;  %v5514_v37 = vshll.u32 %v17069_v47, 16  ;;  %v5552_v39 = vshrl.u32 %v17083_v62, 16 }
 0x5ea   : > { %5645 = vrot.lane.b32.xlu1 %v12961_v15, %s14649_s26  ;;  %v5489_v51 = vsel %vm16421_vm7, %v5484_v55, %v5488_v49  ;;  %v5497_v56 = vor.u32 %v5496_v0, %v5493_v23  ;;  %v5555_v54 = vshll.u32 %v17083_v62, 16  ;;  %v5502_v6 = vrot.slane %v5500_v12, 5 }
 0x5eb   : > { %v12945_v16 = vcombine.low %v17047_v46, %v5489_v51  ;;  %v5511_v18 = vor.u32 %v5510_v25, %v5507_v24  ;;  %v5561_v50 = vshll.u32 %v17087_v59, 16  ;;  %v5554_v8 = vrot.slane %v5552_v39, 4 }
 0x5ec   : > { %v5498_v36 = vrot.slane %v5497_v56, 4  ;;  %v5557_v9 = vrot.slane %v5555_v54, 5  ;;  %v12938_v47 = vrot.slane %v17083_v62, 9  ;;  %v5516_v10 = vrot.slane %v5514_v37, 5 }
 0x5ed   : > { %5661 = vrot.lane.b32.xlu0 %v12945_v16, %s14650_s22  ;;  %v5512_v31 = vrot.slane %v5511_v18, 4  ;;  %v5567_v29 = vrot.slane %v17087_v59, 5  ;;  %v5563_v40 = vrot.slane %v5561_v50, 5  ;;  %v12963_v45 = vcombine.low %v17077_v1, %v16322_v11 }
 0x5ee   : > { %5588 = vrot.lane.b32.xlu1 %v12945_v16, %s18632_s16  ;;  %v5503_v46 = vsel %vm16421_vm7, %v5498_v36, %v5502_v6  ;;  %v5558_v44 = vor.u32 %v5557_v9, %v5554_v8  ;;  %v12939_v15 = vcombine.low %v16322_v11, %v16974_v7 }
 0x5ef   : > { %v12957_v32 = vcombine.low %v5489_v51, %v5503_v46  ;;  %v5517_v53 = vsel %vm16421_vm7, %v5512_v31, %v5516_v10  ;;  %v17136_v5 = vsel %vm16357_vm8, %v12938_v47, %v5567_v29  ;;  %vm18688_vm8 = vmmov %vm18679_vm11 }
 0x5f0   : > { %v12946_v62 = vcombine.low %v5503_v46, %v5517_v53  ;;  %v5559_v14 = vrot.slane %v5558_v44, 4  ;;  %v12962_v48 = vcombine.low %v5545_v43, %v17136_v5  ;;  %vm18692_vm6 = vmmov %vm18688_vm8 }
 0x5f1   : > { %5621 = vrot.lane.b32.xlu0 %v12954_v61, %s18635_s5 }
 0x5f2   : > { %5609 = vrot.lane.b32.xlu1 %v17116_v35, %s18639_s18  ;;  %v5564_v59 = vsel %vm16421_vm7, %v5559_v14, %v5563_v40  ;;  %vm18687_vm7 = vmmov %vm18673_vm4 }
 0x5f3   : > { %v12958_v13 = vcombine.low %v5517_v53, %v5564_v59  ;;  %v12964_v21 = vcombine.low %v5564_v59, %v16430_v63  ;;  %vm18690_vm4 = vmmov %vm18686_vm1 }
 0x5f4   : > { %vm18691_vm11 = vmmov %vm18687_vm7 }
 0x5f5   : > { %5632 = vrot.lane.b32.xlu0 %v12957_v32, %s18638_s11 }
 0x5f6   : > { %5663 = vrot.lane.b32.xlu1 %v12946_v62, %s14650_s22 }
 0x5f9   : > { %5590 = vrot.lane.b32.xlu0 %v12946_v62, %s18632_s16 }
 0x5fa   : > { %5634 = vrot.lane.b32.xlu1 %v12958_v13, %s18638_s11 }
 0x5fd   : > { %5647 = vrot.lane.b32.xlu0 %v12962_v48, %s14649_s26 }
 0x5fe   : > { %v5618_v52 = vpop.permute.xlu0 %5617  ;;  %5656 = vrot.lane.b32.xlu1 %v12963_v45, %s14648_s9 }
 0x5ff   : > { %v5616_v61 = vpop.permute.xlu1 %5615 }
 0x601   : > { %5665 = vrot.lane.b32.xlu0 %v12964_v21, %s14650_s22 }
 0x602   : > { %v5651_v4 = vpop.permute.xlu0 %5650 }
 0x604   : > { %v5642_v41 = vpop.permute.xlu1 %5641 }
 0x606   : > { %v5604_v30 = vpop.permute.xlu0 %5603 }
 0x608   : > { %v5606_v49 = vpop.permute.xlu1 %5605 }
 0x60a   : > { %v5644_v17 = vpop.permute.xlu0 %5643 }
 0x60c   : > { %v5585_v57 = vpop.permute.xlu1 %5584 }
 0x60d   : > { %v5670_v1 = vsel %vm18686_vm1, %v12939_v15, %v5585_v57 }
 0x60e   : > { %v5681_v20 = vsel %vm18687_vm7, %v5670_v1, %v5604_v30  ;;  %v5629_v33 = vpop.permute.xlu0 %5628  ;;  %vm18695_vm7 = vmmov %vm18686_vm1 }
 0x60f   : > { %v5689_v43 = vsel %vm18688_vm8, %v5681_v20, %v5616_v61  ;;  %vm18696_vm8 = vmmov %vm18691_vm11 }
 0x610   : > { %v5697_v63 = vsel %vm18689_vm10, %v5689_v43, %v5629_v33  ;;  %vm18697_vm10 = vmmov %vm18692_vm6 }
 0x611   : > { %v5631_v12 = vpop.permute.xlu1 %5630  ;;  %v5706_v26 = vsel %vm5704_vm13, %v5697_v63, %v5642_v41 }
 0x612   : > { %v5587_v42 = vpop.permute.xlu0 %5586  ;;  %v5715_v0 = vsel %vm5713_vm9, %v5706_v26, %v5651_v4 }
 0x613   : > { %v5673_v55 = vsel %vm18690_vm4, %v17002_v58, %v5587_v42  ;;  %vm18698_vm4 = vmmov %vm18693_vm5 }
 0x614   : > { %v5683_v11 = vsel %vm18691_vm11, %v5673_v55, %v5606_v49  ;;  %vm18700_vm11 = vmmov %vm18686_vm1 }
 0x615   : > { %v5691_v7 = vsel %vm18692_vm6, %v5683_v11, %v5618_v52  ;;  %v5660_v23 = vpop.permute.xlu1 %5659  ;;  %vm18701_vm6 = vmmov %vm18696_vm8 }
 0x616   : > { %v5699_v24 = vsel %vm18693_vm5, %v5691_v7, %v5631_v12  ;;  %v5724_v25 = vsel %vm5722_vm14, %v5715_v0, %v5660_v23  ;;  %vm18702_vm5 = vmmov %vm18686_vm1 }
 0x617   : > { %v5708_v37 = vsel %vm5704_vm13, %v5699_v24, %v5644_v17  ;;  %5840 = vmatmul.mubr.bf16.vlgmr.msra.gmra.mrb[32].mxu1 %v5724_v25 }
 0x618   : > { %12977 = vmatprep.mubr.msk.bf16.mxu1 %vm18694_vm12, %v17106_v28  ;;  %vm18703_vm12 = vmmov %vm18697_vm10 }
 0x654   : > { %v5653_v58 = vpop.permute.xlu1 %5652 }
 0x655   : > { %v5655_v51 = vpop.permute.xlu0 %5654  ;;  %v5717_v16 = vsel %vm5713_vm9, %v5708_v37, %v5653_v58  ;;  %v14206_v37 = vld [vmem:[%s14708_s14] sm:$0xff]  }
 0x656   : > { %6590 = vmatpush1.bf16.msra.mxu0 %v14206_v37 }
 0x657   : > { %6591 = vmatprep.subr.bf16.mxu0 %v18656_v27 }
 0x658   : > { %v5620_v56 = vpop.permute.xlu1 %5619 }
 0x659   : > { %v5608_v39 = vpop.permute.xlu0 %5607 }
 0x65c   : > { %v5646_v54 = vpop.permute.xlu1 %5645 }
 0x65f   : > { %v5662_v6 = vpop.permute.xlu0 %5661 }
 0x660   : > { %v5589_v18 = vpop.permute.xlu1 %5588  ;;  %v5727_v50 = vsel %vm5722_vm14, %v5717_v16, %v5662_v6 }
 0x661   : > { %v5676_v36 = vsel %vm18686_vm1, %v17092_v38, %v5589_v18  ;;  %5848 = vmatmul.mubr.bf16.gmra.mrb[36].mxu1 %v5727_v50  ;;  %vm18704_vm1 = vmmov %vm18698_vm4  ;;  %v14208_v50 = vld [vmem:[%s14708_s14 + $0x10] sm:$0xff]  }
 0x662   : > { %12978 = vmatprep.mubr.msk.bf16.mxu1 %vm18695_vm7, %v17116_v35  ;;  %v5685_v28 = vsel %vm18696_vm8, %v5676_v36, %v5608_v39  ;;  %v12965_v35 = vcombine.low %v17136_v5, %v16365_v22  ;;  %vm18705_vm7 = vmmov %vm18702_vm5  ;;  %v14207_v39 = vld [vmem:[%s14708_s14 + $0x8] sm:$0xff]  }
 0x663   : > { %v5622_v8 = vpop.permute.xlu0 %5621  ;;  %v5693_v47 = vsel %vm18697_vm10, %v5685_v28, %v5620_v56  ;;  %vm18706_vm8 = vmmov %vm18702_vm5  ;;  %vm5980_vm10 = vcmask 123904   ;;  %6592 = vmatpush1.bf16.msra.mxu0 %v14207_v39 }
 0x664   : > { %v5610_v9 = vpop.permute.xlu1 %5609  ;;  %6593 = vmatprep.subr.bf16.mxu0 %v18656_v27 }
 0x667   : > { %v5633_v31 = vpop.permute.xlu0 %5632  ;;  %6594 = vmatpush1.bf16.msra.mxu0 %v14208_v50 }
 0x668   : > { %v5701_v10 = vsel %vm18698_vm4, %v5693_v47, %v5633_v31  ;;  %v5664_v29 = vpop.permute.xlu1 %5663  ;;  %v14209_v47 = vld [vmem:[%s14708_s14 + $0x18] sm:$0xff]   ;;  %6595 = vmatprep.subr.bf16.mxu0 %v18656_v27  ;;  %vm6212_vm4 = vsmask.f32 2304 }
 0x669   : > { %v5710_v46 = vsel %vm5704_vm13, %v5701_v10, %v5646_v54 }
 0x66a   : > { %v5719_v44 = vsel %vm5713_vm9, %v5710_v46, %v5655_v51 }
 0x66b   : > { %v5591_v32 = vpop.permute.xlu0 %5590  ;;  %v5730_v38 = vsel %vm5722_vm14, %v5719_v44, %v5664_v29  ;;  %6596 = vmatpush1.bf16.msra.mxu0 %v14209_v47 }
 0x66c   : > { %v5679_v53 = vsel %vm18700_vm11, %v17095_v34, %v5591_v32  ;;  %v5635_v62 = vpop.permute.xlu1 %5634  ;;  %5856 = vmatmul.mubr.bf16.gmra.mrb[40].mxu1 %v5730_v38  ;;  %v17195_v34 = vld [vmem:[%s18699_s8] ss:$0 sm:$0xff]  ;;  %6597 = vmatprep.subr.bf16.mxu0 %v18656_v27  ;;  %vm18707_vm11 = vcmask 1042432  }
 0x66d   : > { %v5687_v14 = vsel %vm18701_vm6, %v5679_v53, %v5610_v9  ;;  %12979 = vmatprep.mubr.msk.bf16.mxu1 %vm18702_vm5, %v12965_v35  ;;  %vm17221_vm6 = vmand %vm18707_vm11, %vm6212_vm4  ;;  %vm18715_vm11 = vcmask 1040384  }
 0x66e   : > { %v5695_v40 = vsel %vm18703_vm12, %v5687_v14, %v5622_v8  ;;  %vm18710_vm12 = vmmov %vm18702_vm5 }
 0x66f   : > { %v5703_v48 = vsel %vm18704_vm1, %v5695_v40, %v5635_v62  ;;  %v5648_v59 = vpop.permute.xlu0 %5647  ;;  %vm18711_vm1 = vmmov %vm18702_vm5 }
 0x670   : > { %v5712_v13 = vsel %vm5704_vm13, %v5703_v48, %v5648_v59  ;;  %v5657_v52 = vpop.permute.xlu1 %5656  ;;  %vm18714_vm4 = vmmov %vm18711_vm1 }
 0x671   : > { %v5721_v45 = vsel %vm5713_vm9, %v5712_v13, %v5657_v52 }
 0x673   : > { %v5666_v22 = vpop.permute.xlu0 %5665 }
 0x674   : > { %v5733_v5 = vsel %vm5722_vm14, %v5721_v45, %v5666_v22 }
 0x675   : > { %5864 = vmatmul.mubr.bf16.gmra.mrb[44].mxu1 %v5733_v5 }
 0x6ea   : > { %v5841_v61 = vpop.f32.mrb[32].mxu1 }
 0x6eb   : > { %v5842_v21 = vadd.f32 %v17195_v34, %v5841_v61  ;;  %v5843_v4 = vpop.f32.mrb[33].mxu1 }
 0x6ec   : > { %v5844_v41 = vpop.f32.mrb[34].mxu1 }
 0x6ed   : > { %v5872_v30 = vmax.f32 %v5842_v21, 0.0  ;;  %v5845_v49 = vadd.f32 %v17195_v34, %v5844_v41  ;;  %v5846_v17 = vpop.f32.mrb[35].mxu1 }
 0x6ef   : > { %v5873_v15 = vmax.f32 %v5845_v49, 0.0  ;;  %v5880_v57 = vsel %vm18705_vm7, %v5872_v30, -inf  ;;  %vm18712_vm7 = vmmov %vm18711_vm1 }
 0x6f1   : > { %v5881_v1 = vsel %vm18706_vm8, %v5873_v15, -inf  ;;  %vm18713_vm8 = vmmov %vm18711_vm1 }
 0x6f2   : > { %v5882_v20 = vmax.f32 %v5880_v57, %v5881_v1 }
 0x6f4   : > { %v5903_v33 = vrot.slane %v5882_v20, %v16307_v60  ;;  %v5896_v43 = vcombine.high %v5882_v20, %v5882_v20 }
 0x6f6   : > { %v5911_v63 = vcombine.high %v5903_v33, %v5903_v33  ;;  %v5910_v12 = vrot.slane %v5896_v43, %v16307_v60  ;;  %v5981_v55 = vsel %vm5980_vm10, %v5903_v33, -inf }
 0x6f7   : > { %v5982_v23 = vrot.slane %v5981_v55, 4 }
 0x6f8   : > { %v5988_v42 = vsel %vm5980_vm10, %v5911_v63, -inf  ;;  %v5912_v26 = vcombine.high %v5910_v12, %v5910_v12  ;;  %v5995_v7 = vsel %vm5980_vm10, %v5910_v12, -inf  ;;  %v17230_v12 = vsel %vm17221_vm6, %v14888_v3, 0 }
 0x6f9   : > { %v5989_v11 = vrot.slane %v5988_v42, 4  ;;  %v5996_v0 = vrot.slane %v5995_v7, 4  ;;  %v5983_v58 = vmax.f32 %v5981_v55, %v5982_v23 }
 0x6fa   : > { %v6002_v24 = vsel %vm5980_vm10, %v5912_v26, -inf }
 0x6fb   : > { %v5990_v25 = vmax.f32 %v5988_v42, %v5989_v11  ;;  %v6003_v51 = vrot.slane %v6002_v24, 4  ;;  %v5997_v56 = vmax.f32 %v5995_v7, %v5996_v0  ;;  %v5984_v16 = vrot.slane %v5983_v58, 2 }
 0x6fc   : > { %v17235_v0 = vrot.slane %v17230_v12, %v16307_v60 }
 0x6fd   : > { %v5991_v54 = vrot.slane %v5990_v25, 2  ;;  %v6004_v6 = vmax.f32 %v6002_v24, %v6003_v51  ;;  %v5998_v18 = vrot.slane %v5997_v56, 2  ;;  %v5985_v8 = vmax.f32 %v5983_v58, %v5984_v16 }
 0x6ff   : > { %v5992_v36 = vmax.f32 %v5990_v25, %v5991_v54  ;;  %v6005_v28 = vrot.slane %v6004_v6, 2  ;;  %v5999_v9 = vmax.f32 %v5997_v56, %v5998_v18  ;;  %v5986_v10 = vrot.slane %v5985_v8, 1 }
 0x701   : > { %v5993_v31 = vrot.slane %v5992_v36, 1  ;;  %v6006_v29 = vmax.f32 %v6004_v6, %v6005_v28  ;;  %v6000_v46 = vrot.slane %v5999_v9, 1  ;;  %v5987_v32 = vmax.f32 %v5985_v8, %v5986_v10 }
 0x702   : > { %v17246_v10 = vcombine.high %v17235_v0, %v17235_v0 }
 0x703   : > { %v5994_v44 = vmax.f32 %v5992_v36, %v5993_v31  ;;  %v6007_v38 = vrot.slane %v6006_v29, 1  ;;  %v6001_v35 = vmax.f32 %v5999_v9, %v6000_v46  ;;  %v6112_v14 = vpack.c.bf16 %v5987_v32, %v5987_v32 }
 0x705   : > { %v6113_v53 = vpack.c.bf16 %v5994_v44, %v5994_v44  ;;  %v6008_v62 = vmax.f32 %v6006_v29, %v6007_v38  ;;  %v6114_v40 = vpack.c.bf16 %v6001_v35, %v6001_v35  ;;  %v6144_v13 = vunpack.c.l.b16 %v6112_v14 }
 0x707   : > { %v6145_v48 = vunpack.c.l.b16 %v6113_v53  ;;  %v6115_v59 = vpack.c.bf16 %v6008_v62, %v6008_v62  ;;  %v6146_v52 = vunpack.c.l.b16 %v6114_v40  ;;  %v6263_v53 = vshrl.u32 %v17235_v0, 16 }
 0x708   : > { %v6266_v62 = vshll.u32 %v17235_v0, 16 }
 0x709   : > { %v6160_v45 = vsel %vm4616_vm15, %v6145_v48, %v6144_v13  ;;  %v6147_v22 = vunpack.c.l.b16 %v6115_v59 }
 0x70a   : > { %v6161_v5 = vsel %vm4618_vm3, %v6146_v52, %v6160_v45 }
 0x70b   : > { %v6162_v61 = vsel %vm4620_vm0, %v6147_v22, %v6161_v5  ;;  %v12980_v22 = vrot.slane %v17235_v0, 9  ;;  %v6326_v5 = vrot.slane %v17246_v10, 7 }
 0x70c   : > { %v6172_v30 = vpack.c.b16 %v6162_v61, %v6162_v61 }
 0x70e   : > { %v6177_v33 = vshrl.u32 %v6172_v30, 16  ;;  %v6180_v7 = vshll.u32 %v6172_v30, 16 }
 0x710   : > { %v6179_v26 = vrot.slane %v6177_v33, 7 }
 0x712   : > { %v6182_v54 = vor.u32 %v6180_v7, %v6179_v26 }
 0x714   : > { %v6208_v35 = vsel %vm14881_vm2, 0, %v6182_v54 }
 0x734   : > { %v5849_v21 = vpop.f32.mrb[36].mxu1 }
 0x735   : > { %v5850_v4 = vadd.f32 %v17195_v34, %v5849_v21  ;;  %v5851_v41 = vpop.f32.mrb[37].mxu1 }
 0x736   : > { %v5852_v49 = vpop.f32.mrb[38].mxu1 }
 0x737   : > { %v5874_v17 = vmax.f32 %v5850_v4, 0.0  ;;  %v5853_v15 = vadd.f32 %v17195_v34, %v5852_v49  ;;  %v5854_v57 = vpop.f32.mrb[39].mxu1 }
 0x738   : > { %v17259_v57 = vsel %vm17221_vm6, %v6208_v35, 0 }
 0x739   : > { %v5875_v20 = vmax.f32 %v5853_v15, 0.0  ;;  %v5883_v43 = vsel %vm18702_vm5, %v5874_v17, -inf  ;;  %vm6319_vm5 = vmor %vm18715_vm11, %vm4618_vm3  ;;  %vm6258_vm11 = vsmask.f32 5392 }
 0x73b   : > { %v5884_v63 = vsel %vm18710_vm12, %v5875_v20, -inf  ;;  %v17261_v20 = vrot.slane %v6263_v53, 6  ;;  %vm18716_vm12 = vcmask 1044484  }
 0x73c   : > { %v5885_v42 = vmax.f32 %v5883_v43, %v5884_v63 }
 0x73e   : > { %v5913_v55 = vcombine.high %v5885_v42, %v5885_v42  ;;  %v5920_v11 = vrot.slane %v5885_v42, %v16307_v60 }
 0x73f   : > { %v5857_v23 = vpop.f32.mrb[40].mxu1 }
 0x740   : > { %v5927_v24 = vrot.slane %v5913_v55, %v16307_v60  ;;  %v5928_v25 = vcombine.high %v5920_v11, %v5920_v11  ;;  %v6009_v37 = vsel %vm5980_vm10, %v5920_v11, -inf  ;;  %v5858_v58 = vadd.f32 %v17195_v34, %v5857_v23  ;;  %v5859_v51 = vpop.f32.mrb[41].mxu1 }
 0x741   : > { %v6010_v56 = vrot.slane %v6009_v37, 4  ;;  %v5860_v39 = vpop.f32.mrb[42].mxu1 }
 0x742   : > { %v5929_v16 = vcombine.high %v5927_v24, %v5927_v24  ;;  %v6016_v6 = vsel %vm5980_vm10, %v5928_v25, -inf  ;;  %v6023_v18 = vsel %vm5980_vm10, %v5927_v24, -inf  ;;  %v5862_v50 = vpop.f32.mrb[43].mxu1  ;;  %v5861_v9 = vadd.f32 %v17195_v34, %v5860_v39 }
 0x743   : > { %v6011_v36 = vmax.f32 %v6009_v37, %v6010_v56  ;;  %v6017_v8 = vrot.slane %v6016_v6, 4  ;;  %v6024_v28 = vrot.slane %v6023_v18, 4  ;;  %v5876_v31 = vmax.f32 %v5858_v58, 0.0 }
 0x744   : > { %v6030_v47 = vsel %vm5980_vm10, %v5929_v16, -inf  ;;  %v5877_v38 = vmax.f32 %v5861_v9, 0.0 }
 0x745   : > { %v6012_v29 = vrot.slane %v6011_v36, 2  ;;  %v6018_v46 = vmax.f32 %v6016_v6, %v6017_v8  ;;  %v6025_v44 = vmax.f32 %v6023_v18, %v6024_v28  ;;  %v6031_v32 = vrot.slane %v6030_v47, 4 }
 0x746   : > { %v5886_v13 = vsel %vm18711_vm1, %v5876_v31, -inf  ;;  %v5887_v52 = vsel %vm18712_vm7, %v5877_v38, -inf  ;;  %vm6321_vm1 = vmor %vm6319_vm5, %vm18716_vm12  ;;  %vm18717_vm7 = vcmask 1046534   ;;  %vm6260_vm5 = vsmask.f32 7448 }
 0x747   : > { %v6013_v14 = vmax.f32 %v6011_v36, %v6012_v29  ;;  %v6019_v40 = vrot.slane %v6018_v46, 2  ;;  %v6026_v48 = vrot.slane %v6025_v44, 2  ;;  %v6032_v59 = vmax.f32 %v6030_v47, %v6031_v32 }
 0x748   : > { %v5865_v45 = vpop.f32.mrb[44].mxu1  ;;  %v5888_v49 = vmax.f32 %v5886_v13, %v5887_v52 }
 0x749   : > { %v6014_v61 = vrot.slane %v6013_v14, 1  ;;  %v6020_v21 = vmax.f32 %v6018_v46, %v6019_v40  ;;  %v6027_v4 = vmax.f32 %v6025_v44, %v6026_v48  ;;  %v6033_v41 = vrot.slane %v6032_v59, 2  ;;  %v5867_v30 = vpop.f32.mrb[45].mxu1 }
 0x74a   : > { %v5866_v17 = vadd.f32 %v17195_v34, %v5865_v45  ;;  %v5868_v15 = vpop.f32.mrb[46].mxu1  ;;  %v5930_v55 = vcombine.high %v5888_v49, %v5888_v49  ;;  %v5937_v11 = vrot.slane %v5888_v49, %v16307_v60 }
 0x74b   : > { %v6015_v33 = vmax.f32 %v6013_v14, %v6014_v61  ;;  %v6021_v43 = vrot.slane %v6020_v21, 1  ;;  %v6028_v63 = vrot.slane %v6027_v4, 1  ;;  %v6034_v42 = vmax.f32 %v6032_v59, %v6033_v41  ;;  %v5870_v26 = vpop.f32.mrb[47].mxu1 }
 0x74c   : > { %v5878_v7 = vmax.f32 %v5866_v17, 0.0  ;;  %v5869_v23 = vadd.f32 %v17195_v34, %v5868_v15  ;;  %v5944_v51 = vrot.slane %v5930_v55, %v16307_v60  ;;  %v5945_v56 = vcombine.high %v5937_v11, %v5937_v11 }
 0x74d   : > { %v6022_v24 = vmax.f32 %v6020_v21, %v6021_v43  ;;  %v6029_v25 = vmax.f32 %v6027_v4, %v6028_v63  ;;  %v6035_v37 = vrot.slane %v6034_v42, 1  ;;  %v6116_v58 = vpack.c.bf16 %v6015_v33, %v6015_v33 }
 0x74e   : > { %v6037_v39 = vsel %vm5980_vm10, %v5937_v11, -inf  ;;  %v5889_v54 = vsel %vm18713_vm8, %v5878_v7, -inf  ;;  %v5946_v36 = vcombine.high %v5944_v51, %v5944_v51  ;;  %v6044_v28 = vsel %vm5980_vm10, %v5945_v56, -inf  ;;  %vm17292_vm8 = vmor %vm6321_vm1, %vm18717_vm7 }
 0x74f   : > { %v6036_v16 = vmax.f32 %v6034_v42, %v6035_v37  ;;  %v6117_v6 = vpack.c.bf16 %v6022_v24, %v6022_v24  ;;  %v6118_v18 = vpack.c.bf16 %v6029_v25, %v6029_v25  ;;  %v6148_v50 = vunpack.c.l.b16 %v6116_v58 }
 0x750   : > { %v6038_v8 = vrot.slane %v6037_v39, 4  ;;  %v6051_v34 = vsel %vm5980_vm10, %v5944_v51, -inf  ;;  %v6045_v29 = vrot.slane %v6044_v28, 4  ;;  %v6058_v32 = vsel %vm5980_vm10, %v5946_v36, -inf }
 0x751   : > { %v6119_v9 = vpack.c.bf16 %v6036_v16, %v6036_v16  ;;  %v6149_v47 = vunpack.c.l.b16 %v6117_v6  ;;  %v6150_v31 = vunpack.c.l.b16 %v6118_v18  ;;  %v6052_v44 = vrot.slane %v6051_v34, 4 }
 0x752   : > { %v6039_v46 = vmax.f32 %v6037_v39, %v6038_v8  ;;  %v5879_v38 = vmax.f32 %v5869_v23, 0.0  ;;  %v6046_v14 = vmax.f32 %v6044_v28, %v6045_v29  ;;  %v6059_v40 = vrot.slane %v6058_v32, 4 }
 0x753   : > { %v6151_v35 = vunpack.c.l.b16 %v6119_v9  ;;  %v6163_v53 = vsel %vm4616_vm15, %v6149_v47, %v6148_v50  ;;  %v6053_v13 = vmax.f32 %v6051_v34, %v6052_v44  ;;  %v17277_v17 = vrot.slane %v17259_v57, %v16307_v60 }
 0x754   : > { %v6164_v48 = vsel %vm4618_vm3, %v6150_v31, %v6163_v53  ;;  %v6040_v59 = vrot.slane %v6039_v46, 2  ;;  %v5890_v52 = vsel %vm18714_vm4, %v5879_v38, -inf  ;;  %v6047_v61 = vrot.slane %v6046_v14, 2 }
 0x755   : > { %v6165_v45 = vsel %vm4620_vm0, %v6151_v35, %v6164_v48  ;;  %v6060_v21 = vmax.f32 %v6058_v32, %v6059_v40  ;;  %v5891_v4 = vmax.f32 %v5889_v54, %v5890_v52  ;;  %v6054_v49 = vrot.slane %v6053_v13, 2 }
 0x756   : > { %v6173_v41 = vpack.c.b16 %v6165_v45, %v6165_v45  ;;  %v6041_v30 = vmax.f32 %v6039_v46, %v6040_v59  ;;  %v6048_v15 = vmax.f32 %v6046_v14, %v6047_v61  ;;  %vm6256_vm4 = vsmask.f32 3336 }
 0x757   : > { %v6061_v33 = vrot.slane %v6060_v21, 2  ;;  %v5947_v43 = vcombine.high %v5891_v4, %v5891_v4  ;;  %v5954_v63 = vrot.slane %v5891_v4, %v16307_v60  ;;  %v6055_v11 = vmax.f32 %v6053_v13, %v6054_v49 }
 0x758   : > { %v6184_v42 = vshrl.u32 %v6173_v41, 16  ;;  %v6187_v26 = vshll.u32 %v6173_v41, 16  ;;  %v6042_v55 = vrot.slane %v6041_v30, 1  ;;  %v6049_v7 = vrot.slane %v6048_v15, 1 }
 0x759   : > { %v6062_v23 = vmax.f32 %v6060_v21, %v6061_v33  ;;  %v5961_v24 = vrot.slane %v5947_v43, %v16307_v60  ;;  %v5962_v25 = vcombine.high %v5954_v63, %v5954_v63  ;;  %v6056_v51 = vrot.slane %v6055_v11, 1 }
 0x75a   : > { %v6186_v37 = vrot.slane %v6184_v42, 7  ;;  %v6043_v58 = vmax.f32 %v6041_v30, %v6042_v55  ;;  %v6065_v56 = vsel %vm5980_vm10, %v5954_v63, -inf  ;;  %v6050_v39 = vmax.f32 %v6048_v15, %v6049_v7 }
 0x75b   : > { %v6063_v54 = vrot.slane %v6062_v23, 1  ;;  %v5963_v16 = vcombine.high %v5961_v24, %v5961_v24  ;;  %v6066_v6 = vrot.slane %v6065_v56, 4  ;;  %v6057_v50 = vmax.f32 %v6055_v11, %v6056_v51 }
 0x75c   : > { %v6189_v18 = vor.u32 %v6187_v26, %v6186_v37  ;;  %v6120_v36 = vpack.c.bf16 %v6043_v58, %v6043_v58  ;;  %v6072_v8 = vsel %vm5980_vm10, %v5962_v25, -inf  ;;  %v6121_v34 = vpack.c.bf16 %v6050_v39, %v6050_v39 }
 0x75d   : > { %v6064_v28 = vmax.f32 %v6062_v23, %v6063_v54  ;;  %v6067_v9 = vmax.f32 %v6065_v56, %v6066_v6  ;;  %v6073_v47 = vrot.slane %v6072_v8, 4  ;;  %v6122_v31 = vpack.c.bf16 %v6057_v50, %v6057_v50 }
 0x75e   : > { %v6152_v29 = vunpack.c.l.b16 %v6120_v36  ;;  %v6079_v46 = vsel %vm5980_vm10, %v5961_v24, -inf  ;;  %v6086_v44 = vsel %vm5980_vm10, %v5963_v16, -inf  ;;  %v6153_v38 = vunpack.c.l.b16 %v6121_v34 }
 0x75f   : > { %v6123_v32 = vpack.c.bf16 %v6064_v28, %v6064_v28  ;;  %v6068_v35 = vrot.slane %v6067_v9, 2  ;;  %v6074_v53 = vmax.f32 %v6072_v8, %v6073_v47  ;;  %v6154_v14 = vunpack.c.l.b16 %v6122_v31 }
 0x760   : > { %v6080_v40 = vrot.slane %v6079_v46, 4  ;;  %v6087_v48 = vrot.slane %v6086_v44, 4  ;;  %v6209_v59 = vsel %vm14881_vm2, 0, %v6189_v18  ;;  %v6166_v52 = vsel %vm4616_vm15, %v6153_v38, %v6152_v29 }
 0x761   : > { %v6155_v13 = vunpack.c.l.b16 %v6123_v32  ;;  %v6069_v45 = vmax.f32 %v6067_v9, %v6068_v35  ;;  %v6075_v61 = vrot.slane %v6074_v53, 2  ;;  %v6167_v4 = vsel %vm4618_vm3, %v6154_v14, %v6166_v52 }
 0x762   : > { %v6081_v41 = vmax.f32 %v6079_v46, %v6080_v40  ;;  %v6088_v30 = vmax.f32 %v6086_v44, %v6087_v48  ;;  %v17299_v49 = vsel %vm17221_vm6, %v6209_v59, 0  ;;  %v17304_v63 = vcombine.high %v17277_v17, %v17277_v17  ;;  %v14210_v59 = vld [vmem:[%s14708_s14 + $0x20] sm:$0xff]  }
 0x763   : > { %v6168_v15 = vsel %vm4620_vm0, %v6155_v13, %v6167_v4  ;;  %v6070_v33 = vrot.slane %v6069_v45, 1  ;;  %v6076_v43 = vmax.f32 %v6074_v53, %v6075_v61  ;;  %v17308_v11 = vrot.slane %v6266_v62, 7  ;;  %6598 = vmatpush1.bf16.msra.mxu0 %v14210_v59 }
 0x764   : > { %v6174_v42 = vpack.c.b16 %v6168_v15, %v6168_v15  ;;  %v6082_v26 = vrot.slane %v6081_v41, 2  ;;  %v6089_v55 = vrot.slane %v6088_v30, 2  ;;  %vm6255_vm10 = vsmask.f32 1280  ;;  %6599 = vmatprep.subr.bf16.mxu0 %v18656_v27 }
 0x765   : > { %v6071_v7 = vmax.f32 %v6069_v45, %v6070_v33  ;;  %v6077_v23 = vrot.slane %v6076_v43, 1  ;;  %v17312_v24 = vrot.slane %v17299_v49, %v16307_v60  ;;  %v17320_v25 = vsel %vm17292_vm8, %v12980_v22, %v6326_v5  ;;  %vm6257_vm12 = vmor %vm6255_vm10, %vm6256_vm4 }
 0x766   : > { %v6191_v37 = vshrl.u32 %v6174_v42, 16  ;;  %v6083_v58 = vmax.f32 %v6081_v41, %v6082_v26  ;;  %v6090_v62 = vmax.f32 %v6088_v30, %v6089_v55  ;;  %v6277_v51 = vshrl.u32 %v17277_v17, 16  ;;  %vm6259_vm1 = vmor %vm6257_vm12, %vm6258_vm11 }
 0x767   : > { %v6078_v56 = vmax.f32 %v6076_v43, %v6077_v23  ;;  %v6124_v39 = vpack.c.bf16 %v6071_v7, %v6071_v7  ;;  %v6330_v54 = vrot.slane %v17304_v63, 7  ;;  %v6280_v16 = vshll.u32 %v17277_v17, 16 }
 0x768   : > { %v6193_v6 = vrot.slane %v6191_v37, 7  ;;  %v6194_v18 = vshll.u32 %v6174_v42, 16  ;;  %v6084_v50 = vrot.slane %v6083_v58, 1  ;;  %v6091_v0 = vrot.slane %v6090_v62, 1 }
 0x769   : > { %v6125_v36 = vpack.c.bf16 %v6078_v56, %v6078_v56  ;;  %v12981_v22 = vrot.slane %v17277_v17, 9  ;;  %v6291_v5 = vshrl.u32 %v17312_v24, 16  ;;  %v6294_v8 = vshll.u32 %v17312_v24, 16 }
 0x76a   : > { %v6196_v28 = vor.u32 %v6194_v18, %v6193_v6  ;;  %v6085_v34 = vmax.f32 %v6083_v58, %v6084_v50  ;;  %v6092_v9 = vmax.f32 %v6090_v62, %v6091_v0  ;;  %v6279_v47 = vrot.slane %v6277_v51, 6  ;;  %v14211_v18 = vld [vmem:[%s14708_s14 + $0x28] sm:$0xff]  }
 0x76b   : > { %v6156_v31 = vunpack.c.l.b16 %v6124_v39  ;;  %v6157_v29 = vunpack.c.l.b16 %v6125_v36  ;;  %v17330_v46 = vsel %vm17292_vm8, %v12981_v22, %v6330_v54  ;;  %v6282_v44 = vrot.slane %v6280_v16, 7  ;;  %6600 = vmatpush1.bf16.msra.mxu0 %v14211_v18 }
 0x76c   : > { %v6126_v32 = vpack.c.bf16 %v6085_v34, %v6085_v34  ;;  %v6127_v38 = vpack.c.bf16 %v6092_v9, %v6092_v9  ;;  %v6210_v17 = vsel %vm14881_vm2, 0, %v6196_v28  ;;  %v6246_v35 = vcombine.high %v17312_v24, %v17312_v24  ;;  %6601 = vmatprep.subr.bf16.mxu0 %v18656_v27 }
 0x76d   : > { %v6169_v53 = vsel %vm4616_vm15, %v6157_v29, %v6156_v31  ;;  %v17339_v14 = vsel %vm17221_vm6, %v6210_v17, 0  ;;  %v6293_v40 = vrot.slane %v6291_v5, 6  ;;  %v6296_v48 = vrot.slane %v6294_v8, 7 }
 0x76e   : > { %v6158_v13 = vunpack.c.l.b16 %v6126_v32  ;;  %v6159_v52 = vunpack.c.l.b16 %v6127_v38  ;;  %v6253_v45 = vrot.slane %v17339_v14, %v16307_v60  ;;  %v6269_v61 = vor.u32 %v17308_v11, %v17261_v20 }
 0x76f   : > { %v6403_v4 = vcombine.low %v17320_v25, %v17330_v46  ;;  %v6272_v41 = vshll.u32 %v17246_v10, 16  ;;  %v6283_v30 = vor.u32 %v6282_v44, %v6279_v47  ;;  %v6368_v15 = vcombine.low %v17299_v49, %v17339_v14 }
 0x770   : > { %v6170_v33 = vsel %vm4618_vm3, %v6158_v13, %v6169_v53  ;;  %v6254_v43 = vcombine.high %v6253_v45, %v6253_v45  ;;  %v6334_v42 = vrot.slane %v6246_v35, 7  ;;  %v6305_v26 = vshrl.u32 %v6253_v45, 16 }
 0x771   : > { %v12982_v20 = vrot.slane %v17312_v24, 9  ;;  %v6171_v55 = vsel %vm4620_vm0, %v6159_v52, %v6170_v33  ;;  %v6297_v10 = vor.u32 %v6296_v48, %v6293_v40  ;;  %v6308_v11 = vshll.u32 %v6253_v45, 16  ;;  %vm17371_vm0 = vmor %vm6259_vm1, %vm6260_vm5  ;;  %v14212_v52 = vld [vmem:[%s14708_s14 + $0x30] sm:$0xff]  }
 0x772   : > { %v12983_v7 = vrot.slane %v6253_v45, 9  ;;  %v6338_v23 = vrot.slane %v6254_v43, 7  ;;  %v6175_v37 = vpack.c.b16 %v6171_v55, %v6171_v55  ;;  %v6307_v58 = vrot.slane %v6305_v26, 6  ;;  %6602 = vmatpush1.bf16.msra.mxu0 %v14212_v52 }
 0x773   : > { %v6270_v62 = vrot.slane %v6269_v61, 2  ;;  %v6300_v51 = vshll.u32 %v6246_v35, 16  ;;  %v6310_v56 = vrot.slane %v6308_v11, 7  ;;  %v6314_v39 = vshll.u32 %v6254_v43, 16  ;;  %6603 = vmatprep.subr.bf16.mxu0 %v18656_v27 }
 0x774   : > { %v17360_v54 = vsel %vm17292_vm8, %v12982_v20, %v6334_v42  ;;  %v17364_v24 = vsel %vm17292_vm8, %v12983_v7, %v6338_v23  ;;  %v6198_v16 = vshrl.u32 %v6175_v37, 16  ;;  %v6286_v6 = vshll.u32 %v17304_v63, 16 }
 0x775   : > { %v6404_v50 = vcombine.low %v17360_v54, %v17364_v24  ;;  %v6274_v0 = vrot.slane %v6272_v41, 7  ;;  %v6298_v36 = vrot.slane %v6297_v10, 2  ;;  %v6311_v22 = vor.u32 %v6310_v56, %v6307_v58 }
 0x776   : > { %v6411_v8 = vrot.slane %v6403_v4, %v16307_v60  ;;  %v6200_v28 = vrot.slane %v6198_v16, 7  ;;  %v6201_v34 = vshll.u32 %v6175_v37, 16  ;;  %v6284_v9 = vrot.slane %v6283_v30, 2  ;;  %v14213_v30 = vld [vmem:[%s14708_s14 + $0x38] sm:$0xff]  }
 0x777   : > { %v17377_v63 = vrot.slane %v6404_v50, %v16307_v60  ;;  %v6302_v47 = vrot.slane %v6300_v51, 7  ;;  %v6312_v31 = vrot.slane %v6311_v22, 2  ;;  %v6316_v29 = vrot.slane %v6314_v39, 7  ;;  %6604 = vmatpush1.bf16.msra.mxu0 %v14213_v30 }
 0x778   : > { %v6203_v44 = vor.u32 %v6201_v34, %v6200_v28  ;;  %v6288_v32 = vrot.slane %v6286_v6, 7  ;;  %v17383_v17 = vsel %vm17371_vm0, %v6270_v62, %v6274_v0  ;;  %v6422_v48 = vcombine.low %v17259_v57, %v17299_v49  ;;  %6605 = vmatprep.subr.bf16.mxu0 %v18656_v27 }
 0x779   : > { %v6419_v38 = vcombine.low %v6411_v8, %v17377_v63  ;;  %v6303_v35 = vsel %vm17371_vm0, %v6298_v36, %v6302_v47  ;;  %v6317_v53 = vsel %vm17371_vm0, %v6312_v31, %v6316_v29  ;;  %v6460_v20 = vcombine.low %v17330_v46, %v17360_v54  ;;  %v14214_v46 = vld [vmem:[%s14708_s14 + $0x40] sm:$0xff]  }
 0x77a   : > { %v6211_v40 = vsel %vm14881_vm2, 0, %v6203_v44  ;;  %v6289_v59 = vsel %vm17371_vm0, %v6284_v9, %v6288_v32  ;;  %v6385_v13 = vcombine.low %v6303_v35, %v6317_v53  ;;  %v6430_v43 = vrot.slane %v6422_v48, %v16307_v60 }
 0x77b   : > { %6420 = vrot.lane.b32.xlu0 %v6419_v38, %s18639_s18  ;;  %v6218_v45 = vsel %vm17221_vm6, %v6211_v40, 0  ;;  %v6384_v33 = vcombine.low %v17383_v17, %v6289_v59  ;;  %v6382_v11 = vrot.slane %v6368_v15, %v16307_v60  ;;  %v6468_v50 = vrot.slane %v6460_v20, %v16307_v60  ;;  %6606 = vmatpush1.bf16.msra.mxu0 %v14214_v46  ;;  %v14215_v20 = vld [vmem:[%s14718_s24 + $0x40] sm:$0xff]  }
 0x77c   : > { %v6423_v61 = vcombine.low %v17339_v14, %v6218_v45  ;;  %v6347_v4 = vrot.slane %v6218_v45, %v16307_v60  ;;  %v6479_v41 = vcombine.low %v6218_v45, %v17230_v12  ;;  %v6399_v37 = vrot.slane %v6385_v13, %v16307_v60  ;;  %13430 = vmatprep.subr.bf16.mxu1 %v14215_v20  ;;  %v14227_v20 = vld [vmem:[%s14718_s24 + $0x70] sm:$0xff]  }
 0x77d   : > { %v6392_v49 = vrot.slane %v6384_v33, %v16307_v60  ;;  %v6441_v28 = vcombine.low %v6289_v59, %v6303_v35  ;;  %vm18722_vm3 = vcmask 130048   ;;  %vm18724_vm4 = vcmask 261120  }
 0x77e   : > { %v6437_v42 = vrot.slane %v6423_v61, %v16307_v60  ;;  %v6348_v26 = vcombine.high %v6347_v4, %v6347_v4  ;;  %v6350_v55 = vshrl.u32 %v6347_v4, 16  ;;  %v6353_v10 = vshll.u32 %v6347_v4, 16  ;;  %vm18723_vm7 = vmmov %vm18722_vm3 }
 0x77f   : > { %v6486_v7 = vrot.slane %v6479_v41, %v16307_v60  ;;  %v12984_v58 = vrot.slane %v6347_v4, 9  ;;  %v6400_v18 = vcombine.low %v6392_v49, %v6399_v37  ;;  %v6449_v29 = vrot.slane %v6441_v28, %v16307_v60 }
 0x780   : > { %v6438_v23 = vcombine.low %v6430_v43, %v6437_v42  ;;  %v6365_v62 = vrot.slane %v6348_v26, 7  ;;  %v6352_v51 = vrot.slane %v6350_v55, 6  ;;  %v6355_v56 = vrot.slane %v6353_v10, 7  ;;  %v14216_v55 = vld [vmem:[%s14718_s24] sm:$0xff]   ;;  %v14217_v10 = vld [vmem:[%s14718_s24 + $0x48] sm:$0xff]  }
 0x781   : > { %v6359_v39 = vshll.u32 %v6348_v26, 16  ;;  %v6487_v16 = vcombine.low %v6382_v11, %v6486_v7  ;;  %vm18725_vm11 = vcmask 392192   ;;  %vm18726_vm5 = vcmask 523264   ;;  %13431 = vmatpush3.bf16.msra.mxu1 %v14216_v55  ;;  %v14219_v7 = vld [vmem:[%s14718_s24 + $0x50] sm:$0xff]  }
 0x782   : > { %6439 = vrot.lane.b32.xlu1 %v6438_v23, %s18635_s5  ;;  %v6366_v14 = vsel %vm17292_vm8, %v12984_v58, %v6365_v62  ;;  %v6356_v6 = vor.u32 %v6355_v56, %v6352_v51  ;;  %13432 = vmatprep.subr.bf16.mxu1 %v14217_v10  ;;  %v14220_v23 = vld [vmem:[%s14718_s24 + $0x10] sm:$0xff]   ;;  %v14222_v58 = vld [vmem:[%s14718_s24 + $0x18] sm:$0xff]   ;;  %v14223_v62 = vld [vmem:[%s14718_s24 + $0x60] sm:$0xff]   ;;  %s18733_s5 = sld [smem:[#allocation12_spill]] }
 0x783   : > { %v6501_v15 = vcombine.low %v6366_v14, %v17320_v25  ;;  %v6461_v54 = vcombine.low %v17364_v24, %v6366_v14  ;;  %v6361_v8 = vrot.slane %v6359_v39, 7  ;;  %v14224_v51 = vld [vmem:[%s14718_s24 + $0x20] sm:$0xff]   ;;  %v14228_v55 = vld [vmem:[%s14718_s24 + $0x30] sm:$0xff]   ;;  %vm18729_vm12 = vmmov %vm18726_vm5 }
 0x784   : > { %v6357_v22 = vrot.slane %v6356_v6, 2  ;;  %v12985_v56 = vld [vmem:[%s14713_s19] ss:$0 sm:$0xff]  ;;  %vm18730_vm1 = vmmov %vm18726_vm5 }
 0x785   : > { %v6508_v0 = vrot.slane %v6501_v15, %v16307_v60  ;;  %v6475_v36 = vrot.slane %v6461_v54, %v16307_v60 }
 0x786   : > { %6401 = vrot.lane.b32.xlu1 %v6400_v18, %s18632_s16  ;;  %v6362_v24 = vsel %vm17371_vm0, %v6357_v22, %v6361_v8  ;;  %s18743_s16 = sld [smem:[#allocation13_spill]] }
 0x787   : > { %v6509_v34 = vcombine.low %v17377_v63, %v6508_v0  ;;  %v6476_v9 = vcombine.low %v6468_v50, %v6475_v36  ;;  %v6442_v47 = vcombine.low %v6317_v53, %v6362_v24  ;;  %v6490_v31 = vcombine.low %v6362_v24, %v17383_v17 }
 0x788   : > { %v6367_v63 = vcombine.low %v17230_v12, %v17259_v57  ;;  %v14266_v1 = vld [vmem:[%s18733_s5 + $0x30] sm:$0xff]  }
 0x789   : > { %12995 = vmatprep.mubr.msk.bf16.mxu0 %vm18722_vm3, %v6509_v34  ;;  %v6456_v44 = vrot.slane %v6442_v47, %v16307_v60  ;;  %v6497_v32 = vrot.slane %v6490_v31, %v16307_v60  ;;  %vm14652_vm3 = vmmov 0  }
 0x78a   : > { %6477 = vrot.lane.b32.xlu1 %v6476_v9, %s14649_s26  ;;  %v6375_v40 = vrot.slane %v6367_v63, %v16307_v60  ;;  %s18759_s26 = sld [smem:[#allocation18_spill]] }
 0x78b   : > { %v6457_v38 = vcombine.low %v6449_v29, %v6456_v44  ;;  %v6498_v35 = vcombine.low %v6399_v37, %v6497_v32  ;;  %v14221_v37 = vld [vmem:[%s14718_s24 + $0x58] sm:$0xff]  }
 0x78c   : > { %v6383_v48 = vcombine.low %v6375_v40, %v6382_v11  ;;  %v14218_v11 = vld [vmem:[%s14718_s24 + $0x8] sm:$0xff]  }
 0x78d   : > { %6458 = vrot.lane.b32.xlu0 %v6457_v38, %s18638_s11  ;;  %13433 = vmatpush3.bf16.msra.mxu1 %v14218_v11  ;;  %v14225_v38 = vld [vmem:[%s14718_s24 + $0x68] sm:$0xff]  }
 0x78e   : > { %6499 = vrot.lane.b32.xlu1 %v6498_v35, %s14650_s22  ;;  %13434 = vmatprep.subr.bf16.mxu1 %v14219_v7  ;;  %v14226_v35 = vld [vmem:[%s14718_s24 + $0x28] sm:$0xff]   ;;  %s18762_s22 = sld [smem:[#allocation17_spill]] }
 0x791   : > { %6488 = vrot.lane.b32.xlu0 %v6487_v16, %s14648_s9  ;;  %13435 = vmatpush3.bf16.msra.mxu1 %v14220_v23 }
 0x792   : > { %13436 = vmatprep.subr.bf16.mxu1 %v14221_v37 }
 0x795   : > { %13437 = vmatpush3.bf16.msra.mxu1 %v14222_v58 }
 0x796   : > { %13438 = vmatprep.subr.bf16.mxu1 %v14223_v62 }
 0x799   : > { %13439 = vmatpush3.bf16.msra.mxu1 %v14224_v51 }
 0x79a   : > { %13440 = vmatprep.subr.bf16.mxu1 %v14225_v38 }
 0x79d   : > { %13441 = vmatpush3.bf16.msra.mxu1 %v14226_v35 }
 0x79e   : > { %13442 = vmatprep.subr.bf16.mxu1 %v14227_v20 }
 0x7a1   : > { %13443 = vmatpush3.bf16.msra.mxu1 %v14228_v55 }
 0x7ed   : > { %v6421_v52 = vpop.permute.xlu0 %6420 }
 0x7f4   : > { %v6440_v53 = vpop.permute.xlu1 %6439 }
 0x7f8   : > { %v6402_v59 = vpop.permute.xlu1 %6401 }
 0x7f9   : > { %v6512_v13 = vsel %vm18723_vm7, %v6383_v48, %v6402_v59  ;;  %vm18731_vm7 = vmmov %vm18724_vm4 }
 0x7fa   : > { %v6514_v45 = vsel %vm18724_vm4, %v6512_v13, %v6421_v52 }
 0x7fb   : > { %v6516_v4 = vsel %vm18725_vm11, %v6514_v45, %v6440_v53  ;;  %vm18732_vm11 = vmmov %vm18724_vm4 }
 0x7fc   : > { %v6478_v61 = vpop.permute.xlu1 %6477 }
 0x7ff   : > { %v6459_v41 = vpop.permute.xlu0 %6458 }
 0x800   : > { %v6518_v57 = vsel %vm18726_vm5, %v6516_v4, %v6459_v41  ;;  %v6500_v43 = vpop.permute.xlu1 %6499  ;;  %vm18734_vm5 = vmmov %vm18724_vm4 }
 0x801   : > { %v6520_v30 = vsel %vm5704_vm13, %v6518_v57, %v6478_v61  ;;  %vm18727_vm13 = vmmov %vm18724_vm4 }
 0x803   : > { %v6489_v33 = vpop.permute.xlu0 %6488 }
 0x804   : > { %v6522_v42 = vsel %vm5713_vm9, %v6520_v30, %v6489_v33 }
 0x805   : > { %v6524_v26 = vsel %vm5722_vm14, %v6522_v42, %v6500_v43  ;;  %vm18728_vm14 = vmmov %vm18724_vm4 }
 0x806   : > { %6622 = vmatmul.mubr.bf16.vlgmr.msra.gmra.mrb[40].mxu0 %v6524_v26 }
 0x8d9   : > { %v6623_v39 = vpop.f32.mrb[40].mxu0 }
 0x8da   : > { %v6624_v16 = vadd.f32 %v12985_v56, %v6623_v39  ;;  %v6625_v46 = vpop.f32.mrb[41].mxu0 }
 0x8db   : > { %v6626_v49 = vpop.f32.mrb[42].mxu0 }
 0x8dc   : > { %v6630_v14 = vmax.f32 %v6624_v16, 0.0  ;;  %v6627_v15 = vadd.f32 %v12985_v56, %v6626_v49  ;;  %v6628_v54 = vpop.f32.mrb[43].mxu0 }
 0x8de   : > { %v6634_v6 = vcombine.high %v6630_v14, %v6630_v14  ;;  %v6675_v18 = vpack.c.bf16 %v6630_v14, %v6630_v14  ;;  %v6631_v50 = vmax.f32 %v6627_v15, 0.0 }
 0x8e0   : > { %v6676_v0 = vpack.c.bf16 %v6634_v6, %v6634_v6  ;;  %v6680_v36 = vshrl.u32 %v6675_v18, 16  ;;  %v6635_v22 = vcombine.high %v6631_v50, %v6631_v50  ;;  %v6677_v8 = vpack.c.bf16 %v6631_v50, %v6631_v50 }
 0x8e1   : > { %v6683_v34 = vshll.u32 %v6675_v18, 16 }
 0x8e2   : > { %v6682_v28 = vrot.slane %v6680_v36, 7  ;;  %v6687_v9 = vshrl.u32 %v6676_v0, 16  ;;  %v6678_v24 = vpack.c.bf16 %v6635_v22, %v6635_v22  ;;  %v6694_v47 = vshrl.u32 %v6677_v8, 16 }
 0x8e3   : > { %v6690_v44 = vshll.u32 %v6676_v0, 16  ;;  %v6697_v53 = vshll.u32 %v6677_v8, 16 }
 0x8e4   : > { %v6685_v31 = vor.u32 %v6683_v34, %v6682_v28  ;;  %v6689_v29 = vrot.slane %v6687_v9, 7  ;;  %v6701_v32 = vshrl.u32 %v6678_v24, 16  ;;  %v6696_v63 = vrot.slane %v6694_v47, 7 }
 0x8e5   : > { %v6704_v13 = vshll.u32 %v6678_v24, 16 }
 0x8e6   : > { %v6692_v40 = vor.u32 %v6690_v44, %v6689_v29  ;;  %v6711_v48 = vsel %vm14881_vm2, 0, %v6685_v31  ;;  %v6703_v59 = vrot.slane %v6701_v32, 7  ;;  %v6699_v45 = vor.u32 %v6697_v53, %v6696_v63 }
 0x8e7   : > { %v17466_v52 = vsel %vm17221_vm6, %v6711_v48, 0 }
 0x8e8   : > { %v6712_v61 = vsel %vm14881_vm2, 0, %v6692_v40  ;;  %v6728_v4 = vrot.slane %v17466_v52, %v16307_v60  ;;  %v6706_v41 = vor.u32 %v6704_v13, %v6703_v59  ;;  %v6713_v30 = vsel %vm14881_vm2, 0, %v6699_v45 }
 0x8e9   : > { %v17474_v57 = vsel %vm17221_vm6, %v6712_v61, 0  ;;  %v17484_v42 = vsel %vm17221_vm6, %v6713_v30, 0 }
 0x8ea   : > { %v6736_v33 = vrot.slane %v17474_v57, %v16307_v60  ;;  %v6714_v43 = vsel %vm14881_vm2, 0, %v6706_v41  ;;  %v6729_v26 = vcombine.high %v6728_v4, %v6728_v4  ;;  %v6744_v11 = vrot.slane %v17484_v42, %v16307_v60 }
 0x8eb   : > { %v17490_v10 = vsel %vm17221_vm6, %v6714_v43, 0  ;;  %v6828_v7 = vcombine.low %v17474_v57, %v17484_v42  ;;  %v12996_v23 = vrot.slane %v6728_v4, 9  ;;  %v6747_v50 = vshrl.u32 %v6728_v4, 16 }
 0x8ec   : > { %v17498_v37 = vrot.slane %v17490_v10, %v16307_v60  ;;  %v6937_v58 = vcombine.low %v17490_v10, %v17230_v12  ;;  %v6737_v62 = vcombine.high %v6736_v33, %v6736_v33  ;;  %v6790_v51 = vrot.slane %v6729_v26, 7 }
 0x8ed   : > { %v17503_v56 = vrot.slane %v6828_v7, %v16307_v60  ;;  %v17505_v39 = vcombine.high %v6744_v11, %v6744_v11  ;;  %v12997_v16 = vrot.slane %v6736_v33, 9  ;;  %v12998_v15 = vrot.slane %v6744_v11, 9 }
 0x8ee   : > { %v17509_v46 = vcombine.high %v17498_v37, %v17498_v37  ;;  %v6944_v49 = vrot.slane %v6937_v58, %v16307_v60  ;;  %v6791_v14 = vsel %vm17292_vm8, %v12996_v23, %v6790_v51  ;;  %v6794_v54 = vrot.slane %v6737_v62, 7 }
 0x8ef   : > { %v6798_v6 = vrot.slane %v17505_v39, 7  ;;  %v6863_v18 = vcombine.low %v17320_v25, %v6791_v14  ;;  %v12999_v0 = vrot.slane %v17498_v37, 9  ;;  %v6750_v8 = vshll.u32 %v6728_v4, 16 }
 0x8f0   : > { %v6945_v36 = vcombine.low %v17503_v56, %v6944_v49  ;;  %v6825_v22 = vrot.slane %v17509_v46, 7  ;;  %v6795_v28 = vsel %vm17292_vm8, %v12997_v16, %v6794_v54  ;;  %v6749_v9 = vrot.slane %v6747_v50, 6  ;;  %v14230_v54 = vld [vmem:[%s14718_s24 + $0x38] sm:$0xff]  }
 0x8f1   : > { %v6799_v34 = vsel %vm17292_vm8, %v12998_v15, %v6798_v6  ;;  %v6756_v24 = vshll.u32 %v6729_v26, 16  ;;  %v6918_v29 = vcombine.low %v6791_v14, %v6795_v28  ;;  %v6752_v44 = vrot.slane %v6750_v8, 7  ;;  %v14229_v15 = vld [vmem:[%s14718_s24 + $0x78] sm:$0xff]  }
 0x8f2   : > { %6946 = vrot.lane.b32.xlu0 %v6945_v36, %s18638_s11  ;;  %v6826_v47 = vsel %vm17292_vm8, %v12999_v0, %v6825_v22  ;;  %v6864_v31 = vcombine.low %v6795_v28, %v6799_v34  ;;  %v6871_v32 = vrot.slane %v6863_v18, %v16307_v60  ;;  %v6761_v63 = vshrl.u32 %v6736_v33, 16  ;;  %13444 = vmatprep.subr.bf16.mxu1 %v14229_v15 }
 0x8f3   : > { %v6959_v38 = vcombine.low %v6826_v47, %v17320_v25  ;;  %v6919_v35 = vcombine.low %v6799_v34, %v6826_v47  ;;  %v6926_v40 = vrot.slane %v6918_v29, %v16307_v60  ;;  %v6753_v48 = vor.u32 %v6752_v44, %v6749_v9  ;;  %13445 = vmatpush3.bf16.msra.mxu1 %v14230_v54  ;;  %v14232_v54 = vld [vmem:[%s14718_s24 + $0x88] sm:$0xff]  }
 0x8f4   : > { %v17529_v53 = vrot.slane %v6864_v31, %v16307_v60  ;;  %v6764_v59 = vshll.u32 %v6736_v33, 16  ;;  %v6763_v61 = vrot.slane %v6761_v63, 6  ;;  %v6770_v4 = vshll.u32 %v6737_v62, 16 }
 0x8f5   : > { %v17533_v13 = vrot.slane %v6959_v38, %v16307_v60  ;;  %v6933_v45 = vrot.slane %v6919_v35, %v16307_v60  ;;  %v6754_v30 = vrot.slane %v6753_v48, 2  ;;  %v6775_v26 = vshrl.u32 %v6744_v11, 16 }
 0x8f6   : > { %v6879_v41 = vcombine.low %v6871_v32, %v17529_v53  ;;  %v6766_v43 = vrot.slane %v6764_v59, 7  ;;  %v6778_v7 = vshll.u32 %v6744_v11, 16  ;;  %v6758_v33 = vrot.slane %v6756_v24, 7 }
 0x8f7   : > { %v6967_v20 = vcombine.low %v17529_v53, %v17533_v13  ;;  %v6934_v55 = vcombine.low %v6926_v40, %v6933_v45  ;;  %v6777_v58 = vrot.slane %v6775_v26, 6  ;;  %v6784_v51 = vshll.u32 %v17505_v39, 16  ;;  %v14238_v53 = vld [vmem:[%s18621_s6 + $0x8] sm:$0xff]   ;;  %v14239_v13 = vld [vmem:[%s18621_s6 + $0x50] sm:$0xff]  }
 0x8f8   : > { %6880 = vrot.lane.b32.xlu1 %v6879_v41, %s18638_s11  ;;  %v6767_v23 = vor.u32 %v6766_v43, %v6763_v61  ;;  %v6780_v62 = vrot.slane %v6778_v7, 7  ;;  %v6810_v16 = vshrl.u32 %v17498_v37, 16  ;;  %v6813_v49 = vshll.u32 %v17498_v37, 16 }
 0x8f9   : > { %6935 = vrot.lane.b32.xlu0 %v6934_v55, %s18639_s18  ;;  %v6827_v14 = vcombine.low %v17230_v12, %v17466_v52  ;;  %v6759_v11 = vsel %vm17371_vm0, %v6754_v30, %v6758_v33  ;;  %v6772_v18 = vrot.slane %v6770_v4, 7  ;;  %v6882_v39 = vcombine.low %v17466_v52, %v17474_v57 }
 0x8fa   : > { %v6768_v6 = vrot.slane %v6767_v23, 2  ;;  %v6781_v50 = vor.u32 %v6780_v62, %v6777_v58  ;;  %v6812_v0 = vrot.slane %v6810_v16, 6  ;;  %v6815_v36 = vrot.slane %v6813_v49, 7  ;;  %v14231_v16 = vld [vmem:[%s14718_s24 + $0x80] sm:$0xff]  }
 0x8fb   : > { %v6819_v22 = vshll.u32 %v17509_v46, 16  ;;  %v6786_v8 = vrot.slane %v6784_v51, 7  ;;  %v6883_v28 = vcombine.low %v17484_v42, %v17490_v10  ;;  %v6835_v47 = vrot.slane %v6827_v14, %v16307_v60 }
 0x8fc   : > { %v6773_v37 = vsel %vm17371_vm0, %v6768_v6, %v6772_v18  ;;  %v6782_v34 = vrot.slane %v6781_v50, 2  ;;  %v6816_v9 = vor.u32 %v6815_v36, %v6812_v0  ;;  %v6844_v52 = vcombine.low %v17383_v17, %v6759_v11  ;;  %v14234_v6 = vld [vmem:[%s18621_s6 + $0x88] sm:$0xff]   ;;  %v14235_v18 = vld [vmem:[%s18621_s6 + $0x40] sm:$0xff]   ;;  %v14241_v0 = vld [vmem:[%s18621_s6 + $0x58] sm:$0xff]  }
 0x8fd   : > { %v6901_v24 = vcombine.low %v6759_v11, %v6773_v37  ;;  %v6890_v57 = vrot.slane %v6882_v39, %v16307_v60  ;;  %v6897_v46 = vrot.slane %v6883_v28, %v16307_v60  ;;  %v6821_v44 = vrot.slane %v6819_v22, 7  ;;  %v14233_v11 = vld [vmem:[%s18621_s6 + $0x80] sm:$0xff]   ;;  %v14237_v50 = vld [vmem:[%s18621_s6 + $0x48] sm:$0xff]   ;;  %13455 = vmatprep.subr.bf16.mxu0 %v14235_v18  ;;  %v14242_v36 = vld [vmem:[%s18621_s6 + $0x18] sm:$0xff]  }
 0x8fe   : > { %v6787_v31 = vsel %vm17371_vm0, %v6782_v34, %v6786_v8  ;;  %v6817_v29 = vrot.slane %v6816_v9, 2  ;;  %v6843_v32 = vcombine.low %v6835_v47, %v17503_v56  ;;  %v14651_v42 = vmov 0.0   ;;  %v14236_v39 = vld [vmem:[%s18621_s6] sm:$0xff]  }
 0x8ff   : > { %13975 = vmatprep.subr.bf16.mxu1 %v14651_v42  ;;  %v6845_v10 = vcombine.low %v6773_v37, %v6787_v31  ;;  %v6898_v38 = vcombine.low %v6890_v57, %v6897_v46  ;;  %v6852_v63 = vrot.slane %v6844_v52, %v16307_v60  ;;  %v6909_v4 = vrot.slane %v6901_v24, %v16307_v60  ;;  %v14243_v22 = vld [vmem:[%s18621_s6 + $0x60] sm:$0xff]  }
 0x900   : > { %v6822_v35 = vsel %vm17371_vm0, %v6817_v29, %v6821_v44  ;;  %13456 = vmatpush3.bf16.msra.mxu0 %v14236_v39  ;;  %v14244_v37 = vld [vmem:[%s18621_s6 + $0x20] sm:$0xff]  }
 0x901   : > { %v6859_v40 = vrot.slane %v6845_v10, %v16307_v60  ;;  %v6948_v48 = vcombine.low %v6822_v35, %v17383_v17  ;;  %v6902_v59 = vcombine.low %v6787_v31, %v6822_v35  ;;  %13457 = vmatprep.subr.bf16.mxu0 %v14237_v50  ;;  %v13000_v52 = vld [vmem:[%s14723_s30] ss:$0 sm:$0xff] }
 0x903   : > { %v6860_v45 = vcombine.low %v6852_v63, %v6859_v40  ;;  %v6955_v61 = vrot.slane %v6948_v48, %v16307_v60  ;;  %v6916_v56 = vrot.slane %v6902_v59, %v16307_v60 }
 0x904   : > { %13458 = vmatpush3.bf16.msra.mxu0 %v14238_v53 }
 0x905   : > { %6861 = vrot.lane.b32.xlu1 %v6860_v45, %s18639_s18  ;;  %v6956_v41 = vcombine.low %v6859_v40, %v6955_v61  ;;  %v6917_v30 = vcombine.low %v6909_v4, %v6916_v56  ;;  %13459 = vmatprep.subr.bf16.mxu0 %v14239_v13 }
 0x907   : > { %6957 = vrot.lane.b32.xlu0 %v6956_v41, %s14648_s9 }
 0x909   : > { %6899 = vrot.lane.b32.xlu1 %v6898_v38, %s14648_s9 }
 0x964   : > { %v6947_v43 = vpop.permute.xlu0 %6946 }
 0x96a   : > { %v6881_v26 = vpop.permute.xlu1 %6880 }
 0x96b   : > { %v6936_v55 = vpop.permute.xlu0 %6935 }
 0x96c   : > { %v6978_v7 = vsel %vm18727_vm13, %v6917_v30, %v6936_v55  ;;  %vm18735_vm13 = vmmov %vm18730_vm1 }
 0x96d   : > { %v6980_v51 = vsel %vm18729_vm12, %v6978_v7, %v6947_v43  ;;  %vm18742_vm12 = vmmov %vm18730_vm1 }
 0x977   : > { %v6862_v33 = vpop.permute.xlu1 %6861 }
 0x978   : > { %v6970_v23 = vsel %vm18728_vm14, %v6843_v32, %v6862_v33  ;;  %vm18736_vm14 = vmmov %vm18730_vm1 }
 0x979   : > { %v6958_v58 = vpop.permute.xlu0 %6957  ;;  %v6972_v49 = vsel %vm18730_vm1, %v6970_v23, %v6881_v26 }
 0x97a   : > { %v6982_v62 = vsel %vm5713_vm9, %v6980_v51, %v6958_v58  ;;  %v14245_v58 = vld [vmem:[%s18621_s6 + $0x68] sm:$0xff]  }
 0x97b   : > { %7133 = vmatprep.mubr.bf16.mxu1 %v6982_v62  ;;  %v6900_v14 = vpop.permute.xlu1 %6899  ;;  %v14246_v51 = vld [vmem:[%s18621_s6 + $0x28] sm:$0xff]  }
 0x97c   : > { %v6974_v15 = vsel %vm5713_vm9, %v6972_v49, %v6900_v14 }
 0x97d   : > { %7134 = vmatmul.mubr.bf16.vlgmr.msra.gmra.mrb[48].mxu1 %v6974_v15 }
 0x97e   : > { %13976 = vmatpush3.bf16.msra.mxu1 %v14231_v16  ;;  %13979 = vmatprep.mubr.msk.bf16.mxu1 %vm14652_vm3, %v14651_v42 }
 0x97f   : > { %13977 = vmatprep.subr.bf16.mxu1 %v14651_v42 }
 0x982   : > { %13978 = vmatpush3.bf16.msra.mxu1 %v14232_v54 }
 0x983   : > { %13983 = vmatprep.subr.bf16.mxu1 %v14651_v42 }
 0x985   : > { %13980 = vmatmul.mubr.msk.bf16.vlgmr.msra.gmra.mrb[52].mxu1 %vm18731_vm7, %v6967_v20  ;;  %v14240_v20 = vld [vmem:[%s18621_s6 + $0x10] sm:$0xff]   ;;  %vm8297_vm7 = vcmask 257024  }
 0x986   : > { %13987 = vmatprep.mubr.msk.bf16.mxu1 %vm14652_vm3, %v14651_v42  ;;  %13984 = vmatpush3.bf16.msra.mxu1 %v14233_v11 }
 0x987   : > { %13985 = vmatprep.subr.bf16.mxu1 %v14651_v42  ;;  %13460 = vmatpush3.bf16.msra.mxu0 %v14240_v20 }
 0x988   : > { %13461 = vmatprep.subr.bf16.mxu0 %v14241_v0 }
 0x98a   : > { %13986 = vmatpush3.bf16.msra.mxu1 %v14234_v6 }
 0x98b   : > { %13462 = vmatpush3.bf16.msra.mxu0 %v14242_v36 }
 0x98c   : > { %13463 = vmatprep.subr.bf16.mxu0 %v14243_v22 }
 0x98f   : > { %13464 = vmatpush3.bf16.msra.mxu0 %v14244_v37  ;;  %v14247_v37 = vld [vmem:[%s18621_s6 + $0x70] sm:$0xff]  }
 0x990   : > { %13465 = vmatprep.subr.bf16.mxu0 %v14245_v58 }
 0x993   : > { %13466 = vmatpush3.bf16.msra.mxu0 %v14246_v51 }
 0x994   : > { %13467 = vmatprep.subr.bf16.mxu0 %v14247_v37 }
 0xa50   : > { %v13446_v8 = vpop.f32.mrb[48].mxu1 }
 0xa51   : > { %v13447_v28 = vpop.f32.mrb[49].mxu1 }
 0xa52   : > { %v13448_v34 = vadd.f32 %v13447_v28, %v13446_v8  ;;  %v13449_v9 = vpop.f32.mrb[50].mxu1 }
 0xa53   : > { %v13450_v24 = vpop.f32.mrb[51].mxu1 }
 0xa54   : > { %v13451_v47 = vadd.f32 %v13450_v24, %v13449_v9  ;;  %v7136_v57 = vadd.f32 %v13448_v34, %v13000_v52 }
 0xa56   : > { %v7139_v44 = vadd.f32 %v13451_v47, %v13000_v52 }
 0xa58   : > { %v7176_v46 = vpop.f32.mrb[52].mxu1 }
 0xa59   : > { %v7177_v31 = vadd.f32 %v7176_v46, %v7136_v57  ;;  %v13981_v29 = vpop.f32.mrb[53].mxu1  ;;  %v14248_v46 = vld [vmem:[%s18621_s6 + $0x30] sm:$0xff]  }
 0xa5a   : > { %v7179_v32 = vpop.f32.mrb[54].mxu1  ;;  %13468 = vmatpush3.bf16.msra.mxu0 %v14248_v46 }
 0xa5b   : > { %v7183_v10 = vmax.f32 %v7177_v31, 0.0  ;;  %v7180_v38 = vadd.f32 %v7179_v32, %v7139_v44  ;;  %v13982_v35 = vpop.f32.mrb[55].mxu1 }
 0xa5d   : > { %v7187_v63 = vcombine.high %v7183_v10, %v7183_v10  ;;  %v7228_v40 = vpack.c.bf16 %v7183_v10, %v7183_v10  ;;  %v7184_v48 = vmax.f32 %v7180_v38, 0.0 }
 0xa5f   : > { %v7229_v59 = vpack.c.bf16 %v7187_v63, %v7187_v63  ;;  %v7233_v45 = vshrl.u32 %v7228_v40, 16  ;;  %v7188_v61 = vcombine.high %v7184_v48, %v7184_v48  ;;  %v7230_v56 = vpack.c.bf16 %v7184_v48, %v7184_v48 }
 0xa60   : > { %v7236_v41 = vshll.u32 %v7228_v40, 16 }
 0xa61   : > { %v7235_v4 = vrot.slane %v7233_v45, 7  ;;  %v7240_v30 = vshrl.u32 %v7229_v59, 16  ;;  %v7231_v43 = vpack.c.bf16 %v7188_v61, %v7188_v61  ;;  %v7247_v26 = vshrl.u32 %v7230_v56, 16 }
 0xa62   : > { %v7243_v33 = vshll.u32 %v7229_v59, 16  ;;  %v7250_v16 = vshll.u32 %v7230_v56, 16 }
 0xa63   : > { %v7238_v55 = vor.u32 %v7236_v41, %v7235_v4  ;;  %v7242_v7 = vrot.slane %v7240_v30, 7  ;;  %v7254_v23 = vshrl.u32 %v7231_v43, 16  ;;  %v7249_v62 = vrot.slane %v7247_v26, 7 }
 0xa64   : > { %v7257_v54 = vshll.u32 %v7231_v43, 16 }
 0xa65   : > { %v7245_v49 = vor.u32 %v7243_v33, %v7242_v7  ;;  %v7264_v14 = vsel %vm14881_vm2, 0, %v7238_v55  ;;  %v7256_v15 = vrot.slane %v7254_v23, 7  ;;  %v7252_v6 = vor.u32 %v7250_v16, %v7249_v62 }
 0xa66   : > { %v17614_v11 = vsel %vm17221_vm6, %v7264_v14, 0 }
 0xa67   : > { %v7265_v18 = vsel %vm14881_vm2, 0, %v7245_v49  ;;  %v7281_v39 = vrot.slane %v17614_v11, %v16307_v60  ;;  %v7259_v50 = vor.u32 %v7257_v54, %v7256_v15  ;;  %v7266_v13 = vsel %vm14881_vm2, 0, %v7252_v6 }
 0xa68   : > { %v17622_v53 = vsel %vm17221_vm6, %v7265_v18, 0  ;;  %v17632_v36 = vsel %vm17221_vm6, %v7266_v13, 0 }
 0xa69   : > { %v7289_v20 = vrot.slane %v17622_v53, %v16307_v60  ;;  %v7267_v0 = vsel %vm14881_vm2, 0, %v7259_v50  ;;  %v7282_v22 = vcombine.high %v7281_v39, %v7281_v39  ;;  %v7297_v28 = vrot.slane %v17632_v36, %v16307_v60 }
 0xa6a   : > { %v17637_v8 = vsel %vm17221_vm6, %v7267_v0, 0  ;;  %v7381_v34 = vcombine.low %v17622_v53, %v17632_v36  ;;  %v13020_v9 = vrot.slane %v7281_v39, 9  ;;  %v7300_v59 = vshrl.u32 %v7281_v39, 16 }
 0xa6b   : > { %v17645_v24 = vrot.slane %v17637_v8, %v16307_v60  ;;  %v7490_v47 = vcombine.low %v17637_v8, %v17230_v12  ;;  %v7290_v52 = vcombine.high %v7289_v20, %v7289_v20  ;;  %v7343_v57 = vrot.slane %v7282_v22, 7 }
 0xa6c   : > { %v17651_v31 = vrot.slane %v7381_v34, %v16307_v60  ;;  %v17653_v29 = vcombine.high %v7297_v28, %v7297_v28  ;;  %v13021_v44 = vrot.slane %v7289_v20, 9  ;;  %v13022_v35 = vrot.slane %v7297_v28, 9 }
 0xa6d   : > { %v17657_v32 = vcombine.high %v17645_v24, %v17645_v24  ;;  %v7497_v10 = vrot.slane %v7490_v47, %v16307_v60  ;;  %v7344_v38 = vsel %vm17292_vm8, %v13020_v9, %v7343_v57  ;;  %v7347_v63 = vrot.slane %v7290_v52, 7 }
 0xa6e   : > { %v7351_v40 = vrot.slane %v17653_v29, 7  ;;  %v7416_v48 = vcombine.low %v17320_v25, %v7344_v38  ;;  %v13023_v45 = vrot.slane %v17645_v24, 9  ;;  %v7303_v4 = vshll.u32 %v7281_v39, 16 }
 0xa6f   : > { %v7498_v61 = vcombine.low %v17651_v31, %v7497_v10  ;;  %v7378_v56 = vrot.slane %v17657_v32, 7  ;;  %v7348_v41 = vsel %vm17292_vm8, %v13021_v44, %v7347_v63  ;;  %v7302_v43 = vrot.slane %v7300_v59, 6  ;;  %v14250_v59 = vld [vmem:[%s18621_s6 + $0x38] sm:$0xff]  }
 0xa70   : > { %v7352_v30 = vsel %vm17292_vm8, %v13022_v35, %v7351_v40  ;;  %v7309_v26 = vshll.u32 %v7282_v22, 16  ;;  %v7471_v33 = vcombine.low %v7344_v38, %v7348_v41  ;;  %v7305_v23 = vrot.slane %v7303_v4, 7  ;;  %v14249_v35 = vld [vmem:[%s18621_s6 + $0x78] sm:$0xff]  }
 0xa71   : > { %7499 = vrot.lane.b32.xlu0 %v7498_v61, %s18638_s11  ;;  %v7379_v55 = vsel %vm17292_vm8, %v13023_v45, %v7378_v56  ;;  %v7417_v7 = vcombine.low %v7348_v41, %v7352_v30  ;;  %v7424_v58 = vrot.slane %v7416_v48, %v16307_v60  ;;  %v7314_v16 = vshrl.u32 %v7289_v20, 16  ;;  %13469 = vmatprep.subr.bf16.mxu0 %v14249_v35 }
 0xa72   : > { %v7512_v51 = vcombine.low %v7379_v55, %v17320_v25  ;;  %v7472_v62 = vcombine.low %v7352_v30, %v7379_v55  ;;  %v7479_v14 = vrot.slane %v7471_v33, %v16307_v60  ;;  %v7306_v15 = vor.u32 %v7305_v23, %v7302_v43  ;;  %13470 = vmatpush3.bf16.msra.mxu0 %v14250_v59  ;;  %v14255_v59 = vld [vmem:[%s18733_s5 + $0x48] sm:$0xff]  }
 0xa73   : > { %v7431_v49 = vrot.slane %v7417_v7, %v16307_v60  ;;  %v7317_v54 = vshll.u32 %v7289_v20, 16  ;;  %v7316_v39 = vrot.slane %v7314_v16, 6  ;;  %v7323_v50 = vshll.u32 %v7290_v52, 16  ;;  %13991 = vmatprep.subr.bf16.mxu0 %v14651_v42 }
 0xa74   : > { %v7519_v6 = vrot.slane %v7512_v51, %v16307_v60  ;;  %v7486_v18 = vrot.slane %v7472_v62, %v16307_v60  ;;  %v7307_v0 = vrot.slane %v7306_v15, 2  ;;  %v7328_v37 = vshrl.u32 %v7297_v28, 16 }
 0xa75   : > { %v7432_v13 = vcombine.low %v7424_v58, %v7431_v49  ;;  %v7319_v22 = vrot.slane %v7317_v54, 7  ;;  %v7331_v47 = vshll.u32 %v7297_v28, 16  ;;  %v7311_v57 = vrot.slane %v7309_v26, 7 }
 0xa76   : > { %v7520_v34 = vcombine.low %v7431_v49, %v7519_v6  ;;  %v7487_v9 = vcombine.low %v7479_v14, %v7486_v18  ;;  %v7330_v20 = vrot.slane %v7328_v37, 6  ;;  %v7337_v44 = vshll.u32 %v17653_v29, 16 }
 0xa77   : > { %7433 = vrot.lane.b32.xlu1 %v7432_v13, %s18638_s11  ;;  %v7320_v46 = vor.u32 %v7319_v22, %v7316_v39  ;;  %v7333_v52 = vrot.slane %v7331_v47, 7  ;;  %v7363_v10 = vshrl.u32 %v17645_v24, 16  ;;  %v7366_v38 = vshll.u32 %v17645_v24, 16 }
 0xa78   : > { %7488 = vrot.lane.b32.xlu0 %v7487_v9, %s18639_s18  ;;  %13988 = vmatmul.mubr.msk.bf16.vlgmr.msra.gmra.mrb[56].mxu1 %vm18724_vm4, %v7520_v34  ;;  %v7380_v28 = vcombine.low %v17230_v12, %v17614_v11  ;;  %v7312_v63 = vsel %vm17371_vm0, %v7307_v0, %v7311_v57  ;;  %v7325_v48 = vrot.slane %v7323_v50, 7  ;;  %v7435_v29 = vcombine.low %v17614_v11, %v17622_v53 }
 0xa79   : > { %v7321_v40 = vrot.slane %v7320_v46, 2  ;;  %v7334_v45 = vor.u32 %v7333_v52, %v7330_v20  ;;  %v7365_v61 = vrot.slane %v7363_v10, 6  ;;  %v7368_v56 = vrot.slane %v7366_v38, 7 }
 0xa7a   : > { %v7372_v4 = vshll.u32 %v17657_v32, 16  ;;  %v7339_v41 = vrot.slane %v7337_v44, 7  ;;  %v7436_v30 = vcombine.low %v17632_v36, %v17637_v8  ;;  %v7388_v11 = vrot.slane %v7380_v28, %v16307_v60 }
 0xa7b   : > { %v7326_v24 = vsel %vm17371_vm0, %v7321_v40, %v7325_v48  ;;  %v7335_v43 = vrot.slane %v7334_v45, 2  ;;  %v7369_v26 = vor.u32 %v7368_v56, %v7365_v61  ;;  %v7397_v53 = vcombine.low %v17383_v17, %v7312_v63  ;;  %v14252_v40 = vld [vmem:[%s18733_s5 + $0x88] sm:$0xff]   ;;  %v14253_v48 = vld [vmem:[%s18733_s5 + $0x40] sm:$0xff]   ;;  %v14257_v61 = vld [vmem:[%s18733_s5 + $0x50] sm:$0xff]  }
 0xa7c   : > { %v7454_v55 = vcombine.low %v7312_v63, %v7326_v24  ;;  %v7443_v32 = vrot.slane %v7435_v29, %v16307_v60  ;;  %v7450_v7 = vrot.slane %v7436_v30, %v16307_v60  ;;  %v7374_v58 = vrot.slane %v7372_v4, 7  ;;  %v14251_v63 = vld [vmem:[%s18733_s5 + $0x80] sm:$0xff]   ;;  %13480 = vmatprep.subr.bf16.mxu1 %v14253_v48  ;;  %v14256_v45 = vld [vmem:[%s18733_s5 + $0x8] sm:$0xff]   ;;  %v14258_v56 = vld [vmem:[%s18733_s5 + $0x10] sm:$0xff]  }
 0xa7d   : > { %v7340_v33 = vsel %vm17371_vm0, %v7335_v43, %v7339_v41  ;;  %v7370_v23 = vrot.slane %v7369_v26, 2  ;;  %v7396_v36 = vcombine.low %v7388_v11, %v17651_v31  ;;  %v7405_v16 = vrot.slane %v7397_v53, %v16307_v60  ;;  %v14254_v29 = vld [vmem:[%s18733_s5] sm:$0xff]   ;;  %v14259_v4 = vld [vmem:[%s18733_s5 + $0x58] sm:$0xff]  }
 0xa7e   : > { %v7398_v8 = vcombine.low %v7326_v24, %v7340_v33  ;;  %v7451_v51 = vcombine.low %v7443_v32, %v7450_v7  ;;  %v7462_v39 = vrot.slane %v7454_v55, %v16307_v60  ;;  %13481 = vmatpush3.bf16.msra.mxu1 %v14254_v29  ;;  %v14260_v24 = vld [vmem:[%s18733_s5 + $0x18] sm:$0xff]   ;;  %v14261_v41 = vld [vmem:[%s18733_s5 + $0x60] sm:$0xff]  }
 0xa7f   : > { %v7375_v62 = vsel %vm17371_vm0, %v7370_v23, %v7374_v58  ;;  %13482 = vmatprep.subr.bf16.mxu1 %v14255_v59  ;;  %v14262_v30 = vld [vmem:[%s18733_s5 + $0x20] sm:$0xff]  }
 0xa80   : > { %v7412_v49 = vrot.slane %v7398_v8, %v16307_v60  ;;  %v7501_v14 = vcombine.low %v7375_v62, %v17383_v17  ;;  %v7455_v15 = vcombine.low %v7340_v33, %v7375_v62  ;;  %v13024_v26 = vld [vmem:[%s18737_s23] ss:$0 sm:$0xff]  ;;  %s18766_s23 = sld [smem:[#allocation20_spill]] }
 0xa82   : > { %v7413_v54 = vcombine.low %v7405_v16, %v7412_v49  ;;  %v7508_v6 = vrot.slane %v7501_v14, %v16307_v60  ;;  %v7469_v18 = vrot.slane %v7455_v15, %v16307_v60  ;;  %13483 = vmatpush3.bf16.msra.mxu1 %v14256_v45 }
 0xa83   : > { %13484 = vmatprep.subr.bf16.mxu1 %v14257_v61 }
 0xa84   : > { %7414 = vrot.lane.b32.xlu1 %v7413_v54, %s18639_s18  ;;  %v7509_v31 = vcombine.low %v7412_v49, %v7508_v6  ;;  %v7470_v50 = vcombine.low %v7462_v39, %v7469_v18 }
 0xa86   : > { %7510 = vrot.lane.b32.xlu0 %v7509_v31, %s14648_s9  ;;  %13485 = vmatpush3.bf16.msra.mxu1 %v14258_v56  ;;  %v14265_v56 = vld [vmem:[%s18733_s5 + $0x70] sm:$0xff]  }
 0xa87   : > { %13486 = vmatprep.subr.bf16.mxu1 %v14259_v4 }
 0xa88   : > { %7452 = vrot.lane.b32.xlu1 %v7451_v51, %s14648_s9 }
 0xa8a   : > { %13487 = vmatpush3.bf16.msra.mxu1 %v14260_v24 }
 0xa8b   : > { %13488 = vmatprep.subr.bf16.mxu1 %v14261_v41 }
 0xa8e   : > { %13489 = vmatpush3.bf16.msra.mxu1 %v14262_v30 }
 0xae3   : > { %v7500_v13 = vpop.permute.xlu0 %7499 }
 0xae9   : > { %v7434_v0 = vpop.permute.xlu1 %7433 }
 0xaea   : > { %v7489_v22 = vpop.permute.xlu0 %7488 }
 0xaeb   : > { %v7531_v37 = vsel %vm18732_vm11, %v7470_v50, %v7489_v22  ;;  %vm8426_vm11 = vcmask 1041408  }
 0xaec   : > { %v7533_v57 = vsel %vm18735_vm13, %v7531_v37, %v7500_v13  ;;  %vm17875_vm13 = vmand %vm8426_vm11, %vm6255_vm10 }
 0xaf6   : > { %v7415_v34 = vpop.permute.xlu1 %7414 }
 0xaf7   : > { %v7523_v9 = vsel %vm18734_vm5, %v7396_v36, %v7415_v34  ;;  %v14263_v34 = vld [vmem:[%s18733_s5 + $0x68] sm:$0xff]   ;;  %vm8477_vm5 = vsmask.f32 1284 }
 0xaf8   : > { %v7511_v47 = vpop.permute.xlu0 %7510  ;;  %v7525_v20 = vsel %vm18736_vm14, %v7523_v9, %v7434_v0  ;;  %v14264_v9 = vld [vmem:[%s18733_s5 + $0x28] sm:$0xff]   ;;  %13490 = vmatprep.subr.bf16.mxu1 %v14263_v34  ;;  %vm18746_vm14 = vsmask.f32 256 }
 0xaf9   : > { %v7535_v46 = vsel %vm5713_vm9, %v7533_v57, %v7511_v47  ;;  %13491 = vmatpush3.bf16.msra.mxu1 %v14264_v9 }
 0xafa   : > { %7686 = vmatprep.mubr.bf16.mxu0 %v7535_v46  ;;  %v7453_v44 = vpop.permute.xlu1 %7452  ;;  %13492 = vmatprep.subr.bf16.mxu1 %v14265_v56 }
 0xafb   : > { %v7527_v52 = vsel %vm5713_vm9, %v7525_v20, %v7453_v44 }
 0xafc   : > { %7687 = vmatmul.mubr.bf16.vlgmr.msra.gmra.mrb[44].mxu0 %v7527_v52 }
 0xafd   : > { %13995 = vmatprep.mubr.msk.bf16.mxu0 %vm14652_vm3, %v14651_v42  ;;  %13992 = vmatpush3.bf16.msra.mxu0 %v14251_v63 }
 0xafe   : > { %13993 = vmatprep.subr.bf16.mxu0 %v14651_v42  ;;  %13493 = vmatpush3.bf16.msra.mxu1 %v14266_v1 }
 0xb01   : > { %13994 = vmatpush3.bf16.msra.mxu0 %v14252_v40 }
 0xb4b   : > { %v7729_v10 = vpop.f32.mrb[56].mxu1 }
 0xb4c   : > { %v13989_v38 = vpop.f32.mrb[57].mxu1 }
 0xb4d   : > { %v7732_v28 = vpop.f32.mrb[58].mxu1 }
 0xb4e   : > { %v13990_v35 = vpop.f32.mrb[59].mxu1 }
 0xbcf   : > { %v13471_v43 = vpop.f32.mrb[44].mxu0 }
 0xbd0   : > { %v13472_v55 = vpop.f32.mrb[45].mxu0 }
 0xbd1   : > { %v13473_v11 = vadd.f32 %v13472_v55, %v13471_v43  ;;  %v13474_v53 = vpop.f32.mrb[46].mxu0 }
 0xbd2   : > { %v13475_v32 = vpop.f32.mrb[47].mxu0 }
 0xbd3   : > { %v7689_v7 = vadd.f32 %v13473_v11, %v13024_v26  ;;  %v13476_v33 = vadd.f32 %v13475_v32, %v13474_v53 }
 0xbd5   : > { %v7730_v23 = vadd.f32 %v7729_v10, %v7689_v7  ;;  %v7692_v58 = vadd.f32 %v13476_v33, %v13024_v26 }
 0xbd7   : > { %v7736_v36 = vmax.f32 %v7730_v23, 0.0  ;;  %v7733_v8 = vadd.f32 %v7732_v28, %v7692_v58 }
 0xbd9   : > { %v7740_v51 = vcombine.high %v7736_v36, %v7736_v36  ;;  %v7781_v62 = vpack.c.bf16 %v7736_v36, %v7736_v36  ;;  %v7737_v16 = vmax.f32 %v7733_v8, 0.0 }
 0xbdb   : > { %v7782_v49 = vpack.c.bf16 %v7740_v51, %v7740_v51  ;;  %v7786_v14 = vshrl.u32 %v7781_v62, 16  ;;  %v7741_v15 = vcombine.high %v7737_v16, %v7737_v16  ;;  %v7783_v54 = vpack.c.bf16 %v7737_v16, %v7737_v16 }
 0xbdc   : > { %v7789_v18 = vshll.u32 %v7781_v62, 16 }
 0xbdd   : > { %v7788_v6 = vrot.slane %v7786_v14, 7  ;;  %v7793_v39 = vshrl.u32 %v7782_v49, 16  ;;  %v7784_v31 = vpack.c.bf16 %v7741_v15, %v7741_v15  ;;  %v7800_v50 = vshrl.u32 %v7783_v54, 16 }
 0xbde   : > { %v7796_v22 = vshll.u32 %v7782_v49, 16  ;;  %v7803_v57 = vshll.u32 %v7783_v54, 16 }
 0xbdf   : > { %v7791_v13 = vor.u32 %v7789_v18, %v7788_v6  ;;  %v7795_v0 = vrot.slane %v7793_v39, 7  ;;  %v7807_v37 = vshrl.u32 %v7784_v31, 16  ;;  %v7802_v47 = vrot.slane %v7800_v50, 7 }
 0xbe0   : > { %v7810_v52 = vshll.u32 %v7784_v31, 16 }
 0xbe1   : > { %v7798_v46 = vor.u32 %v7796_v22, %v7795_v0  ;;  %v7817_v20 = vsel %vm14881_vm2, 0, %v7791_v13  ;;  %v7809_v44 = vrot.slane %v7807_v37, 7  ;;  %v7805_v38 = vor.u32 %v7803_v57, %v7802_v47 }
 0xbe2   : > { %v17746_v10 = vsel %vm17221_vm6, %v7817_v20, 0 }
 0xbe3   : > { %v7818_v28 = vsel %vm14881_vm2, 0, %v7798_v46  ;;  %v7834_v35 = vrot.slane %v17746_v10, %v16307_v60  ;;  %v7812_v63 = vor.u32 %v7810_v52, %v7809_v44  ;;  %v7819_v40 = vsel %vm14881_vm2, 0, %v7805_v38 }
 0xbe4   : > { %v17756_v48 = vsel %vm17221_vm6, %v7818_v28, 0  ;;  %v17762_v59 = vsel %vm17221_vm6, %v7819_v40, 0 }
 0xbe5   : > { %v7820_v29 = vsel %vm14881_vm2, 0, %v7812_v63  ;;  %v7842_v45 = vrot.slane %v17756_v48, %v16307_v60  ;;  %v7835_v61 = vcombine.high %v7834_v35, %v7834_v35  ;;  %v7850_v24 = vrot.slane %v17762_v59, %v16307_v60 }
 0xbe6   : > { %v17769_v4 = vsel %vm17221_vm6, %v7820_v29, 0  ;;  %v7934_v41 = vcombine.low %v17756_v48, %v17762_v59  ;;  %v13044_v30 = vrot.slane %v7834_v35, 9  ;;  %v7853_v49 = vshrl.u32 %v7834_v35, 16  ;;  %vm18738_vm6 = vmmov %vm18724_vm4 }
 0xbe7   : > { %v17777_v43 = vrot.slane %v17769_v4, %v16307_v60  ;;  %v8043_v26 = vcombine.low %v17769_v4, %v17230_v12  ;;  %v7843_v55 = vcombine.high %v7842_v45, %v7842_v45  ;;  %v7896_v11 = vrot.slane %v7835_v61, 7 }
 0xbe8   : > { %v17783_v53 = vrot.slane %v7934_v41, %v16307_v60  ;;  %v17785_v32 = vcombine.high %v7850_v24, %v7850_v24  ;;  %v13045_v7 = vrot.slane %v7842_v45, 9  ;;  %v13046_v33 = vrot.slane %v7850_v24, 9 }
 0xbe9   : > { %v8050_v23 = vrot.slane %v8043_v26, %v16307_v60  ;;  %v7897_v58 = vsel %vm17292_vm8, %v13044_v30, %v7896_v11  ;;  %v7900_v36 = vrot.slane %v7843_v55, 7  ;;  %v17792_v8 = vcombine.high %v17777_v43, %v17777_v43 }
 0xbea   : > { %v7904_v51 = vrot.slane %v17785_v32, 7  ;;  %v13047_v62 = vrot.slane %v17777_v43, 9  ;;  %v7969_v16 = vcombine.low %v17320_v25, %v7897_v58  ;;  %v7856_v6 = vshll.u32 %v7834_v35, 16 }
 0xbeb   : > { %v8051_v14 = vcombine.low %v17783_v53, %v8050_v23  ;;  %v7901_v15 = vsel %vm17292_vm8, %v13045_v7, %v7900_v36  ;;  %v7931_v54 = vrot.slane %v17792_v8, 7  ;;  %v7855_v31 = vrot.slane %v7853_v49, 6  ;;  %v14267_v7 = vld [vmem:[%s18733_s5 + $0x78] sm:$0xff]  }
 0xbec   : > { %v7905_v18 = vsel %vm17292_vm8, %v13046_v33, %v7904_v51  ;;  %v8024_v39 = vcombine.low %v7897_v58, %v7901_v15  ;;  %v7977_v0 = vrot.slane %v7969_v16, %v16307_v60  ;;  %v7858_v22 = vrot.slane %v7856_v6, 7  ;;  %v14268_v36 = vld [vmem:[%s18733_s5 + $0x38] sm:$0xff]   ;;  %13494 = vmatprep.subr.bf16.mxu1 %v14267_v7  ;;  %v14274_v7 = vld [vmem:[%s18740_s2 + $0x8] sm:$0xff]  }
 0xbed   : > { %8052 = vrot.lane.b32.xlu0 %v8051_v14, %s18638_s11  ;;  %v7932_v50 = vsel %vm17292_vm8, %v13047_v62, %v7931_v54  ;;  %v7970_v13 = vcombine.low %v7901_v15, %v7905_v18  ;;  %v7862_v9 = vshll.u32 %v7835_v61, 16  ;;  %v7867_v47 = vshrl.u32 %v7842_v45, 16  ;;  %13495 = vmatpush3.bf16.msra.mxu1 %v14268_v36  ;;  %vm18739_vm8 = vmmov %vm18724_vm4  ;;  %v14279_v36 = vld [vmem:[%s18740_s2 + $0x60] sm:$0xff]  }
 0xbee   : > { %v8065_v37 = vcombine.low %v7932_v50, %v17320_v25  ;;  %v8025_v34 = vcombine.low %v7905_v18, %v7932_v50  ;;  %v8032_v46 = vrot.slane %v8024_v39, %v16307_v60  ;;  %v7859_v20 = vor.u32 %v7858_v22, %v7855_v31  ;;  %13999 = vmatprep.subr.bf16.mxu1 %v14651_v42 }
 0xbef   : > { %v7984_v57 = vrot.slane %v7970_v13, %v16307_v60  ;;  %v7870_v44 = vshll.u32 %v7842_v45, 16  ;;  %v7869_v38 = vrot.slane %v7867_v47, 6  ;;  %v7876_v28 = vshll.u32 %v7843_v55, 16 }
 0xbf0   : > { %v8072_v52 = vrot.slane %v8065_v37, %v16307_v60  ;;  %v8039_v21 = vrot.slane %v8025_v34, %v16307_v60  ;;  %v7860_v63 = vrot.slane %v7859_v20, 2  ;;  %v7881_v25 = vshrl.u32 %v7850_v24, 16 }
 0xbf1   : > { %v7985_v35 = vcombine.low %v7977_v0, %v7984_v57  ;;  %v7872_v40 = vrot.slane %v7870_v44, 7  ;;  %v7884_v56 = vshll.u32 %v7850_v24, 16  ;;  %v7864_v41 = vrot.slane %v7862_v9, 7 }
 0xbf2   : > { %v8073_v29 = vcombine.low %v7984_v57, %v8072_v52  ;;  %v8040_v61 = vcombine.low %v8032_v46, %v8039_v21  ;;  %v7883_v45 = vrot.slane %v7881_v25, 6  ;;  %v7890_v26 = vshll.u32 %v17785_v32, 16 }
 0xbf3   : > { %7986 = vrot.lane.b32.xlu1 %v7985_v35, %s18638_s11  ;;  %v7873_v30 = vor.u32 %v7872_v40, %v7869_v38  ;;  %v7886_v55 = vrot.slane %v7884_v56, 7  ;;  %v7916_v11 = vshrl.u32 %v17777_v43, 16  ;;  %v7919_v1 = vshll.u32 %v17777_v43, 16 }
 0xbf4   : > { %8041 = vrot.lane.b32.xlu0 %v8040_v61, %s18639_s18  ;;  %13996 = vmatmul.mubr.msk.bf16.vlgmr.msra.gmra.mrb[48].mxu0 %vm18738_vm6, %v8073_v29  ;;  %v7933_v24 = vcombine.low %v17230_v12, %v17746_v10  ;;  %v7865_v33 = vsel %vm17371_vm0, %v7860_v63, %v7864_v41  ;;  %v7878_v58 = vrot.slane %v7876_v28, 7  ;;  %v7988_v32 = vcombine.low %v17746_v10, %v17756_v48  ;;  %vm8478_vm6 = vmor %vm18746_vm14, %vm8477_vm5 }
 0xbf5   : > { %v7874_v23 = vrot.slane %v7873_v30, 2  ;;  %v7887_v51 = vor.u32 %v7886_v55, %v7883_v45  ;;  %v7918_v62 = vrot.slane %v7916_v11, 6  ;;  %v7921_v16 = vrot.slane %v7919_v1, 7  ;;  %v14270_v55 = vld [vmem:[%s18740_s2 + $0x88] sm:$0xff]   ;;  %v14271_v11 = vld [vmem:[%s18740_s2 + $0x40] sm:$0xff]  }
 0xbf6   : > { %v7925_v49 = vshll.u32 %v17792_v8, 16  ;;  %v7892_v12 = vrot.slane %v7890_v26, 7  ;;  %v7989_v14 = vcombine.low %v17762_v59, %v17769_v4  ;;  %v7941_v10 = vrot.slane %v7933_v24, %v16307_v60  ;;  %v14269_v26 = vld [vmem:[%s18740_s2 + $0x80] sm:$0xff]   ;;  %v14273_v24 = vld [vmem:[%s18740_s2 + $0x48] sm:$0xff]   ;;  %13505 = vmatprep.subr.bf16.mxu0 %v14271_v11 }
 0xbf7   : > { %v7879_v43 = vsel %vm17371_vm0, %v7874_v23, %v7878_v58  ;;  %v7888_v15 = vrot.slane %v7887_v51, 2  ;;  %v7922_v54 = vor.u32 %v7921_v16, %v7918_v62  ;;  %v7950_v48 = vcombine.low %v17383_v17, %v7865_v33  ;;  %v14272_v1 = vld [vmem:[%s18740_s2] sm:$0xff]   ;;  %v14276_v23 = vld [vmem:[%s18740_s2 + $0x10] sm:$0xff]   ;;  %v14277_v58 = vld [vmem:[%s18740_s2 + $0x58] sm:$0xff]  }
 0xbf8   : > { %v8007_v6 = vcombine.low %v7865_v33, %v7879_v43  ;;  %v7996_v8 = vrot.slane %v7988_v32, %v16307_v60  ;;  %v8003_v18 = vrot.slane %v7989_v14, %v16307_v60  ;;  %v7927_v50 = vrot.slane %v7925_v49, 7  ;;  %13506 = vmatpush3.bf16.msra.mxu0 %v14272_v1  ;;  %v14275_v33 = vld [vmem:[%s18740_s2 + $0x50] sm:$0xff]   ;;  %v14278_v32 = vld [vmem:[%s18740_s2 + $0x18] sm:$0xff]   ;;  %v14280_v51 = vld [vmem:[%s18740_s2 + $0x20] sm:$0xff]  }
 0xbf9   : > { %v7893_v39 = vsel %vm17371_vm0, %v7888_v15, %v7892_v12  ;;  %v7923_v31 = vrot.slane %v7922_v54, 2  ;;  %v7949_v59 = vcombine.low %v7941_v10, %v17783_v53  ;;  %v7958_v22 = vrot.slane %v7950_v48, %v16307_v60  ;;  %13507 = vmatprep.subr.bf16.mxu0 %v14273_v24  ;;  %v13048_v16 = vld [vmem:[%s18743_s16] ss:$0 sm:$0xff]  ;;  %s18769_s16 = sld [smem:[#allocation19_spill]] }
 0xbfa   : > { %v7951_v4 = vcombine.low %v7879_v43, %v7893_v39  ;;  %v8004_v13 = vcombine.low %v7996_v8, %v8003_v18  ;;  %v8015_v20 = vrot.slane %v8007_v6, %v16307_v60  ;;  %vm8487_vm5 = vsmask.f32 6424 }
 0xbfb   : > { %v7928_v0 = vsel %vm17371_vm0, %v7923_v31, %v7927_v50  ;;  %vm18741_vm0 = vmmov %vm18724_vm4  ;;  %vm8326_vm4 = vcmask 254976   ;;  %vm8489_vm14 = vsmask.f32 7452 }
 0xbfc   : > { %v7965_v37 = vrot.slane %v7951_v4, %v16307_v60  ;;  %v8054_v34 = vcombine.low %v7928_v0, %v17383_v17  ;;  %v8008_v9 = vcombine.low %v7893_v39, %v7928_v0  ;;  %13508 = vmatpush3.bf16.msra.mxu0 %v14274_v7 }
 0xbfd   : > { %13509 = vmatprep.subr.bf16.mxu0 %v14275_v33 }
 0xbfe   : > { %v7966_v47 = vcombine.low %v7958_v22, %v7965_v37  ;;  %v8061_v57 = vrot.slane %v8054_v34, %v16307_v60  ;;  %v8022_v46 = vrot.slane %v8008_v9, %v16307_v60 }
 0xc00   : > { %7967 = vrot.lane.b32.xlu1 %v7966_v47, %s18639_s18  ;;  %v8062_v53 = vcombine.low %v7965_v37, %v8061_v57  ;;  %v8023_v44 = vcombine.low %v8015_v20, %v8022_v46  ;;  %13510 = vmatpush3.bf16.msra.mxu0 %v14276_v23 }
 0xc01   : > { %13511 = vmatprep.subr.bf16.mxu0 %v14277_v58 }
 0xc02   : > { %8063 = vrot.lane.b32.xlu0 %v8062_v53, %s14648_s9 }
 0xc04   : > { %8005 = vrot.lane.b32.xlu1 %v8004_v13, %s14648_s9  ;;  %13512 = vmatpush3.bf16.msra.mxu0 %v14278_v32 }
 0xc05   : > { %13513 = vmatprep.subr.bf16.mxu0 %v14279_v36 }
 0xc08   : > { %13514 = vmatpush3.bf16.msra.mxu0 %v14280_v51 }
 0xc5f   : > { %v8053_v5 = vpop.permute.xlu0 %8052 }
 0xc65   : > { %v7987_v52 = vpop.permute.xlu1 %7986 }
 0xc66   : > { %v8042_v21 = vpop.permute.xlu0 %8041 }
 0xc67   : > { %v8084_v17 = vsel %vm18739_vm8, %v8023_v44, %v8042_v21  ;;  %vm8479_vm8 = vsmask.f32 2312 }
 0xc68   : > { %v8086_v63 = vsel %vm18742_vm12, %v8084_v17, %v8053_v5  ;;  %vm8480_vm10 = vmor %vm8478_vm6, %vm8479_vm8  ;;  %vm18749_vm8 = vcmask 261120  }
 0xc72   : > { %v7968_v38 = vpop.permute.xlu1 %7967 }
 0xc73   : > { %v8076_v28 = vsel %vm18741_vm0, %v7949_v59, %v7968_v38  ;;  %vm8481_vm0 = vsmask.f32 3340 }
 0xc74   : > { %v8064_v35 = vpop.permute.xlu0 %8063  ;;  %v8078_v25 = vsel %vm18730_vm1, %v8076_v28, %v7987_v52  ;;  %vm8482_vm12 = vmor %vm8480_vm10, %vm8481_vm0  ;;  %vm8483_vm1 = vsmask.f32 4368 }
 0xc75   : > { %v8088_v40 = vsel %vm5713_vm9, %v8086_v63, %v8064_v35  ;;  %v14653_v63 = vmov 1966171168   ;;  %vm18750_vm10 = vmmov %vm18749_vm8 }
 0xc76   : > { %8239 = vmatprep.mubr.bf16.mxu1 %v8088_v40  ;;  %v8006_v29 = vpop.permute.xlu1 %8005  ;;  %v8434_v40 = vunpack.c.l.s4 %v14653_v63  ;;  %vm18752_vm0 = vmmov %vm18749_vm8 }
 0xc77   : > { %v8080_v61 = vsel %vm5713_vm9, %v8078_v25, %v8006_v29 }
 0xc78   : > { %8240 = vmatmul.mubr.bf16.vlgmr.msra.gmra.mrb[60].mxu1 %v8080_v61 }
 0xc79   : > { %14003 = vmatprep.mubr.msk.bf16.mxu1 %vm14652_vm3, %v14651_v42  ;;  %14000 = vmatpush3.bf16.msra.mxu1 %v14269_v26 }
 0xc7a   : > { %14001 = vmatprep.subr.bf16.mxu1 %v14651_v42 }
 0xc7d   : > { %14002 = vmatpush3.bf16.msra.mxu1 %v14270_v55  ;;  %v8435_v55 = vunpack.c.0.s8 %v8434_v40 }
 0xc7f   : > { %v17881_v51 = vsub.s32 %v8435_v55, %v16299_v19 }
 0xcc7   : > { %v8282_v56 = vpop.f32.mrb[48].mxu0 }
 0xcc8   : > { %v13997_v41 = vpop.f32.mrb[49].mxu0 }
 0xcc9   : > { %v8285_v30 = vpop.f32.mrb[50].mxu0 }
 0xcca   : > { %v13998_v45 = vpop.f32.mrb[51].mxu0 }
 0xd4b   : > { %v13496_v62 = vpop.f32.mrb[60].mxu1 }
 0xd4c   : > { %v13497_v49 = vpop.f32.mrb[61].mxu1 }
 0xd4d   : > { %v13498_v43 = vadd.f32 %v13497_v49, %v13496_v62  ;;  %v13499_v12 = vpop.f32.mrb[62].mxu1 }
 0xd4e   : > { %v13500_v14 = vpop.f32.mrb[63].mxu1 }
 0xd4f   : > { %v8242_v15 = vadd.f32 %v13498_v43, %v13048_v16  ;;  %v13501_v54 = vadd.f32 %v13500_v14, %v13499_v12  ;;  %v17886_v43 = vsel %vm17875_vm13, %v14888_v3, 0 }
 0xd51   : > { %v8283_v6 = vadd.f32 %v8282_v56, %v8242_v15  ;;  %v8245_v10 = vadd.f32 %v13501_v54, %v13048_v16  ;;  %v8439_v54 = vrot.slane %v17886_v43, %v17881_v51 }
 0xd53   : > { %v8289_v48 = vmax.f32 %v8283_v6, 0.0  ;;  %v8286_v8 = vadd.f32 %v8285_v30, %v8245_v10 }
 0xd55   : > { %v8293_v18 = vcombine.high %v8289_v48, %v8289_v48  ;;  %v8290_v39 = vmax.f32 %v8286_v8, 0.0  ;;  %v8298_v31 = vsel %vm8297_vm7, %v8289_v48, -inf }
 0xd57   : > { %v8299_v50 = vsel %vm8297_vm7, %v8293_v18, -inf  ;;  %v8294_v59 = vcombine.high %v8290_v39, %v8290_v39  ;;  %v8301_v13 = vsel %vm8297_vm7, %v8290_v39, -inf  ;;  %v8440_v39 = vcombine.high %v8439_v54, %v8439_v54 }
 0xd58   : > { %v8300_v4 = vmax.f32 %v8298_v31, %v8299_v50 }
 0xd59   : > { %v8302_v0 = vsel %vm8297_vm7, %v8294_v59, -inf  ;;  %vm8484_vm7 = vmor %vm8482_vm12, %vm8483_vm1  ;;  %vm18753_vm12 = vcmask 523264  }
 0xd5a   : > { %v8312_v22 = vrot.slane %v8300_v4, %v16307_v60  ;;  %v8303_v37 = vmax.f32 %v8301_v13, %v8302_v0  ;;  %v14281_v4 = vld [vmem:[%s18740_s2 + $0x68] sm:$0xff]   ;;  %vm18754_vm1 = vmmov %vm18753_vm12 }
 0xd5b   : > { %v14282_v13 = vld [vmem:[%s18740_s2 + $0x28] sm:$0xff]   ;;  %13515 = vmatprep.subr.bf16.mxu0 %v14281_v4 }
 0xd5c   : > { %v8313_v34 = vcombine.high %v8312_v22, %v8312_v22  ;;  %v8327_v9 = vsel %vm8326_vm4, %v8312_v22, -inf  ;;  %v8320_v47 = vrot.slane %v8303_v37, %v16307_v60  ;;  %13516 = vmatpush3.bf16.msra.mxu0 %v14282_v13 }
 0xd5d   : > { %v8328_v57 = vrot.slane %v8327_v9, 4 }
 0xd5e   : > { %v8334_v46 = vsel %vm8326_vm4, %v8313_v34, -inf  ;;  %v8321_v20 = vcombine.high %v8320_v47, %v8320_v47  ;;  %v8341_v53 = vsel %vm8326_vm4, %v8320_v47, -inf  ;;  %v17895_v34 = vrot.slane %v8440_v39, %v17881_v51 }
 0xd5f   : > { %v8329_v44 = vmax.f32 %v8327_v9, %v8328_v57  ;;  %v8335_v5 = vrot.slane %v8334_v46, 4  ;;  %v8342_v52 = vrot.slane %v8341_v53, 4  ;;  %v8447_v9 = vrot.slane %v8439_v54, %v17881_v51 }
 0xd60   : > { %v8348_v21 = vsel %vm8326_vm4, %v8321_v20, -inf  ;;  %vm8485_vm4 = vsmask.f32 5396 }
 0xd61   : > { %v8330_v17 = vrot.slane %v8329_v44, 2  ;;  %v8336_v38 = vmax.f32 %v8334_v46, %v8335_v5  ;;  %v8343_v28 = vmax.f32 %v8341_v53, %v8342_v52  ;;  %v8349_v35 = vrot.slane %v8348_v21, 4  ;;  %vm8486_vm11 = vmor %vm8484_vm7, %vm8485_vm4  ;;  %v14283_v46 = vld [vmem:[%s18740_s2 + $0x70] sm:$0xff]  }
 0xd62   : > { %13517 = vmatprep.subr.bf16.mxu0 %v14283_v46  ;;  %v8492_v52 = vshrl.u32 %v8447_v9, 16  ;;  %vm18757_vm7 = vmmov %vm18754_vm1 }
 0xd63   : > { %v8331_v25 = vmax.f32 %v8329_v44, %v8330_v17  ;;  %v8337_v29 = vrot.slane %v8336_v38, 2  ;;  %v8344_v61 = vrot.slane %v8343_v28, 2  ;;  %v8350_v56 = vmax.f32 %v8348_v21, %v8349_v35  ;;  %v14284_v17 = vld [vmem:[%s18740_s2 + $0x30] sm:$0xff]   ;;  %vm18758_vm4 = vmmov %vm18754_vm1 }
 0xd64   : > { %v8497_v21 = vshll.u32 %v17895_v34, 16  ;;  %13518 = vmatpush3.bf16.msra.mxu0 %v14284_v17 }
 0xd65   : > { %v8332_v41 = vrot.slane %v8331_v25, 1  ;;  %v8338_v30 = vmax.f32 %v8336_v38, %v8337_v29  ;;  %v8345_v45 = vmax.f32 %v8343_v28, %v8344_v61  ;;  %v8351_v26 = vrot.slane %v8350_v56, 2  ;;  %v14285_v29 = vld [vmem:[%s18740_s2 + $0x78] sm:$0xff]  }
 0xd66   : > { %13519 = vmatprep.subr.bf16.mxu0 %v14285_v29 }
 0xd67   : > { %v8333_v11 = vmax.f32 %v8331_v25, %v8332_v41  ;;  %v8339_v1 = vrot.slane %v8338_v30, 1  ;;  %v8346_v24 = vrot.slane %v8345_v45, 1  ;;  %v8352_v7 = vmax.f32 %v8350_v56, %v8351_v26 }
 0xd69   : > { %v8340_v23 = vmax.f32 %v8338_v30, %v8339_v1  ;;  %v8392_v58 = vpack.c.bf16 %v8333_v11, %v8333_v11  ;;  %v8347_v32 = vmax.f32 %v8345_v45, %v8346_v24  ;;  %v8353_v36 = vrot.slane %v8352_v7, 1  ;;  %v14286_v30 = vld [vmem:[%s18740_s2 + $0x38] sm:$0xff]   ;;  %s18790_s2 = sld [smem:[#allocation25_spill]] }
 0xd6a   : > { %13520 = vmatpush3.bf16.msra.mxu0 %v14286_v30 }
 0xd6b   : > { %v8393_v62 = vpack.c.bf16 %v8340_v23, %v8340_v23  ;;  %v8354_v16 = vmax.f32 %v8352_v7, %v8353_v36  ;;  %v8394_v49 = vpack.c.bf16 %v8347_v32, %v8347_v32  ;;  %v8400_v12 = vunpack.c.l.b16 %v8392_v58 }
 0xd6d   : > { %v8401_v14 = vunpack.c.l.b16 %v8393_v62  ;;  %v8395_v15 = vpack.c.bf16 %v8354_v16, %v8354_v16  ;;  %v8402_v6 = vunpack.c.l.b16 %v8394_v49 }
 0xd6f   : > { %v8404_v19 = vsel %vm4616_vm15, %v8401_v14, %v8400_v12  ;;  %v8403_v10 = vunpack.c.l.b16 %v8395_v15 }
 0xd70   : > { %v8406_v48 = vpack.c.b16 %v8404_v19, %v8404_v19 }
 0xd71   : > { %v8405_v3 = vsel %vm4616_vm15, %v8403_v10, %v8402_v6  ;;  %vm8488_vm15 = vmor %vm8486_vm11, %vm8487_vm5 }
 0xd72   : > { %v8409_v8 = vshrl.u32 %v8406_v48, 16  ;;  %v8407_v18 = vpack.c.b16 %v8405_v3, %v8405_v3  ;;  %v8412_v50 = vshll.u32 %v8406_v48, 16  ;;  %vm17916_vm6 = vmor %vm8488_vm15, %vm8489_vm14 }
 0xd73   : > { %v17927_v45 = vsel %vm17916_vm6, %v8492_v52, %v8497_v21  ;;  %vm18760_vm11 = vmmov %vm18754_vm1 }
 0xd74   : > { %v8411_v31 = vrot.slane %v8409_v8, 7  ;;  %v8416_v59 = vshrl.u32 %v8407_v18, 16  ;;  %v8419_v22 = vshll.u32 %v8407_v18, 16  ;;  %vm18761_vm5 = vmmov %vm18754_vm1 }
 0xd75   : > { %vm18763_vm15 = vmmov %vm18754_vm1 }
 0xd76   : > { %v8418_v0 = vrot.slane %v8416_v59, 7  ;;  %v8414_v37 = vor.u32 %v8412_v50, %v8411_v31  ;;  %vm18764_vm14 = vmmov %vm18754_vm1 }
 0xd78   : > { %v8421_v47 = vor.u32 %v8419_v22, %v8418_v0  ;;  %v8424_v57 = vsel %vm14881_vm2, 0, %v8414_v37 }
 0xd79   : > { %v17903_v20 = vsel %vm17875_vm13, %v8424_v57, 0 }
 0xd7a   : > { %v8425_v53 = vsel %vm14881_vm2, 0, %v8421_v47  ;;  %v8461_v44 = vrot.slane %v17903_v20, %v17881_v51  ;;  %v8541_v59 = vcombine.low %v17886_v43, %v17903_v20 }
 0xd7b   : > { %v8430_v5 = vsel %vm17875_vm13, %v8425_v53, 0 }
 0xd7c   : > { %v8639_v38 = vcombine.low %v8430_v5, %v17886_v43  ;;  %v8516_v28 = vrot.slane %v8430_v5, %v17881_v51  ;;  %v8462_v35 = vcombine.high %v8461_v44, %v8461_v44  ;;  %v8469_v63 = vrot.slane %v8461_v44, %v17881_v51 }
 0xd7d   : > { %v8590_v25 = vcombine.low %v17903_v20, %v8430_v5  ;;  %v8548_v0 = vrot.slane %v8541_v59, %v17881_v51 }
 0xd7e   : > { %v8646_v61 = vrot.slane %v8639_v38, %v17881_v51  ;;  %v8517_v56 = vcombine.high %v8516_v28, %v8516_v28  ;;  %v8476_v41 = vrot.slane %v8462_v35, %v17881_v51  ;;  %v8501_v26 = vshrl.u32 %v8469_v63, 16 }
 0xd7f   : > { %v8524_v55 = vrot.slane %v8516_v28, %v17881_v51  ;;  %v8597_v39 = vrot.slane %v8590_v25, %v17881_v51  ;;  %v8555_v57 = vrot.slane %v8548_v0, %v17881_v51 }
 0xd80   : > { %v8653_v11 = vrot.slane %v8646_v61, %v17881_v51  ;;  %v8531_v1 = vrot.slane %v8517_v56, %v17881_v51  ;;  %v8573_v24 = vcombine.low %v17895_v34, %v8476_v41  ;;  %v8506_v7 = vshll.u32 %v8476_v41, 16 }
 0xd81   : > { %v8533_v16 = vshrl.u32 %v8524_v55, 16  ;;  %v8604_v50 = vrot.slane %v8597_v39, %v17881_v51 }
 0xd82   : > { %8654 = vrot.lane.b32.xlu0 %v8653_v11, %s18638_s11  ;;  %v8580_v23 = vrot.slane %v8573_v24, %v17881_v51  ;;  %v8673_v58 = vcombine.low %v8531_v1, %v17895_v34  ;;  %v8622_v32 = vcombine.low %v8476_v41, %v8531_v1  ;;  %v8508_v36 = vsel %vm17916_vm6, %v8501_v26, %v8506_v7 }
 0xd83   : > { %v8556_v62 = vcombine.low %v17927_v45, %v8508_v36  ;;  %v8538_v49 = vshll.u32 %v8531_v1, 16 }
 0xd84   : > { %v8587_v12 = vrot.slane %v8580_v23, %v17881_v51  ;;  %v8680_v14 = vrot.slane %v8673_v58, %v17881_v51  ;;  %v8629_v15 = vrot.slane %v8622_v32, %v17881_v51 }
 0xd85   : > { %v8563_v54 = vrot.slane %v8556_v62, %v17881_v51  ;;  %v8540_v19 = vsel %vm17916_vm6, %v8533_v16, %v8538_v49 }
 0xd86   : > { %8588 = vrot.lane.b32.xlu1 %v8587_v12, %s18638_s11  ;;  %v8687_v6 = vrot.slane %v8680_v14, %v17881_v51  ;;  %v8636_v10 = vrot.slane %v8629_v15, %v17881_v51  ;;  %v8656_v48 = vcombine.low %v8540_v19, %v17927_v45  ;;  %v8607_v3 = vcombine.low %v8508_v36, %v8540_v19 }
 0xd87   : > { %v8570_v8 = vrot.slane %v8563_v54, %v17881_v51 }
 0xd88   : > { %14004 = vmatmul.mubr.msk.bf16.vlgmr.msra.gmra.mrb[64].mxu1 %vm18749_vm8, %v8687_v6  ;;  %8637 = vrot.lane.b32.xlu0 %v8636_v10, %s18639_s18  ;;  %v8663_v18 = vrot.slane %v8656_v48, %v17881_v51  ;;  %v8614_v4 = vrot.slane %v8607_v3, %v17881_v51  ;;  %vm18765_vm8 = vmmov %vm18754_vm1 }
 0xd8a   : > { %8571 = vrot.lane.b32.xlu1 %v8570_v8, %s18639_s18  ;;  %v8670_v31 = vrot.slane %v8663_v18, %v17881_v51  ;;  %v8621_v37 = vrot.slane %v8614_v4, %v17881_v51  ;;  %s18751_s18 = sld [smem:[#allocation16_spill]] }
 0xd8c   : > { %8671 = vrot.lane.b32.xlu0 %v8670_v31, %s14648_s9 }
 0xd8e   : > { %8605 = vrot.lane.b32.xlu1 %v8604_v50, %s14648_s9  ;;  %s18755_s9 = sld [smem:[#allocation15_spill]] }
 0xd90   : > { %v14287_v25 = vld [vmem:[%s18751_s18 + $0x40] sm:$0xff]   ;;  %v14289_v61 = vld [vmem:[%s18751_s18 + $0x48] sm:$0xff]   ;;  %v14293_v55 = vld [vmem:[%s18751_s18 + $0x50] sm:$0xff]  }
 0xd91   : > { %v14288_v29 = vld [vmem:[%s18751_s18] sm:$0xff]   ;;  %13530 = vmatprep.subr.bf16.mxu1 %v14287_v25  ;;  %v14295_v30 = vld [vmem:[%s18751_s18 + $0xc8] sm:$0xff]   ;;  %v14299_v1 = vld [vmem:[%s18751_s18 + $0xd0] sm:$0xff]  }
 0xd92   : > { %v14291_v56 = vld [vmem:[%s18751_s18 + $0xc0] sm:$0xff]   ;;  %13531 = vmatpush3.bf16.msra.mxu1 %v14288_v29  ;;  %v14290_v26 = vld [vmem:[%s18751_s18 + $0x8] sm:$0xff]   ;;  %v14294_v24 = vld [vmem:[%s18751_s18 + $0x10] sm:$0xff]  }
 0xd93   : > { %v14292_v41 = vld [vmem:[%s18751_s18 + $0x80] sm:$0xff]   ;;  %13552 = vmatprep.subr.bf16.mxu0 %v14291_v56  ;;  %13532 = vmatprep.subr.bf16.mxu1 %v14289_v61  ;;  %v14296_v11 = vld [vmem:[%s18751_s18 + $0x88] sm:$0xff]   ;;  %v14297_v7 = vld [vmem:[%s18751_s18 + $0x58] sm:$0xff]  }
 0xd94   : > { %v14300_v23 = vld [vmem:[%s18751_s18 + $0x90] sm:$0xff]   ;;  %v14303_v58 = vld [vmem:[%s18751_s18 + $0xd8] sm:$0xff]   ;;  %v14301_v36 = vld [vmem:[%s18751_s18 + $0x60] sm:$0xff]  }
 0xd95   : > { %v14298_v32 = vld [vmem:[%s18751_s18 + $0x18] sm:$0xff]   ;;  %v14307_v16 = vld [vmem:[%s18751_s18 + $0xe0] sm:$0xff]   ;;  %v14305_v12 = vld [vmem:[%s18751_s18 + $0x68] sm:$0xff]  }
 0xd96   : > { %13533 = vmatpush3.bf16.msra.mxu1 %v14290_v26  ;;  %v14304_v62 = vld [vmem:[%s18751_s18 + $0x98] sm:$0xff]   ;;  %v14302_v49 = vld [vmem:[%s18751_s18 + $0x20] sm:$0xff]   ;;  %v14306_v15 = vld [vmem:[%s18751_s18 + $0x28] sm:$0xff]  }
 0xd97   : > { %13534 = vmatprep.subr.bf16.mxu1 %v14293_v55  ;;  %v14308_v14 = vld [vmem:[%s18751_s18 + $0xa0] sm:$0xff]   ;;  %v14309_v54 = vld [vmem:[%s18751_s18 + $0x70] sm:$0xff]   ;;  %v14317_v26 = vld [vmem:[%s18751_s18 + $0xf8] sm:$0xff]  }
 0xd98   : > { %v13071_v6 = vld [vmem:[%s18755_s9] ss:$0 sm:$0xff]  ;;  %s18773_s9 = sld [smem:[#allocation22_spill]] }
 0xd9a   : > { %13535 = vmatpush3.bf16.msra.mxu1 %v14294_v24  ;;  %v14319_v24 = vld [vmem:[%s18751_s18 + $0xb8] sm:$0xff]  }
 0xd9b   : > { %13536 = vmatprep.subr.bf16.mxu1 %v14297_v7 }
 0xd9e   : > { %13537 = vmatpush3.bf16.msra.mxu1 %v14298_v32 }
 0xd9f   : > { %13538 = vmatprep.subr.bf16.mxu1 %v14301_v36 }
 0xda2   : > { %13539 = vmatpush3.bf16.msra.mxu1 %v14302_v49 }
 0xda3   : > { %13540 = vmatprep.subr.bf16.mxu1 %v14305_v12 }
 0xda6   : > { %13541 = vmatpush3.bf16.msra.mxu1 %v14306_v15 }
 0xda7   : > { %13542 = vmatprep.subr.bf16.mxu1 %v14309_v54 }
 0xdf4   : > { %v8655_v13 = vpop.permute.xlu0 %8654 }
 0xdf8   : > { %v8589_v22 = vpop.permute.xlu1 %8588 }
 0xdfa   : > { %v8638_v9 = vpop.permute.xlu0 %8637 }
 0xdfb   : > { %v8698_v47 = vsel %vm18750_vm10, %v8621_v37, %v8638_v9  ;;  %vm18767_vm10 = vmmov %vm18754_vm1 }
 0xdfc   : > { %v8572_v46 = vpop.permute.xlu1 %8571  ;;  %v8700_v44 = vsel %vm18753_vm12, %v8698_v47, %v8655_v13  ;;  %v14310_v47 = vld [vmem:[%s18751_s18 + $0x30] sm:$0xff]  }
 0xdfd   : > { %v8690_v53 = vsel %vm18752_vm0, %v8555_v57, %v8572_v46  ;;  %v14311_v57 = vld [vmem:[%s18751_s18 + $0xe8] sm:$0xff]   ;;  %13543 = vmatpush3.bf16.msra.mxu1 %v14310_v47  ;;  %v14318_v47 = vld [vmem:[%s18751_s18 + $0x100] sm:$0xff]   ;;  %vm18768_vm0 = vmmov %vm18754_vm1 }
 0xdfe   : > { %v8672_v20 = vpop.permute.xlu0 %8671  ;;  %v8692_v52 = vsel %vm18754_vm1, %v8690_v53, %v8589_v22  ;;  %vm18772_vm12 = vmmov %vm18768_vm0 }
 0xdff   : > { %v8702_v5 = vsel %vm5713_vm9, %v8700_v44, %v8672_v20  ;;  %v14312_v44 = vld [vmem:[%s18751_s18 + $0xa8] sm:$0xff]  }
 0xe00   : > { %8853 = vmatprep.mubr.bf16.mxu0 %v8702_v5  ;;  %v8606_v21 = vpop.permute.xlu1 %8605  ;;  %v14313_v5 = vld [vmem:[%s18751_s18 + $0x78] sm:$0xff]  }
 0xe01   : > { %v8694_v17 = vsel %vm5713_vm9, %v8692_v52, %v8606_v21  ;;  %v14314_v52 = vld [vmem:[%s18751_s18 + $0x38] sm:$0xff]   ;;  %v14315_v21 = vld [vmem:[%s18751_s18 + $0xf0] sm:$0xff]   ;;  %13544 = vmatprep.subr.bf16.mxu1 %v14313_v5  ;;  %vm18756_vm9 = vmmov %vm18754_vm1 }
 0xe02   : > { %8854 = vmatmul.mubr.bf16.vlgmr.msra.gmra.mrb[52].mxu0 %v8694_v17  ;;  %13545 = vmatpush3.bf16.msra.mxu1 %v14314_v52  ;;  %vm18774_vm1 = vmmov %vm18768_vm0 }
 0xe03   : > { %13553 = vmatpush3.bf16.msra.mxu0 %v14292_v41  ;;  %14007 = vmatprep.subr.bf16.mxu1 %v14651_v42 }
 0xe04   : > { %13554 = vmatprep.subr.bf16.mxu0 %v14295_v30 }
 0xe07   : > { %13555 = vmatpush3.bf16.msra.mxu0 %v14296_v11 }
 0xe08   : > { %13556 = vmatprep.subr.bf16.mxu0 %v14299_v1 }
 0xe0b   : > { %13557 = vmatpush3.bf16.msra.mxu0 %v14300_v23 }
 0xe0c   : > { %13558 = vmatprep.subr.bf16.mxu0 %v14303_v58 }
 0xe0f   : > { %13559 = vmatpush3.bf16.msra.mxu0 %v14304_v62 }
 0xe10   : > { %13560 = vmatprep.subr.bf16.mxu0 %v14307_v16 }
 0xe13   : > { %13561 = vmatpush3.bf16.msra.mxu0 %v14308_v14 }
 0xe14   : > { %13562 = vmatprep.subr.bf16.mxu0 %v14311_v57 }
 0xe17   : > { %13563 = vmatpush3.bf16.msra.mxu0 %v14312_v44 }
 0xe18   : > { %13564 = vmatprep.subr.bf16.mxu0 %v14315_v21  ;;  %v14320_v21 = vld [vmem:[%s18751_s18 + $0x108] sm:$0xff]  }
 0xe5b   : > { %v8895_v38 = vpop.f32.mrb[64].mxu1 }
 0xe5c   : > { %v14005_v28 = vpop.f32.mrb[65].mxu1 }
 0xe5d   : > { %v8898_v35 = vpop.f32.mrb[66].mxu1  ;;  %v14316_v28 = vld [vmem:[%s18751_s18 + $0xb0] sm:$0xff]  }
 0xe5e   : > { %v14006_v63 = vpop.f32.mrb[67].mxu1  ;;  %13565 = vmatpush3.bf16.msra.mxu0 %v14316_v28  ;;  %v14321_v28 = vld [vmem:[%s18751_s18 + $0x110] sm:$0xff]  }
 0xe5f   : > { %13566 = vmatprep.subr.bf16.mxu0 %v14317_v26  ;;  %v14328_v26 = vld [vmem:[%s18759_s26 + $0x80] sm:$0xff]  }
 0xe62   : > { %13567 = vmatpush3.bf16.msra.mxu0 %v14319_v24  ;;  %v14332_v24 = vld [vmem:[%s18759_s26 + $0x88] sm:$0xff]  }
 0xed5   : > { %v13521_v19 = vpop.f32.mrb[52].mxu0 }
 0xed6   : > { %v13522_v10 = vpop.f32.mrb[53].mxu0 }
 0xed7   : > { %v13523_v48 = vadd.f32 %v13522_v10, %v13521_v19  ;;  %v13524_v3 = vpop.f32.mrb[54].mxu0 }
 0xed8   : > { %v13525_v8 = vpop.f32.mrb[55].mxu0 }
 0xed9   : > { %v8856_v18 = vadd.f32 %v13523_v48, %v13071_v6 }
 0xedb   : > { %v8896_v39 = vadd.f32 %v8895_v38, %v8856_v18 }
 0xedd   : > { %v8901_v31 = vmax.f32 %v8896_v39, 0.0 }
 0xedf   : > { %v8909_v50 = vrot.slane %v8901_v31, %v16307_v60 }
 0xee1   : > { %v8910_v59 = vcombine.high %v8909_v50, %v8909_v50  ;;  %v8986_v4 = vpack.c.bf16 %v8909_v50, %v8909_v50 }
 0xee3   : > { %v8987_v13 = vpack.c.bf16 %v8910_v59, %v8910_v59  ;;  %v8989_v0 = vshrl.u32 %v8986_v4, 16  ;;  %v8992_v37 = vshll.u32 %v8986_v4, 16 }
 0xee5   : > { %v8991_v22 = vrot.slane %v8989_v0, 7  ;;  %v8996_v9 = vshrl.u32 %v8987_v13, 16  ;;  %v8999_v20 = vshll.u32 %v8987_v13, 16 }
 0xee7   : > { %v8994_v46 = vor.u32 %v8992_v37, %v8991_v22  ;;  %v8998_v53 = vrot.slane %v8996_v9, 7 }
 0xee9   : > { %v9001_v17 = vor.u32 %v8999_v20, %v8998_v53  ;;  %v9004_v38 = vsel %vm14881_vm2, 0, %v8994_v46 }
 0xeea   : > { %v9006_v35 = vsel %vm17875_vm13, %v9004_v38, 0 }
 0xeeb   : > { %v9005_v63 = vsel %vm14881_vm2, 0, %v9001_v17  ;;  %v9015_v25 = vrot.slane %v9006_v35, %v17881_v51  ;;  %v9072_v50 = vcombine.low %v17886_v43, %v9006_v35 }
 0xeec   : > { %v9007_v29 = vsel %vm17875_vm13, %v9005_v63, 0  ;;  %v14322_v63 = vld [vmem:[%s18751_s18 + $0x118] sm:$0xff]  }
 0xeed   : > { %v9016_v61 = vcombine.high %v9015_v25, %v9015_v25  ;;  %v9119_v56 = vcombine.low %v9006_v35, %v9007_v29  ;;  %v9047_v41 = vrot.slane %v9007_v29, %v17881_v51  ;;  %v9023_v30 = vrot.slane %v9015_v25, %v17881_v51 }
 0xeee   : > { %v9168_v13 = vcombine.low %v9007_v29, %v17886_v43  ;;  %v9079_v22 = vrot.slane %v9072_v50, %v17881_v51 }
 0xeef   : > { %v9030_v55 = vrot.slane %v9016_v61, %v17881_v51  ;;  %v9126_v11 = vrot.slane %v9119_v56, %v17881_v51  ;;  %v9048_v1 = vcombine.high %v9047_v41, %v9047_v41  ;;  %v9055_v7 = vrot.slane %v9047_v41, %v17881_v51  ;;  %v14323_v61 = vld [vmem:[%s18759_s26 + $0x40] sm:$0xff]   ;;  %v14325_v41 = vld [vmem:[%s18759_s26 + $0x48] sm:$0xff]  }
 0xef0   : > { %v9032_v32 = vshrl.u32 %v9023_v30, 16  ;;  %v9175_v37 = vrot.slane %v9168_v13, %v17881_v51  ;;  %v9086_v9 = vrot.slane %v9079_v22, %v17881_v51  ;;  %v14324_v56 = vld [vmem:[%s18759_s26] sm:$0xff]  }
 0xef1   : > { %v9133_v23 = vrot.slane %v9126_v11, %v17881_v51  ;;  %v9062_v58 = vrot.slane %v9048_v1, %v17881_v51  ;;  %v9037_v36 = vshll.u32 %v9030_v55, 16  ;;  %v9064_v16 = vshrl.u32 %v9055_v7, 16  ;;  %v14327_v30 = vld [vmem:[%s18759_s26 + $0xc0] sm:$0xff]   ;;  %v14326_v11 = vld [vmem:[%s18759_s26 + $0x8] sm:$0xff]   ;;  %v14329_v1 = vld [vmem:[%s18759_s26 + $0x50] sm:$0xff]  }
 0xef2   : > { %v9104_v39 = vcombine.low %v17895_v34, %v9030_v55  ;;  %v9182_v20 = vrot.slane %v9175_v37, %v17881_v51  ;;  %13601 = vmatprep.subr.bf16.mxu0 %v14327_v30  ;;  %v14335_v7 = vld [vmem:[%s18759_s26 + $0xd0] sm:$0xff]   ;;  %v14350_v30 = vld [vmem:[%s18759_s26 + $0x38] sm:$0xff]  }
 0xef3   : > { %9134 = vrot.lane.b32.xlu0 %v9133_v23, %s18638_s11  ;;  %v9039_v62 = vsel %vm17916_vm6, %v9032_v32, %v9037_v36  ;;  %v9069_v49 = vshll.u32 %v9062_v58, 16  ;;  %v9151_v14 = vcombine.low %v9030_v55, %v9062_v58  ;;  %v9200_v35 = vcombine.low %v9062_v58, %v17895_v34  ;;  %v14331_v55 = vld [vmem:[%s18759_s26 + $0xc8] sm:$0xff]   ;;  %v14330_v23 = vld [vmem:[%s18759_s26 + $0x10] sm:$0xff]   ;;  %v14333_v58 = vld [vmem:[%s18759_s26 + $0x58] sm:$0xff]  }
 0xef4   : > { %v9087_v12 = vcombine.low %v17927_v45, %v9039_v62  ;;  %v9111_v31 = vrot.slane %v9104_v39, %v17881_v51  ;;  %v14336_v32 = vld [vmem:[%s18759_s26 + $0x90] sm:$0xff]   ;;  %v14339_v36 = vld [vmem:[%s18759_s26 + $0xd8] sm:$0xff]  }
 0xef5   : > { %v9071_v15 = vsel %vm17916_vm6, %v9064_v16, %v9069_v49  ;;  %v9158_v3 = vrot.slane %v9151_v14, %v17881_v51  ;;  %v9207_v25 = vrot.slane %v9200_v35, %v17881_v51  ;;  %v14337_v16 = vld [vmem:[%s18759_s26 + $0x60] sm:$0xff]   ;;  %v14340_v49 = vld [vmem:[%s18759_s26 + $0x98] sm:$0xff]   ;;  %v14346_v35 = vld [vmem:[%s18759_s26 + $0x30] sm:$0xff]  }
 0xef6   : > { %v9094_v54 = vrot.slane %v9087_v12, %v17881_v51  ;;  %v9183_v19 = vcombine.low %v9071_v15, %v17927_v45  ;;  %v9136_v6 = vcombine.low %v9039_v62, %v9071_v15  ;;  %v9118_v59 = vrot.slane %v9111_v31, %v17881_v51  ;;  %v14334_v62 = vld [vmem:[%s18759_s26 + $0x18] sm:$0xff]   ;;  %v14343_v12 = vld [vmem:[%s18759_s26 + $0xe0] sm:$0xff]   ;;  %v14341_v15 = vld [vmem:[%s18759_s26 + $0x68] sm:$0xff]  }
 0xef7   : > { %v9165_v18 = vrot.slane %v9158_v3, %v17881_v51  ;;  %v9214_v29 = vrot.slane %v9207_v25, %v17881_v51  ;;  %v14338_v14 = vld [vmem:[%s18759_s26 + $0x20] sm:$0xff]  }
 0xef8   : > { %v9101_v10 = vrot.slane %v9094_v54, %v17881_v51  ;;  %v9190_v48 = vrot.slane %v9183_v19, %v17881_v51  ;;  %v9143_v57 = vrot.slane %v9136_v6, %v17881_v51  ;;  %v14344_v54 = vld [vmem:[%s18759_s26 + $0xa0] sm:$0xff]   ;;  %v14342_v19 = vld [vmem:[%s18759_s26 + $0x28] sm:$0xff]   ;;  %v14345_v6 = vld [vmem:[%s18759_s26 + $0x70] sm:$0xff]  }
 0xefa   : > { %9102 = vrot.lane.b32.xlu1 %v9101_v10, %s18638_s11  ;;  %v9197_v8 = vrot.slane %v9190_v48, %v17881_v51  ;;  %v9150_v5 = vrot.slane %v9143_v57, %v17881_v51 }
 0xefc   : > { %9198 = vrot.lane.b32.xlu0 %v9197_v8, %s18638_s11 }
 0xefe   : > { %9166 = vrot.lane.b32.xlu1 %v9165_v18, %s18638_s11  ;;  %v13093_v18 = vld [vmem:[%s18762_s22] ss:$0 sm:$0xff]  ;;  %s18776_s22 = sld [smem:[#allocation21_spill]] }
 0xf65   : > { %v9135_v4 = vpop.permute.xlu0 %9134 }
 0xf66   : > { %v9221_v0 = vsel %vm18756_vm9, %v9118_v59, %v9135_v4  ;;  %vm18775_vm9 = vmmov %vm18768_vm0 }
 0xf67   : > { %9488 = vmatprep.mubr.bf16.mxu1 %v9221_v0 }
 0xf6c   : > { %v9103_v46 = vpop.permute.xlu1 %9102 }
 0xf6d   : > { %v9217_v53 = vsel %vm18757_vm7, %v9086_v9, %v9103_v46  ;;  %vm10938_vm7 = vcmask 517120  }
 0xf6e   : > { %9489 = vmatmul.mubr.bf16.vlgmr.msra.gmra.mrb[68].mxu1 %v9217_v53  ;;  %v9199_v44 = vpop.permute.xlu0 %9198 }
 0xf6f   : > { %14008 = vmatpush3.bf16.msra.mxu1 %v14318_v47  ;;  %v9229_v52 = vsel %vm18758_vm4, %v9182_v20, %v9199_v44  ;;  %14015 = vmatprep.mubr.msk.bf16.mxu1 %vm14652_vm3, %v14651_v42  ;;  %vm18777_vm4 = vmmov %vm18768_vm0 }
 0xf70   : > { %v9167_v17 = vpop.permute.xlu1 %9166  ;;  %9528 = vmatprep.mubr.bf16.mxu0 %v9229_v52  ;;  %14009 = vmatprep.subr.bf16.mxu1 %v14651_v42 }
 0xf71   : > { %v9225_v38 = vsel %vm18760_vm11, %v9150_v5, %v9167_v17  ;;  %vm18295_vm11 = vmneg %vm18777_vm4 }
 0xf72   : > { %9529 = vmatmul.mubr.bf16.vlgmr.msra.gmra.mrb[56].mxu0 %v9225_v38 }
 0xf73   : > { %14010 = vmatpush3.bf16.msra.mxu1 %v14320_v21  ;;  %13602 = vmatpush3.bf16.msra.mxu0 %v14328_v26 }
 0xf74   : > { %14011 = vmatprep.subr.bf16.mxu1 %v14651_v42  ;;  %13603 = vmatprep.subr.bf16.mxu0 %v14331_v55 }
 0xf77   : > { %14012 = vmatpush3.bf16.msra.mxu1 %v14321_v28  ;;  %13604 = vmatpush3.bf16.msra.mxu0 %v14332_v24  ;;  %v14352_v24 = vld [vmem:[%s18759_s26 + $0xb0] sm:$0xff]  }
 0xf78   : > { %14013 = vmatprep.subr.bf16.mxu1 %v14651_v42  ;;  %13605 = vmatprep.subr.bf16.mxu0 %v14335_v7 }
 0xf7b   : > { %14014 = vmatpush3.bf16.msra.mxu1 %v14322_v63  ;;  %13606 = vmatpush3.bf16.msra.mxu0 %v14336_v32  ;;  %v14347_v63 = vld [vmem:[%s18759_s26 + $0xe8] sm:$0xff]  }
 0xf7c   : > { %13579 = vmatprep.subr.bf16.mxu1 %v14323_v61  ;;  %13607 = vmatprep.subr.bf16.mxu0 %v14339_v36 }
 0xf7e   : > { %14016 = vmatmul.mubr.msk.bf16.vlgmr.msra.gmra.mrb[72].mxu1 %vm18761_vm5, %v9214_v29  ;;  %vm18780_vm5 = vcmask 1040384  }
 0xf7f   : > { %13580 = vmatpush3.bf16.msra.mxu1 %v14324_v56  ;;  %13608 = vmatpush3.bf16.msra.mxu0 %v14340_v49  ;;  %v14348_v56 = vld [vmem:[%s18759_s26 + $0xa8] sm:$0xff]   ;;  %v14353_v49 = vld [vmem:[%s18759_s26 + $0xf8] sm:$0xff]   ;;  %vm18796_vm4 = vmmov %vm18780_vm5 }
 0xf80   : > { %13581 = vmatprep.subr.bf16.mxu1 %v14325_v41  ;;  %13609 = vmatprep.subr.bf16.mxu0 %v14343_v12  ;;  %v14349_v41 = vld [vmem:[%s18759_s26 + $0x78] sm:$0xff]  }
 0xf83   : > { %13582 = vmatpush3.bf16.msra.mxu1 %v14326_v11  ;;  %13610 = vmatpush3.bf16.msra.mxu0 %v14344_v54  ;;  %v14351_v11 = vld [vmem:[%s18759_s26 + $0xf0] sm:$0xff]   ;;  %v14355_v54 = vld [vmem:[%s18759_s26 + $0xb8] sm:$0xff]  }
 0xf84   : > { %13583 = vmatprep.subr.bf16.mxu1 %v14329_v1  ;;  %13611 = vmatprep.subr.bf16.mxu0 %v14347_v63 }
 0xf87   : > { %13584 = vmatpush3.bf16.msra.mxu1 %v14330_v23  ;;  %13612 = vmatpush3.bf16.msra.mxu0 %v14348_v56 }
 0xf88   : > { %13585 = vmatprep.subr.bf16.mxu1 %v14333_v58  ;;  %13613 = vmatprep.subr.bf16.mxu0 %v14351_v11 }
 0xf8b   : > { %13586 = vmatpush3.bf16.msra.mxu1 %v14334_v62  ;;  %13614 = vmatpush3.bf16.msra.mxu0 %v14352_v24 }
 0xf8c   : > { %13587 = vmatprep.subr.bf16.mxu1 %v14337_v16  ;;  %13615 = vmatprep.subr.bf16.mxu0 %v14353_v49  ;;  %v14364_v49 = vld [vmem:[%s18766_s23 + $0x80] sm:$0xff]  }
 0xf8f   : > { %13588 = vmatpush3.bf16.msra.mxu1 %v14338_v14  ;;  %13616 = vmatpush3.bf16.msra.mxu0 %v14355_v54  ;;  %v14368_v54 = vld [vmem:[%s18766_s23 + $0x88] sm:$0xff]  }
 0xf90   : > { %13589 = vmatprep.subr.bf16.mxu1 %v14341_v15 }
 0xf93   : > { %13590 = vmatpush3.bf16.msra.mxu1 %v14342_v19 }
 0xf94   : > { %13591 = vmatprep.subr.bf16.mxu1 %v14345_v6 }
 0xf97   : > { %13592 = vmatpush3.bf16.msra.mxu1 %v14346_v35  ;;  %v14354_v35 = vld [vmem:[%s18759_s26 + $0x100] sm:$0xff]  }
 0xf98   : > { %13593 = vmatprep.subr.bf16.mxu1 %v14349_v41 }
 0xf9b   : > { %13594 = vmatpush3.bf16.msra.mxu1 %v14350_v30 }
 0xf9c   : > { %14019 = vmatprep.subr.bf16.mxu1 %v14651_v42 }
0x1041   : > { %v13546_v10 = vpop.f32.mrb[68].mxu1 }
0x1042   : > { %v13547_v48 = vpop.f32.mrb[69].mxu1 }
0x1043   : > { %v13548_v3 = vadd.f32 %v13547_v48, %v13546_v10  ;;  %v13549_v8 = vpop.f32.mrb[70].mxu1 }
0x1044   : > { %v13550_v39 = vpop.f32.mrb[71].mxu1 }
0x1045   : > { %v13568_v31 = vpop.f32.mrb[56].mxu0  ;;  %v9491_v59 = vadd.f32 %v13548_v3, %v13093_v18 }
0x1046   : > { %v13569_v50 = vpop.f32.mrb[57].mxu0 }
0x1047   : > { %v13570_v4 = vadd.f32 %v13569_v50, %v13568_v31  ;;  %v13571_v13 = vpop.f32.mrb[58].mxu0 }
0x1048   : > { %v13572_v0 = vpop.f32.mrb[59].mxu0 }
0x1049   : > { %v9531_v22 = vadd.f32 %v13570_v4, %v9491_v59 }
0x1051   : > { %v9570_v37 = vpop.f32.mrb[72].mxu1 }
0x1052   : > { %v9571_v9 = vadd.f32 %v9570_v37, %v9531_v22  ;;  %v14017_v47 = vpop.f32.mrb[73].mxu1 }
0x1053   : > { %v9573_v57 = vpop.f32.mrb[74].mxu1 }
0x1054   : > { %v9576_v46 = vmax.f32 %v9571_v9, 0.0  ;;  %v14018_v53 = vpop.f32.mrb[75].mxu1 }
0x1056   : > { %v9584_v20 = vrot.slane %v9576_v46, %v16307_v60 }
0x1058   : > { %v9585_v44 = vcombine.high %v9584_v20, %v9584_v20  ;;  %v9661_v5 = vpack.c.bf16 %v9584_v20, %v9584_v20 }
0x105a   : > { %v9662_v52 = vpack.c.bf16 %v9585_v44, %v9585_v44  ;;  %v9664_v21 = vshrl.u32 %v9661_v5, 16  ;;  %v9667_v38 = vshll.u32 %v9661_v5, 16 }
0x105c   : > { %v9666_v17 = vrot.slane %v9664_v21, 7  ;;  %v9671_v28 = vshrl.u32 %v9662_v52, 16  ;;  %v9674_v61 = vshll.u32 %v9662_v52, 16 }
0x105e   : > { %v9669_v25 = vor.u32 %v9667_v38, %v9666_v17  ;;  %v9673_v29 = vrot.slane %v9671_v28, 7 }
0x1060   : > { %v9676_v26 = vor.u32 %v9674_v61, %v9673_v29  ;;  %v9679_v55 = vsel %vm14881_vm2, 0, %v9669_v25 }
0x1061   : > { %v9681_v1 = vsel %vm17875_vm13, %v9679_v55, 0 }
0x1062   : > { %v9680_v7 = vsel %vm14881_vm2, 0, %v9676_v26  ;;  %v9690_v23 = vrot.slane %v9681_v1, %v17881_v51  ;;  %v9747_v20 = vcombine.low %v17886_v43, %v9681_v1  ;;  %v14356_v26 = vld [vmem:[%s18759_s26 + $0x108] sm:$0xff]  }
0x1063   : > { %v9682_v58 = vsel %vm17875_vm13, %v9680_v7, 0  ;;  %v14358_v7 = vld [vmem:[%s18759_s26 + $0x118] sm:$0xff]  }
0x1064   : > { %v9691_v32 = vcombine.high %v9690_v23, %v9690_v23  ;;  %v9698_v36 = vrot.slane %v9690_v23, %v17881_v51  ;;  %v9722_v62 = vrot.slane %v9682_v58, %v17881_v51  ;;  %v9794_v16 = vcombine.low %v9681_v1, %v9682_v58  ;;  %v14357_v1 = vld [vmem:[%s18759_s26 + $0x110] sm:$0xff]  }
0x1065   : > { %v9843_v5 = vcombine.low %v9682_v58, %v17886_v43  ;;  %v9754_v17 = vrot.slane %v9747_v20, %v17881_v51 }
0x1066   : > { %v9705_v12 = vrot.slane %v9691_v32, %v17881_v51  ;;  %v9723_v14 = vcombine.high %v9722_v62, %v9722_v62  ;;  %v9730_v15 = vrot.slane %v9722_v62, %v17881_v51  ;;  %v9801_v19 = vrot.slane %v9794_v16, %v17881_v51  ;;  %v14359_v32 = vld [vmem:[%s18766_s23 + $0x40] sm:$0xff]   ;;  %v14361_v62 = vld [vmem:[%s18766_s23 + $0x48] sm:$0xff]  }
0x1067   : > { %v9707_v6 = vshrl.u32 %v9698_v36, 16  ;;  %v9850_v38 = vrot.slane %v9843_v5, %v17881_v51  ;;  %v9761_v28 = vrot.slane %v9754_v17, %v17881_v51  ;;  %v14360_v36 = vld [vmem:[%s18766_s23] sm:$0xff]   ;;  %13628 = vmatprep.subr.bf16.mxu0 %v14359_v32 }
0x1068   : > { %v9737_v10 = vrot.slane %v9723_v14, %v17881_v51  ;;  %v9712_v48 = vshll.u32 %v9705_v12, 16  ;;  %v9808_v3 = vrot.slane %v9801_v19, %v17881_v51  ;;  %v9739_v18 = vshrl.u32 %v9730_v15, 16  ;;  %v14363_v16 = vld [vmem:[%s18766_s23 + $0xc0] sm:$0xff]   ;;  %v14362_v14 = vld [vmem:[%s18766_s23 + $0x8] sm:$0xff]   ;;  %v14365_v15 = vld [vmem:[%s18766_s23 + $0x50] sm:$0xff]  }
0x1069   : > { %v9779_v46 = vcombine.low %v17895_v34, %v9705_v12  ;;  %v9857_v61 = vrot.slane %v9850_v38, %v17881_v51  ;;  %v14371_v19 = vld [vmem:[%s18766_s23 + $0xd0] sm:$0xff]  }
0x106a   : > { %v9714_v8 = vsel %vm17916_vm6, %v9707_v6, %v9712_v48  ;;  %v9744_v39 = vshll.u32 %v9737_v10, 16  ;;  %9809 = vrot.lane.b32.xlu0 %v9808_v3, %s18638_s11  ;;  %v9826_v50 = vcombine.low %v9705_v12, %v9737_v10  ;;  %v9875_v24 = vcombine.low %v9737_v10, %v17895_v34  ;;  %v14367_v12 = vld [vmem:[%s18766_s23 + $0xc8] sm:$0xff]   ;;  %v14366_v6 = vld [vmem:[%s18766_s23 + $0x10] sm:$0xff]   ;;  %v14369_v10 = vld [vmem:[%s18766_s23 + $0x58] sm:$0xff]  }
0x106b   : > { %v9762_v31 = vcombine.low %v17927_v45, %v9714_v8  ;;  %v9786_v53 = vrot.slane %v9779_v46, %v17881_v51  ;;  %v14372_v48 = vld [vmem:[%s18766_s23 + $0x90] sm:$0xff]   ;;  %v14375_v3 = vld [vmem:[%s18766_s23 + $0xd8] sm:$0xff]  }
0x106c   : > { %v9746_v59 = vsel %vm17916_vm6, %v9739_v18, %v9744_v39  ;;  %v9833_v9 = vrot.slane %v9826_v50, %v17881_v51  ;;  %v9882_v23 = vrot.slane %v9875_v24, %v17881_v51  ;;  %v14373_v18 = vld [vmem:[%s18766_s23 + $0x60] sm:$0xff]   ;;  %v14376_v39 = vld [vmem:[%s18766_s23 + $0x98] sm:$0xff]   ;;  %v14382_v24 = vld [vmem:[%s18766_s23 + $0x30] sm:$0xff]  }
0x106d   : > { %v9769_v4 = vrot.slane %v9762_v31, %v17881_v51  ;;  %v9858_v13 = vcombine.low %v9746_v59, %v17927_v45  ;;  %v9811_v0 = vcombine.low %v9714_v8, %v9746_v59  ;;  %v9793_v44 = vrot.slane %v9786_v53, %v17881_v51  ;;  %v14370_v8 = vld [vmem:[%s18766_s23 + $0x18] sm:$0xff]   ;;  %v14379_v31 = vld [vmem:[%s18766_s23 + $0xe0] sm:$0xff]   ;;  %v14377_v59 = vld [vmem:[%s18766_s23 + $0x68] sm:$0xff]  }
0x106e   : > { %v9840_v57 = vrot.slane %v9833_v9, %v17881_v51  ;;  %v9889_v58 = vrot.slane %v9882_v23, %v17881_v51  ;;  %v14374_v50 = vld [vmem:[%s18766_s23 + $0x20] sm:$0xff]  }
0x106f   : > { %v9776_v22 = vrot.slane %v9769_v4, %v17881_v51  ;;  %v9865_v37 = vrot.slane %v9858_v13, %v17881_v51  ;;  %v9818_v63 = vrot.slane %v9811_v0, %v17881_v51  ;;  %v14380_v4 = vld [vmem:[%s18766_s23 + $0xa0] sm:$0xff]   ;;  %v14378_v13 = vld [vmem:[%s18766_s23 + $0x28] sm:$0xff]   ;;  %v14381_v0 = vld [vmem:[%s18766_s23 + $0x70] sm:$0xff]  }
0x1071   : > { %9777 = vrot.lane.b32.xlu1 %v9776_v22, %s18638_s11  ;;  %v9872_v47 = vrot.slane %v9865_v37, %v17881_v51  ;;  %v9825_v41 = vrot.slane %v9818_v63, %v17881_v51 }
0x1073   : > { %9873 = vrot.lane.b32.xlu0 %v9872_v47, %s18638_s11 }
0x1075   : > { %9841 = vrot.lane.b32.xlu1 %v9840_v57, %s18638_s11  ;;  %v13133_v57 = vld [vmem:[%s18769_s16] ss:$0 sm:$0xff]  ;;  %s18782_s16 = sld [smem:[#allocation24_spill]] }
0x10dc   : > { %v9810_v52 = vpop.permute.xlu0 %9809 }
0x10dd   : > { %v9896_v21 = vsel %vm18763_vm15, %v9793_v44, %v9810_v52  ;;  %vm18781_vm15 = vmmov %vm18768_vm0 }
0x10de   : > { %10163 = vmatprep.mubr.bf16.mxu1 %v9896_v21 }
0x10e3   : > { %v9778_v25 = vpop.permute.xlu1 %9777 }
0x10e4   : > { %v9892_v29 = vsel %vm18764_vm14, %v9761_v28, %v9778_v25  ;;  %vm18783_vm14 = vmmov %vm18768_vm0 }
0x10e5   : > { %10164 = vmatmul.mubr.bf16.vlgmr.msra.gmra.mrb[76].mxu1 %v9892_v29  ;;  %v9874_v56 = vpop.permute.xlu0 %9873 }
0x10e6   : > { %14020 = vmatpush3.bf16.msra.mxu1 %v14354_v35  ;;  %v9904_v30 = vsel %vm18765_vm8, %v9857_v61, %v9874_v56  ;;  %14027 = vmatprep.mubr.msk.bf16.mxu1 %vm14652_vm3, %v14651_v42  ;;  %vm18784_vm8 = vmmov %vm18768_vm0 }
0x10e7   : > { %v9842_v55 = vpop.permute.xlu1 %9841  ;;  %10203 = vmatprep.mubr.bf16.mxu0 %v9904_v30  ;;  %14021 = vmatprep.subr.bf16.mxu1 %v14651_v42 }
0x10e8   : > { %v9900_v11 = vsel %vm18767_vm10, %v9825_v41, %v9842_v55  ;;  %vm18786_vm10 = vmmov %vm18780_vm5 }
0x10e9   : > { %10204 = vmatmul.mubr.bf16.vlgmr.msra.gmra.mrb[60].mxu0 %v9900_v11 }
0x10ea   : > { %14022 = vmatpush3.bf16.msra.mxu1 %v14356_v26  ;;  %13629 = vmatpush3.bf16.msra.mxu0 %v14360_v36  ;;  %v14384_v36 = vld [vmem:[%s18766_s23 + $0xa8] sm:$0xff]  }
0x10eb   : > { %14023 = vmatprep.subr.bf16.mxu1 %v14651_v42  ;;  %13630 = vmatprep.subr.bf16.mxu0 %v14361_v62  ;;  %v14385_v62 = vld [vmem:[%s18766_s23 + $0x78] sm:$0xff]  }
0x10ee   : > { %14024 = vmatpush3.bf16.msra.mxu1 %v14357_v1  ;;  %13631 = vmatpush3.bf16.msra.mxu0 %v14362_v14  ;;  %v14387_v14 = vld [vmem:[%s18766_s23 + $0xf0] sm:$0xff]  }
0x10ef   : > { %14025 = vmatprep.subr.bf16.mxu1 %v14651_v42  ;;  %13632 = vmatprep.subr.bf16.mxu0 %v14365_v15 }
0x10f2   : > { %14026 = vmatpush3.bf16.msra.mxu1 %v14358_v7  ;;  %13633 = vmatpush3.bf16.msra.mxu0 %v14366_v6  ;;  %v14383_v7 = vld [vmem:[%s18766_s23 + $0xe8] sm:$0xff]  }
0x10f3   : > { %13650 = vmatprep.subr.bf16.mxu1 %v14363_v16  ;;  %13634 = vmatprep.subr.bf16.mxu0 %v14369_v10  ;;  %v14386_v16 = vld [vmem:[%s18766_s23 + $0x38] sm:$0xff]  }
0x10f5   : > { %14028 = vmatmul.mubr.msk.bf16.vlgmr.msra.gmra.mrb[80].mxu1 %vm18768_vm0, %v9889_v58 }
0x10f6   : > { %13651 = vmatpush3.bf16.msra.mxu1 %v14364_v49  ;;  %13635 = vmatpush3.bf16.msra.mxu0 %v14370_v8 }
0x10f7   : > { %13652 = vmatprep.subr.bf16.mxu1 %v14367_v12  ;;  %13636 = vmatprep.subr.bf16.mxu0 %v14373_v18 }
0x10fa   : > { %13653 = vmatpush3.bf16.msra.mxu1 %v14368_v54  ;;  %13637 = vmatpush3.bf16.msra.mxu0 %v14374_v50  ;;  %v14388_v54 = vld [vmem:[%s18766_s23 + $0xb0] sm:$0xff]  }
0x10fb   : > { %13654 = vmatprep.subr.bf16.mxu1 %v14371_v19  ;;  %13638 = vmatprep.subr.bf16.mxu0 %v14377_v59 }
0x10fe   : > { %13655 = vmatpush3.bf16.msra.mxu1 %v14372_v48  ;;  %13639 = vmatpush3.bf16.msra.mxu0 %v14378_v13 }
0x10ff   : > { %13656 = vmatprep.subr.bf16.mxu1 %v14375_v3  ;;  %13640 = vmatprep.subr.bf16.mxu0 %v14381_v0 }
0x1102   : > { %13657 = vmatpush3.bf16.msra.mxu1 %v14376_v39  ;;  %13641 = vmatpush3.bf16.msra.mxu0 %v14382_v24  ;;  %v14389_v39 = vld [vmem:[%s18766_s23 + $0xf8] sm:$0xff]  }
0x1103   : > { %13658 = vmatprep.subr.bf16.mxu1 %v14379_v31  ;;  %13642 = vmatprep.subr.bf16.mxu0 %v14385_v62 }
0x1106   : > { %13659 = vmatpush3.bf16.msra.mxu1 %v14380_v4  ;;  %13643 = vmatpush3.bf16.msra.mxu0 %v14386_v16  ;;  %v14391_v4 = vld [vmem:[%s18766_s23 + $0xb8] sm:$0xff]   ;;  %v14393_v16 = vld [vmem:[%s18766_s23 + $0x110] sm:$0xff]  }
0x1107   : > { %13660 = vmatprep.subr.bf16.mxu1 %v14383_v7  ;;  %14031 = vmatprep.subr.bf16.mxu0 %v14651_v42 }
0x110a   : > { %13661 = vmatpush3.bf16.msra.mxu1 %v14384_v36 }
0x110b   : > { %13662 = vmatprep.subr.bf16.mxu1 %v14387_v14 }
0x110e   : > { %13663 = vmatpush3.bf16.msra.mxu1 %v14388_v54  ;;  %v14395_v54 = vld [vmem:[%s18773_s9 + $0x40] sm:$0xff]  }
0x110f   : > { %13664 = vmatprep.subr.bf16.mxu1 %v14389_v39  ;;  %v14403_v39 = vld [vmem:[%s18773_s9 + $0x10] sm:$0xff]  }
0x1112   : > { %13665 = vmatpush3.bf16.msra.mxu1 %v14391_v4  ;;  %v14407_v4 = vld [vmem:[%s18773_s9 + $0x18] sm:$0xff]  }
0x1113   : > { %13677 = vmatprep.subr.bf16.mxu1 %v14395_v54 }
0x11b8   : > { %v13595_v22 = vpop.f32.mrb[76].mxu1 }
0x11b9   : > { %v13596_v37 = vpop.f32.mrb[77].mxu1 }
0x11ba   : > { %v13597_v9 = vadd.f32 %v13596_v37, %v13595_v22  ;;  %v13598_v47 = vpop.f32.mrb[78].mxu1 }
0x11bb   : > { %v13599_v46 = vpop.f32.mrb[79].mxu1 }
0x11bc   : > { %v13617_v53 = vpop.f32.mrb[60].mxu0  ;;  %v10166_v44 = vadd.f32 %v13597_v9, %v13133_v57 }
0x11bd   : > { %v13618_v20 = vpop.f32.mrb[61].mxu0 }
0x11be   : > { %v13619_v5 = vadd.f32 %v13618_v20, %v13617_v53  ;;  %v13620_v52 = vpop.f32.mrb[62].mxu0 }
0x11bf   : > { %v13621_v21 = vpop.f32.mrb[63].mxu0 }
0x11c0   : > { %v10206_v17 = vadd.f32 %v13619_v5, %v10166_v44 }
0x11c8   : > { %v10245_v38 = vpop.f32.mrb[80].mxu1 }
0x11c9   : > { %v10246_v28 = vadd.f32 %v10245_v38, %v10206_v17  ;;  %v14029_v35 = vpop.f32.mrb[81].mxu1 }
0x11ca   : > { %v10248_v63 = vpop.f32.mrb[82].mxu1 }
0x11cb   : > { %v10251_v25 = vmax.f32 %v10246_v28, 0.0  ;;  %v14030_v29 = vpop.f32.mrb[83].mxu1 }
0x11cd   : > { %v10259_v61 = vrot.slane %v10251_v25, %v16307_v60 }
0x11cf   : > { %v10260_v56 = vcombine.high %v10259_v61, %v10259_v61  ;;  %v10336_v41 = vpack.c.bf16 %v10259_v61, %v10259_v61 }
0x11d1   : > { %v10337_v30 = vpack.c.bf16 %v10260_v56, %v10260_v56  ;;  %v10339_v26 = vshrl.u32 %v10336_v41, 16  ;;  %v10342_v11 = vshll.u32 %v10336_v41, 16 }
0x11d3   : > { %v10341_v55 = vrot.slane %v10339_v26, 7  ;;  %v10346_v1 = vshrl.u32 %v10337_v30, 16  ;;  %v10349_v32 = vshll.u32 %v10337_v30, 16 }
0x11d5   : > { %v10344_v23 = vor.u32 %v10342_v11, %v10341_v55  ;;  %v10348_v58 = vrot.slane %v10346_v1, 7  ;;  %v14390_v55 = vld [vmem:[%s18766_s23 + $0x100] sm:$0xff]  }
0x11d7   : > { %v10351_v49 = vor.u32 %v10349_v32, %v10348_v58  ;;  %v10354_v12 = vsel %vm14881_vm2, 0, %v10344_v23  ;;  %v14392_v32 = vld [vmem:[%s18766_s23 + $0x108] sm:$0xff]  }
0x11d8   : > { %v10356_v15 = vsel %vm17875_vm13, %v10354_v12, 0  ;;  %v14394_v12 = vld [vmem:[%s18766_s23 + $0x118] sm:$0xff]  }
0x11d9   : > { %v10355_v19 = vsel %vm14881_vm2, 0, %v10351_v49  ;;  %v10365_v6 = vrot.slane %v10356_v15, %v17881_v51  ;;  %v10422_v63 = vcombine.low %v17886_v43, %v10356_v15 }
0x11da   : > { %v10357_v10 = vsel %vm17875_vm13, %v10355_v19, 0  ;;  %vm18770_vm13 = vmmov %vm18768_vm0  ;;  %v14396_v19 = vld [vmem:[%s18773_s9] sm:$0xff]  }
0x11db   : > { %v10366_v48 = vcombine.high %v10365_v6, %v10365_v6  ;;  %v10373_v3 = vrot.slane %v10365_v6, %v17881_v51  ;;  %v10397_v8 = vrot.slane %v10357_v10, %v17881_v51  ;;  %v10469_v18 = vcombine.low %v10356_v15, %v10357_v10  ;;  %v14397_v6 = vld [vmem:[%s18773_s9 + $0x48] sm:$0xff]  }
0x11dc   : > { %v10518_v29 = vcombine.low %v10357_v10, %v17886_v43  ;;  %v10429_v41 = vrot.slane %v10422_v63, %v17881_v51  ;;  %v14400_v10 = vld [vmem:[%s18773_s9 + $0x80] sm:$0xff]  }
0x11dd   : > { %v10380_v31 = vrot.slane %v10366_v48, %v17881_v51  ;;  %v10398_v50 = vcombine.high %v10397_v8, %v10397_v8  ;;  %v10405_v59 = vrot.slane %v10397_v8, %v17881_v51  ;;  %v10476_v33 = vrot.slane %v10469_v18, %v17881_v51  ;;  %v14402_v48 = vld [vmem:[%s18773_s9 + $0xc8] sm:$0xff]   ;;  %v14406_v18 = vld [vmem:[%s18773_s9 + $0xd0] sm:$0xff]  }
0x11de   : > { %v10382_v13 = vshrl.u32 %v10373_v3, 16  ;;  %v10525_v30 = vrot.slane %v10518_v29, %v17881_v51  ;;  %v10436_v26 = vrot.slane %v10429_v41, %v17881_v51  ;;  %v14399_v3 = vld [vmem:[%s18773_s9 + $0x8] sm:$0xff]  }
0x11df   : > { %v10412_v0 = vrot.slane %v10398_v50, %v17881_v51  ;;  %v10387_v22 = vshll.u32 %v10380_v31, 16  ;;  %v10483_v37 = vrot.slane %v10476_v33, %v17881_v51  ;;  %v10414_v47 = vshrl.u32 %v10405_v59, 16  ;;  %v14404_v8 = vld [vmem:[%s18773_s9 + $0x88] sm:$0xff]   ;;  %v14408_v50 = vld [vmem:[%s18773_s9 + $0x90] sm:$0xff]   ;;  %v14410_v59 = vld [vmem:[%s18773_s9 + $0xd8] sm:$0xff]  }
0x11e0   : > { %v10532_v43 = vrot.slane %v10525_v30, %v17881_v51  ;;  %v14409_v33 = vld [vmem:[%s18773_s9 + $0x60] sm:$0xff]  }
0x11e1   : > { %v10389_v9 = vsel %vm17916_vm6, %v10382_v13, %v10387_v22  ;;  %v10419_v57 = vshll.u32 %v10412_v0, 16  ;;  %10484 = vrot.lane.b32.xlu0 %v10483_v37, %s18638_s11  ;;  %v10501_v53 = vcombine.low %v10380_v31, %v10412_v0  ;;  %v10550_v49 = vcombine.low %v10412_v0, %v17895_v34  ;;  %v14412_v13 = vld [vmem:[%s18773_s9 + $0x98] sm:$0xff]   ;;  %v14414_v0 = vld [vmem:[%s18773_s9 + $0xe0] sm:$0xff]   ;;  %v14413_v37 = vld [vmem:[%s18773_s9 + $0x68] sm:$0xff]  }
0x11e2   : > { %v10437_v46 = vcombine.low %v17927_v45, %v10389_v9  ;;  %v14411_v22 = vld [vmem:[%s18773_s9 + $0x20] sm:$0xff]  }
0x11e3   : > { %v10421_v20 = vsel %vm17916_vm6, %v10414_v47, %v10419_v57  ;;  %v10508_v38 = vrot.slane %v10501_v53, %v17881_v51  ;;  %vm18771_vm6 = vmmov %vm18768_vm0  ;;  %v10557_v14 = vrot.slane %v10550_v49, %v17881_v51  ;;  %v14418_v47 = vld [vmem:[%s18773_s9 + $0xe8] sm:$0xff]  }
0x11e4   : > { %v10444_v44 = vrot.slane %v10437_v46, %v17881_v51  ;;  %v10533_v5 = vcombine.low %v10421_v20, %v17927_v45  ;;  %v10486_v52 = vcombine.low %v10389_v9, %v10421_v20  ;;  %v10454_v45 = vcombine.low %v17895_v34, %v10380_v31  ;;  %v14398_v34 = vld [vmem:[%s18773_s9 + $0xc0] sm:$0xff]   ;;  %v14405_v31 = vld [vmem:[%s18773_s9 + $0x58] sm:$0xff]   ;;  %v14415_v57 = vld [vmem:[%s18773_s9 + $0x28] sm:$0xff]  }
0x11e5   : > { %v10515_v40 = vrot.slane %v10508_v38, %v17881_v51  ;;  %v10564_v15 = vrot.slane %v10557_v14, %v17881_v51  ;;  %v14416_v9 = vld [vmem:[%s18773_s9 + $0xa0] sm:$0xff]   ;;  %v14417_v46 = vld [vmem:[%s18773_s9 + $0x70] sm:$0xff]   ;;  %v14420_v53 = vld [vmem:[%s18773_s9 + $0xa8] sm:$0xff]  }
0x11e6   : > { %v10451_v21 = vrot.slane %v10444_v44, %v17881_v51  ;;  %v10540_v17 = vrot.slane %v10533_v5, %v17881_v51  ;;  %v10461_v35 = vrot.slane %v10454_v45, %v17881_v51  ;;  %v10493_v11 = vrot.slane %v10486_v52, %v17881_v51  ;;  %v14422_v20 = vld [vmem:[%s18773_s9 + $0xf0] sm:$0xff]   ;;  %v14421_v5 = vld [vmem:[%s18773_s9 + $0x78] sm:$0xff]   ;;  %v13173_v45 = vld [vmem:[%s18776_s22] ss:$0 sm:$0xff]  ;;  %s18785_s22 = sld [smem:[#allocation23_spill]] }
0x11e7   : > { %v14419_v44 = vld [vmem:[%s18773_s9 + $0x30] sm:$0xff]   ;;  %v14425_v14 = vld [vmem:[%s18773_s9 + $0xf8] sm:$0xff]  }
0x11e8   : > { %10452 = vrot.lane.b32.xlu1 %v10451_v21, %s18638_s11  ;;  %v10547_v28 = vrot.slane %v10540_v17, %v17881_v51  ;;  %v10468_v25 = vrot.slane %v10461_v35, %v17881_v51  ;;  %v10500_v23 = vrot.slane %v10493_v11, %v17881_v51  ;;  %v14401_v51 = vld [vmem:[%s18773_s9 + $0x50] sm:$0xff]   ;;  %v14423_v21 = vld [vmem:[%s18773_s9 + $0x38] sm:$0xff]  }
0x11e9   : > { %v14424_v52 = vld [vmem:[%s18773_s9 + $0xb0] sm:$0xff]  }
0x11ea   : > { %10548 = vrot.lane.b32.xlu0 %v10547_v28, %s18638_s11 }
0x11ec   : > { %10516 = vrot.lane.b32.xlu1 %v10515_v40, %s18638_s11 }
0x11f0   : > { %11037 = vrot.lane.b32.xlu1 %v18656_v27, %s18638_s11 }
0x1253   : > { %v10485_v61 = vpop.permute.xlu0 %10484 }
0x1254   : > { %v10571_v56 = vsel %vm18770_vm13, %v10468_v25, %v10485_v61  ;;  %vm18787_vm13 = vmmov %vm18768_vm0 }
0x1255   : > { %10838 = vmatprep.mubr.bf16.mxu0 %v10571_v56 }
0x125a   : > { %v10453_v1 = vpop.permute.xlu1 %10452 }
0x125b   : > { %v10567_v24 = vsel %vm18771_vm6, %v10436_v26, %v10453_v1  ;;  %vm18789_vm6 = vmmov %vm18768_vm0 }
0x125c   : > { %10839 = vmatmul.mubr.bf16.vlgmr.msra.gmra.mrb[64].mxu0 %v10567_v24  ;;  %v10549_v7 = vpop.permute.xlu0 %10548 }
0x125d   : > { %14032 = vmatpush3.bf16.msra.mxu0 %v14390_v55  ;;  %v10579_v58 = vsel %vm18772_vm12, %v10532_v43, %v10549_v7  ;;  %14039 = vmatprep.mubr.msk.bf16.mxu0 %vm14652_vm3, %v14651_v42  ;;  %vm18791_vm12 = vmmov %vm18780_vm5 }
0x125e   : > { %v10517_v36 = vpop.permute.xlu1 %10516  ;;  %10878 = vmatprep.mubr.bf16.mxu1 %v10579_v58  ;;  %14033 = vmatprep.subr.bf16.mxu0 %v14651_v42 }
0x125f   : > { %v10575_v62 = vsel %vm18774_vm1, %v10500_v23, %v10517_v36  ;;  %vm18792_vm1 = vmmov %vm18768_vm0 }
0x1260   : > { %10879 = vmatmul.mubr.bf16.vlgmr.msra.gmra.mrb[84].mxu1 %v10575_v62 }
0x1261   : > { %14034 = vmatpush3.bf16.msra.mxu0 %v14392_v32  ;;  %13678 = vmatpush3.bf16.msra.mxu1 %v14396_v19  ;;  %v12337_v19 = vld [vmem:[%s14823_s27] sm:$0x1] }
0x1262   : > { %14035 = vmatprep.subr.bf16.mxu0 %v14651_v42  ;;  %13679 = vmatprep.subr.bf16.mxu1 %v14397_v6 }
0x1265   : > { %14036 = vmatpush3.bf16.msra.mxu0 %v14393_v16  ;;  %13680 = vmatpush3.bf16.msra.mxu1 %v14399_v3 }
0x1266   : > { %14037 = vmatprep.subr.bf16.mxu0 %v14651_v42  ;;  %13681 = vmatprep.subr.bf16.mxu1 %v14401_v51 }
0x1269   : > { %14038 = vmatpush3.bf16.msra.mxu0 %v14394_v12  ;;  %13682 = vmatpush3.bf16.msra.mxu1 %v14403_v39 }
0x126a   : > { %13699 = vmatprep.subr.bf16.mxu0 %v14398_v34  ;;  %13683 = vmatprep.subr.bf16.mxu1 %v14405_v31  ;;  %v14427_v31 = vld [vmem:[%s18773_s9 + $0x100] sm:$0xff]  }
0x126c   : > { %14040 = vmatmul.mubr.msk.bf16.vlgmr.msra.gmra.mrb[68].mxu0 %vm18775_vm9, %v10564_v15  ;;  %v18292_v15 = vpop.permute.xlu1 %11037  ;;  %vm18793_vm9 = vmmov %vm18768_vm0 }
0x126d   : > { %13700 = vmatpush3.bf16.msra.mxu0 %v14400_v10  ;;  %13684 = vmatpush3.bf16.msra.mxu1 %v14407_v4 }
0x126e   : > { %13701 = vmatprep.subr.bf16.mxu0 %v14402_v48  ;;  %13685 = vmatprep.subr.bf16.mxu1 %v14409_v33  ;;  %v14428_v33 = vld [vmem:[%s18773_s9 + $0x108] sm:$0xff]  }
0x126f   : > { %13250 = vmatprep.mubr.msk.bf16.mxu0 %vm18295_vm11, %v18292_v15 }
0x1271   : > { %13702 = vmatpush3.bf16.msra.mxu0 %v14404_v8  ;;  %13686 = vmatpush3.bf16.msra.mxu1 %v14411_v22  ;;  %v14431_v22 = vld [vmem:[%s18782_s16 + $0x40] sm:$0xff]  }
0x1272   : > { %13703 = vmatprep.subr.bf16.mxu0 %v14406_v18  ;;  %13687 = vmatprep.subr.bf16.mxu1 %v14413_v37  ;;  %v18309_v18 = vrot.slane %v18656_v27, 1  ;;  %v14432_v37 = vld [vmem:[%s18782_s16] sm:$0xff]  }
0x1275   : > { %13704 = vmatpush3.bf16.msra.mxu0 %v14408_v50  ;;  %13688 = vmatpush3.bf16.msra.mxu1 %v14415_v57  ;;  %v14435_v57 = vld [vmem:[%s18782_s16 + $0x48] sm:$0xff]  }
0x1276   : > { %13705 = vmatprep.subr.bf16.mxu0 %v14410_v59  ;;  %13689 = vmatprep.subr.bf16.mxu1 %v14417_v46  ;;  %v14437_v46 = vld [vmem:[%s18782_s16 + $0xc8] sm:$0xff]  }
0x1279   : > { %13706 = vmatpush3.bf16.msra.mxu0 %v14412_v13  ;;  %13690 = vmatpush3.bf16.msra.mxu1 %v14419_v44  ;;  %v14429_v13 = vld [vmem:[%s18773_s9 + $0x110] sm:$0xff]  }
0x127a   : > { %13707 = vmatprep.subr.bf16.mxu0 %v14414_v0  ;;  %13691 = vmatprep.subr.bf16.mxu1 %v14421_v5  ;;  %v14430_v0 = vld [vmem:[%s18773_s9 + $0x118] sm:$0xff]   ;;  %v14439_v44 = vld [vmem:[%s18782_s16 + $0x50] sm:$0xff]  }
0x127b   : > { %v14441_v5 = vld [vmem:[%s18782_s16 + $0xd0] sm:$0xff]  }
0x127d   : > { %13708 = vmatpush3.bf16.msra.mxu0 %v14416_v9  ;;  %13692 = vmatpush3.bf16.msra.mxu1 %v14423_v21  ;;  %v14433_v9 = vld [vmem:[%s18782_s16 + $0xc0] sm:$0xff]   ;;  %v14442_v21 = vld [vmem:[%s18782_s16 + $0x90] sm:$0xff]  }
0x127e   : > { %13709 = vmatprep.subr.bf16.mxu0 %v14418_v47  ;;  %14043 = vmatprep.subr.bf16.mxu1 %v14651_v42  ;;  %v14434_v47 = vld [vmem:[%s18782_s16 + $0x80] sm:$0xff]  }
0x1281   : > { %13710 = vmatpush3.bf16.msra.mxu0 %v14420_v53  ;;  %v14436_v53 = vld [vmem:[%s18782_s16 + $0x8] sm:$0xff]  }
0x1282   : > { %13711 = vmatprep.subr.bf16.mxu0 %v14422_v20  ;;  %v14438_v20 = vld [vmem:[%s18782_s16 + $0x88] sm:$0xff]  }
0x1285   : > { %13712 = vmatpush3.bf16.msra.mxu0 %v14424_v52  ;;  %v14440_v52 = vld [vmem:[%s18782_s16 + $0x10] sm:$0xff]  }
0x1286   : > { %13713 = vmatprep.subr.bf16.mxu0 %v14425_v14 }
0x132f   : > { %v13644_v17 = vpop.f32.mrb[64].mxu0 }
0x1330   : > { %v13645_v38 = vpop.f32.mrb[65].mxu0 }
0x1331   : > { %v13646_v28 = vadd.f32 %v13645_v38, %v13644_v17  ;;  %v13647_v40 = vpop.f32.mrb[66].mxu0  ;;  %v14443_v17 = vld [vmem:[%s18782_s16 + $0x58] sm:$0xff]  }
0x1332   : > { %v13648_v35 = vpop.f32.mrb[67].mxu0  ;;  %v14445_v38 = vld [vmem:[%s18782_s16 + $0xd8] sm:$0xff]  }
0x1333   : > { %v13666_v63 = vpop.f32.mrb[84].mxu1  ;;  %v10841_v29 = vadd.f32 %v13646_v28, %v13173_v45  ;;  %v14444_v28 = vld [vmem:[%s18782_s16 + $0x18] sm:$0xff]   ;;  %v14447_v45 = vld [vmem:[%s18782_s16 + $0x60] sm:$0xff]  }
0x1334   : > { %v13667_v25 = vpop.f32.mrb[85].mxu1  ;;  %v14446_v40 = vld [vmem:[%s18782_s16 + $0x98] sm:$0xff]   ;;  %v14449_v35 = vld [vmem:[%s18782_s16 + $0xe0] sm:$0xff]  }
0x1335   : > { %v13668_v61 = vadd.f32 %v13667_v25, %v13666_v63  ;;  %v13669_v56 = vpop.f32.mrb[86].mxu1  ;;  %v14448_v63 = vld [vmem:[%s18782_s16 + $0x20] sm:$0xff]  }
0x1336   : > { %v13670_v41 = vpop.f32.mrb[87].mxu1  ;;  %v14450_v25 = vld [vmem:[%s18782_s16 + $0xa0] sm:$0xff]   ;;  %v14452_v56 = vld [vmem:[%s18782_s16 + $0x28] sm:$0xff]  }
0x1337   : > { %v10881_v30 = vadd.f32 %v13668_v61, %v10841_v29  ;;  %v14451_v29 = vld [vmem:[%s18782_s16 + $0x68] sm:$0xff]  }
0x1338   : > { %v14453_v61 = vld [vmem:[%s18782_s16 + $0xe8] sm:$0xff]  }
0x1339   : > { %v14454_v41 = vld [vmem:[%s18782_s16 + $0xa8] sm:$0xff]  }
0x133f   : > { %v10920_v26 = vpop.f32.mrb[68].mxu0 }
0x1340   : > { %v10921_v55 = vadd.f32 %v10920_v26, %v10881_v30  ;;  %v14041_v11 = vpop.f32.mrb[69].mxu0  ;;  %v14455_v30 = vld [vmem:[%s18782_s16 + $0x70] sm:$0xff]  }
0x1341   : > { %v10923_v1 = vpop.f32.mrb[70].mxu0  ;;  %v14457_v26 = vld [vmem:[%s18782_s16 + $0xf0] sm:$0xff]  }
0x1342   : > { %v10926_v24 = vmax.f32 %v10921_v55, 0.0  ;;  %v14042_v43 = vpop.f32.mrb[71].mxu0  ;;  %v14456_v55 = vld [vmem:[%s18782_s16 + $0x30] sm:$0xff]   ;;  %v14459_v1 = vld [vmem:[%s18782_s16 + $0x78] sm:$0xff]  }
0x1343   : > { %v14458_v11 = vld [vmem:[%s18782_s16 + $0xb0] sm:$0xff]   ;;  %v14460_v43 = vld [vmem:[%s18782_s16 + $0x38] sm:$0xff]  }
0x1344   : > { %v10934_v7 = vrot.slane %v10926_v24, %v16307_v60  ;;  %v14426_v60 = vld [vmem:[%s18773_s9 + $0xb8] sm:$0xff]  }
0x1345   : > { %13714 = vmatpush3.bf16.msra.mxu0 %v14426_v60  ;;  %v14461_v24 = vld [vmem:[%s18782_s16 + $0xf8] sm:$0xff]  }
0x1346   : > { %v10935_v23 = vcombine.high %v10934_v7, %v10934_v7  ;;  %v10939_v58 = vsel %vm10938_vm7, %v10934_v7, -inf  ;;  %13726 = vmatprep.subr.bf16.mxu0 %v14431_v22 }
0x1348   : > { %v10940_v32 = vsel %vm10938_vm7, %v10935_v23, -inf  ;;  %v11021_v23 = vld [vmem:[%s18785_s22] sm:$0x1]  ;;  %s18788_s22 = sld [smem:[#allocation26_spill]] }
0x1349   : > { %v10941_v36 = vmax.f32 %v10939_v58, %v10940_v32 }
0x134b   : > { %v10942_v62 = vsel %vm10938_vm7, %v10941_v36, -inf  ;;  %vm18794_vm7 = vmmov %vm18768_vm0 }
0x134c   : > { %v10943_v16 = vrot.slane %v10942_v62, 4 }
0x134e   : > { %v10944_v49 = vmax.f32 %v10942_v62, %v10943_v16 }
0x1350   : > { %v10945_v12 = vrot.slane %v10944_v49, 2 }
0x1352   : > { %v10946_v54 = vmax.f32 %v10944_v49, %v10945_v12 }
0x1354   : > { %v10947_v6 = vrot.slane %v10946_v54, 1 }
0x1356   : > { %v10948_v34 = vmax.f32 %v10946_v54, %v10947_v6 }
0x1358   : > { %v11022_v10 = vpack.c.bf16 %v10948_v34, %v10948_v34  ;;  %v14462_v34 = vld [vmem:[%s18782_s16 + $0xb8] sm:$0xff]  }
0x135a   : > { %v11024_v48 = vshll.u32 %v11022_v10, 16 }
0x135c   : > { %v11029_v3 = vsel %vm14881_vm2, 0, %v11024_v48 }
0x135d   : > { %v11034_v51 = vsel %vm18780_vm5, %v11029_v3, 0  ;;  %vm18797_vm5 = vmmov %vm18768_vm0 }
0x135e   : > { %11042 = vrot.lane.b32.xlu0 %v11034_v51, %s18638_s11  ;;  %v11046_v8 = vrot.slane %v11034_v51, 1  ;;  %v11044_v59 = vshrl.u32 %v11034_v51, 16 }
0x1362   : > { %11047 = vrot.lane.b32.xlu0 %v11046_v8, %s18638_s11 }
0x13d0   : > { %v11043_v39 = vpop.permute.xlu0 %11042 }
0x13d1   : > { %v11054_v50 = vsel %vm18781_vm15, %v18309_v18, %v11043_v39  ;;  %vm18798_vm15 = vmmov %vm18768_vm0 }
0x13d2   : > { %11310 = vmatprep.mubr.bf16.mxu1 %v11054_v50 }
0x13d3   : > { %13248 = vmatmul.mubr.msk.bf16.vlgmr.msra.gmra.mrb[88].mxu1 %vm18295_vm11, %v18292_v15 }
0x13d4   : > { %14044 = vmatpush3.bf16.msra.mxu1 %v14427_v31  ;;  %v11048_v4 = vpop.permute.xlu0 %11047  ;;  %14051 = vmatprep.mubr.msk.bf16.mxu1 %vm14652_vm3, %v14651_v42 }
0x13d5   : > { %v11058_v27 = vsel %vm18783_vm14, %v11044_v59, %v11048_v4  ;;  %14045 = vmatprep.subr.bf16.mxu1 %v14651_v42 }
0x13d6   : > { %11351 = vmatmul.mubr.bf16.vlgmr.msra.gmra.mrb[72].mxu0 %v11058_v27 }
0x13d7   : > { %13727 = vmatpush3.bf16.msra.mxu0 %v14432_v37 }
0x13d8   : > { %14046 = vmatpush3.bf16.msra.mxu1 %v14428_v33  ;;  %13728 = vmatprep.subr.bf16.mxu0 %v14435_v57  ;;  %v14465_v57 = vld [vmem:[%s18782_s16 + $0x110] sm:$0xff]  }
0x13d9   : > { %14047 = vmatprep.subr.bf16.mxu1 %v14651_v42 }
0x13db   : > { %13729 = vmatpush3.bf16.msra.mxu0 %v14436_v53  ;;  %v14467_v53 = vld [vmem:[%s18788_s22 + $0x40] sm:$0xff]  }
0x13dc   : > { %14048 = vmatpush3.bf16.msra.mxu1 %v14429_v13  ;;  %13730 = vmatprep.subr.bf16.mxu0 %v14439_v44  ;;  %v14463_v13 = vld [vmem:[%s18782_s16 + $0x100] sm:$0xff]  }
0x13dd   : > { %14049 = vmatprep.subr.bf16.mxu1 %v14651_v42  ;;  %v14469_v44 = vld [vmem:[%s18788_s22 + $0xc0] sm:$0xff]  }
0x13df   : > { %13731 = vmatpush3.bf16.msra.mxu0 %v14440_v52  ;;  %v14471_v52 = vld [vmem:[%s18788_s22 + $0x48] sm:$0xff]  }
0x13e0   : > { %14050 = vmatpush3.bf16.msra.mxu1 %v14430_v0  ;;  %13732 = vmatprep.subr.bf16.mxu0 %v14443_v17  ;;  %v14472_v17 = vld [vmem:[%s18788_s22 + $0x8] sm:$0xff]  }
0x13e1   : > { %13748 = vmatprep.subr.bf16.mxu1 %v14433_v9 }
0x13e3   : > { %14052 = vmatmul.mubr.msk.bf16.vlgmr.msra.gmra.mrb[92].mxu1 %vm18784_vm8, %v18309_v18  ;;  %13733 = vmatpush3.bf16.msra.mxu0 %v14444_v28  ;;  %v14475_v28 = vld [vmem:[%s18788_s22 + $0x50] sm:$0xff]  }
0x13e4   : > { %13291 = vmatprep.mubr.msk.bf16.mxu1 %vm18295_vm11, %v18292_v15  ;;  %13749 = vmatpush3.bf16.msra.mxu1 %v14434_v47  ;;  %v14464_v47 = vld [vmem:[%s18782_s16 + $0x108] sm:$0xff]  }
0x13e5   : > { %13750 = vmatprep.subr.bf16.mxu1 %v14437_v46  ;;  %13734 = vmatprep.subr.bf16.mxu0 %v14447_v45  ;;  %v14466_v46 = vld [vmem:[%s18782_s16 + $0x118] sm:$0xff]   ;;  %v14476_v45 = vld [vmem:[%s18788_s22 + $0x10] sm:$0xff]  }
0x13e7   : > { %13735 = vmatpush3.bf16.msra.mxu0 %v14448_v63  ;;  %v14479_v63 = vld [vmem:[%s18788_s22 + $0x58] sm:$0xff]  }
0x13e8   : > { %13751 = vmatpush3.bf16.msra.mxu1 %v14438_v20  ;;  %13736 = vmatprep.subr.bf16.mxu0 %v14451_v29  ;;  %v14468_v20 = vld [vmem:[%s18788_s22] sm:$0xff]   ;;  %v14480_v29 = vld [vmem:[%s18788_s22 + $0x18] sm:$0xff]  }
0x13e9   : > { %13752 = vmatprep.subr.bf16.mxu1 %v14441_v5  ;;  %v14470_v5 = vld [vmem:[%s18788_s22 + $0x80] sm:$0xff]  }
0x13eb   : > { %13737 = vmatpush3.bf16.msra.mxu0 %v14452_v56  ;;  %v14483_v56 = vld [vmem:[%s18788_s22 + $0x60] sm:$0xff]  }
0x13ec   : > { %13753 = vmatpush3.bf16.msra.mxu1 %v14442_v21  ;;  %13738 = vmatprep.subr.bf16.mxu0 %v14455_v30  ;;  %v14473_v21 = vld [vmem:[%s18788_s22 + $0xc8] sm:$0xff]   ;;  %v14484_v30 = vld [vmem:[%s18788_s22 + $0x20] sm:$0xff]  }
0x13ed   : > { %13754 = vmatprep.subr.bf16.mxu1 %v14445_v38  ;;  %v14474_v38 = vld [vmem:[%s18788_s22 + $0x88] sm:$0xff]  }
0x13ef   : > { %13739 = vmatpush3.bf16.msra.mxu0 %v14456_v55  ;;  %v14487_v55 = vld [vmem:[%s18788_s22 + $0x68] sm:$0xff]  }
0x13f0   : > { %13755 = vmatpush3.bf16.msra.mxu1 %v14446_v40  ;;  %13740 = vmatprep.subr.bf16.mxu0 %v14459_v1  ;;  %v14477_v40 = vld [vmem:[%s18788_s22 + $0xd0] sm:$0xff]   ;;  %v14488_v1 = vld [vmem:[%s18788_s22 + $0x28] sm:$0xff]  }
0x13f1   : > { %13756 = vmatprep.subr.bf16.mxu1 %v14449_v35  ;;  %v14478_v35 = vld [vmem:[%s18788_s22 + $0x90] sm:$0xff]  }
0x13f3   : > { %13741 = vmatpush3.bf16.msra.mxu0 %v14460_v43  ;;  %v14491_v43 = vld [vmem:[%s18788_s22 + $0x70] sm:$0xff]  }
0x13f4   : > { %13757 = vmatpush3.bf16.msra.mxu1 %v14450_v25  ;;  %14055 = vmatprep.subr.bf16.mxu0 %v14651_v42  ;;  %v14481_v25 = vld [vmem:[%s18788_s22 + $0xd8] sm:$0xff]  }
0x13f5   : > { %13758 = vmatprep.subr.bf16.mxu1 %v14453_v61  ;;  %v14482_v61 = vld [vmem:[%s18788_s22 + $0x98] sm:$0xff]  }
0x13f8   : > { %13759 = vmatpush3.bf16.msra.mxu1 %v14454_v41  ;;  %v14485_v41 = vld [vmem:[%s18788_s22 + $0xe0] sm:$0xff]  }
0x13f9   : > { %13760 = vmatprep.subr.bf16.mxu1 %v14457_v26  ;;  %v14486_v26 = vld [vmem:[%s18788_s22 + $0xa0] sm:$0xff]  }
0x13fc   : > { %13761 = vmatpush3.bf16.msra.mxu1 %v14458_v11  ;;  %v14489_v11 = vld [vmem:[%s18788_s22 + $0xe8] sm:$0xff]  }
0x13fd   : > { %13762 = vmatprep.subr.bf16.mxu1 %v14461_v24  ;;  %v14490_v24 = vld [vmem:[%s18788_s22 + $0xa8] sm:$0xff]  }
0x1400   : > { %13763 = vmatpush3.bf16.msra.mxu1 %v14462_v34 }
0x1401   : > { %13775 = vmatprep.subr.bf16.mxu1 %v14467_v53 }
0x14a6   : > { %v13693_v7 = vpop.f32.mrb[88].mxu1 }
0x14a7   : > { %v13694_v58 = vpop.f32.mrb[89].mxu1 }
0x14a8   : > { %v13695_v32 = vadd.f32 %v13694_v58, %v13693_v7  ;;  %v13696_v36 = vpop.f32.mrb[90].mxu1  ;;  %v14493_v7 = vld [vmem:[%s18788_s22 + $0xf0] sm:$0xff]  }
0x14a9   : > { %v13697_v62 = vpop.f32.mrb[91].mxu1  ;;  %v13715_v16 = vpop.f32.mrb[72].mxu0  ;;  %v14494_v58 = vld [vmem:[%s18788_s22 + $0xb0] sm:$0xff]   ;;  %v14497_v36 = vld [vmem:[%s18788_s22 + $0xf8] sm:$0xff]  }
0x14aa   : > { %v11313_v49 = vadd.f32 %v13695_v32, %v11021_v23  ;;  %v13716_v12 = vpop.f32.mrb[73].mxu0  ;;  %v14492_v23 = vld [vmem:[%s18788_s22 + $0x30] sm:$0xff]   ;;  %v14495_v32 = vld [vmem:[%s18788_s22 + $0x78] sm:$0xff]  }
0x14ab   : > { %v13717_v14 = vadd.f32 %v13716_v12, %v13715_v16  ;;  %v13718_v54 = vpop.f32.mrb[74].mxu0  ;;  %v14496_v62 = vld [vmem:[%s18788_s22 + $0x38] sm:$0xff]  }
0x14ac   : > { %v13719_v60 = vpop.f32.mrb[75].mxu0 }
0x14ad   : > { %v11353_v6 = vadd.f32 %v13717_v14, %v11313_v49  ;;  %v11471_v49 = vld [vmem:[%s18790_s2] sm:$0x1]  ;;  %s13375_s2 = sshll.u32 %s14851_s0, 4  ;;  %s14654_s0 = smov [#allocation2]  }
0x14ae   : > { %s18509_s6 = scalar_lea.hbm %s14828_s4, %s13375_s2 }
0x14b6   : > { %v11392_v10 = vpop.f32.mrb[92].mxu1 }
0x14b7   : > { %v11393_v48 = vadd.f32 %v11392_v10, %v11353_v6  ;;  %v14053_v3 = vpop.f32.mrb[93].mxu1 }
0x14b8   : > { %v11395_v51 = vpop.f32.mrb[94].mxu1 }
0x14b9   : > { %v11398_v8 = vmax.f32 %v11393_v48, 0.0  ;;  %v14054_v39 = vpop.f32.mrb[95].mxu1 }
0x14ba   : > { %v14498_v39 = vld [vmem:[%s18788_s22 + $0xb8] sm:$0xff]  }
0x14bb   : > { %v11472_v31 = vpack.c.bf16 %v11398_v8, %v11398_v8 }
0x14bd   : > { %v11474_v50 = vshll.u32 %v11472_v31, 16 }
0x14bf   : > { %v11477_v59 = vsel %vm14881_vm2, 0, %v11474_v50 }
0x14c0   : > { %v11479_v4 = vsel %vm18786_vm10, %v11477_v59, 0 }
0x14c1   : > { %11481 = vrot.lane.b32.xlu1 %v11479_v4, %s18638_s11  ;;  %v11485_v33 = vrot.slane %v11479_v4, 1  ;;  %v11483_v0 = vshrl.u32 %v11479_v4, 16 }
0x14c3   : > { %11486 = vrot.lane.b32.xlu0 %v11485_v33, %s18638_s11 }
0x1533   : > { %v11482_v27 = vpop.permute.xlu1 %11481 }
0x1534   : > { %v11489_v22 = vsel %vm18768_vm0, %v18309_v18, %v11482_v27 }
0x1535   : > { %11743 = vmatprep.mubr.bf16.mxu0 %v11489_v22  ;;  %v11487_v37 = vpop.permute.xlu0 %11486 }
0x1536   : > { %v11493_v9 = vsel %vm18787_vm13, %v11483_v0, %v11487_v37  ;;  %13289 = vmatmul.mubr.msk.bf16.vlgmr.msra.gmra.mrb[76].mxu0 %vm18295_vm11, %v18292_v15 }
0x1537   : > { %14056 = vmatpush3.bf16.msra.mxu0 %v14463_v13  ;;  %11784 = vmatmul.mubr.bf16.vlgmr.msra.gmra.mrb[96].mxu1 %v11493_v9 }
0x1538   : > { %14057 = vmatprep.subr.bf16.mxu0 %v14651_v42  ;;  %14063 = vmatprep.mubr.msk.bf16.mxu0 %vm14652_vm3, %v14651_v42 }
0x1539   : > { %13776 = vmatpush3.bf16.msra.mxu1 %v14468_v20 }
0x153a   : > { %13777 = vmatprep.subr.bf16.mxu1 %v14471_v52  ;;  %v14501_v52 = vld [vmem:[%s18788_s22 + $0x110] sm:$0xff]  }
0x153b   : > { %14058 = vmatpush3.bf16.msra.mxu0 %v14464_v47 }
0x153c   : > { %14059 = vmatprep.subr.bf16.mxu0 %v14651_v42 }
0x153d   : > { %13778 = vmatpush3.bf16.msra.mxu1 %v14472_v17  ;;  %v14503_v17 = vld [vmem:[%s14818_s20 + $0x40] sm:$0xff]  }
0x153e   : > { %13779 = vmatprep.subr.bf16.mxu1 %v14475_v28  ;;  %v14505_v28 = vld [vmem:[%s14818_s20 + $0xc0] sm:$0xff]  }
0x153f   : > { %14060 = vmatpush3.bf16.msra.mxu0 %v14465_v57  ;;  %v14499_v57 = vld [vmem:[%s18788_s22 + $0x100] sm:$0xff]  }
0x1540   : > { %14061 = vmatprep.subr.bf16.mxu0 %v14651_v42 }
0x1541   : > { %13780 = vmatpush3.bf16.msra.mxu1 %v14476_v45  ;;  %v14507_v45 = vld [vmem:[%s14818_s20 + $0x48] sm:$0xff]  }
0x1542   : > { %13781 = vmatprep.subr.bf16.mxu1 %v14479_v63  ;;  %v14508_v63 = vld [vmem:[%s14818_s20 + $0x8] sm:$0xff]  }
0x1543   : > { %14062 = vmatpush3.bf16.msra.mxu0 %v14466_v46 }
0x1544   : > { %13797 = vmatprep.subr.bf16.mxu0 %v14469_v44 }
0x1545   : > { %13782 = vmatpush3.bf16.msra.mxu1 %v14480_v29  ;;  %v14511_v29 = vld [vmem:[%s14818_s20 + $0x50] sm:$0xff]  }
0x1546   : > { %14064 = vmatmul.mubr.msk.bf16.vlgmr.msra.gmra.mrb[80].mxu0 %vm18789_vm6, %v18309_v18  ;;  %13783 = vmatprep.subr.bf16.mxu1 %v14483_v56  ;;  %v14512_v56 = vld [vmem:[%s14818_s20 + $0x10] sm:$0xff]  }
0x1547   : > { %13332 = vmatprep.mubr.msk.bf16.mxu0 %vm18295_vm11, %v18292_v15  ;;  %13798 = vmatpush3.bf16.msra.mxu0 %v14470_v5  ;;  %v14500_v5 = vld [vmem:[%s18788_s22 + $0x108] sm:$0xff]  }
0x1548   : > { %13799 = vmatprep.subr.bf16.mxu0 %v14473_v21  ;;  %v14502_v21 = vld [vmem:[%s18788_s22 + $0x118] sm:$0xff]  }
0x1549   : > { %13784 = vmatpush3.bf16.msra.mxu1 %v14484_v30  ;;  %v14515_v30 = vld [vmem:[%s14818_s20 + $0x58] sm:$0xff]  }
0x154a   : > { %13785 = vmatprep.subr.bf16.mxu1 %v14487_v55  ;;  %v14516_v55 = vld [vmem:[%s14818_s20 + $0x18] sm:$0xff]  }
0x154b   : > { %13800 = vmatpush3.bf16.msra.mxu0 %v14474_v38  ;;  %v14504_v38 = vld [vmem:[%s14818_s20] sm:$0xff]  }
0x154c   : > { %13801 = vmatprep.subr.bf16.mxu0 %v14477_v40  ;;  %v14506_v40 = vld [vmem:[%s14818_s20 + $0x80] sm:$0xff]  }
0x154d   : > { %13786 = vmatpush3.bf16.msra.mxu1 %v14488_v1  ;;  %v14519_v1 = vld [vmem:[%s14818_s20 + $0x60] sm:$0xff]  }
0x154e   : > { %13787 = vmatprep.subr.bf16.mxu1 %v14491_v43  ;;  %v14520_v43 = vld [vmem:[%s14818_s20 + $0x20] sm:$0xff]  }
0x154f   : > { %13802 = vmatpush3.bf16.msra.mxu0 %v14478_v35  ;;  %v14509_v35 = vld [vmem:[%s14818_s20 + $0xc8] sm:$0xff]  }
0x1550   : > { %13803 = vmatprep.subr.bf16.mxu0 %v14481_v25  ;;  %v14510_v25 = vld [vmem:[%s14818_s20 + $0x88] sm:$0xff]  }
0x1551   : > { %13788 = vmatpush3.bf16.msra.mxu1 %v14492_v23  ;;  %v14523_v23 = vld [vmem:[%s14818_s20 + $0x68] sm:$0xff]  }
0x1552   : > { %13789 = vmatprep.subr.bf16.mxu1 %v14495_v32  ;;  %v14524_v32 = vld [vmem:[%s14818_s20 + $0x28] sm:$0xff]  }
0x1553   : > { %13804 = vmatpush3.bf16.msra.mxu0 %v14482_v61  ;;  %v14513_v61 = vld [vmem:[%s14818_s20 + $0xd0] sm:$0xff]  }
0x1554   : > { %13805 = vmatprep.subr.bf16.mxu0 %v14485_v41  ;;  %v14514_v41 = vld [vmem:[%s14818_s20 + $0x90] sm:$0xff]  }
0x1555   : > { %13790 = vmatpush3.bf16.msra.mxu1 %v14496_v62  ;;  %v14527_v62 = vld [vmem:[%s14818_s20 + $0x70] sm:$0xff]  }
0x1556   : > { %14067 = vmatprep.subr.bf16.mxu1 %v14651_v42 }
0x1557   : > { %13806 = vmatpush3.bf16.msra.mxu0 %v14486_v26  ;;  %v14517_v26 = vld [vmem:[%s14818_s20 + $0xd8] sm:$0xff]  }
0x1558   : > { %13807 = vmatprep.subr.bf16.mxu0 %v14489_v11  ;;  %v14518_v11 = vld [vmem:[%s14818_s20 + $0x98] sm:$0xff]  }
0x155b   : > { %13808 = vmatpush3.bf16.msra.mxu0 %v14490_v24  ;;  %v14521_v24 = vld [vmem:[%s14818_s20 + $0xe0] sm:$0xff]  }
0x155c   : > { %13809 = vmatprep.subr.bf16.mxu0 %v14493_v7  ;;  %v14522_v7 = vld [vmem:[%s14818_s20 + $0xa0] sm:$0xff]  }
0x155f   : > { %13810 = vmatpush3.bf16.msra.mxu0 %v14494_v58  ;;  %v14525_v58 = vld [vmem:[%s14818_s20 + $0xe8] sm:$0xff]  }
0x1560   : > { %13811 = vmatprep.subr.bf16.mxu0 %v14497_v36  ;;  %v14526_v36 = vld [vmem:[%s14818_s20 + $0xa8] sm:$0xff]  }
0x1563   : > { %13812 = vmatpush3.bf16.msra.mxu0 %v14498_v39 }
0x1564   : > { %13824 = vmatprep.subr.bf16.mxu0 %v14503_v17 }
0x1609   : > { %v13742_v16 = vpop.f32.mrb[76].mxu0 }
0x160a   : > { %v13743_v12 = vpop.f32.mrb[77].mxu0  ;;  %v13764_v14 = vpop.f32.mrb[96].mxu1 }
0x160b   : > { %v13744_v54 = vadd.f32 %v13743_v12, %v13742_v16  ;;  %v13745_v60 = vpop.f32.mrb[78].mxu0  ;;  %v13765_v6 = vpop.f32.mrb[97].mxu1  ;;  %v14529_v16 = vld [vmem:[%s14818_s20 + $0xf0] sm:$0xff]  }
0x160c   : > { %v13766_v34 = vadd.f32 %v13765_v6, %v13764_v14  ;;  %v13746_v10 = vpop.f32.mrb[79].mxu0  ;;  %v13767_v48 = vpop.f32.mrb[98].mxu1  ;;  %v14530_v12 = vld [vmem:[%s14818_s20 + $0xb0] sm:$0xff]   ;;  %v14531_v14 = vld [vmem:[%s14818_s20 + $0x78] sm:$0xff]  }
0x160d   : > { %v11746_v3 = vadd.f32 %v13744_v54, %v11471_v49  ;;  %v13768_v51 = vpop.f32.mrb[99].mxu1  ;;  %v14528_v49 = vld [vmem:[%s14818_s20 + $0x30] sm:$0xff]   ;;  %v14533_v54 = vld [vmem:[%s14818_s20 + $0xf8] sm:$0xff]  }
0x160e   : > { %v14532_v60 = vld [vmem:[%s14818_s20 + $0x38] sm:$0xff]  }
0x160f   : > { %v11786_v8 = vadd.f32 %v13766_v34, %v11746_v3  ;;  %v11904_v34 = vld [vmem:[%s18795_s12] sm:$0x1]  ;;  %s14545_s12 = sshll.u32 %s14654_s0, 4  ;;  %s14546_s12 = int_to_ptr.vmem [resolvable:$false] %s14545_s12 }
0x1610   : > { %s14547_s13 = scalar_lea.vmem %s14546_s12, 32 }
0x1619   : > { %v11825_v31 = vpop.f32.mrb[80].mxu0 }
0x161a   : > { %v11826_v50 = vadd.f32 %v11825_v31, %v11786_v8  ;;  %v14065_v59 = vpop.f32.mrb[81].mxu0 }
0x161b   : > { %v11828_v4 = vpop.f32.mrb[82].mxu0 }
0x161c   : > { %v11831_v33 = vmax.f32 %v11826_v50, 0.0  ;;  %v14066_v27 = vpop.f32.mrb[83].mxu0 }
0x161d   : > { %v14534_v27 = vld [vmem:[%s14818_s20 + $0xb8] sm:$0xff]  }
0x161e   : > { %v11905_v13 = vpack.c.bf16 %v11831_v33, %v11831_v33 }
0x1620   : > { %v11907_v0 = vshll.u32 %v11905_v13, 16 }
0x1622   : > { %v11910_v22 = vsel %vm14881_vm2, 0, %v11907_v0 }
0x1623   : > { %v11912_v37 = vsel %vm18791_vm12, %v11910_v22, 0 }
0x1624   : > { %11914 = vrot.lane.b32.xlu1 %v11912_v37, %s18638_s11  ;;  %v11918_v9 = vrot.slane %v11912_v37, 1  ;;  %v11916_v46 = vshrl.u32 %v11912_v37, 16 }
0x1626   : > { %11919 = vrot.lane.b32.xlu0 %v11918_v9, %s18638_s11 }
0x1696   : > { %v11915_v47 = vpop.permute.xlu1 %11914 }
0x1697   : > { %v11922_v53 = vsel %vm18792_vm1, %v18309_v18, %v11915_v47 }
0x1698   : > { %12176 = vmatprep.mubr.bf16.mxu1 %v11922_v53  ;;  %v11920_v20 = vpop.permute.xlu0 %11919 }
0x1699   : > { %v11926_v44 = vsel %vm18793_vm9, %v11916_v46, %v11920_v20  ;;  %13330 = vmatmul.mubr.msk.bf16.vlgmr.msra.gmra.mrb[100].mxu1 %vm18295_vm11, %v18292_v15 }
0x169a   : > { %14068 = vmatpush3.bf16.msra.mxu1 %v14499_v57  ;;  %12217 = vmatmul.mubr.bf16.vlgmr.msra.gmra.mrb[84].mxu0 %v11926_v44 }
0x169b   : > { %14069 = vmatprep.subr.bf16.mxu1 %v14651_v42  ;;  %14075 = vmatprep.mubr.msk.bf16.mxu1 %vm14652_vm3, %v14651_v42 }
0x169c   : > { %13825 = vmatpush3.bf16.msra.mxu0 %v14504_v38 }
0x169d   : > { %13826 = vmatprep.subr.bf16.mxu0 %v14507_v45  ;;  %v14538_v45 = vld [vmem:[%s14818_s20 + $0x118] sm:$0xff]  }
0x169e   : > { %14070 = vmatpush3.bf16.msra.mxu1 %v14500_v5 }
0x169f   : > { %14071 = vmatprep.subr.bf16.mxu1 %v14651_v42 }
0x16a0   : > { %13827 = vmatpush3.bf16.msra.mxu0 %v14508_v63 }
0x16a1   : > { %13828 = vmatprep.subr.bf16.mxu0 %v14511_v29 }
0x16a2   : > { %14072 = vmatpush3.bf16.msra.mxu1 %v14501_v52  ;;  %v14535_v52 = vld [vmem:[%s14818_s20 + $0x100] sm:$0xff]  }
0x16a3   : > { %14073 = vmatprep.subr.bf16.mxu1 %v14651_v42 }
0x16a4   : > { %13829 = vmatpush3.bf16.msra.mxu0 %v14512_v56 }
0x16a5   : > { %13830 = vmatprep.subr.bf16.mxu0 %v14515_v30 }
0x16a6   : > { %14074 = vmatpush3.bf16.msra.mxu1 %v14502_v21 }
0x16a7   : > { %13846 = vmatprep.subr.bf16.mxu1 %v14505_v28  ;;  %v14536_v28 = vld [vmem:[%s14818_s20 + $0x108] sm:$0xff]  }
0x16a8   : > { %13831 = vmatpush3.bf16.msra.mxu0 %v14516_v55 }
0x16a9   : > { %14076 = vmatmul.mubr.msk.bf16.vlgmr.msra.gmra.mrb[104].mxu1 %vm18794_vm7, %v18309_v18  ;;  %13832 = vmatprep.subr.bf16.mxu0 %v14519_v1 }
0x16aa   : > { %13373 = vmatprep.mubr.msk.bf16.mxu1 %vm18295_vm11, %v18292_v15  ;;  %13847 = vmatpush3.bf16.msra.mxu1 %v14506_v40  ;;  %v14537_v40 = vld [vmem:[%s14818_s20 + $0x110] sm:$0xff]  }
0x16ab   : > { %13848 = vmatprep.subr.bf16.mxu1 %v14509_v35 }
0x16ac   : > { %13833 = vmatpush3.bf16.msra.mxu0 %v14520_v43 }
0x16ad   : > { %13834 = vmatprep.subr.bf16.mxu0 %v14523_v23 }
0x16ae   : > { %13849 = vmatpush3.bf16.msra.mxu1 %v14510_v25 }
0x16af   : > { %13850 = vmatprep.subr.bf16.mxu1 %v14513_v61 }
0x16b0   : > { %13835 = vmatpush3.bf16.msra.mxu0 %v14524_v32 }
0x16b1   : > { %13836 = vmatprep.subr.bf16.mxu0 %v14527_v62 }
0x16b2   : > { %13851 = vmatpush3.bf16.msra.mxu1 %v14514_v41 }
0x16b3   : > { %13852 = vmatprep.subr.bf16.mxu1 %v14517_v26 }
0x16b4   : > { %13837 = vmatpush3.bf16.msra.mxu0 %v14528_v49 }
0x16b5   : > { %13838 = vmatprep.subr.bf16.mxu0 %v14531_v14 }
0x16b6   : > { %13853 = vmatpush3.bf16.msra.mxu1 %v14518_v11 }
0x16b7   : > { %13854 = vmatprep.subr.bf16.mxu1 %v14521_v24 }
0x16b8   : > { %13839 = vmatpush3.bf16.msra.mxu0 %v14532_v60 }
0x16b9   : > { %14079 = vmatprep.subr.bf16.mxu0 %v14651_v42 }
0x16ba   : > { %13855 = vmatpush3.bf16.msra.mxu1 %v14522_v7 }
0x16bb   : > { %13856 = vmatprep.subr.bf16.mxu1 %v14525_v58 }
0x16be   : > { %13857 = vmatpush3.bf16.msra.mxu1 %v14526_v36 }
0x16bf   : > { %13858 = vmatprep.subr.bf16.mxu1 %v14529_v16 }
0x16c2   : > { %13859 = vmatpush3.bf16.msra.mxu1 %v14530_v12 }
0x16c3   : > { %13860 = vmatprep.subr.bf16.mxu1 %v14533_v54 }
0x16c6   : > { %13861 = vmatpush3.bf16.msra.mxu1 %v14534_v27 }
0x176c   : > { %v13791_v6 = vpop.f32.mrb[100].mxu1 }
0x176d   : > { %v13792_v10 = vpop.f32.mrb[101].mxu1  ;;  %v13813_v48 = vpop.f32.mrb[84].mxu0 }
0x176e   : > { %v13793_v3 = vadd.f32 %v13792_v10, %v13791_v6  ;;  %v13794_v51 = vpop.f32.mrb[102].mxu1  ;;  %v13814_v8 = vpop.f32.mrb[85].mxu0 }
0x176f   : > { %v13815_v39 = vadd.f32 %v13814_v8, %v13813_v48  ;;  %v13795_v31 = vpop.f32.mrb[103].mxu1  ;;  %v13816_v50 = vpop.f32.mrb[86].mxu0 }
0x1770   : > { %v12179_v59 = vadd.f32 %v13793_v3, %v11904_v34  ;;  %v13817_v4 = vpop.f32.mrb[87].mxu0 }
0x1772   : > { %v12219_v33 = vadd.f32 %v13815_v39, %v12179_v59 }
0x177c   : > { %v12258_v13 = vpop.f32.mrb[104].mxu1 }
0x177d   : > { %v12259_v0 = vadd.f32 %v12258_v13, %v12219_v33  ;;  %v14077_v22 = vpop.f32.mrb[105].mxu1 }
0x177e   : > { %v12261_v37 = vpop.f32.mrb[106].mxu1 }
0x177f   : > { %v12264_v9 = vmax.f32 %v12259_v0, 0.0  ;;  %v14078_v47 = vpop.f32.mrb[107].mxu1 }
0x1781   : > { %v12338_v57 = vpack.c.bf16 %v12264_v9, %v12264_v9 }
0x1783   : > { %v12340_v46 = vshll.u32 %v12338_v57, 16 }
0x1785   : > { %v12343_v53 = vsel %vm14881_vm2, 0, %v12340_v46  ;;  %vm18799_vm2 = vmmov %vm18768_vm0 }
0x1786   : > { %v12345_v20 = vsel %vm18796_vm4, %v12343_v53, 0 }
0x1787   : > { %12347 = vrot.lane.b32.xlu1 %v12345_v20, %s18638_s11  ;;  %v12351_v44 = vrot.slane %v12345_v20, 1  ;;  %v12349_v21 = vshrl.u32 %v12345_v20, 16 }
0x1789   : > { %12352 = vrot.lane.b32.xlu0 %v12351_v44, %s18638_s11  ;;  %s1005_s11 = sand.u32 1, %s14595_s10  }
0x178a   : > { %s1006_s3 = scalar_lea.vmem [#allocation2], %s1005_s11  ;;  %s12701_s8 = scalar_lea.sflag [#allocation3], %s1005_s11 }
0x178b   : > { %s12713_s5 = sshll.u32 %s1006_s3, 4  ;;  %s18511_s5 = int_to_ptr.vmem [resolvable:$true] %s12713_s5 }
0x178c   : > { %s14541_s9 = scalar_lea.vmem %s18511_s5, 16  ;;  %p14548_p0 = scmp.lt.s32.totalorder %s18511_s5, %s14546_s12 }
0x178d   : > { %p14542_p11 = scmp.ne.s32.totalorder %s18511_s5, %s14541_s9  ;;  %p14549_p1 = scmp.lt.s32.totalorder %s14547_s13, %s14541_s9 }
0x178f   : > { %p14543_p12 = pnand %p14542_p11, %p14868_p5  ;;  %p14550_p2 = por %p14549_p1, %p14548_p0 }
0x1791   : > { %p14544_p13 = pneg %p14543_p12 }
0x1793   : > { %p14551_p3 = pnand %p14550_p2, %p14544_p13 }
0x17f9   : > { %v12348_v5 = vpop.permute.xlu1 %12347 }
0x17fa   : > { %v12355_v17 = vsel %vm18797_vm5, %v18309_v18, %v12348_v5 }
0x17fb   : > { %12609 = vmatprep.mubr.bf16.mxu0 %v12355_v17  ;;  %v12353_v38 = vpop.permute.xlu0 %12352 }
0x17fc   : > { %v12359_v2 = vsel %vm18798_vm15, %v12349_v21, %v12353_v38  ;;  %13371 = vmatmul.mubr.msk.bf16.vlgmr.msra.gmra.mrb[88].mxu0 %vm18295_vm11, %v18292_v15 }
0x17fd   : > { %14080 = vmatpush3.bf16.msra.mxu0 %v14535_v52  ;;  %12650 = vmatmul.mubr.bf16.vlgmr.msra.gmra.mrb[108].mxu1 %v12359_v2 }
0x17fe   : > { %14081 = vmatprep.subr.bf16.mxu0 %v14651_v42  ;;  %14087 = vmatprep.mubr.msk.bf16.mxu0 %vm14652_vm3, %v14651_v42  ;;  %vm12698_vm3 = vcmask 516096  }
0x1801   : > { %14082 = vmatpush3.bf16.msra.mxu0 %v14536_v28 }
0x1802   : > { %14083 = vmatprep.subr.bf16.mxu0 %v14651_v42 }
0x1805   : > { %14084 = vmatpush3.bf16.msra.mxu0 %v14537_v40 }
0x1806   : > { %14085 = vmatprep.subr.bf16.mxu0 %v14651_v42 }
0x1809   : > { %14086 = vmatpush3.bf16.msra.mxu0 %v14538_v45 }
0x180c   : > { %14088 = vmatmul.mubr.msk.bf16.vlgmr.msra.gmra.mrb[92].mxu0 %vm18799_vm2, %v18309_v18 }
0x18cf   : > { %v13840_v15 = vpop.f32.mrb[88].mxu0 }
0x18d0   : > { %v13841_v35 = vpop.f32.mrb[89].mxu0  ;;  %v13862_v63 = vpop.f32.mrb[108].mxu1 }
0x18d1   : > { %v13842_v25 = vadd.f32 %v13841_v35, %v13840_v15  ;;  %v13843_v29 = vpop.f32.mrb[90].mxu0  ;;  %v13863_v61 = vpop.f32.mrb[109].mxu1 }
0x18d2   : > { %v13864_v56 = vadd.f32 %v13863_v61, %v13862_v63  ;;  %v13844_v41 = vpop.f32.mrb[91].mxu0  ;;  %v13865_v30 = vpop.f32.mrb[110].mxu1 }
0x18d3   : > { %v12612_v26 = vadd.f32 %v13842_v25, %v12337_v19  ;;  %v13866_v55 = vpop.f32.mrb[111].mxu1 }
0x18d5   : > { %v12652_v42 = vadd.f32 %v13864_v56, %v12612_v26 }
0x18df   : > { %v12691_v11 = vpop.f32.mrb[92].mxu0 }
0x18e0   : > { %v12692_v18 = vadd.f32 %v12691_v11, %v12652_v42  ;;  %v14089_v1 = vpop.f32.mrb[93].mxu0 }
0x18e1   : > { %v12694_v24 = vpop.f32.mrb[94].mxu0 }
0x18e2   : > { %v12697_v43 = vmax.f32 %v12692_v18, 0.0  ;;  %v14090_v7 = vpop.f32.mrb[95].mxu0 }
0x18e4   : > { %12699 = vst.msk [vmem:[%s1006_s3] sm:$0x1] %vm12698_vm3, %v12697_v43 }
0x18e5   : > { %14554 = shalt.err (!%p14551_p3)
}
0x18e6   : > { %s14555_s3 = scalar_lea.hbm %s18509_s6, 16  ;;  %s14559_s11 = scalar_lea.hbm %s14828_s4, 32 }
0x18e7   : > { %p14556_p4 = scmp.ne.s32.totalorder %s18509_s6, %s14555_s3  ;;  %p14560_p9 = scmp.lt.u32.totalorder %s18509_s6, %s14828_s4 }
0x18e8   : > { %p14561_p10 = scmp.lt.u32.totalorder %s14559_s11, %s14555_s3  ;;  %p14563_p12 = scmp.lt.u32.totalorder %s14555_s3, %s18509_s6 }
0x18e9   : > { %p14557_p7 = pnand %p14556_p4, %p14868_p5 }
0x18ea   : > { %p14562_p11 = por %p14561_p10, %p14560_p9 }
0x18eb   : > { %p14558_p8 = pneg %p14557_p7 }
0x18ec   : > { %p14564_p0 = por %p14563_p12, %p14562_p11 }
0x18ee   : > { %p14565_p13 = pnand %p14564_p0, %p14558_p8 }
0x18f0   : > { %14568 = shalt.err (!%p14565_p13)
}
0x18f1   : > { %14094 = dma.vmem_to_hbm [thread:$0]  (%p14868_p5), %s18511_s5, 16, %s18509_s6, %s12701_s8  }
0x18f2 PF: > { %p14100_p1 = scmp.ge.s32.totalorder %s14603_s15, 2  ;;  %s12725_s13 = sand.u32 1, %s14591_s7  }
0x18f3   : > { %s12726_s12 = scalar_lea.sflag [#allocation3], %s12725_s13 }
0x18f4   : > { %p14097_p2 = pnand %p14100_p1, %p14872_p6 }
0x18f6   : > { %14586 = dma.done.wait (!%p14097_p2), %s12726_s12, 16  }
0x18f7   : > { %14588 = vsyncadd (!%p14097_p2), %s12726_s12, 4294967280  ;;  %s18800_s15 = sld [smem:[#allocation29_spill]]  ;;  %s18801_s9 = sld [smem:[#allocation28_spill]] }
0x18f8   : > { %s18802_s11 = sld [smem:[#allocation30_spill]]  ;;  %s18803_s7 = smov %s14595_s10 }
0x18fd   : > { %p77_p3 = scmp.ge.s32.totalorder %s18800_s15, 4   ;;  %s18804_s10 = smov %s18801_s9 }
0x18ff   :  { %79 = sbr.rel (!%p77_p3) target bundleno = 70 (0x46), region = 220 }
0x1906   :  { %12730 = vsyncpa [#allocation3], 1 }
0x1907   :  { %12732 = vsyncpa [#allocation3 + $0x1], 1 }

</bundles_post_ra>
